<compile_context>
chip_gen: v7x
topology: tpu7x:2x2x1
jax: 0.10.0
libtpu: 0.0.40
codegen_flags: <defaults>
</compile_context>

<pallas_src>
import functools

import jax
import jax.numpy as jnp
import numpy as np
from jax.experimental import pallas as pl
from jax.experimental.pallas import tpu as pltpu

T_SOFTMAX = 4.0
INCEPTION_KS = (1, 3, 5, 7)
PAD = (max(INCEPTION_KS) - 1) // 2          # 3
N_TAPS = 2 * PAD + 1                         # 7
N_SPLIT = 4                                  # output-column split for K2
VMEM_LIMIT = 32 << 20                        # safe on v5e/v6e (128 MiB) and v7x (64 MiB)


# ---------------------------------------------------------------------------
# Kernel 1: fused 1x1 conv + attention pooling (per batch element).
#   img_embed = conv_w @ img_flat[b]                  (bf16 MXU, f32 acc)
#   attn      = softmax(text[b] @ img_embed / T)      (exact divide)
#   img_cat   = attn @ img_embed^T  (lane-dense (L, C_txt), contracting HW)
#   xcat      = [text | img_cat] bf16 (fed straight to K2, no XLA concat)
# ---------------------------------------------------------------------------
def _conv_attn_kernel(t_ref, x_ref, w_ref, attn_ref, xcat_ref, emb_ref, *, temp):
    # 1x1 conv: (Cout, Cin) @ (Cin, HW) -> (Cout, HW); keep result in VMEM as bf16.
    emb_ref[...] = jnp.dot(w_ref[...], x_ref[0],
                           preferred_element_type=jnp.float32).astype(jnp.bfloat16)
    img_e = emb_ref[...]                                   # (Cout, HW) bf16
    txt = t_ref[0]                                         # (L, Cout) bf16

    logits = jnp.dot(txt, img_e, preferred_element_type=jnp.float32) * (1.0 / temp)
    m = jnp.max(logits, axis=-1, keepdims=True)
    e = jnp.exp(logits - m)
    denom = jnp.sum(e, axis=-1, keepdims=True)
    attn = e / denom                                       # exact softmax rows
    attn_ref[0] = attn

    # img_cat lane-dense (L, Cout): contract HW via dot_general (no transpose).
    cat = jax.lax.dot_general(
        attn.astype(jnp.bfloat16), img_e,
        dimension_numbers=(((1,), (1,)), ((), ())),
        preferred_element_type=jnp.float32)                # (L, Cout) f32

    # Emit K2's resident activation directly: [text | img_cat] in bf16.
    xcat_ref[0] = jnp.concatenate([txt, cat.astype(jnp.bfloat16)], axis=-1)


def conv1x1_attention(text_bf16, img_flat_bf16, conv_w_bf16, temp):
    B, L, Ct = text_bf16.shape
    _, Cin, HW = img_flat_bf16.shape
    Cout = conv_w_bf16.shape[0]
    kernel = functools.partial(_conv_attn_kernel, temp=temp)
    return pl.pallas_call(
        kernel,
        out_shape=(jax.ShapeDtypeStruct((B, L, HW), jnp.float32),
                   jax.ShapeDtypeStruct((B, L, Ct + Cout), jnp.bfloat16)),
        grid_spec=pltpu.PrefetchScalarGridSpec(
            num_scalar_prefetch=0,
            grid=(B,),
            in_specs=[
                pl.BlockSpec((1, L, Ct), lambda b: (b, 0, 0)),
                pl.BlockSpec((1, Cin, HW), lambda b: (b, 0, 0)),
                pl.BlockSpec((Cout, Cin), lambda b: (0, 0)),   # weight block never changes
            ],
            out_specs=(pl.BlockSpec((1, L, HW), lambda b: (b, 0, 0)),
                       pl.BlockSpec((1, L, Ct + Cout), lambda b: (b, 0, 0))),
            scratch_shapes=[pltpu.VMEM((Cout, HW), jnp.bfloat16)],
        ),
        compiler_params=pltpu.CompilerParams(
            dimension_semantics=("parallel",),
            vmem_limit_bytes=VMEM_LIMIT),
    )(text_bf16, img_flat_bf16, conv_w_bf16)


# ---------------------------------------------------------------------------
# Kernel 2: fused Inception1d(gamma) + Inception1d(beta) + bias + FiLM.
#   grid = (N_SPLIT [parallel], N_TAPS [reduction])
#   Per (j, t):  acc (BL, 2*chunk) += xs_taps[t] @ W[t, :, j-chunk]   (bf16 MXU)
#   Epilogue (t == last): fused = acc + bias_j
#                         out_j = fused[:, :chunk] * cat_j + fused[:, chunk:]
#   The column split gives 2 MiB weight blocks (fine-grained DMA stream) and
#   lets both v7x TensorCores share the weight traffic via the parallel axis.
# ---------------------------------------------------------------------------
def _inception_film_kernel(xs_ref, w_ref, b_ref, cat_ref, o_ref, acc_ref):
    t = pl.program_id(1)

    @pl.when(t == 0)
    def _():
        acc_ref[...] = jnp.zeros_like(acc_ref)

    # xs_ref: (1, BL, Cin) bf16 (im2col hoisted into wrapper, no in-kernel
    # slicing / concatenation / casting on the reduction path).
    acc_ref[...] += jnp.dot(xs_ref[0], w_ref[0],
                            preferred_element_type=jnp.float32)

    @pl.when(t == pl.num_programs(1) - 1)
    def _():
        fused = acc_ref[...] + b_ref[...]            # (BL, 2*chunk) + (1, 2*chunk)
        chunk = o_ref.shape[-1]
        gamma = fused[:, :chunk]
        beta = fused[:, chunk:]
        o_ref[...] = gamma * cat_ref[...].astype(jnp.float32) + beta


def inception_film(xs_taps, tap_w, tap_b, cat_flat, *, n_split):
    T, BL, Cin = xs_taps.shape
    Cout = cat_flat.shape[-1]
    assert Cout % n_split == 0
    chunk = Cout // n_split
    return pl.pallas_call(
        _inception_film_kernel,
        out_shape=jax.ShapeDtypeStruct((BL, Cout), jnp.float32),
        grid_spec=pltpu.PrefetchScalarGridSpec(
            num_scalar_prefetch=0,
            grid=(n_split, T),
            in_specs=[
                pl.BlockSpec((1, BL, Cin), lambda j, t: (t, 0, 0)),          # 64 KiB/tap
                pl.BlockSpec((1, Cin, 2 * chunk), lambda j, t: (t, 0, j)),   # 2 MiB/block
                pl.BlockSpec((1, 2 * chunk), lambda j, t: (0, j)),
                pl.BlockSpec((BL, chunk), lambda j, t: (0, j)),
            ],
            out_specs=pl.BlockSpec((BL, chunk), lambda j, t: (0, j)),
            scratch_shapes=[pltpu.VMEM((BL, 2 * chunk), jnp.float32)],
        ),
        compiler_params=pltpu.CompilerParams(
            dimension_semantics=("parallel", "arbitrary"),
            vmem_limit_bytes=VMEM_LIMIT),
    )(xs_taps, tap_w, tap_b, cat_flat)


# ---------------------------------------------------------------------------
# Inception1d substitute params + offline weight folding into per-tap matrices
# with gamma/beta columns interleaved per output chunk (for K2's column split).
# ---------------------------------------------------------------------------
def init_inception_params(key, in_dim, out_per_branch):
    params = []
    for ksz in INCEPTION_KS:
        key, kw, kb = jax.random.split(key, 3)
        w = jax.random.normal(kw, (out_per_branch, in_dim, ksz),
                              jnp.float32) / np.sqrt(in_dim * ksz)
        b = 0.01 * jax.random.normal(kb, (out_per_branch,), jnp.float32)
        params.append((w, b))
    return params


def fold_inception_weights(gamma_params, beta_params, in_dim, out_dim, n_split):
    """Fold branch convs into per-tap (N_TAPS, in_dim, 2*out_dim) matrices whose
    columns are ordered [gamma_chunk_0 | beta_chunk_0 | gamma_chunk_1 | ...]."""

    def fold_one(branch_params):
        w_t = np.zeros((N_TAPS, in_dim, out_dim), np.float32)
        bias = np.zeros((out_dim,), np.float32)
        col = 0
        for (w, b), ksz in zip(branch_params, INCEPTION_KS):
            w = np.asarray(w)                     # (cout_b, in_dim, ksz)
            p = (ksz - 1) // 2
            cout_b = w.shape[0]
            for j in range(ksz):
                t = j - p + PAD
                w_t[t, :, col:col + cout_b] += w[:, :, j].T
            bias[col:col + cout_b] = np.asarray(b)
            col += cout_b
        return w_t, bias

    wg, bg = fold_one(gamma_params)
    wb, bb = fold_one(beta_params)
    chunk = out_dim // n_split
    wg = wg.reshape(N_TAPS, in_dim, n_split, chunk)
    wb = wb.reshape(N_TAPS, in_dim, n_split, chunk)
    w_taps = np.concatenate([wg, wb], axis=-1).reshape(N_TAPS, in_dim, 2 * out_dim)
    bias = np.concatenate([bg.reshape(n_split, chunk),
                           bb.reshape(n_split, chunk)], axis=-1).reshape(1, 2 * out_dim)
    return (jnp.asarray(w_taps, jnp.bfloat16),
            jnp.asarray(bias, jnp.float32))


def prepare_params(params):
    c_txt = params["conv_w"].shape[0]
    tap_w, tap_b = fold_inception_weights(params["gamma"], params["beta"],
                                          in_dim=2 * c_txt, out_dim=c_txt,
                                          n_split=N_SPLIT)
    return {
        "conv_w": params["conv_w"].astype(jnp.bfloat16),
        "tap_w": tap_w,
        "tap_b": tap_b,
    }


# ---------------------------------------------------------------------------
# Full forward (mirrors global_conv.forward; PyTorch layouts at the boundary)
# ---------------------------------------------------------------------------
def global_conv_forward(prepped, img_tensor, text_embed):
    n, cin, h, w = img_tensor.shape
    _, L, ct = text_embed.shape
    img_flat = img_tensor.reshape(n, cin, h * w).astype(jnp.bfloat16)
    text_bf16 = text_embed.astype(jnp.bfloat16)

    attn, xcat = conv1x1_attention(text_bf16, img_flat,
                                   prepped["conv_w"], T_SOFTMAX)
    # xcat: (n, L, 2*ct) bf16 lane-dense = [text | img_cat]

    # Hoisted im2col: small (N_TAPS, n*L, 2*ct) bf16 slab (~448 KiB), built once
    # in plain XLA instead of per-tap dynamic slicing inside the kernel.
    x_pad = jnp.pad(xcat, ((0, 0), (PAD, PAD), (0, 0)))
    xs_taps = jnp.stack([x_pad[:, t:t + L, :] for t in range(N_TAPS)], axis=0)
    xs_taps = xs_taps.reshape(N_TAPS, n * L, 2 * ct)
    cat_flat = xcat[:, :, ct:].reshape(n * L, ct)            # img_cat, bf16

    out_flat = inception_film(xs_taps, prepped["tap_w"], prepped["tap_b"],
                              cat_flat, n_split=N_SPLIT)      # (n*L, ct) f32
    # Single transpose back to the PyTorch (N, C, L) layout.
    out = out_flat.reshape(n, L, ct).transpose(0, 2, 1)
    return out, attn


# ---------------------------------------------------------------------------
# Pure-JAX f32 reference for validation (uses the unfolded branch weights).
# ---------------------------------------------------------------------------
def reference_forward(params, img_tensor, text_embed):
    n, cin, h, w = img_tensor.shape
    img_flat = img_tensor.reshape(n, cin, h * w)
    img_embed = jnp.einsum("oc,bcs->bos", params["conv_w"], img_flat)
    logits = jnp.einsum("blc,bcs->bls", text_embed, img_embed) / T_SOFTMAX
    attn = jax.nn.softmax(logits, axis=-1)
    img_cat = jnp.einsum("bcs,bls->bcl", img_embed, attn)
    x = jnp.concatenate([jnp.transpose(text_embed, (0, 2, 1)), img_cat], axis=1)

    def inc(ps):
        outs = []
        L = x.shape[-1]
        for (wgt, b), ksz in zip(ps, INCEPTION_KS):
            pad = (ksz - 1) // 2
            xp = jnp.pad(x, ((0, 0), (0, 0), (pad, pad)))
            cols = jnp.stack([xp[:, :, t:t + L] for t in range(ksz)], axis=2)
            outs.append(jnp.einsum("oct,bctl->bol", wgt, cols) + b[None, :, None])
        return jnp.concatenate(outs, axis=1)

    gamma, beta = inc(params["gamma"]), inc(params["beta"])
    return gamma * img_cat + beta, attn


if __name__ == "__main__":
    key = jax.random.PRNGKey(0)
    k_img, k_txt, k_w, k_g, k_b = jax.random.split(key, 5)

    N, C_IMG, H, W = 2, 2048, 16, 16          # img_tensor: NCHW
    L, C_TXT = 8, 1024                         # text_embed: (N, L, 1024)

    img_tensor = 0.5 * jax.random.normal(k_img, (N, C_IMG, H, W), jnp.float32)
    text_embed = 0.5 * jax.random.normal(k_txt, (N, L, C_TXT), jnp.float32)

    params = {
        "conv_w": jax.random.normal(k_w, (C_TXT, C_IMG), jnp.float32)
                  / np.sqrt(C_IMG),
        "gamma": init_inception_params(k_g, 2 * C_TXT, C_TXT // len(INCEPTION_KS)),
        "beta": init_inception_params(k_b, 2 * C_TXT, C_TXT // len(INCEPTION_KS)),
    }
    prepped = prepare_params(params)

    fwd = jax.jit(global_conv_forward)
    out, attn = fwd(prepped, img_tensor, text_embed)
    jax.block_until_ready((out, attn))

    ref_out, ref_attn = reference_forward(params, img_tensor, text_embed)

    def max_rel(a, b):
        return float(jnp.max(jnp.abs(a - b)) / (jnp.max(jnp.abs(b)) + 1e-6))

    assert out.shape == (N, C_TXT, L) and attn.shape == (N, L, H * W)
    assert max_rel(out, ref_out) < 0.1, max_rel(out, ref_out)
    assert float(jnp.max(jnp.abs(attn - ref_attn))) < 0.08

    print("KERNEL_OK")
</pallas_src>

<mosaic_0001>
module attributes {stable_mosaic.version = 11 : i64} {
  func.func @_conv_attn_kernel(%arg0: i32, %arg1: memref<1x8x1024xbf16, #tpu.memory_space<vmem>>, %arg2: memref<1x2048x256xbf16, #tpu.memory_space<vmem>>, %arg3: memref<1024x2048xbf16, #tpu.memory_space<vmem>>, %arg4: memref<1x8x256xf32, #tpu.memory_space<vmem>>, %arg5: memref<1x8x2048xbf16, #tpu.memory_space<vmem>>, %arg6: memref<1024x256xbf16, #tpu.memory_space<vmem>>) attributes {dimension_semantics = [#tpu.dimension_semantics<parallel>], iteration_bounds = array<i64: 2>, scalar_prefetch = 0 : i64, scratch_operands = 1 : i64, tpu.core_type = #tpu.core_type<tc>, window_params = [{transform_indices = @transform_0, window_bounds = array<i64: 1, 8, 1024>}, {transform_indices = @transform_1, window_bounds = array<i64: 1, 2048, 256>}, {pipeline_mode = #tpu.pipeline_mode<synchronous>, transform_indices = @transform_2, window_bounds = array<i64: 1024, 2048>}, {transform_indices = @transform_3, window_bounds = array<i64: 1, 8, 256>}, {transform_indices = @transform_4, window_bounds = array<i64: 1, 8, 2048>}]} {
    %c0 = arith.constant 0 : index
    %c0_0 = arith.constant 0 : index
    %0 = vector.load %arg3[%c0, %c0_0] : memref<1024x2048xbf16, #tpu.memory_space<vmem>>, vector<1024x2048xbf16>
    %c0_1 = arith.constant 0 : index
    %c0_2 = arith.constant 0 : index
    %c0_3 = arith.constant 0 : index
    %1 = vector.load %arg2[%c0_1, %c0_2, %c0_3] : memref<1x2048x256xbf16, #tpu.memory_space<vmem>>, vector<1x2048x256xbf16>
    %2 = vector.shape_cast %1 : vector<1x2048x256xbf16> to vector<2048x256xbf16>
    %cst = arith.constant dense<0.000000e+00> : vector<1024x256xf32>
    %3 = tpu.matmul %0, %2, %cst {dimension_numbers = #tpu.dot_dimension_numbers<[1], [0], [0], [1], [0, 0, 1, 1], [], []>} : vector<1024x2048xbf16>, vector<2048x256xbf16>, vector<1024x256xf32> -> vector<1024x256xf32>
    %4 = arith.truncf %3 : vector<1024x256xf32> to vector<1024x256xbf16>
    %c0_4 = arith.constant 0 : index
    %c0_5 = arith.constant 0 : index
    %5 = vector.load %arg6[%c0_4, %c0_5] : memref<1024x256xbf16, #tpu.memory_space<vmem>>, vector<1024x256xbf16>
    tpu.vector_store %arg6[%c0_4, %c0_5], %4 {strides = array<i32>} : memref<1024x256xbf16, #tpu.memory_space<vmem>>, vector<1024x256xbf16>,
    %c0_6 = arith.constant 0 : index
    %c0_7 = arith.constant 0 : index
    %6 = vector.load %arg6[%c0_6, %c0_7] : memref<1024x256xbf16, #tpu.memory_space<vmem>>, vector<1024x256xbf16>
    %c0_8 = arith.constant 0 : index
    %c0_9 = arith.constant 0 : index
    %c0_10 = arith.constant 0 : index
    %7 = vector.load %arg1[%c0_8, %c0_9, %c0_10] : memref<1x8x1024xbf16, #tpu.memory_space<vmem>>, vector<1x8x1024xbf16>
    %8 = vector.shape_cast %7 : vector<1x8x1024xbf16> to vector<8x1024xbf16>
    %cst_11 = arith.constant dense<0.000000e+00> : vector<8x256xf32>
    %9 = tpu.matmul %8, %6, %cst_11 {dimension_numbers = #tpu.dot_dimension_numbers<[1], [0], [0], [1], [0, 0, 1, 1], [], []>} : vector<8x1024xbf16>, vector<1024x256xbf16>, vector<8x256xf32> -> vector<8x256xf32>
    %cst_12 = arith.constant 2.500000e-01 : f32
    %10 = vector.broadcast %cst_12 : f32 to vector<8x256xf32>
    %11 = arith.mulf %9, %10 : vector<8x256xf32>
    %cst_13 = arith.constant dense<0xFF800000> : vector<8xf32>
    %12 = vector.multi_reduction <maximumf>, %11, %cst_13 [1] : vector<8x256xf32> to vector<8xf32>
    %13 = vector.shape_cast %12 : vector<8xf32> to vector<8x1xf32>
    %14 = vector.broadcast %13 : vector<8x1xf32> to vector<8x256xf32>
    %15 = arith.subf %11, %14 : vector<8x256xf32>
    %16 = math.exp %15 : vector<8x256xf32>
    %cst_14 = arith.constant dense<0.000000e+00> : vector<8xf32>
    %17 = vector.multi_reduction <add>, %16, %cst_14 [1] : vector<8x256xf32> to vector<8xf32>
    %18 = vector.shape_cast %17 : vector<8xf32> to vector<8x1xf32>
    %19 = vector.broadcast %18 : vector<8x1xf32> to vector<8x256xf32>
    %20 = arith.divf %16, %19 : vector<8x256xf32>
    %c0_15 = arith.constant 0 : index
    %c0_16 = arith.constant 0 : index
    %c0_17 = arith.constant 0 : index
    %21 = vector.load %arg4[%c0_15, %c0_16, %c0_17] : memref<1x8x256xf32, #tpu.memory_space<vmem>>, vector<1x8x256xf32>
    %22 = vector.shape_cast %21 : vector<1x8x256xf32> to vector<8x256xf32>
    %23 = vector.shape_cast %20 : vector<8x256xf32> to vector<1x8x256xf32>
    tpu.vector_store %arg4[%c0_15, %c0_16, %c0_17], %23 {strides = array<i32>} : memref<1x8x256xf32, #tpu.memory_space<vmem>>, vector<1x8x256xf32>,
    %24 = arith.truncf %20 : vector<8x256xf32> to vector<8x256xbf16>
    %cst_18 = arith.constant dense<0.000000e+00> : vector<8x1024xf32>
    %25 = tpu.matmul %24, %6, %cst_18 {dimension_numbers = #tpu.dot_dimension_numbers<[1], [1], [0], [0], [0, 0, 1, 0], [], []>} : vector<8x256xbf16>, vector<1024x256xbf16>, vector<8x1024xf32> -> vector<8x1024xf32>
    %26 = arith.truncf %25 : vector<8x1024xf32> to vector<8x1024xbf16>
    %27 = tpu.concatenate %8, %26 in 1 : vector<8x1024xbf16>, vector<8x1024xbf16> -> vector<8x2048xbf16>
    %c0_19 = arith.constant 0 : index
    %c0_20 = arith.constant 0 : index
    %c0_21 = arith.constant 0 : index
    %28 = vector.load %arg5[%c0_19, %c0_20, %c0_21] : memref<1x8x2048xbf16, #tpu.memory_space<vmem>>, vector<1x8x2048xbf16>
    %29 = vector.shape_cast %28 : vector<1x8x2048xbf16> to vector<8x2048xbf16>
    %30 = vector.shape_cast %27 : vector<8x2048xbf16> to vector<1x8x2048xbf16>
    tpu.vector_store %arg5[%c0_19, %c0_20, %c0_21], %30 {strides = array<i32>} : memref<1x8x2048xbf16, #tpu.memory_space<vmem>>, vector<1x8x2048xbf16>,
    return
  }
  func.func @transform_0(%arg0: i32) -> (i32, i32, i32) {
    %c0_i32 = arith.constant 0 : i32
    %c0_i32_0 = arith.constant 0 : i32
    %c0_i32_1 = arith.constant 0 : i32
    return %arg0, %c0_i32, %c0_i32_0 : i32, i32, i32
  }
  func.func @transform_1(%arg0: i32) -> (i32, i32, i32) {
    %c0_i32 = arith.constant 0 : i32
    %c0_i32_0 = arith.constant 0 : i32
    %c0_i32_1 = arith.constant 0 : i32
    return %arg0, %c0_i32, %c0_i32_0 : i32, i32, i32
  }
  func.func @transform_2(%arg0: i32) -> (i32, i32) {
    %c0_i32 = arith.constant 0 : i32
    %c0_i32_0 = arith.constant 0 : i32
    %c0_i32_1 = arith.constant 0 : i32
    return %c0_i32, %c0_i32_0 : i32, i32
  }
  func.func @transform_3(%arg0: i32) -> (i32, i32, i32) {
    %c0_i32 = arith.constant 0 : i32
    %c0_i32_0 = arith.constant 0 : i32
    %c0_i32_1 = arith.constant 0 : i32
    return %arg0, %c0_i32, %c0_i32_0 : i32, i32, i32
  }
  func.func @transform_4(%arg0: i32) -> (i32, i32, i32) {
    %c0_i32 = arith.constant 0 : i32
    %c0_i32_0 = arith.constant 0 : i32
    %c0_i32_1 = arith.constant 0 : i32
    return %arg0, %c0_i32, %c0_i32_0 : i32, i32, i32
  }
}

module attributes {stable_mosaic.version = 11 : i64} {
  func.func @_inception_film_kernel(%arg0: i32, %arg1: i32, %arg2: memref<1x16x2048xbf16, #tpu.memory_space<vmem>>, %arg3: memref<1x2048x512xbf16, #tpu.memory_space<vmem>>, %arg4: memref<1x512xf32, #tpu.memory_space<vmem>>, %arg5: memref<16x256xbf16, #tpu.memory_space<vmem>>, %arg6: memref<16x256xf32, #tpu.memory_space<vmem>>, %arg7: memref<16x512xf32, #tpu.memory_space<vmem>>) attributes {dimension_semantics = [#tpu.dimension_semantics<parallel>, #tpu.dimension_semantics<arbitrary>], iteration_bounds = array<i64: 4, 7>, scalar_prefetch = 0 : i64, scratch_operands = 1 : i64, tpu.core_type = #tpu.core_type<tc>, window_params = [{transform_indices = @transform_0, window_bounds = array<i64: 1, 16, 2048>}, {transform_indices = @transform_1, window_bounds = array<i64: 1, 2048, 512>}, {transform_indices = @transform_2, window_bounds = array<i64: 1, 512>}, {transform_indices = @transform_3, window_bounds = array<i64: 16, 256>}, {transform_indices = @transform_4, window_bounds = array<i64: 16, 256>}]} {
    %c0_i32 = arith.constant 0 : i32
    %0 = arith.cmpi eq, %arg1, %c0_i32 : i32
    %1 = arith.extui %0 : i1 to i32
    %c0_i32_0 = arith.constant 0 : i32
    %2 = arith.cmpi ne, %1, %c0_i32_0 : i32
    scf.if %2 {
      %cst_11 = arith.constant 0.000000e+00 : f32
      %14 = vector.broadcast %cst_11 : f32 to vector<16x512xf32>
      %c0_12 = arith.constant 0 : index
      %c0_13 = arith.constant 0 : index
      %15 = vector.load %arg7[%c0_12, %c0_13] : memref<16x512xf32, #tpu.memory_space<vmem>>, vector<16x512xf32>
      tpu.vector_store %arg7[%c0_12, %c0_13], %14 {strides = array<i32>} : memref<16x512xf32, #tpu.memory_space<vmem>>, vector<16x512xf32>,
    } else {
    }
    %c0 = arith.constant 0 : index
    %c0_1 = arith.constant 0 : index
    %3 = vector.load %arg7[%c0, %c0_1] : memref<16x512xf32, #tpu.memory_space<vmem>>, vector<16x512xf32>
    %c0_2 = arith.constant 0 : index
    %c0_3 = arith.constant 0 : index
    %c0_4 = arith.constant 0 : index
    %4 = vector.load %arg2[%c0_2, %c0_3, %c0_4] : memref<1x16x2048xbf16, #tpu.memory_space<vmem>>, vector<1x16x2048xbf16>
    %5 = vector.shape_cast %4 : vector<1x16x2048xbf16> to vector<16x2048xbf16>
    %c0_5 = arith.constant 0 : index
    %c0_6 = arith.constant 0 : index
    %c0_7 = arith.constant 0 : index
    %6 = vector.load %arg3[%c0_5, %c0_6, %c0_7] : memref<1x2048x512xbf16, #tpu.memory_space<vmem>>, vector<1x2048x512xbf16>
    %7 = vector.shape_cast %6 : vector<1x2048x512xbf16> to vector<2048x512xbf16>
    %cst = arith.constant dense<0.000000e+00> : vector<16x512xf32>
    %8 = tpu.matmul %5, %7, %cst {dimension_numbers = #tpu.dot_dimension_numbers<[1], [0], [0], [1], [0, 0, 1, 1], [], []>} : vector<16x2048xbf16>, vector<2048x512xbf16>, vector<16x512xf32> -> vector<16x512xf32>
    %9 = arith.addf %3, %8 : vector<16x512xf32>
    %c0_8 = arith.constant 0 : index
    %c0_9 = arith.constant 0 : index
    %10 = vector.load %arg7[%c0_8, %c0_9] : memref<16x512xf32, #tpu.memory_space<vmem>>, vector<16x512xf32>
    tpu.vector_store %arg7[%c0_8, %c0_9], %9 {strides = array<i32>} : memref<16x512xf32, #tpu.memory_space<vmem>>, vector<16x512xf32>,
    %c6_i32 = arith.constant 6 : i32
    %11 = arith.cmpi eq, %arg1, %c6_i32 : i32
    %12 = arith.extui %11 : i1 to i32
    %c0_i32_10 = arith.constant 0 : i32
    %13 = arith.cmpi ne, %12, %c0_i32_10 : i32
    scf.if %13 {
      %c0_11 = arith.constant 0 : index
      %c0_12 = arith.constant 0 : index
      %14 = vector.load %arg7[%c0_11, %c0_12] : memref<16x512xf32, #tpu.memory_space<vmem>>, vector<16x512xf32>
      %c0_13 = arith.constant 0 : index
      %c0_14 = arith.constant 0 : index
      %15 = vector.load %arg4[%c0_13, %c0_14] : memref<1x512xf32, #tpu.memory_space<vmem>>, vector<1x512xf32>
      %16 = vector.broadcast %15 : vector<1x512xf32> to vector<16x512xf32>
      %17 = arith.addf %14, %16 : vector<16x512xf32>
      %18 = vector.extract_strided_slice %17 {offsets = [0, 0], sizes = [16, 256], strides = [1, 1]} : vector<16x512xf32> to vector<16x256xf32>
      %19 = vector.extract_strided_slice %17 {offsets = [0, 256], sizes = [16, 256], strides = [1, 1]} : vector<16x512xf32> to vector<16x256xf32>
      %c0_15 = arith.constant 0 : index
      %c0_16 = arith.constant 0 : index
      %20 = vector.load %arg5[%c0_15, %c0_16] : memref<16x256xbf16, #tpu.memory_space<vmem>>, vector<16x256xbf16>
      %21 = arith.extf %20 : vector<16x256xbf16> to vector<16x256xf32>
      %22 = arith.mulf %18, %21 : vector<16x256xf32>
      %23 = arith.addf %22, %19 : vector<16x256xf32>
      %c0_17 = arith.constant 0 : index
      %c0_18 = arith.constant 0 : index
      %24 = vector.load %arg6[%c0_17, %c0_18] : memref<16x256xf32, #tpu.memory_space<vmem>>, vector<16x256xf32>
      tpu.vector_store %arg6[%c0_17, %c0_18], %23 {strides = array<i32>} : memref<16x256xf32, #tpu.memory_space<vmem>>, vector<16x256xf32>,
    } else {
    }
    return
  }
  func.func @transform_0(%arg0: i32, %arg1: i32) -> (i32, i32, i32) {
    %c0_i32 = arith.constant 0 : i32
    %c0_i32_0 = arith.constant 0 : i32
    %c0_i32_1 = arith.constant 0 : i32
    return %arg1, %c0_i32, %c0_i32_0 : i32, i32, i32
  }
  func.func @transform_1(%arg0: i32, %arg1: i32) -> (i32, i32, i32) {
    %c0_i32 = arith.constant 0 : i32
    %c0_i32_0 = arith.constant 0 : i32
    return %arg1, %c0_i32, %arg0 : i32, i32, i32
  }
  func.func @transform_2(%arg0: i32, %arg1: i32) -> (i32, i32) {
    %c0_i32 = arith.constant 0 : i32
    %c0_i32_0 = arith.constant 0 : i32
    return %c0_i32, %arg0 : i32, i32
  }
  func.func @transform_3(%arg0: i32, %arg1: i32) -> (i32, i32) {
    %c0_i32 = arith.constant 0 : i32
    %c0_i32_0 = arith.constant 0 : i32
    return %c0_i32, %arg0 : i32, i32
  }
  func.func @transform_4(%arg0: i32, %arg1: i32) -> (i32, i32) {
    %c0_i32 = arith.constant 0 : i32
    %c0_i32_0 = arith.constant 0 : i32
    return %c0_i32, %arg0 : i32, i32
  }
}

</mosaic_0001>

<bundles_post_ra>
// kernel: global_conv_forward.3
= control target key start
LH: loop header
LB: loop body
LE: loop exit
PB: predicated region body
PF: predicated region fallthrough
CT: control target
= control target key end

     0   :  { %9 = vsyncpa [#allocation4], 0  ;;  %s6942_s0 = inlined_call_operand.vmem [shape: bf16[7,16,2048], index: 0, kind: input, shape index: {}]   ;;  %s6943_s1 = inlined_call_operand.hbm [shape: bf16[7,2048,2048], index: 1, kind: input, shape index: {}]   ;;  %s6944_s2 = inlined_call_operand.vmem [shape: f32[1,2048], index: 2, kind: input, shape index: {}]   ;;  %s6945_s3 = inlined_call_operand.vmem [shape: bf16[16,1024], index: 3, kind: input, shape index: {}]   ;;  %s6946_s4 = inlined_call_operand.hbm [shape: f32[16,1024], index: 4, kind: output, shape index: {}]  }
   0x1   :  { %11 = vsyncpa [#allocation4 + $0x1], 0 }
   0x2   :  { %12 = vsyncpa [#allocation5], 0 }
   0x3   :  { %14 = vsyncpa [#allocation5 + $0x1], 0  ;;  %s6095_s15 = smov 0   ;;  %s6097_s16 = smov 0  }
   0x4   :  { %s6099_s17 = smov 0   ;;  %s6101_s18 = smov 0  }
   0x5   :  { %s6103_s19 = smov 0   ;;  %s6105_s20 = smov 0  }
   0x6   :  { %s6107_s21 = smov 0   ;;  %s6109_s22 = smov 0  }
   0x7   :  { %s6111_s23 = smov 0   ;;  %s6113_s24 = smov 0  }
   0x8   :  { %s6115_s25 = smov 0  }
   0x9 LB: > { %6953 = sst [smem:[#allocation10_spill]] %s6039_s20  ;;  %s4425_s26 = sadd.s32 4294967295, %s6059_s25   ;;  %s6059_s25 = sphi %s6115_s25, %s20_s25   ;;  %s6055_s24 = sphi %s6113_s24, %s6981_s24   ;;  %s6051_s23 = sphi %s6111_s23, %s6980_s23   ;;  %s6047_s22 = sphi %s6109_s22, %s6979_s22   ;;  %s6043_s21 = sphi %s6107_s21, %s6978_s21   ;;  %s6039_s20 = sphi %s6105_s20, %s6970_s20   ;;  %s6035_s19 = sphi %s6103_s19, %s6977_s19   ;;  %s6031_s18 = sphi %s6101_s18, %s6976_s18   ;;  %s6027_s17 = sphi %s6099_s17, %s6975_s17   ;;  %s6023_s16 = sphi %s6097_s16, %s6974_s16   ;;  %s6019_s15 = sphi %s6095_s15, %s6973_s15  }
   0xa   : > { %s4426_s27 = sadd.s32 4294967294, %s6059_s25   ;;  %s29_s28 = sadd.s32 1, %s6051_s23 }
   0xb   : > { %s32_s29 = sadd.s32 1, %s6055_s24  ;;  %p30_p0 = scmp.ge.s32.totalorder %s29_s28, 7 }
   0xc   : > { %s67_s30 = sadd.s32 1, %s6039_s20  ;;  %p74_p1 = scmp.ne.s32.totalorder %s6039_s20, %s6035_s19 }
   0xd   : > { %p75_p2 = scmp.eq.s32.totalorder %s6059_s25, 0  ;;  %s6983_s28 = smov (%p30_p0, %s29_s28), 0 }
   0xe   : > { %6954 = sst [smem:[#allocation11_spill]] %s6983_s28  ;;  %s6985_s29 = smov (!%p30_p0, %s32_s29), %s6055_s24 }
   0xf   : > { %s62_s5 = ssub.s32 %s6051_s23, %s6983_s28  ;;  %p6163_p3 = por %p75_p2, %p74_p1 }
  0x10   : > { %p34_p4 = scmp.ge.s32.totalorder %s6985_s29, 4  ;;  %p80_p5 = scmp.ne.s32.totalorder %s6035_s19, %s6031_s18 }
  0x11   : > { %p81_p6 = scmp.eq.s32.totalorder %s4425_s26, 0  ;;  %s119_s7 = sadd.s32 1, %s6027_s17 }
  0x12   : > { %s6987_s29 = smov (%p34_p4, %s6985_s29), 0  ;;  %p126_p8 = scmp.ne.s32.totalorder %s6027_s17, %s6023_s16 }
  0x13   : > { %6956 = sst [smem:[#allocation12_spill]] %s6987_s29  ;;  %p6171_p7 = por %p81_p6, %p80_p5 }
  0x14   : > { %s63_s9 = ssub.s32 %s6055_s24, %s6987_s29  ;;  %p156_p9 = scmp.eq.s32.totalorder %s4425_s26, 27 }
  0x15   : > { %s6957_s8 = scalar_select %p6171_p7, 1, 0 }
  0x16   : > { %s64_s10 = sor.u32 %s63_s9, %s62_s5  ;;  %p117_p10 = scmp.eq.s32.totalorder %s63_s9, 0 }
  0x17   : > { %p65_p11 = scmp.eq.s32.totalorder %s64_s10, 0  ;;  %p6181_p12 = por %p126_p8, %p75_p2 }
  0x18   : > { %s6186_s12 = scalar_select %p117_p10, %s6027_s17, %s119_s7  }
  0x19   : > { %s6189_s13 = scalar_select %p65_p11, %s6039_s20, %s67_s30  }
  0x1a   : > { %6959 = sst [smem:[#allocation13_spill]] %s6186_s12  ;;  %p6191_p13 = por %p156_p9, %p126_p8 }
  0x1b   : > { %6960 = sst [smem:[#allocation14_spill]] %s6189_s13  ;;  %p161_p0 = scmp.ne.s32.totalorder %s6023_s16, %s6019_s15 }
  0x1c   : > { %s6961_s14 = scalar_select %p6191_p13, 1, 0 }
  0x1d   : > { %p162_p1 = scmp.eq.s32.totalorder %s4426_s27, 27  ;;  %p4428_p5 = scmp.ge.s32.totalorder %s6059_s25, 28 }
  0x1e   : > { %s190_s26 = sand.u32 (!%p4428_p5), 1, %s6039_s20   ;;  %s4430_s30 = sshll.u32 (!%p4428_p5), %s6055_s24, 2 }
  0x1f   : > { %p6197_p4 = por %p162_p1, %p161_p0  ;;  %178 = sbr.rel (%p4428_p5) target bundleno = 66 (0x42), region = 16 }
  0x20   : > { %s4429_s5 = sshll.u32 (!%p4428_p5), %s190_s26, 12  ;;  %s4431_s7 = sshll.u32 (!%p4428_p5), %s6051_s23, 12 }
  0x21   : > { %s6962_s18 = scalar_select %p6197_p4, 1, 0 }
  0x22   : > { %s200_s9 = sadd.s32 (!%p4428_p5), %s4431_s7, %s4430_s30  ;;  %s194_s10 = scalar_lea.vmem (!%p4428_p5), [#allocation3], %s4429_s5 }
  0x23   : > { %6963 = sst [smem:[#allocation15_spill]] %s6962_s18  ;;  %s203_s29 = sshll.u32 (!%p4428_p5), %s194_s10, 4  ;;  %s6205_s29 = int_to_ptr.vmem [resolvable:$true] %s203_s29 }
  0x24   : > { %s4432_s28 = sshll.u32 (!%p4428_p5), %s200_s9, 6  ;;  %s6212_s18 = scalar_lea.sflag (!%p4428_p5), [#allocation4], %s190_s26 }
  0x25   : > { %s6210_s12 = scalar_lea.hbm (!%p4428_p5), %s6943_s1, %s4432_s28  ;;  %s5913_s7 = scalar_lea.hbm (!%p4428_p5), %s6943_s1, 1835008 }
  0x26   : > { %s5909_s20 = scalar_lea.hbm %s6210_s12, 65536  ;;  %p5914_p9 = scmp.lt.u32.totalorder %s6210_s12, %s6943_s1 }
  0x27   : > { %p5910_p2 = scmp.ne.s32.totalorder %s6210_s12, %s5909_s20  ;;  %p5915_p10 = scmp.lt.u32.totalorder %s5913_s7, %s5909_s20 }
  0x28   : > { %p5917_p0 = scmp.lt.u32.totalorder %s5909_s20, %s6210_s12 }
  0x29   : > { %p5911_p6 = pnand %p5910_p2, %p6163_p3  ;;  %p5916_p11 = por %p5915_p10, %p5914_p9 }
  0x2b   : > { %p5912_p8 = pneg %p5911_p6  ;;  %p5918_p1 = por %p5917_p0, %p5916_p11 }
  0x2d   : > { %p5919_p5 = pnand %p5918_p1, %p5912_p8 }
  0x2f   : > { %5922 = shalt.err (!%p5919_p5)
}
  0x30   : > { %s5923_s28 = scalar_lea.vmem %s6205_s29, 65536  ;;  %s6061_s13 = smov [#allocation3]  }
  0x31   : > { %p5924_p2 = scmp.ne.s32.totalorder %s6205_s29, %s5923_s28  ;;  %s5927_s26 = sshll.u32 %s6061_s13, 4  ;;  %s5928_s26 = int_to_ptr.vmem [resolvable:$false] %s5927_s26 }
  0x32   : > { %s5929_s27 = scalar_lea.vmem %s5928_s26, 131072  ;;  %p5930_p13 = scmp.lt.s32.totalorder %s6205_s29, %s5928_s26 }
  0x33   : > { %p5925_p6 = pnand %p5924_p2, %p6163_p3  ;;  %p5931_p7 = scmp.lt.s32.totalorder %s5929_s27, %s5923_s28 }
  0x35   : > { %p5926_p4 = pneg %p5925_p6  ;;  %p5932_p9 = por %p5931_p7, %p5930_p13 }
  0x37   : > { %p5933_p10 = pnand %p5932_p9, %p5926_p4 }
  0x39   : > { %5936 = shalt.err (!%p5933_p10)
}
  0x3a   : > { %s6062_s20 = smov 1024   ;;  %s6063_s30 = smov 256  }
  0x3b   : > { %s6064_s5 = smov 16   ;;  %220 = sbr.rel (!%p6181_p12) target bundleno = 66 (0x42), region = 32 }
  0x3c   : > { %5037 = dma.hbm_to_vmem [thread:$0]  (%p6163_p3), %s6210_s12, 65536, %s6205_s29, %s6212_s18, %s6062_s20, %s6063_s30, %s6064_s5  }
  0x3d   : > { %s222_s7 = sand.u32 (%p6181_p12), 1, %s6027_s17   ;;  %s4978_s9 = sshll.u32 (%p6181_p12), %s6055_s24, 3 }
  0x3e   : > { %s4433_s10 = sshll.u32 (%p6181_p12), %s222_s7, 4  ;;  %s227_s26 = scalar_lea.vmem (%p6181_p12), %s6945_s3, %s4978_s9 }
  0x3f   : > { %v257_v0 = vld [vmem:[%s227_s26] sm:$0xff] (%p6181_p12)  ;;  %s224_s27 = scalar_lea.vmem (%p6181_p12), [#allocation6], %s4433_s10 }
  0x40   : > { %v259_v1 = vld [vmem:[%s227_s26 + $0x20] sm:$0xff] (%p6181_p12)  ;;  %258 = vst [vmem:[%s224_s27] sm:$0xff] (%p6181_p12), %v257_v0 }
  0x41   : > { %260 = vst [vmem:[%s224_s27 + $0x8] sm:$0xff] (%p6181_p12), %v259_v1 }
  0x42 PF: > { %p4436_p3 = scmp.ge.s32.totalorder %s6059_s25, 1  ;;  %p265_p7 = scmp.lt.s32.totalorder %s6059_s25, 29 }
  0x44   : > { %p266_p12 = pnand %p4436_p3, %p265_p7 }
  0x45   : > { %s271_s29 = sand.u32 (!%p266_p12), 1, %s6035_s19   ;;  %p6964_p13 = scmp.ne.s32.totalorder (!%p266_p12), %s6957_s8, 0 }
  0x46   : > { %269 = sbr.rel (%p266_p12) target bundleno = 865 (0x361), region = 70  ;;  %s4437_s6 = sshll.u32 (!%p266_p12), %s271_s29, 12 }
  0x47   : > { %s272_s11 = scalar_lea.sflag (!%p266_p12), [#allocation4], %s271_s29  ;;  %s6246_s12 = scalar_lea.vmem (!%p266_p12), [#allocation3], %s4437_s6 }
  0x4d   : > { %6010 = dma.done.wait (%p6964_p13), %s272_s11, 65536  }
  0x4e   : > { %6012 = vsyncadd (%p6964_p13), %s272_s11, 4294901760  ;;  %s6253_s18 = sand.u32 1, %s6023_s16   ;;  %p320_p4 = scmp.lt.s32.totalorder %s6043_s21, 6 }
  0x4f   : > { %s4438_s20 = sshll.u32 %s6253_s18, 4  ;;  %s4439_s30 = sshll.u32 %s6253_s18, 5 }
  0x50   : > { %s321_s5 = scalar_select %p320_p4, %s6043_s21, 6 }
  0x51   : > { %s4442_s7 = sshll.u32 %s6047_s22, 2  ;;  %s6271_s29 = scalar_lea.vmem [#allocation6], %s4438_s20 }
  0x52   : > { %s4979_s9 = sshll.u32 %s321_s5, 7  ;;  %p327_p8 = scmp.lt.s32.totalorder %s4442_s7, 15 }
  0x53   : > { %s6263_s8 = scalar_lea.vmem %s6942_s0, %s4979_s9  ;;  %s6273_s6 = scalar_lea.vmem [#allocation7], %s4439_s30 }
  0x54   : > { %s6989_s7 = smov (!%p327_p8, %s4442_s7), 15  ;;  %p4443_p11 = scmp.ne.s32.totalorder %s6043_s21, 0 }
  0x55   : > { %s329_s27 = scalar_lea.vmem %s6944_s2, %s6989_s7  ;;  %v6065_v2 = vmov (!%p4443_p11), 0.0  }
  0x56   : > { %336 = sbr.rel (%p4443_p11) target bundleno = 93 (0x5d), region = 82  ;;  %337 = vst [vmem:[#allocation2] sm:$0xff] (!%p4443_p11), %v6065_v2  ;;  %338 = vst [vmem:[#allocation2 + $0x8] sm:$0xff] (!%p4443_p11), %v6065_v2 }
  0x57   : > { %339 = vst [vmem:[#allocation2 + $0x10] sm:$0xff] (!%p4443_p11), %v6065_v2  ;;  %340 = vst [vmem:[#allocation2 + $0x18] sm:$0xff] (!%p4443_p11), %v6065_v2 }
  0x58   : > { %341 = vst [vmem:[#allocation2 + $0x20] sm:$0xff] (!%p4443_p11), %v6065_v2  ;;  %342 = vst [vmem:[#allocation2 + $0x28] sm:$0xff] (!%p4443_p11), %v6065_v2 }
  0x59   : > { %343 = vst [vmem:[#allocation2 + $0x30] sm:$0xff] (!%p4443_p11), %v6065_v2  ;;  %344 = vst [vmem:[#allocation2 + $0x38] sm:$0xff] (!%p4443_p11), %v6065_v2 }
  0x5d PF: > { %v5141_v3 = vld [vmem:[%s6246_s12 + $0x4] ss:$16 sps:$4 sm:$0xff]   ;;  %v5143_v4 = vld [vmem:[%s6246_s12 + $0xc] ss:$16 sps:$4 sm:$0xff]   ;;  %v5145_v5 = vld [vmem:[%s6246_s12] ss:$16 sps:$4 sm:$0xff]  }
  0x5e   : > { %3521 = vmatprep.subr.bf16.mxu0 %v5141_v3  ;;  %v5146_v6 = vld [vmem:[%s6246_s12 + $0x8] ss:$16 sps:$4 sm:$0xff]   ;;  %3865 = vmatprep.subr.bf16.mxu1 %v5143_v4  ;;  %v5147_v7 = vld [vmem:[%s6246_s12 + $0x24] ss:$16 sps:$4 sm:$0xff]   ;;  %v5149_v8 = vld [vmem:[%s6246_s12 + $0x2c] ss:$16 sps:$4 sm:$0xff]  }
  0x5f   : > { %3522 = vmatpush1.bf16.msra.mxu0 %v5145_v5  ;;  %3866 = vmatpush1.bf16.msra.mxu1 %v5146_v6  ;;  %v5151_v9 = vld [vmem:[%s6246_s12 + $0x20] ss:$16 sps:$4 sm:$0xff]   ;;  %v5152_v10 = vld [vmem:[%s6246_s12 + $0x28] ss:$16 sps:$4 sm:$0xff]   ;;  %v5153_v11 = vld [vmem:[%s6246_s12 + $0x44] ss:$16 sps:$4 sm:$0xff]  }
  0x60   : > { %3523 = vmatprep.subr.bf16.mxu0 %v5147_v7  ;;  %3867 = vmatprep.subr.bf16.mxu1 %v5149_v8  ;;  %v5155_v12 = vld [vmem:[%s6246_s12 + $0x4c] ss:$16 sps:$4 sm:$0xff]   ;;  %v5157_v13 = vld [vmem:[%s6246_s12 + $0x40] ss:$16 sps:$4 sm:$0xff]   ;;  %v5158_v14 = vld [vmem:[%s6246_s12 + $0x48] ss:$16 sps:$4 sm:$0xff]  }
  0x61   : > { %v5159_v15 = vld [vmem:[%s6246_s12 + $0x64] ss:$16 sps:$4 sm:$0xff]   ;;  %v5161_v16 = vld [vmem:[%s6246_s12 + $0x6c] ss:$16 sps:$4 sm:$0xff]   ;;  %v5163_v17 = vld [vmem:[%s6246_s12 + $0x60] ss:$16 sps:$4 sm:$0xff]  }
  0x62   : > { %v5164_v18 = vld [vmem:[%s6246_s12 + $0x68] ss:$16 sps:$4 sm:$0xff]   ;;  %v5165_v19 = vld [vmem:[%s6246_s12 + $0x84] ss:$16 sps:$4 sm:$0xff]   ;;  %v5167_v20 = vld [vmem:[%s6246_s12 + $0x8c] ss:$16 sps:$4 sm:$0xff]  }
  0x63   : > { %3524 = vmatpush1.bf16.msra.mxu0 %v5151_v9  ;;  %3868 = vmatpush1.bf16.msra.mxu1 %v5152_v10  ;;  %v5169_v21 = vld [vmem:[%s6246_s12 + $0x80] ss:$16 sps:$4 sm:$0xff]   ;;  %v5170_v22 = vld [vmem:[%s6246_s12 + $0x88] ss:$16 sps:$4 sm:$0xff]   ;;  %v5171_v23 = vld [vmem:[%s6246_s12 + $0xa4] ss:$16 sps:$4 sm:$0xff]  }
  0x64   : > { %3525 = vmatprep.subr.bf16.mxu0 %v5153_v11  ;;  %3869 = vmatprep.subr.bf16.mxu1 %v5155_v12  ;;  %v5173_v24 = vld [vmem:[%s6246_s12 + $0xac] ss:$16 sps:$4 sm:$0xff]   ;;  %v5175_v25 = vld [vmem:[%s6246_s12 + $0xa0] ss:$16 sps:$4 sm:$0xff]   ;;  %v5176_v26 = vld [vmem:[%s6246_s12 + $0xa8] ss:$16 sps:$4 sm:$0xff]  }
  0x65   : > { %v5177_v27 = vld [vmem:[%s6246_s12 + $0xc4] ss:$16 sps:$4 sm:$0xff]   ;;  %v5179_v28 = vld [vmem:[%s6246_s12 + $0xcc] ss:$16 sps:$4 sm:$0xff]   ;;  %v5181_v29 = vld [vmem:[%s6246_s12 + $0xc0] ss:$16 sps:$4 sm:$0xff]  }
  0x66   : > { %v5182_v30 = vld [vmem:[%s6246_s12 + $0xc8] ss:$16 sps:$4 sm:$0xff]   ;;  %v5183_v31 = vld [vmem:[%s6246_s12 + $0xe4] ss:$16 sps:$4 sm:$0xff]   ;;  %v5185_v32 = vld [vmem:[%s6246_s12 + $0xec] ss:$16 sps:$4 sm:$0xff]  }
  0x67   : > { %3526 = vmatpush1.bf16.msra.mxu0 %v5157_v13  ;;  %3870 = vmatpush1.bf16.msra.mxu1 %v5158_v14  ;;  %v5187_v33 = vld [vmem:[%s6246_s12 + $0xe0] ss:$16 sps:$4 sm:$0xff]   ;;  %v5188_v34 = vld [vmem:[%s6246_s12 + $0xe8] ss:$16 sps:$4 sm:$0xff]   ;;  %v5189_v35 = vld [vmem:[%s6246_s12 + $0x104] ss:$16 sps:$4 sm:$0xff]  }
  0x68   : > { %3527 = vmatprep.subr.bf16.mxu0 %v5159_v15  ;;  %3871 = vmatprep.subr.bf16.mxu1 %v5161_v16  ;;  %v5191_v36 = vld [vmem:[%s6246_s12 + $0x10c] ss:$16 sps:$4 sm:$0xff]   ;;  %v5193_v37 = vld [vmem:[%s6246_s12 + $0x100] ss:$16 sps:$4 sm:$0xff]   ;;  %v5194_v38 = vld [vmem:[%s6246_s12 + $0x108] ss:$16 sps:$4 sm:$0xff]  }
  0x69   : > { %v5195_v39 = vld [vmem:[%s6246_s12 + $0x124] ss:$16 sps:$4 sm:$0xff]   ;;  %v5197_v40 = vld [vmem:[%s6246_s12 + $0x12c] ss:$16 sps:$4 sm:$0xff]   ;;  %v5199_v41 = vld [vmem:[%s6246_s12 + $0x120] ss:$16 sps:$4 sm:$0xff]  }
  0x6a   : > { %v5200_v42 = vld [vmem:[%s6246_s12 + $0x128] ss:$16 sps:$4 sm:$0xff]   ;;  %v5201_v43 = vld [vmem:[%s6246_s12 + $0x144] ss:$16 sps:$4 sm:$0xff]   ;;  %v5203_v44 = vld [vmem:[%s6246_s12 + $0x14c] ss:$16 sps:$4 sm:$0xff]  }
  0x6b   : > { %3528 = vmatpush1.bf16.msra.mxu0 %v5163_v17  ;;  %3872 = vmatpush1.bf16.msra.mxu1 %v5164_v18  ;;  %v5205_v45 = vld [vmem:[%s6246_s12 + $0x140] ss:$16 sps:$4 sm:$0xff]   ;;  %v5206_v46 = vld [vmem:[%s6246_s12 + $0x148] ss:$16 sps:$4 sm:$0xff]   ;;  %v5207_v47 = vld [vmem:[%s6246_s12 + $0x164] ss:$16 sps:$4 sm:$0xff]  }
  0x6c   : > { %3529 = vmatprep.subr.bf16.mxu0 %v5165_v19  ;;  %3873 = vmatprep.subr.bf16.mxu1 %v5167_v20  ;;  %v5209_v48 = vld [vmem:[%s6246_s12 + $0x16c] ss:$16 sps:$4 sm:$0xff]   ;;  %v353_v49 = vld [vmem:[%s6263_s8] sm:$0xff]  ;;  %v5212_v52 = vld [vmem:[%s6246_s12 + $0x168] ss:$16 sps:$4 sm:$0xff]   ;;  %p4972_p0 = scmp.ne.s32.totalorder %s6043_s21, 6 }
  0x6d   : > { %v361_v50 = vld [vmem:[%s6263_s8 + $0x40] sm:$0xff]  ;;  %v5215_v55 = vld [vmem:[%s6246_s12 + $0x18c] ss:$16 sps:$4 sm:$0xff]   ;;  %v5218_v57 = vld [vmem:[%s6246_s12 + $0x188] ss:$16 sps:$4 sm:$0xff]  }
  0x6e   : > { %v5211_v51 = vld [vmem:[%s6246_s12 + $0x160] ss:$16 sps:$4 sm:$0xff]   ;;  %v4445_v53 = vcombine.high %v353_v49, %v361_v50  ;;  %v5213_v54 = vld [vmem:[%s6246_s12 + $0x184] ss:$16 sps:$4 sm:$0xff]   ;;  %v5221_v59 = vld [vmem:[%s6246_s12 + $0x1ac] ss:$16 sps:$4 sm:$0xff]   ;;  %v4444_v8 = vcombine.low %v353_v49, %v361_v50 }
  0x6f   : > { %3530 = vmatpush1.bf16.msra.mxu0 %v5169_v21  ;;  %3874 = vmatpush1.bf16.msra.mxu1 %v5170_v22  ;;  %v5217_v56 = vld [vmem:[%s6246_s12 + $0x180] ss:$16 sps:$4 sm:$0xff]   ;;  %v5219_v58 = vld [vmem:[%s6246_s12 + $0x1a4] ss:$16 sps:$4 sm:$0xff]   ;;  %v5224_v61 = vld [vmem:[%s6246_s12 + $0x1a8] ss:$16 sps:$4 sm:$0xff]  }
  0x70   : > { %3531 = vmatprep.subr.bf16.mxu0 %v5171_v23  ;;  %3875 = vmatprep.subr.bf16.mxu1 %v5173_v24  ;;  %v5223_v60 = vld [vmem:[%s6246_s12 + $0x1a0] ss:$16 sps:$4 sm:$0xff]   ;;  %v5225_v62 = vld [vmem:[%s6246_s12 + $0x1c4] ss:$16 sps:$4 sm:$0xff]   ;;  %v5227_v63 = vld [vmem:[%s6246_s12 + $0x1cc] ss:$16 sps:$4 sm:$0xff]  }
  0x71   : > { %3553 = vmatprep.mubr.bf16.mxu0 %v4445_v53  ;;  %3897 = vmatprep.mubr.bf16.mxu1 %v4445_v53  ;;  %v5229_v0 = vld [vmem:[%s6246_s12 + $0x1c0] ss:$16 sps:$4 sm:$0xff]   ;;  %v5230_v1 = vld [vmem:[%s6246_s12 + $0x1c8] ss:$16 sps:$4 sm:$0xff]   ;;  %v5231_v2 = vld [vmem:[%s6246_s12 + $0x1e4] ss:$16 sps:$4 sm:$0xff]  }
  0x72   : > { %v5233_v3 = vld [vmem:[%s6246_s12 + $0x1ec] ss:$16 sps:$4 sm:$0xff]   ;;  %v5235_v4 = vld [vmem:[%s6246_s12 + $0x1e0] ss:$16 sps:$4 sm:$0xff]   ;;  %v5236_v5 = vld [vmem:[%s6246_s12 + $0x1e8] ss:$16 sps:$4 sm:$0xff]  }
  0x73   : > { %3532 = vmatpush1.bf16.msra.mxu0 %v5175_v25  ;;  %3876 = vmatpush1.bf16.msra.mxu1 %v5176_v26  ;;  %v5239_v6 = vld [vmem:[%s6246_s12 + $0x204] ss:$16 sps:$4 sm:$0xff]   ;;  %v5242_v7 = vld [vmem:[%s6246_s12 + $0x20c] ss:$16 sps:$4 sm:$0xff]   ;;  %v5237_v9 = vld [vmem:[%s6246_s12 + $0x200] ss:$16 sps:$4 sm:$0xff]  }
  0x74   : > { %3533 = vmatprep.subr.bf16.mxu0 %v5177_v27  ;;  %3877 = vmatprep.subr.bf16.mxu1 %v5179_v28  ;;  %v5240_v10 = vld [vmem:[%s6246_s12 + $0x208] ss:$16 sps:$4 sm:$0xff]   ;;  %v5245_v11 = vld [vmem:[%s6246_s12 + $0x224] ss:$16 sps:$4 sm:$0xff]   ;;  %v5248_v12 = vld [vmem:[%s6246_s12 + $0x22c] ss:$16 sps:$4 sm:$0xff]  }
  0x75   : > { %v5243_v13 = vld [vmem:[%s6246_s12 + $0x220] ss:$16 sps:$4 sm:$0xff]   ;;  %v5246_v14 = vld [vmem:[%s6246_s12 + $0x228] ss:$16 sps:$4 sm:$0xff]   ;;  %v5251_v15 = vld [vmem:[%s6246_s12 + $0x244] ss:$16 sps:$4 sm:$0xff]  }
  0x76   : > { %v5254_v16 = vld [vmem:[%s6246_s12 + $0x24c] ss:$16 sps:$4 sm:$0xff]   ;;  %v5249_v17 = vld [vmem:[%s6246_s12 + $0x240] ss:$16 sps:$4 sm:$0xff]   ;;  %v5252_v18 = vld [vmem:[%s6246_s12 + $0x248] ss:$16 sps:$4 sm:$0xff]  }
  0x77   : > { %3534 = vmatpush1.bf16.msra.mxu0 %v5181_v29  ;;  %3878 = vmatpush1.bf16.msra.mxu1 %v5182_v30  ;;  %v5257_v19 = vld [vmem:[%s6246_s12 + $0x264] ss:$16 sps:$4 sm:$0xff]   ;;  %v5260_v20 = vld [vmem:[%s6246_s12 + $0x26c] ss:$16 sps:$4 sm:$0xff]   ;;  %v5255_v21 = vld [vmem:[%s6246_s12 + $0x260] ss:$16 sps:$4 sm:$0xff]  }
  0x78   : > { %3535 = vmatprep.subr.bf16.mxu0 %v5183_v31  ;;  %3879 = vmatprep.subr.bf16.mxu1 %v5185_v32  ;;  %v5258_v22 = vld [vmem:[%s6246_s12 + $0x268] ss:$16 sps:$4 sm:$0xff]   ;;  %v5263_v23 = vld [vmem:[%s6246_s12 + $0x284] ss:$16 sps:$4 sm:$0xff]   ;;  %v5266_v24 = vld [vmem:[%s6246_s12 + $0x28c] ss:$16 sps:$4 sm:$0xff]  }
  0x79   : > { %v5261_v25 = vld [vmem:[%s6246_s12 + $0x280] ss:$16 sps:$4 sm:$0xff]   ;;  %v5264_v26 = vld [vmem:[%s6246_s12 + $0x288] ss:$16 sps:$4 sm:$0xff]   ;;  %v5269_v27 = vld [vmem:[%s6246_s12 + $0x2a4] ss:$16 sps:$4 sm:$0xff]  }
  0x7a   : > { %v5272_v28 = vld [vmem:[%s6246_s12 + $0x2ac] ss:$16 sps:$4 sm:$0xff]   ;;  %v5267_v29 = vld [vmem:[%s6246_s12 + $0x2a0] ss:$16 sps:$4 sm:$0xff]   ;;  %v5270_v30 = vld [vmem:[%s6246_s12 + $0x2a8] ss:$16 sps:$4 sm:$0xff]  }
  0x7b   : > { %3536 = vmatpush1.bf16.msra.mxu0 %v5187_v33  ;;  %3880 = vmatpush1.bf16.msra.mxu1 %v5188_v34  ;;  %v5275_v31 = vld [vmem:[%s6246_s12 + $0x2c4] ss:$16 sps:$4 sm:$0xff]   ;;  %v5278_v32 = vld [vmem:[%s6246_s12 + $0x2cc] ss:$16 sps:$4 sm:$0xff]   ;;  %v5294_v49 = vld [vmem:[%s6246_s12 + $0x328] ss:$16 sps:$4 sm:$0xff]  }
  0x7c   : > { %3537 = vmatprep.subr.bf16.mxu0 %v5189_v35  ;;  %3881 = vmatprep.subr.bf16.mxu1 %v5191_v36  ;;  %v6369_v33 = vld [vmem:[%s6263_s8 + $0x8] sm:$0xff]  ;;  %v5273_v35 = vld [vmem:[%s6246_s12 + $0x2c0] ss:$16 sps:$4 sm:$0xff]   ;;  %v5299_v50 = vld [vmem:[%s6246_s12 + $0x344] ss:$16 sps:$4 sm:$0xff]  }
  0x7d   : > { %v6372_v34 = vld [vmem:[%s6263_s8 + $0x48] sm:$0xff] }
  0x7e   : > { %v5276_v36 = vld [vmem:[%s6246_s12 + $0x2c8] ss:$16 sps:$4 sm:$0xff]  }
  0x7f   : > { %3538 = vmatpush1.bf16.msra.mxu0 %v5193_v37  ;;  %3882 = vmatpush1.bf16.msra.mxu1 %v5194_v38  ;;  %v4447_v37 = vcombine.high %v6369_v33, %v6372_v34  ;;  %v5281_v38 = vld [vmem:[%s6246_s12 + $0x2e4] ss:$16 sps:$4 sm:$0xff]   ;;  %v5300_v53 = vld [vmem:[%s6246_s12 + $0x348] ss:$16 sps:$4 sm:$0xff]  }
  0x80   : > { %3539 = vmatprep.subr.bf16.mxu0 %v5195_v39  ;;  %3883 = vmatprep.subr.bf16.mxu1 %v5197_v40  ;;  %v5284_v39 = vld [vmem:[%s6246_s12 + $0x2ec] ss:$16 sps:$4 sm:$0xff]   ;;  %v5279_v40 = vld [vmem:[%s6246_s12 + $0x2e0] ss:$16 sps:$4 sm:$0xff]  }
  0x83   : > { %3540 = vmatpush1.bf16.msra.mxu0 %v5199_v41  ;;  %3884 = vmatpush1.bf16.msra.mxu1 %v5200_v42  ;;  %v5282_v41 = vld [vmem:[%s6246_s12 + $0x2e8] ss:$16 sps:$4 sm:$0xff]   ;;  %v5287_v42 = vld [vmem:[%s6246_s12 + $0x304] ss:$16 sps:$4 sm:$0xff]  }
  0x84   : > { %3541 = vmatprep.subr.bf16.mxu0 %v5201_v43  ;;  %3885 = vmatprep.subr.bf16.mxu1 %v5203_v44  ;;  %v5290_v43 = vld [vmem:[%s6246_s12 + $0x30c] ss:$16 sps:$4 sm:$0xff]   ;;  %v5285_v44 = vld [vmem:[%s6246_s12 + $0x300] ss:$16 sps:$4 sm:$0xff]  }
  0x87   : > { %3542 = vmatpush1.bf16.msra.mxu0 %v5205_v45  ;;  %3886 = vmatpush1.bf16.msra.mxu1 %v5206_v46  ;;  %v5288_v45 = vld [vmem:[%s6246_s12 + $0x308] ss:$16 sps:$4 sm:$0xff]   ;;  %v5293_v46 = vld [vmem:[%s6246_s12 + $0x324] ss:$16 sps:$4 sm:$0xff]  }
  0x88   : > { %3543 = vmatprep.subr.bf16.mxu0 %v5207_v47  ;;  %3887 = vmatprep.subr.bf16.mxu1 %v5209_v48  ;;  %v5296_v47 = vld [vmem:[%s6246_s12 + $0x32c] ss:$16 sps:$4 sm:$0xff]   ;;  %v5291_v48 = vld [vmem:[%s6246_s12 + $0x320] ss:$16 sps:$4 sm:$0xff]  }
  0x8b   : > { %3544 = vmatpush1.bf16.msra.mxu0 %v5211_v51  ;;  %3888 = vmatpush1.bf16.msra.mxu1 %v5212_v52  ;;  %v5302_v51 = vld [vmem:[%s6246_s12 + $0x34c] ss:$16 sps:$4 sm:$0xff]   ;;  %v5297_v52 = vld [vmem:[%s6246_s12 + $0x340] ss:$16 sps:$4 sm:$0xff]  }
  0x8c   : > { %3545 = vmatprep.subr.bf16.mxu0 %v5213_v54  ;;  %3889 = vmatprep.subr.bf16.mxu1 %v5215_v55  ;;  %v5305_v54 = vld [vmem:[%s6246_s12 + $0x364] ss:$16 sps:$4 sm:$0xff]   ;;  %v5308_v55 = vld [vmem:[%s6246_s12 + $0x36c] ss:$16 sps:$4 sm:$0xff]  }
  0x8f   : > { %3546 = vmatpush1.bf16.msra.mxu0 %v5217_v56  ;;  %3890 = vmatpush1.bf16.msra.mxu1 %v5218_v57  ;;  %v5303_v56 = vld [vmem:[%s6246_s12 + $0x360] ss:$16 sps:$4 sm:$0xff]   ;;  %v5306_v57 = vld [vmem:[%s6246_s12 + $0x368] ss:$16 sps:$4 sm:$0xff]  }
  0x90   : > { %3547 = vmatprep.subr.bf16.mxu0 %v5219_v58  ;;  %3891 = vmatprep.subr.bf16.mxu1 %v5221_v59  ;;  %v5311_v58 = vld [vmem:[%s6246_s12 + $0x384] ss:$16 sps:$4 sm:$0xff]   ;;  %v5314_v59 = vld [vmem:[%s6246_s12 + $0x38c] ss:$16 sps:$4 sm:$0xff]  }
  0x93   : > { %3548 = vmatpush1.bf16.msra.mxu0 %v5223_v60  ;;  %3892 = vmatpush1.bf16.msra.mxu1 %v5224_v61  ;;  %v5309_v60 = vld [vmem:[%s6246_s12 + $0x380] ss:$16 sps:$4 sm:$0xff]   ;;  %v5312_v61 = vld [vmem:[%s6246_s12 + $0x388] ss:$16 sps:$4 sm:$0xff]  }
  0x94   : > { %3549 = vmatprep.subr.bf16.mxu0 %v5225_v62  ;;  %3893 = vmatprep.subr.bf16.mxu1 %v5227_v63  ;;  %v5317_v62 = vld [vmem:[%s6246_s12 + $0x3a4] ss:$16 sps:$4 sm:$0xff]   ;;  %v5320_v63 = vld [vmem:[%s6246_s12 + $0x3ac] ss:$16 sps:$4 sm:$0xff]  }
  0x97   : > { %3550 = vmatpush1.bf16.msra.mxu0 %v5229_v0  ;;  %3894 = vmatpush1.bf16.msra.mxu1 %v5230_v1  ;;  %v5315_v0 = vld [vmem:[%s6246_s12 + $0x3a0] ss:$16 sps:$4 sm:$0xff]   ;;  %v5318_v1 = vld [vmem:[%s6246_s12 + $0x3a8] ss:$16 sps:$4 sm:$0xff]  }
  0x98   : > { %3551 = vmatprep.subr.bf16.mxu0 %v5231_v2  ;;  %3895 = vmatprep.subr.bf16.mxu1 %v5233_v3  ;;  %v5323_v2 = vld [vmem:[%s6246_s12 + $0x3c4] ss:$16 sps:$4 sm:$0xff]   ;;  %v5326_v3 = vld [vmem:[%s6246_s12 + $0x3cc] ss:$16 sps:$4 sm:$0xff]  }
  0x9b   : > { %3552 = vmatpush1.bf16.msra.mxu0 %v5235_v4  ;;  %3896 = vmatpush1.bf16.msra.mxu1 %v5236_v5  ;;  %v5321_v4 = vld [vmem:[%s6246_s12 + $0x3c0] ss:$16 sps:$4 sm:$0xff]   ;;  %v5324_v5 = vld [vmem:[%s6246_s12 + $0x3c8] ss:$16 sps:$4 sm:$0xff]  }
  0x9c   : > { %3564 = vmatprep.subr.bf16.mxu0 %v5239_v6  ;;  %3908 = vmatprep.subr.bf16.mxu1 %v5242_v7  ;;  %v5329_v6 = vld [vmem:[%s6246_s12 + $0x3e4] ss:$16 sps:$4 sm:$0xff]   ;;  %v5332_v7 = vld [vmem:[%s6246_s12 + $0x3ec] ss:$16 sps:$4 sm:$0xff]  }
  0x9e   : > { %3554 = vmatmul.mubr.bf16.vlgmr.msra.gmra.mrb[0].mxu0 %v4444_v8  ;;  %3898 = vmatmul.mubr.bf16.vlgmr.msra.gmra.mrb[0].mxu1 %v4444_v8  ;;  %v5327_v8 = vld [vmem:[%s6246_s12 + $0x3e0] ss:$16 sps:$4 sm:$0xff]  }
  0x9f   : > { %3565 = vmatpush1.bf16.msra.mxu0 %v5237_v9  ;;  %3909 = vmatpush1.bf16.msra.mxu1 %v5240_v10  ;;  %v5330_v9 = vld [vmem:[%s6246_s12 + $0x3e8] ss:$16 sps:$4 sm:$0xff]   ;;  %v5335_v10 = vld [vmem:[%s6246_s12 + $0x404] ss:$16 sps:$4 sm:$0xff]  }
  0xa0   : > { %3566 = vmatprep.subr.bf16.mxu0 %v5245_v11  ;;  %3910 = vmatprep.subr.bf16.mxu1 %v5248_v12  ;;  %v5338_v11 = vld [vmem:[%s6246_s12 + $0x40c] ss:$16 sps:$4 sm:$0xff]   ;;  %v4446_v12 = vcombine.low %v6369_v33, %v6372_v34  ;;  %v5360_v33 = vld [vmem:[%s6246_s12 + $0x488] ss:$16 sps:$4 sm:$0xff]   ;;  %v5365_v34 = vld [vmem:[%s6246_s12 + $0x4a4] ss:$16 sps:$4 sm:$0xff]  }
  0xa1   : > { %3596 = vmatprep.mubr.bf16.mxu0 %v4447_v37  ;;  %3940 = vmatprep.mubr.bf16.mxu1 %v4447_v37  ;;  %v5366_v37 = vld [vmem:[%s6246_s12 + $0x4a8] ss:$16 sps:$4 sm:$0xff]  }
  0xa3   : > { %3567 = vmatpush1.bf16.msra.mxu0 %v5243_v13  ;;  %3911 = vmatpush1.bf16.msra.mxu1 %v5246_v14  ;;  %v5333_v13 = vld [vmem:[%s6246_s12 + $0x400] ss:$16 sps:$4 sm:$0xff]   ;;  %v5336_v14 = vld [vmem:[%s6246_s12 + $0x408] ss:$16 sps:$4 sm:$0xff]  }
  0xa4   : > { %3568 = vmatprep.subr.bf16.mxu0 %v5251_v15  ;;  %3912 = vmatprep.subr.bf16.mxu1 %v5254_v16  ;;  %v5341_v15 = vld [vmem:[%s6246_s12 + $0x424] ss:$16 sps:$4 sm:$0xff]   ;;  %v5344_v16 = vld [vmem:[%s6246_s12 + $0x42c] ss:$16 sps:$4 sm:$0xff]  }
  0xa7   : > { %3569 = vmatpush1.bf16.msra.mxu0 %v5249_v17  ;;  %3913 = vmatpush1.bf16.msra.mxu1 %v5252_v18  ;;  %v6423_v17 = vld [vmem:[%s6263_s8 + $0x10] sm:$0xff] }
  0xa8   : > { %3570 = vmatprep.subr.bf16.mxu0 %v5257_v19  ;;  %3914 = vmatprep.subr.bf16.mxu1 %v5260_v20  ;;  %v6426_v18 = vld [vmem:[%s6263_s8 + $0x50] sm:$0xff] }
  0xa9   : > { %v4449_v19 = vcombine.high %v6423_v17, %v6426_v18  ;;  %v5339_v20 = vld [vmem:[%s6246_s12 + $0x420] ss:$16 sps:$4 sm:$0xff]  }
  0xab   : > { %3571 = vmatpush1.bf16.msra.mxu0 %v5255_v21  ;;  %3915 = vmatpush1.bf16.msra.mxu1 %v5258_v22  ;;  %v5342_v21 = vld [vmem:[%s6246_s12 + $0x428] ss:$16 sps:$4 sm:$0xff]   ;;  %v5347_v22 = vld [vmem:[%s6246_s12 + $0x444] ss:$16 sps:$4 sm:$0xff]  }
  0xac   : > { %3572 = vmatprep.subr.bf16.mxu0 %v5263_v23  ;;  %3916 = vmatprep.subr.bf16.mxu1 %v5266_v24  ;;  %v5350_v23 = vld [vmem:[%s6246_s12 + $0x44c] ss:$16 sps:$4 sm:$0xff]   ;;  %v5345_v24 = vld [vmem:[%s6246_s12 + $0x440] ss:$16 sps:$4 sm:$0xff]  }
  0xaf   : > { %3573 = vmatpush1.bf16.msra.mxu0 %v5261_v25  ;;  %3917 = vmatpush1.bf16.msra.mxu1 %v5264_v26  ;;  %v5348_v25 = vld [vmem:[%s6246_s12 + $0x448] ss:$16 sps:$4 sm:$0xff]   ;;  %v5353_v26 = vld [vmem:[%s6246_s12 + $0x464] ss:$16 sps:$4 sm:$0xff]  }
  0xb0   : > { %3574 = vmatprep.subr.bf16.mxu0 %v5269_v27  ;;  %3918 = vmatprep.subr.bf16.mxu1 %v5272_v28  ;;  %v5356_v27 = vld [vmem:[%s6246_s12 + $0x46c] ss:$16 sps:$4 sm:$0xff]   ;;  %v5351_v28 = vld [vmem:[%s6246_s12 + $0x460] ss:$16 sps:$4 sm:$0xff]  }
  0xb3   : > { %3575 = vmatpush1.bf16.msra.mxu0 %v5267_v29  ;;  %3919 = vmatpush1.bf16.msra.mxu1 %v5270_v30  ;;  %v5354_v29 = vld [vmem:[%s6246_s12 + $0x468] ss:$16 sps:$4 sm:$0xff]   ;;  %v5359_v30 = vld [vmem:[%s6246_s12 + $0x484] ss:$16 sps:$4 sm:$0xff]  }
  0xb4   : > { %3576 = vmatprep.subr.bf16.mxu0 %v5275_v31  ;;  %3920 = vmatprep.subr.bf16.mxu1 %v5278_v32  ;;  %v5362_v31 = vld [vmem:[%s6246_s12 + $0x48c] ss:$16 sps:$4 sm:$0xff]   ;;  %v5357_v32 = vld [vmem:[%s6246_s12 + $0x480] ss:$16 sps:$4 sm:$0xff]  }
  0xb7   : > { %3577 = vmatpush1.bf16.msra.mxu0 %v5273_v35  ;;  %3921 = vmatpush1.bf16.msra.mxu1 %v5276_v36  ;;  %v5368_v35 = vld [vmem:[%s6246_s12 + $0x4ac] ss:$16 sps:$4 sm:$0xff]   ;;  %v5363_v36 = vld [vmem:[%s6246_s12 + $0x4a0] ss:$16 sps:$4 sm:$0xff]  }
  0xb8   : > { %3578 = vmatprep.subr.bf16.mxu0 %v5281_v38  ;;  %3922 = vmatprep.subr.bf16.mxu1 %v5284_v39  ;;  %v5371_v38 = vld [vmem:[%s6246_s12 + $0x4c4] ss:$16 sps:$4 sm:$0xff]   ;;  %v5374_v39 = vld [vmem:[%s6246_s12 + $0x4cc] ss:$16 sps:$4 sm:$0xff]  }
  0xbb   : > { %3579 = vmatpush1.bf16.msra.mxu0 %v5279_v40  ;;  %3923 = vmatpush1.bf16.msra.mxu1 %v5282_v41  ;;  %v5369_v40 = vld [vmem:[%s6246_s12 + $0x4c0] ss:$16 sps:$4 sm:$0xff]   ;;  %v5372_v41 = vld [vmem:[%s6246_s12 + $0x4c8] ss:$16 sps:$4 sm:$0xff]  }
  0xbc   : > { %3580 = vmatprep.subr.bf16.mxu0 %v5287_v42  ;;  %3924 = vmatprep.subr.bf16.mxu1 %v5290_v43  ;;  %v5377_v42 = vld [vmem:[%s6246_s12 + $0x4e4] ss:$16 sps:$4 sm:$0xff]   ;;  %v5380_v43 = vld [vmem:[%s6246_s12 + $0x4ec] ss:$16 sps:$4 sm:$0xff]  }
  0xbf   : > { %3581 = vmatpush1.bf16.msra.mxu0 %v5285_v44  ;;  %3925 = vmatpush1.bf16.msra.mxu1 %v5288_v45  ;;  %v5375_v44 = vld [vmem:[%s6246_s12 + $0x4e0] ss:$16 sps:$4 sm:$0xff]   ;;  %v5378_v45 = vld [vmem:[%s6246_s12 + $0x4e8] ss:$16 sps:$4 sm:$0xff]  }
  0xc0   : > { %3582 = vmatprep.subr.bf16.mxu0 %v5293_v46  ;;  %3926 = vmatprep.subr.bf16.mxu1 %v5296_v47  ;;  %v5383_v46 = vld [vmem:[%s6246_s12 + $0x504] ss:$16 sps:$4 sm:$0xff]   ;;  %v5386_v47 = vld [vmem:[%s6246_s12 + $0x50c] ss:$16 sps:$4 sm:$0xff]  }
  0xc3   : > { %3583 = vmatpush1.bf16.msra.mxu0 %v5291_v48  ;;  %3927 = vmatpush1.bf16.msra.mxu1 %v5294_v49  ;;  %v5381_v48 = vld [vmem:[%s6246_s12 + $0x500] ss:$16 sps:$4 sm:$0xff]   ;;  %v5384_v49 = vld [vmem:[%s6246_s12 + $0x508] ss:$16 sps:$4 sm:$0xff]  }
  0xc4   : > { %3584 = vmatprep.subr.bf16.mxu0 %v5299_v50  ;;  %3928 = vmatprep.subr.bf16.mxu1 %v5302_v51  ;;  %v5389_v50 = vld [vmem:[%s6246_s12 + $0x524] ss:$16 sps:$4 sm:$0xff]   ;;  %v5392_v51 = vld [vmem:[%s6246_s12 + $0x52c] ss:$16 sps:$4 sm:$0xff]  }
  0xc7   : > { %3585 = vmatpush1.bf16.msra.mxu0 %v5297_v52  ;;  %3929 = vmatpush1.bf16.msra.mxu1 %v5300_v53  ;;  %v5387_v52 = vld [vmem:[%s6246_s12 + $0x520] ss:$16 sps:$4 sm:$0xff]   ;;  %v5390_v53 = vld [vmem:[%s6246_s12 + $0x528] ss:$16 sps:$4 sm:$0xff]  }
  0xc8   : > { %3586 = vmatprep.subr.bf16.mxu0 %v5305_v54  ;;  %3930 = vmatprep.subr.bf16.mxu1 %v5308_v55  ;;  %v5395_v54 = vld [vmem:[%s6246_s12 + $0x544] ss:$16 sps:$4 sm:$0xff]   ;;  %v5398_v55 = vld [vmem:[%s6246_s12 + $0x54c] ss:$16 sps:$4 sm:$0xff]  }
  0xcb   : > { %3587 = vmatpush1.bf16.msra.mxu0 %v5303_v56  ;;  %3931 = vmatpush1.bf16.msra.mxu1 %v5306_v57  ;;  %v5393_v56 = vld [vmem:[%s6246_s12 + $0x540] ss:$16 sps:$4 sm:$0xff]   ;;  %v5396_v57 = vld [vmem:[%s6246_s12 + $0x548] ss:$16 sps:$4 sm:$0xff]  }
  0xcc   : > { %3588 = vmatprep.subr.bf16.mxu0 %v5311_v58  ;;  %3932 = vmatprep.subr.bf16.mxu1 %v5314_v59  ;;  %v5401_v58 = vld [vmem:[%s6246_s12 + $0x564] ss:$16 sps:$4 sm:$0xff]   ;;  %v5404_v59 = vld [vmem:[%s6246_s12 + $0x56c] ss:$16 sps:$4 sm:$0xff]  }
  0xcf   : > { %3589 = vmatpush1.bf16.msra.mxu0 %v5309_v60  ;;  %3933 = vmatpush1.bf16.msra.mxu1 %v5312_v61  ;;  %v5399_v60 = vld [vmem:[%s6246_s12 + $0x560] ss:$16 sps:$4 sm:$0xff]   ;;  %v5402_v61 = vld [vmem:[%s6246_s12 + $0x568] ss:$16 sps:$4 sm:$0xff]  }
  0xd0   : > { %3590 = vmatprep.subr.bf16.mxu0 %v5317_v62  ;;  %3934 = vmatprep.subr.bf16.mxu1 %v5320_v63  ;;  %v5407_v62 = vld [vmem:[%s6246_s12 + $0x584] ss:$16 sps:$4 sm:$0xff]   ;;  %v5410_v63 = vld [vmem:[%s6246_s12 + $0x58c] ss:$16 sps:$4 sm:$0xff]  }
  0xd3   : > { %3591 = vmatpush1.bf16.msra.mxu0 %v5315_v0  ;;  %3935 = vmatpush1.bf16.msra.mxu1 %v5318_v1  ;;  %v5405_v0 = vld [vmem:[%s6246_s12 + $0x580] ss:$16 sps:$4 sm:$0xff]   ;;  %v5408_v1 = vld [vmem:[%s6246_s12 + $0x588] ss:$16 sps:$4 sm:$0xff]  }
  0xd4   : > { %3592 = vmatprep.subr.bf16.mxu0 %v5323_v2  ;;  %3936 = vmatprep.subr.bf16.mxu1 %v5326_v3  ;;  %v5413_v2 = vld [vmem:[%s6246_s12 + $0x5a4] ss:$16 sps:$4 sm:$0xff]   ;;  %v5416_v3 = vld [vmem:[%s6246_s12 + $0x5ac] ss:$16 sps:$4 sm:$0xff]  }
  0xd7   : > { %3593 = vmatpush1.bf16.msra.mxu0 %v5321_v4  ;;  %3937 = vmatpush1.bf16.msra.mxu1 %v5324_v5  ;;  %v5411_v4 = vld [vmem:[%s6246_s12 + $0x5a0] ss:$16 sps:$4 sm:$0xff]   ;;  %v5414_v5 = vld [vmem:[%s6246_s12 + $0x5a8] ss:$16 sps:$4 sm:$0xff]  }
  0xd8   : > { %3594 = vmatprep.subr.bf16.mxu0 %v5329_v6  ;;  %3938 = vmatprep.subr.bf16.mxu1 %v5332_v7  ;;  %v5419_v6 = vld [vmem:[%s6246_s12 + $0x5c4] ss:$16 sps:$4 sm:$0xff]   ;;  %v5422_v7 = vld [vmem:[%s6246_s12 + $0x5cc] ss:$16 sps:$4 sm:$0xff]  }
  0xdb   : > { %3595 = vmatpush1.bf16.msra.mxu0 %v5327_v8  ;;  %3939 = vmatpush1.bf16.msra.mxu1 %v5330_v9  ;;  %v5417_v8 = vld [vmem:[%s6246_s12 + $0x5c0] ss:$16 sps:$4 sm:$0xff]   ;;  %v5420_v9 = vld [vmem:[%s6246_s12 + $0x5c8] ss:$16 sps:$4 sm:$0xff]  }
  0xdc   : > { %3607 = vmatprep.subr.bf16.mxu0 %v5335_v10  ;;  %3951 = vmatprep.subr.bf16.mxu1 %v5338_v11  ;;  %v5425_v10 = vld [vmem:[%s6246_s12 + $0x5e4] ss:$16 sps:$4 sm:$0xff]   ;;  %v5428_v11 = vld [vmem:[%s6246_s12 + $0x5ec] ss:$16 sps:$4 sm:$0xff]  }
  0xde   : > { %3597 = vmatmul.mubr.bf16.vlgmr.msra.gmra.mrb[0].mxu0 %v4446_v12  ;;  %3941 = vmatmul.mubr.bf16.vlgmr.msra.gmra.mrb[0].mxu1 %v4446_v12  ;;  %v5423_v12 = vld [vmem:[%s6246_s12 + $0x5e0] ss:$16 sps:$4 sm:$0xff]  }
  0xdf   : > { %3608 = vmatpush1.bf16.msra.mxu0 %v5333_v13  ;;  %3952 = vmatpush1.bf16.msra.mxu1 %v5336_v14  ;;  %v5426_v13 = vld [vmem:[%s6246_s12 + $0x5e8] ss:$16 sps:$4 sm:$0xff]   ;;  %v5431_v14 = vld [vmem:[%s6246_s12 + $0x604] ss:$16 sps:$4 sm:$0xff]  }
  0xe0   : > { %3609 = vmatprep.subr.bf16.mxu0 %v5341_v15  ;;  %3953 = vmatprep.subr.bf16.mxu1 %v5344_v16  ;;  %v5434_v15 = vld [vmem:[%s6246_s12 + $0x60c] ss:$16 sps:$4 sm:$0xff]   ;;  %v5429_v16 = vld [vmem:[%s6246_s12 + $0x600] ss:$16 sps:$4 sm:$0xff]  }
  0xe1   : > { %3639 = vmatprep.mubr.bf16.mxu0 %v4449_v19  ;;  %3983 = vmatprep.mubr.bf16.mxu1 %v4449_v19  ;;  %v5432_v19 = vld [vmem:[%s6246_s12 + $0x608] ss:$16 sps:$4 sm:$0xff]  }
  0xe3   : > { %3610 = vmatpush1.bf16.msra.mxu0 %v5339_v20  ;;  %3954 = vmatpush1.bf16.msra.mxu1 %v5342_v21  ;;  %v4448_v20 = vcombine.low %v6423_v17, %v6426_v18  ;;  %v6495_v21 = vld [vmem:[%s6263_s8 + $0x18] sm:$0xff]  ;;  %v5435_v17 = vld [vmem:[%s6246_s12 + $0x620] ss:$16 sps:$4 sm:$0xff]  }
  0xe4   : > { %3611 = vmatprep.subr.bf16.mxu0 %v5347_v22  ;;  %3955 = vmatprep.subr.bf16.mxu1 %v5350_v23  ;;  %v6498_v22 = vld [vmem:[%s6263_s8 + $0x58] sm:$0xff]  ;;  %v5437_v23 = vld [vmem:[%s6246_s12 + $0x624] ss:$16 sps:$4 sm:$0xff]  }
  0xe5   : > { %v5438_v18 = vld [vmem:[%s6246_s12 + $0x628] ss:$16 sps:$4 sm:$0xff]  }
  0xe7   : > { %3612 = vmatpush1.bf16.msra.mxu0 %v5345_v24  ;;  %3956 = vmatpush1.bf16.msra.mxu1 %v5348_v25  ;;  %v5440_v24 = vld [vmem:[%s6246_s12 + $0x62c] ss:$16 sps:$4 sm:$0xff]   ;;  %v4451_v25 = vcombine.high %v6495_v21, %v6498_v22 }
  0xe8   : > { %3613 = vmatprep.subr.bf16.mxu0 %v5353_v26  ;;  %3957 = vmatprep.subr.bf16.mxu1 %v5356_v27  ;;  %v5443_v26 = vld [vmem:[%s6246_s12 + $0x644] ss:$16 sps:$4 sm:$0xff]   ;;  %v5446_v27 = vld [vmem:[%s6246_s12 + $0x64c] ss:$16 sps:$4 sm:$0xff]  }
  0xeb   : > { %3614 = vmatpush1.bf16.msra.mxu0 %v5351_v28  ;;  %3958 = vmatpush1.bf16.msra.mxu1 %v5354_v29  ;;  %v5441_v28 = vld [vmem:[%s6246_s12 + $0x640] ss:$16 sps:$4 sm:$0xff]   ;;  %v5444_v29 = vld [vmem:[%s6246_s12 + $0x648] ss:$16 sps:$4 sm:$0xff]  }
  0xec   : > { %3615 = vmatprep.subr.bf16.mxu0 %v5359_v30  ;;  %3959 = vmatprep.subr.bf16.mxu1 %v5362_v31  ;;  %v5449_v30 = vld [vmem:[%s6246_s12 + $0x664] ss:$16 sps:$4 sm:$0xff]   ;;  %v5452_v31 = vld [vmem:[%s6246_s12 + $0x66c] ss:$16 sps:$4 sm:$0xff]  }
  0xef   : > { %3616 = vmatpush1.bf16.msra.mxu0 %v5357_v32  ;;  %3960 = vmatpush1.bf16.msra.mxu1 %v5360_v33  ;;  %v5447_v32 = vld [vmem:[%s6246_s12 + $0x660] ss:$16 sps:$4 sm:$0xff]   ;;  %v5450_v33 = vld [vmem:[%s6246_s12 + $0x668] ss:$16 sps:$4 sm:$0xff]  }
  0xf0   : > { %3617 = vmatprep.subr.bf16.mxu0 %v5365_v34  ;;  %3961 = vmatprep.subr.bf16.mxu1 %v5368_v35  ;;  %v5455_v34 = vld [vmem:[%s6246_s12 + $0x684] ss:$16 sps:$4 sm:$0xff]   ;;  %v5458_v35 = vld [vmem:[%s6246_s12 + $0x68c] ss:$16 sps:$4 sm:$0xff]  }
  0xf3   : > { %3618 = vmatpush1.bf16.msra.mxu0 %v5363_v36  ;;  %3962 = vmatpush1.bf16.msra.mxu1 %v5366_v37  ;;  %v5453_v36 = vld [vmem:[%s6246_s12 + $0x680] ss:$16 sps:$4 sm:$0xff]   ;;  %v5456_v37 = vld [vmem:[%s6246_s12 + $0x688] ss:$16 sps:$4 sm:$0xff]  }
  0xf4   : > { %3619 = vmatprep.subr.bf16.mxu0 %v5371_v38  ;;  %3963 = vmatprep.subr.bf16.mxu1 %v5374_v39  ;;  %v5461_v38 = vld [vmem:[%s6246_s12 + $0x6a4] ss:$16 sps:$4 sm:$0xff]   ;;  %v5464_v39 = vld [vmem:[%s6246_s12 + $0x6ac] ss:$16 sps:$4 sm:$0xff]  }
  0xf7   : > { %3620 = vmatpush1.bf16.msra.mxu0 %v5369_v40  ;;  %3964 = vmatpush1.bf16.msra.mxu1 %v5372_v41  ;;  %v5459_v40 = vld [vmem:[%s6246_s12 + $0x6a0] ss:$16 sps:$4 sm:$0xff]   ;;  %v5462_v41 = vld [vmem:[%s6246_s12 + $0x6a8] ss:$16 sps:$4 sm:$0xff]  }
  0xf8   : > { %3621 = vmatprep.subr.bf16.mxu0 %v5377_v42  ;;  %3965 = vmatprep.subr.bf16.mxu1 %v5380_v43  ;;  %v5467_v42 = vld [vmem:[%s6246_s12 + $0x6c4] ss:$16 sps:$4 sm:$0xff]   ;;  %v5470_v43 = vld [vmem:[%s6246_s12 + $0x6cc] ss:$16 sps:$4 sm:$0xff]  }
  0xfb   : > { %3622 = vmatpush1.bf16.msra.mxu0 %v5375_v44  ;;  %3966 = vmatpush1.bf16.msra.mxu1 %v5378_v45  ;;  %v5465_v44 = vld [vmem:[%s6246_s12 + $0x6c0] ss:$16 sps:$4 sm:$0xff]   ;;  %v5468_v45 = vld [vmem:[%s6246_s12 + $0x6c8] ss:$16 sps:$4 sm:$0xff]  }
  0xfc   : > { %3623 = vmatprep.subr.bf16.mxu0 %v5383_v46  ;;  %3967 = vmatprep.subr.bf16.mxu1 %v5386_v47  ;;  %v5473_v46 = vld [vmem:[%s6246_s12 + $0x6e4] ss:$16 sps:$4 sm:$0xff]   ;;  %v5476_v47 = vld [vmem:[%s6246_s12 + $0x6ec] ss:$16 sps:$4 sm:$0xff]  }
  0xff   : > { %3624 = vmatpush1.bf16.msra.mxu0 %v5381_v48  ;;  %3968 = vmatpush1.bf16.msra.mxu1 %v5384_v49  ;;  %v5471_v48 = vld [vmem:[%s6246_s12 + $0x6e0] ss:$16 sps:$4 sm:$0xff]   ;;  %v5474_v49 = vld [vmem:[%s6246_s12 + $0x6e8] ss:$16 sps:$4 sm:$0xff]  }
 0x100   : > { %3625 = vmatprep.subr.bf16.mxu0 %v5389_v50  ;;  %3969 = vmatprep.subr.bf16.mxu1 %v5392_v51  ;;  %v5479_v50 = vld [vmem:[%s6246_s12 + $0x704] ss:$16 sps:$4 sm:$0xff]   ;;  %v5482_v51 = vld [vmem:[%s6246_s12 + $0x70c] ss:$16 sps:$4 sm:$0xff]  }
 0x103   : > { %3626 = vmatpush1.bf16.msra.mxu0 %v5387_v52  ;;  %3970 = vmatpush1.bf16.msra.mxu1 %v5390_v53  ;;  %v5477_v52 = vld [vmem:[%s6246_s12 + $0x700] ss:$16 sps:$4 sm:$0xff]   ;;  %v5480_v53 = vld [vmem:[%s6246_s12 + $0x708] ss:$16 sps:$4 sm:$0xff]  }
 0x104   : > { %3627 = vmatprep.subr.bf16.mxu0 %v5395_v54  ;;  %3971 = vmatprep.subr.bf16.mxu1 %v5398_v55  ;;  %v5485_v54 = vld [vmem:[%s6246_s12 + $0x724] ss:$16 sps:$4 sm:$0xff]   ;;  %v5488_v55 = vld [vmem:[%s6246_s12 + $0x72c] ss:$16 sps:$4 sm:$0xff]  }
 0x107   : > { %3628 = vmatpush1.bf16.msra.mxu0 %v5393_v56  ;;  %3972 = vmatpush1.bf16.msra.mxu1 %v5396_v57  ;;  %v5483_v56 = vld [vmem:[%s6246_s12 + $0x720] ss:$16 sps:$4 sm:$0xff]   ;;  %v5486_v57 = vld [vmem:[%s6246_s12 + $0x728] ss:$16 sps:$4 sm:$0xff]  }
 0x108   : > { %3629 = vmatprep.subr.bf16.mxu0 %v5401_v58  ;;  %3973 = vmatprep.subr.bf16.mxu1 %v5404_v59  ;;  %v5491_v58 = vld [vmem:[%s6246_s12 + $0x744] ss:$16 sps:$4 sm:$0xff]   ;;  %v5494_v59 = vld [vmem:[%s6246_s12 + $0x74c] ss:$16 sps:$4 sm:$0xff]  }
 0x10b   : > { %3630 = vmatpush1.bf16.msra.mxu0 %v5399_v60  ;;  %3974 = vmatpush1.bf16.msra.mxu1 %v5402_v61  ;;  %v5489_v60 = vld [vmem:[%s6246_s12 + $0x740] ss:$16 sps:$4 sm:$0xff]   ;;  %v5492_v61 = vld [vmem:[%s6246_s12 + $0x748] ss:$16 sps:$4 sm:$0xff]  }
 0x10c   : > { %3631 = vmatprep.subr.bf16.mxu0 %v5407_v62  ;;  %3975 = vmatprep.subr.bf16.mxu1 %v5410_v63  ;;  %v5497_v62 = vld [vmem:[%s6246_s12 + $0x764] ss:$16 sps:$4 sm:$0xff]   ;;  %v5500_v63 = vld [vmem:[%s6246_s12 + $0x76c] ss:$16 sps:$4 sm:$0xff]  }
 0x10f   : > { %3632 = vmatpush1.bf16.msra.mxu0 %v5405_v0  ;;  %3976 = vmatpush1.bf16.msra.mxu1 %v5408_v1  ;;  %v5495_v0 = vld [vmem:[%s6246_s12 + $0x760] ss:$16 sps:$4 sm:$0xff]   ;;  %v5498_v1 = vld [vmem:[%s6246_s12 + $0x768] ss:$16 sps:$4 sm:$0xff]  }
 0x110   : > { %3633 = vmatprep.subr.bf16.mxu0 %v5413_v2  ;;  %3977 = vmatprep.subr.bf16.mxu1 %v5416_v3  ;;  %v5503_v2 = vld [vmem:[%s6246_s12 + $0x784] ss:$16 sps:$4 sm:$0xff]   ;;  %v5506_v3 = vld [vmem:[%s6246_s12 + $0x78c] ss:$16 sps:$4 sm:$0xff]  }
 0x113   : > { %3634 = vmatpush1.bf16.msra.mxu0 %v5411_v4  ;;  %3978 = vmatpush1.bf16.msra.mxu1 %v5414_v5  ;;  %v5501_v4 = vld [vmem:[%s6246_s12 + $0x780] ss:$16 sps:$4 sm:$0xff]   ;;  %v5504_v5 = vld [vmem:[%s6246_s12 + $0x788] ss:$16 sps:$4 sm:$0xff]  }
 0x114   : > { %3635 = vmatprep.subr.bf16.mxu0 %v5419_v6  ;;  %3979 = vmatprep.subr.bf16.mxu1 %v5422_v7  ;;  %v5509_v6 = vld [vmem:[%s6246_s12 + $0x7a4] ss:$16 sps:$4 sm:$0xff]   ;;  %v5512_v7 = vld [vmem:[%s6246_s12 + $0x7ac] ss:$16 sps:$4 sm:$0xff]  }
 0x117   : > { %3636 = vmatpush1.bf16.msra.mxu0 %v5417_v8  ;;  %3980 = vmatpush1.bf16.msra.mxu1 %v5420_v9  ;;  %v5507_v8 = vld [vmem:[%s6246_s12 + $0x7a0] ss:$16 sps:$4 sm:$0xff]   ;;  %v5510_v9 = vld [vmem:[%s6246_s12 + $0x7a8] ss:$16 sps:$4 sm:$0xff]  }
 0x118   : > { %3637 = vmatprep.subr.bf16.mxu0 %v5425_v10  ;;  %3981 = vmatprep.subr.bf16.mxu1 %v5428_v11  ;;  %v5515_v10 = vld [vmem:[%s6246_s12 + $0x7c4] ss:$16 sps:$4 sm:$0xff]   ;;  %v5518_v11 = vld [vmem:[%s6246_s12 + $0x7cc] ss:$16 sps:$4 sm:$0xff]  }
 0x11b   : > { %3638 = vmatpush1.bf16.msra.mxu0 %v5423_v12  ;;  %3982 = vmatpush1.bf16.msra.mxu1 %v5426_v13  ;;  %v5513_v12 = vld [vmem:[%s6246_s12 + $0x7c0] ss:$16 sps:$4 sm:$0xff]   ;;  %v5516_v13 = vld [vmem:[%s6246_s12 + $0x7c8] ss:$16 sps:$4 sm:$0xff]  }
 0x11c   : > { %3650 = vmatprep.subr.bf16.mxu0 %v5431_v14  ;;  %3994 = vmatprep.subr.bf16.mxu1 %v5434_v15  ;;  %v5521_v14 = vld [vmem:[%s6246_s12 + $0x7e4] ss:$16 sps:$4 sm:$0xff]   ;;  %v5524_v15 = vld [vmem:[%s6246_s12 + $0x7ec] ss:$16 sps:$4 sm:$0xff]  }
 0x11e   : > { %3640 = vmatmul.mubr.bf16.vlgmr.msra.gmra.mrb[0].mxu0 %v4448_v20  ;;  %3984 = vmatmul.mubr.bf16.vlgmr.msra.gmra.mrb[0].mxu1 %v4448_v20  ;;  %v5527_v20 = vld [vmem:[%s6246_s12 + $0x804] ss:$16 sps:$4 sm:$0xff]  }
 0x11f   : > { %3651 = vmatpush1.bf16.msra.mxu0 %v5429_v16  ;;  %3995 = vmatpush1.bf16.msra.mxu1 %v5432_v19  ;;  %v5519_v16 = vld [vmem:[%s6246_s12 + $0x7e0] ss:$16 sps:$4 sm:$0xff]   ;;  %v5522_v19 = vld [vmem:[%s6246_s12 + $0x7e8] ss:$16 sps:$4 sm:$0xff]  }
 0x120   : > { %3652 = vmatprep.subr.bf16.mxu0 %v5437_v23  ;;  %3996 = vmatprep.subr.bf16.mxu1 %v5440_v24  ;;  %v5530_v23 = vld [vmem:[%s6246_s12 + $0x80c] ss:$16 sps:$4 sm:$0xff]   ;;  %v6565_v24 = vld [vmem:[%s6263_s8 + $0x20] sm:$0xff] }
 0x121   : > { %3682 = vmatprep.mubr.bf16.mxu0 %v4451_v25  ;;  %4026 = vmatprep.mubr.bf16.mxu1 %v4451_v25  ;;  %v4450_v25 = vcombine.low %v6495_v21, %v6498_v22  ;;  %v5531_v21 = vld [vmem:[%s6246_s12 + $0x820] ss:$16 sps:$4 sm:$0xff]   ;;  %v5534_v22 = vld [vmem:[%s6246_s12 + $0x828] ss:$16 sps:$4 sm:$0xff]  }
 0x123   : > { %3653 = vmatpush1.bf16.msra.mxu0 %v5435_v17  ;;  %3997 = vmatpush1.bf16.msra.mxu1 %v5438_v18  ;;  %v6570_v17 = vld [vmem:[%s6263_s8 + $0x60] sm:$0xff] }
 0x124   : > { %3654 = vmatprep.subr.bf16.mxu0 %v5443_v26  ;;  %3998 = vmatprep.subr.bf16.mxu1 %v5446_v27  ;;  %v5525_v18 = vld [vmem:[%s6246_s12 + $0x800] ss:$16 sps:$4 sm:$0xff]   ;;  %v5528_v26 = vld [vmem:[%s6246_s12 + $0x808] ss:$16 sps:$4 sm:$0xff]   ;;  %v5533_v27 = vld [vmem:[%s6246_s12 + $0x824] ss:$16 sps:$4 sm:$0xff]  }
 0x127   : > { %3655 = vmatpush1.bf16.msra.mxu0 %v5441_v28  ;;  %3999 = vmatpush1.bf16.msra.mxu1 %v5444_v29  ;;  %v5536_v28 = vld [vmem:[%s6246_s12 + $0x82c] ss:$16 sps:$4 sm:$0xff]   ;;  %v4453_v29 = vcombine.high %v6565_v24, %v6570_v17 }
 0x128   : > { %3656 = vmatprep.subr.bf16.mxu0 %v5449_v30  ;;  %4000 = vmatprep.subr.bf16.mxu1 %v5452_v31  ;;  %v5539_v30 = vld [vmem:[%s6246_s12 + $0x844] ss:$16 sps:$4 sm:$0xff]   ;;  %v5542_v31 = vld [vmem:[%s6246_s12 + $0x84c] ss:$16 sps:$4 sm:$0xff]  }
 0x12b   : > { %3657 = vmatpush1.bf16.msra.mxu0 %v5447_v32  ;;  %4001 = vmatpush1.bf16.msra.mxu1 %v5450_v33  ;;  %v5537_v32 = vld [vmem:[%s6246_s12 + $0x840] ss:$16 sps:$4 sm:$0xff]   ;;  %v5540_v33 = vld [vmem:[%s6246_s12 + $0x848] ss:$16 sps:$4 sm:$0xff]  }
 0x12c   : > { %3658 = vmatprep.subr.bf16.mxu0 %v5455_v34  ;;  %4002 = vmatprep.subr.bf16.mxu1 %v5458_v35  ;;  %v5545_v34 = vld [vmem:[%s6246_s12 + $0x864] ss:$16 sps:$4 sm:$0xff]   ;;  %v5548_v35 = vld [vmem:[%s6246_s12 + $0x86c] ss:$16 sps:$4 sm:$0xff]  }
 0x12f   : > { %3659 = vmatpush1.bf16.msra.mxu0 %v5453_v36  ;;  %4003 = vmatpush1.bf16.msra.mxu1 %v5456_v37  ;;  %v5543_v36 = vld [vmem:[%s6246_s12 + $0x860] ss:$16 sps:$4 sm:$0xff]   ;;  %v5546_v37 = vld [vmem:[%s6246_s12 + $0x868] ss:$16 sps:$4 sm:$0xff]  }
 0x130   : > { %3660 = vmatprep.subr.bf16.mxu0 %v5461_v38  ;;  %4004 = vmatprep.subr.bf16.mxu1 %v5464_v39  ;;  %v5551_v38 = vld [vmem:[%s6246_s12 + $0x884] ss:$16 sps:$4 sm:$0xff]   ;;  %v5554_v39 = vld [vmem:[%s6246_s12 + $0x88c] ss:$16 sps:$4 sm:$0xff]  }
 0x133   : > { %3661 = vmatpush1.bf16.msra.mxu0 %v5459_v40  ;;  %4005 = vmatpush1.bf16.msra.mxu1 %v5462_v41  ;;  %v5549_v40 = vld [vmem:[%s6246_s12 + $0x880] ss:$16 sps:$4 sm:$0xff]   ;;  %v5552_v41 = vld [vmem:[%s6246_s12 + $0x888] ss:$16 sps:$4 sm:$0xff]  }
 0x134   : > { %3662 = vmatprep.subr.bf16.mxu0 %v5467_v42  ;;  %4006 = vmatprep.subr.bf16.mxu1 %v5470_v43  ;;  %v5557_v42 = vld [vmem:[%s6246_s12 + $0x8a4] ss:$16 sps:$4 sm:$0xff]   ;;  %v5560_v43 = vld [vmem:[%s6246_s12 + $0x8ac] ss:$16 sps:$4 sm:$0xff]  }
 0x137   : > { %3663 = vmatpush1.bf16.msra.mxu0 %v5465_v44  ;;  %4007 = vmatpush1.bf16.msra.mxu1 %v5468_v45  ;;  %v5555_v44 = vld [vmem:[%s6246_s12 + $0x8a0] ss:$16 sps:$4 sm:$0xff]   ;;  %v5558_v45 = vld [vmem:[%s6246_s12 + $0x8a8] ss:$16 sps:$4 sm:$0xff]  }
 0x138   : > { %3664 = vmatprep.subr.bf16.mxu0 %v5473_v46  ;;  %4008 = vmatprep.subr.bf16.mxu1 %v5476_v47  ;;  %v5563_v46 = vld [vmem:[%s6246_s12 + $0x8c4] ss:$16 sps:$4 sm:$0xff]   ;;  %v5566_v47 = vld [vmem:[%s6246_s12 + $0x8cc] ss:$16 sps:$4 sm:$0xff]  }
 0x13b   : > { %3665 = vmatpush1.bf16.msra.mxu0 %v5471_v48  ;;  %4009 = vmatpush1.bf16.msra.mxu1 %v5474_v49  ;;  %v5561_v48 = vld [vmem:[%s6246_s12 + $0x8c0] ss:$16 sps:$4 sm:$0xff]   ;;  %v5564_v49 = vld [vmem:[%s6246_s12 + $0x8c8] ss:$16 sps:$4 sm:$0xff]  }
 0x13c   : > { %3666 = vmatprep.subr.bf16.mxu0 %v5479_v50  ;;  %4010 = vmatprep.subr.bf16.mxu1 %v5482_v51  ;;  %v5569_v50 = vld [vmem:[%s6246_s12 + $0x8e4] ss:$16 sps:$4 sm:$0xff]   ;;  %v5572_v51 = vld [vmem:[%s6246_s12 + $0x8ec] ss:$16 sps:$4 sm:$0xff]  }
 0x13f   : > { %3667 = vmatpush1.bf16.msra.mxu0 %v5477_v52  ;;  %4011 = vmatpush1.bf16.msra.mxu1 %v5480_v53  ;;  %v5567_v52 = vld [vmem:[%s6246_s12 + $0x8e0] ss:$16 sps:$4 sm:$0xff]   ;;  %v5570_v53 = vld [vmem:[%s6246_s12 + $0x8e8] ss:$16 sps:$4 sm:$0xff]  }
 0x140   : > { %3668 = vmatprep.subr.bf16.mxu0 %v5485_v54  ;;  %4012 = vmatprep.subr.bf16.mxu1 %v5488_v55  ;;  %v5575_v54 = vld [vmem:[%s6246_s12 + $0x904] ss:$16 sps:$4 sm:$0xff]   ;;  %v5578_v55 = vld [vmem:[%s6246_s12 + $0x90c] ss:$16 sps:$4 sm:$0xff]  }
 0x143   : > { %3669 = vmatpush1.bf16.msra.mxu0 %v5483_v56  ;;  %4013 = vmatpush1.bf16.msra.mxu1 %v5486_v57  ;;  %v5573_v56 = vld [vmem:[%s6246_s12 + $0x900] ss:$16 sps:$4 sm:$0xff]   ;;  %v5576_v57 = vld [vmem:[%s6246_s12 + $0x908] ss:$16 sps:$4 sm:$0xff]  }
 0x144   : > { %3670 = vmatprep.subr.bf16.mxu0 %v5491_v58  ;;  %4014 = vmatprep.subr.bf16.mxu1 %v5494_v59  ;;  %v5581_v58 = vld [vmem:[%s6246_s12 + $0x924] ss:$16 sps:$4 sm:$0xff]   ;;  %v5584_v59 = vld [vmem:[%s6246_s12 + $0x92c] ss:$16 sps:$4 sm:$0xff]  }
 0x147   : > { %3671 = vmatpush1.bf16.msra.mxu0 %v5489_v60  ;;  %4015 = vmatpush1.bf16.msra.mxu1 %v5492_v61  ;;  %v5579_v60 = vld [vmem:[%s6246_s12 + $0x920] ss:$16 sps:$4 sm:$0xff]   ;;  %v5582_v61 = vld [vmem:[%s6246_s12 + $0x928] ss:$16 sps:$4 sm:$0xff]  }
 0x148   : > { %3672 = vmatprep.subr.bf16.mxu0 %v5497_v62  ;;  %4016 = vmatprep.subr.bf16.mxu1 %v5500_v63  ;;  %v5587_v62 = vld [vmem:[%s6246_s12 + $0x944] ss:$16 sps:$4 sm:$0xff]   ;;  %v5590_v63 = vld [vmem:[%s6246_s12 + $0x94c] ss:$16 sps:$4 sm:$0xff]  }
 0x14b   : > { %3673 = vmatpush1.bf16.msra.mxu0 %v5495_v0  ;;  %4017 = vmatpush1.bf16.msra.mxu1 %v5498_v1  ;;  %v5585_v0 = vld [vmem:[%s6246_s12 + $0x940] ss:$16 sps:$4 sm:$0xff]   ;;  %v5588_v1 = vld [vmem:[%s6246_s12 + $0x948] ss:$16 sps:$4 sm:$0xff]  }
 0x14c   : > { %3674 = vmatprep.subr.bf16.mxu0 %v5503_v2  ;;  %4018 = vmatprep.subr.bf16.mxu1 %v5506_v3  ;;  %v5593_v2 = vld [vmem:[%s6246_s12 + $0x964] ss:$16 sps:$4 sm:$0xff]   ;;  %v5596_v3 = vld [vmem:[%s6246_s12 + $0x96c] ss:$16 sps:$4 sm:$0xff]  }
 0x14f   : > { %3675 = vmatpush1.bf16.msra.mxu0 %v5501_v4  ;;  %4019 = vmatpush1.bf16.msra.mxu1 %v5504_v5  ;;  %v5591_v4 = vld [vmem:[%s6246_s12 + $0x960] ss:$16 sps:$4 sm:$0xff]   ;;  %v5594_v5 = vld [vmem:[%s6246_s12 + $0x968] ss:$16 sps:$4 sm:$0xff]  }
 0x150   : > { %3676 = vmatprep.subr.bf16.mxu0 %v5509_v6  ;;  %4020 = vmatprep.subr.bf16.mxu1 %v5512_v7  ;;  %v5599_v6 = vld [vmem:[%s6246_s12 + $0x984] ss:$16 sps:$4 sm:$0xff]   ;;  %v5602_v7 = vld [vmem:[%s6246_s12 + $0x98c] ss:$16 sps:$4 sm:$0xff]  }
 0x153   : > { %3677 = vmatpush1.bf16.msra.mxu0 %v5507_v8  ;;  %4021 = vmatpush1.bf16.msra.mxu1 %v5510_v9  ;;  %v5597_v8 = vld [vmem:[%s6246_s12 + $0x980] ss:$16 sps:$4 sm:$0xff]   ;;  %v5600_v9 = vld [vmem:[%s6246_s12 + $0x988] ss:$16 sps:$4 sm:$0xff]  }
 0x154   : > { %3678 = vmatprep.subr.bf16.mxu0 %v5515_v10  ;;  %4022 = vmatprep.subr.bf16.mxu1 %v5518_v11  ;;  %v5605_v10 = vld [vmem:[%s6246_s12 + $0x9a4] ss:$16 sps:$4 sm:$0xff]   ;;  %v5608_v11 = vld [vmem:[%s6246_s12 + $0x9ac] ss:$16 sps:$4 sm:$0xff]  }
 0x157   : > { %3679 = vmatpush1.bf16.msra.mxu0 %v5513_v12  ;;  %4023 = vmatpush1.bf16.msra.mxu1 %v5516_v13  ;;  %v5603_v12 = vld [vmem:[%s6246_s12 + $0x9a0] ss:$16 sps:$4 sm:$0xff]   ;;  %v5606_v13 = vld [vmem:[%s6246_s12 + $0x9a8] ss:$16 sps:$4 sm:$0xff]  }
 0x158   : > { %3680 = vmatprep.subr.bf16.mxu0 %v5521_v14  ;;  %4024 = vmatprep.subr.bf16.mxu1 %v5524_v15  ;;  %v5611_v14 = vld [vmem:[%s6246_s12 + $0x9c4] ss:$16 sps:$4 sm:$0xff]   ;;  %v5614_v15 = vld [vmem:[%s6246_s12 + $0x9cc] ss:$16 sps:$4 sm:$0xff]  }
 0x15b   : > { %3681 = vmatpush1.bf16.msra.mxu0 %v5519_v16  ;;  %4025 = vmatpush1.bf16.msra.mxu1 %v5522_v19  ;;  %v5609_v16 = vld [vmem:[%s6246_s12 + $0x9c0] ss:$16 sps:$4 sm:$0xff]   ;;  %v5612_v19 = vld [vmem:[%s6246_s12 + $0x9c8] ss:$16 sps:$4 sm:$0xff]  }
 0x15c   : > { %3693 = vmatprep.subr.bf16.mxu0 %v5527_v20  ;;  %4037 = vmatprep.subr.bf16.mxu1 %v5530_v23  ;;  %v5617_v20 = vld [vmem:[%s6246_s12 + $0x9e4] ss:$16 sps:$4 sm:$0xff]   ;;  %v5620_v23 = vld [vmem:[%s6246_s12 + $0x9ec] ss:$16 sps:$4 sm:$0xff]  }
 0x15e   : > { %3683 = vmatmul.mubr.bf16.vlgmr.msra.gmra.mrb[0].mxu0 %v4450_v25  ;;  %4027 = vmatmul.mubr.bf16.vlgmr.msra.gmra.mrb[0].mxu1 %v4450_v25  ;;  %v5615_v25 = vld [vmem:[%s6246_s12 + $0x9e0] ss:$16 sps:$4 sm:$0xff]  }
 0x15f   : > { %3694 = vmatpush1.bf16.msra.mxu0 %v5525_v18  ;;  %4038 = vmatpush1.bf16.msra.mxu1 %v5528_v26  ;;  %v5618_v18 = vld [vmem:[%s6246_s12 + $0x9e8] ss:$16 sps:$4 sm:$0xff]   ;;  %v5623_v26 = vld [vmem:[%s6246_s12 + $0xa04] ss:$16 sps:$4 sm:$0xff]  }
 0x160   : > { %3695 = vmatprep.subr.bf16.mxu0 %v5533_v27  ;;  %4039 = vmatprep.subr.bf16.mxu1 %v5536_v28  ;;  %v5626_v27 = vld [vmem:[%s6246_s12 + $0xa0c] ss:$16 sps:$4 sm:$0xff]  }
 0x161   : > { %3725 = vmatprep.mubr.bf16.mxu0 %v4453_v29  ;;  %4069 = vmatprep.mubr.bf16.mxu1 %v4453_v29  ;;  %v6639_v28 = vld [vmem:[%s6263_s8 + $0x28] sm:$0xff] }
 0x162   : > { %v6642_v29 = vld [vmem:[%s6263_s8 + $0x68] sm:$0xff] }
 0x163   : > { %3696 = vmatpush1.bf16.msra.mxu0 %v5531_v21  ;;  %4040 = vmatpush1.bf16.msra.mxu1 %v5534_v22  ;;  %v4452_v21 = vcombine.low %v6565_v24, %v6570_v17  ;;  %v5621_v22 = vld [vmem:[%s6246_s12 + $0xa00] ss:$16 sps:$4 sm:$0xff]   ;;  %v5630_v17 = vld [vmem:[%s6246_s12 + $0xa28] ss:$16 sps:$4 sm:$0xff]  }
 0x164   : > { %3697 = vmatprep.subr.bf16.mxu0 %v5539_v30  ;;  %4041 = vmatprep.subr.bf16.mxu1 %v5542_v31  ;;  %v5624_v30 = vld [vmem:[%s6246_s12 + $0xa08] ss:$16 sps:$4 sm:$0xff]   ;;  %v5629_v31 = vld [vmem:[%s6246_s12 + $0xa24] ss:$16 sps:$4 sm:$0xff]   ;;  %v5627_v24 = vld [vmem:[%s6246_s12 + $0xa20] ss:$16 sps:$4 sm:$0xff]  }
 0x167   : > { %3698 = vmatpush1.bf16.msra.mxu0 %v5537_v32  ;;  %4042 = vmatpush1.bf16.msra.mxu1 %v5540_v33  ;;  %v5632_v32 = vld [vmem:[%s6246_s12 + $0xa2c] ss:$16 sps:$4 sm:$0xff]   ;;  %v4455_v33 = vcombine.high %v6639_v28, %v6642_v29 }
 0x168   : > { %3699 = vmatprep.subr.bf16.mxu0 %v5545_v34  ;;  %4043 = vmatprep.subr.bf16.mxu1 %v5548_v35  ;;  %v5635_v34 = vld [vmem:[%s6246_s12 + $0xa44] ss:$16 sps:$4 sm:$0xff]   ;;  %v5638_v35 = vld [vmem:[%s6246_s12 + $0xa4c] ss:$16 sps:$4 sm:$0xff]  }
 0x16b   : > { %3700 = vmatpush1.bf16.msra.mxu0 %v5543_v36  ;;  %4044 = vmatpush1.bf16.msra.mxu1 %v5546_v37  ;;  %v5633_v36 = vld [vmem:[%s6246_s12 + $0xa40] ss:$16 sps:$4 sm:$0xff]   ;;  %v5636_v37 = vld [vmem:[%s6246_s12 + $0xa48] ss:$16 sps:$4 sm:$0xff]  }
 0x16c   : > { %3701 = vmatprep.subr.bf16.mxu0 %v5551_v38  ;;  %4045 = vmatprep.subr.bf16.mxu1 %v5554_v39  ;;  %v5641_v38 = vld [vmem:[%s6246_s12 + $0xa64] ss:$16 sps:$4 sm:$0xff]   ;;  %v5644_v39 = vld [vmem:[%s6246_s12 + $0xa6c] ss:$16 sps:$4 sm:$0xff]  }
 0x16f   : > { %3702 = vmatpush1.bf16.msra.mxu0 %v5549_v40  ;;  %4046 = vmatpush1.bf16.msra.mxu1 %v5552_v41  ;;  %v5639_v40 = vld [vmem:[%s6246_s12 + $0xa60] ss:$16 sps:$4 sm:$0xff]   ;;  %v5642_v41 = vld [vmem:[%s6246_s12 + $0xa68] ss:$16 sps:$4 sm:$0xff]  }
 0x170   : > { %3703 = vmatprep.subr.bf16.mxu0 %v5557_v42  ;;  %4047 = vmatprep.subr.bf16.mxu1 %v5560_v43  ;;  %v5647_v42 = vld [vmem:[%s6246_s12 + $0xa84] ss:$16 sps:$4 sm:$0xff]   ;;  %v5650_v43 = vld [vmem:[%s6246_s12 + $0xa8c] ss:$16 sps:$4 sm:$0xff]  }
 0x173   : > { %3704 = vmatpush1.bf16.msra.mxu0 %v5555_v44  ;;  %4048 = vmatpush1.bf16.msra.mxu1 %v5558_v45  ;;  %v5645_v44 = vld [vmem:[%s6246_s12 + $0xa80] ss:$16 sps:$4 sm:$0xff]   ;;  %v5648_v45 = vld [vmem:[%s6246_s12 + $0xa88] ss:$16 sps:$4 sm:$0xff]  }
 0x174   : > { %3705 = vmatprep.subr.bf16.mxu0 %v5563_v46  ;;  %4049 = vmatprep.subr.bf16.mxu1 %v5566_v47  ;;  %v5653_v46 = vld [vmem:[%s6246_s12 + $0xaa4] ss:$16 sps:$4 sm:$0xff]   ;;  %v5656_v47 = vld [vmem:[%s6246_s12 + $0xaac] ss:$16 sps:$4 sm:$0xff]  }
 0x177   : > { %3706 = vmatpush1.bf16.msra.mxu0 %v5561_v48  ;;  %4050 = vmatpush1.bf16.msra.mxu1 %v5564_v49  ;;  %v5651_v48 = vld [vmem:[%s6246_s12 + $0xaa0] ss:$16 sps:$4 sm:$0xff]   ;;  %v5654_v49 = vld [vmem:[%s6246_s12 + $0xaa8] ss:$16 sps:$4 sm:$0xff]  }
 0x178   : > { %3707 = vmatprep.subr.bf16.mxu0 %v5569_v50  ;;  %4051 = vmatprep.subr.bf16.mxu1 %v5572_v51  ;;  %v5659_v50 = vld [vmem:[%s6246_s12 + $0xac4] ss:$16 sps:$4 sm:$0xff]   ;;  %v5662_v51 = vld [vmem:[%s6246_s12 + $0xacc] ss:$16 sps:$4 sm:$0xff]  }
 0x17b   : > { %3708 = vmatpush1.bf16.msra.mxu0 %v5567_v52  ;;  %4052 = vmatpush1.bf16.msra.mxu1 %v5570_v53  ;;  %v5657_v52 = vld [vmem:[%s6246_s12 + $0xac0] ss:$16 sps:$4 sm:$0xff]   ;;  %v5660_v53 = vld [vmem:[%s6246_s12 + $0xac8] ss:$16 sps:$4 sm:$0xff]  }
 0x17c   : > { %3709 = vmatprep.subr.bf16.mxu0 %v5575_v54  ;;  %4053 = vmatprep.subr.bf16.mxu1 %v5578_v55  ;;  %v5665_v54 = vld [vmem:[%s6246_s12 + $0xae4] ss:$16 sps:$4 sm:$0xff]   ;;  %v5668_v55 = vld [vmem:[%s6246_s12 + $0xaec] ss:$16 sps:$4 sm:$0xff]  }
 0x17f   : > { %3710 = vmatpush1.bf16.msra.mxu0 %v5573_v56  ;;  %4054 = vmatpush1.bf16.msra.mxu1 %v5576_v57  ;;  %v5663_v56 = vld [vmem:[%s6246_s12 + $0xae0] ss:$16 sps:$4 sm:$0xff]   ;;  %v5666_v57 = vld [vmem:[%s6246_s12 + $0xae8] ss:$16 sps:$4 sm:$0xff]  }
 0x180   : > { %3711 = vmatprep.subr.bf16.mxu0 %v5581_v58  ;;  %4055 = vmatprep.subr.bf16.mxu1 %v5584_v59  ;;  %v5671_v58 = vld [vmem:[%s6246_s12 + $0xb04] ss:$16 sps:$4 sm:$0xff]   ;;  %v5674_v59 = vld [vmem:[%s6246_s12 + $0xb0c] ss:$16 sps:$4 sm:$0xff]  }
 0x183   : > { %3712 = vmatpush1.bf16.msra.mxu0 %v5579_v60  ;;  %4056 = vmatpush1.bf16.msra.mxu1 %v5582_v61  ;;  %v5669_v60 = vld [vmem:[%s6246_s12 + $0xb00] ss:$16 sps:$4 sm:$0xff]   ;;  %v5672_v61 = vld [vmem:[%s6246_s12 + $0xb08] ss:$16 sps:$4 sm:$0xff]  }
 0x184   : > { %3713 = vmatprep.subr.bf16.mxu0 %v5587_v62  ;;  %4057 = vmatprep.subr.bf16.mxu1 %v5590_v63  ;;  %v5677_v62 = vld [vmem:[%s6246_s12 + $0xb24] ss:$16 sps:$4 sm:$0xff]   ;;  %v5680_v63 = vld [vmem:[%s6246_s12 + $0xb2c] ss:$16 sps:$4 sm:$0xff]  }
 0x187   : > { %3714 = vmatpush1.bf16.msra.mxu0 %v5585_v0  ;;  %4058 = vmatpush1.bf16.msra.mxu1 %v5588_v1  ;;  %v5675_v0 = vld [vmem:[%s6246_s12 + $0xb20] ss:$16 sps:$4 sm:$0xff]   ;;  %v5678_v1 = vld [vmem:[%s6246_s12 + $0xb28] ss:$16 sps:$4 sm:$0xff]  }
 0x188   : > { %3715 = vmatprep.subr.bf16.mxu0 %v5593_v2  ;;  %4059 = vmatprep.subr.bf16.mxu1 %v5596_v3  ;;  %v5683_v2 = vld [vmem:[%s6246_s12 + $0xb44] ss:$16 sps:$4 sm:$0xff]   ;;  %v5686_v3 = vld [vmem:[%s6246_s12 + $0xb4c] ss:$16 sps:$4 sm:$0xff]  }
 0x18b   : > { %3716 = vmatpush1.bf16.msra.mxu0 %v5591_v4  ;;  %4060 = vmatpush1.bf16.msra.mxu1 %v5594_v5  ;;  %v5681_v4 = vld [vmem:[%s6246_s12 + $0xb40] ss:$16 sps:$4 sm:$0xff]   ;;  %v5684_v5 = vld [vmem:[%s6246_s12 + $0xb48] ss:$16 sps:$4 sm:$0xff]  }
 0x18c   : > { %3717 = vmatprep.subr.bf16.mxu0 %v5599_v6  ;;  %4061 = vmatprep.subr.bf16.mxu1 %v5602_v7  ;;  %v5689_v6 = vld [vmem:[%s6246_s12 + $0xb64] ss:$16 sps:$4 sm:$0xff]   ;;  %v5692_v7 = vld [vmem:[%s6246_s12 + $0xb6c] ss:$16 sps:$4 sm:$0xff]  }
 0x18f   : > { %3718 = vmatpush1.bf16.msra.mxu0 %v5597_v8  ;;  %4062 = vmatpush1.bf16.msra.mxu1 %v5600_v9  ;;  %v5687_v8 = vld [vmem:[%s6246_s12 + $0xb60] ss:$16 sps:$4 sm:$0xff]   ;;  %v5690_v9 = vld [vmem:[%s6246_s12 + $0xb68] ss:$16 sps:$4 sm:$0xff]  }
 0x190   : > { %3719 = vmatprep.subr.bf16.mxu0 %v5605_v10  ;;  %4063 = vmatprep.subr.bf16.mxu1 %v5608_v11  ;;  %v5695_v10 = vld [vmem:[%s6246_s12 + $0xb84] ss:$16 sps:$4 sm:$0xff]   ;;  %v5698_v11 = vld [vmem:[%s6246_s12 + $0xb8c] ss:$16 sps:$4 sm:$0xff]  }
 0x193   : > { %3720 = vmatpush1.bf16.msra.mxu0 %v5603_v12  ;;  %4064 = vmatpush1.bf16.msra.mxu1 %v5606_v13  ;;  %v5693_v12 = vld [vmem:[%s6246_s12 + $0xb80] ss:$16 sps:$4 sm:$0xff]   ;;  %v5696_v13 = vld [vmem:[%s6246_s12 + $0xb88] ss:$16 sps:$4 sm:$0xff]  }
 0x194   : > { %3721 = vmatprep.subr.bf16.mxu0 %v5611_v14  ;;  %4065 = vmatprep.subr.bf16.mxu1 %v5614_v15  ;;  %v5701_v14 = vld [vmem:[%s6246_s12 + $0xba4] ss:$16 sps:$4 sm:$0xff]   ;;  %v5704_v15 = vld [vmem:[%s6246_s12 + $0xbac] ss:$16 sps:$4 sm:$0xff]  }
 0x197   : > { %3722 = vmatpush1.bf16.msra.mxu0 %v5609_v16  ;;  %4066 = vmatpush1.bf16.msra.mxu1 %v5612_v19  ;;  %v5699_v16 = vld [vmem:[%s6246_s12 + $0xba0] ss:$16 sps:$4 sm:$0xff]   ;;  %v5702_v19 = vld [vmem:[%s6246_s12 + $0xba8] ss:$16 sps:$4 sm:$0xff]  }
 0x198   : > { %3723 = vmatprep.subr.bf16.mxu0 %v5617_v20  ;;  %4067 = vmatprep.subr.bf16.mxu1 %v5620_v23  ;;  %v5707_v20 = vld [vmem:[%s6246_s12 + $0xbc4] ss:$16 sps:$4 sm:$0xff]   ;;  %v5710_v23 = vld [vmem:[%s6246_s12 + $0xbcc] ss:$16 sps:$4 sm:$0xff]  }
 0x19b   : > { %3724 = vmatpush1.bf16.msra.mxu0 %v5615_v25  ;;  %4068 = vmatpush1.bf16.msra.mxu1 %v5618_v18  ;;  %v5705_v25 = vld [vmem:[%s6246_s12 + $0xbc0] ss:$16 sps:$4 sm:$0xff]   ;;  %v5708_v18 = vld [vmem:[%s6246_s12 + $0xbc8] ss:$16 sps:$4 sm:$0xff]  }
 0x19c   : > { %3736 = vmatprep.subr.bf16.mxu0 %v5623_v26  ;;  %4080 = vmatprep.subr.bf16.mxu1 %v5626_v27  ;;  %v5713_v26 = vld [vmem:[%s6246_s12 + $0xbe4] ss:$16 sps:$4 sm:$0xff]   ;;  %v5716_v27 = vld [vmem:[%s6246_s12 + $0xbec] ss:$16 sps:$4 sm:$0xff]  }
 0x19e   : > { %3726 = vmatmul.mubr.bf16.vlgmr.msra.gmra.mrb[0].mxu0 %v4452_v21  ;;  %4070 = vmatmul.mubr.bf16.vlgmr.msra.gmra.mrb[0].mxu1 %v4452_v21  ;;  %v5711_v21 = vld [vmem:[%s6246_s12 + $0xbe0] ss:$16 sps:$4 sm:$0xff]  }
 0x19f   : > { %3737 = vmatpush1.bf16.msra.mxu0 %v5621_v22  ;;  %4081 = vmatpush1.bf16.msra.mxu1 %v5624_v30  ;;  %v5714_v22 = vld [vmem:[%s6246_s12 + $0xbe8] ss:$16 sps:$4 sm:$0xff]   ;;  %v5719_v30 = vld [vmem:[%s6246_s12 + $0xc04] ss:$16 sps:$4 sm:$0xff]  }
 0x1a0   : > { %3738 = vmatprep.subr.bf16.mxu0 %v5629_v31  ;;  %4082 = vmatprep.subr.bf16.mxu1 %v5632_v32  ;;  %v5722_v31 = vld [vmem:[%s6246_s12 + $0xc0c] ss:$16 sps:$4 sm:$0xff]   ;;  %v4454_v32 = vcombine.low %v6639_v28, %v6642_v29  ;;  %v5723_v29 = vld [vmem:[%s6246_s12 + $0xc20] ss:$16 sps:$4 sm:$0xff]  }
 0x1a1   : > { %3768 = vmatprep.mubr.bf16.mxu0 %v4455_v33  ;;  %4112 = vmatprep.mubr.bf16.mxu1 %v4455_v33  ;;  %v6715_v33 = vld [vmem:[%s6263_s8 + $0x30] sm:$0xff] }
 0x1a3   : > { %3739 = vmatpush1.bf16.msra.mxu0 %v5627_v24  ;;  %4083 = vmatpush1.bf16.msra.mxu1 %v5630_v17  ;;  %v6718_v24 = vld [vmem:[%s6263_s8 + $0x70] sm:$0xff] }
 0x1a4   : > { %3740 = vmatprep.subr.bf16.mxu0 %v5635_v34  ;;  %4084 = vmatprep.subr.bf16.mxu1 %v5638_v35  ;;  %v5717_v17 = vld [vmem:[%s6246_s12 + $0xc00] ss:$16 sps:$4 sm:$0xff]   ;;  %v5720_v34 = vld [vmem:[%s6246_s12 + $0xc08] ss:$16 sps:$4 sm:$0xff]   ;;  %v5725_v35 = vld [vmem:[%s6246_s12 + $0xc24] ss:$16 sps:$4 sm:$0xff]   ;;  %v4457_v28 = vcombine.high %v6715_v33, %v6718_v24 }
 0x1a7   : > { %3741 = vmatpush1.bf16.msra.mxu0 %v5633_v36  ;;  %4085 = vmatpush1.bf16.msra.mxu1 %v5636_v37  ;;  %v5728_v36 = vld [vmem:[%s6246_s12 + $0xc2c] ss:$16 sps:$4 sm:$0xff]   ;;  %v5726_v37 = vld [vmem:[%s6246_s12 + $0xc28] ss:$16 sps:$4 sm:$0xff]  }
 0x1a8   : > { %3742 = vmatprep.subr.bf16.mxu0 %v5641_v38  ;;  %4086 = vmatprep.subr.bf16.mxu1 %v5644_v39  ;;  %v5731_v38 = vld [vmem:[%s6246_s12 + $0xc44] ss:$16 sps:$4 sm:$0xff]   ;;  %v5734_v39 = vld [vmem:[%s6246_s12 + $0xc4c] ss:$16 sps:$4 sm:$0xff]  }
 0x1ab   : > { %3743 = vmatpush1.bf16.msra.mxu0 %v5639_v40  ;;  %4087 = vmatpush1.bf16.msra.mxu1 %v5642_v41  ;;  %v5729_v40 = vld [vmem:[%s6246_s12 + $0xc40] ss:$16 sps:$4 sm:$0xff]   ;;  %v5732_v41 = vld [vmem:[%s6246_s12 + $0xc48] ss:$16 sps:$4 sm:$0xff]  }
 0x1ac   : > { %3744 = vmatprep.subr.bf16.mxu0 %v5647_v42  ;;  %4088 = vmatprep.subr.bf16.mxu1 %v5650_v43  ;;  %v5737_v42 = vld [vmem:[%s6246_s12 + $0xc64] ss:$16 sps:$4 sm:$0xff]   ;;  %v5740_v43 = vld [vmem:[%s6246_s12 + $0xc6c] ss:$16 sps:$4 sm:$0xff]  }
 0x1af   : > { %3745 = vmatpush1.bf16.msra.mxu0 %v5645_v44  ;;  %4089 = vmatpush1.bf16.msra.mxu1 %v5648_v45  ;;  %v5735_v44 = vld [vmem:[%s6246_s12 + $0xc60] ss:$16 sps:$4 sm:$0xff]   ;;  %v5738_v45 = vld [vmem:[%s6246_s12 + $0xc68] ss:$16 sps:$4 sm:$0xff]  }
 0x1b0   : > { %3746 = vmatprep.subr.bf16.mxu0 %v5653_v46  ;;  %4090 = vmatprep.subr.bf16.mxu1 %v5656_v47  ;;  %v5743_v46 = vld [vmem:[%s6246_s12 + $0xc84] ss:$16 sps:$4 sm:$0xff]   ;;  %v5746_v47 = vld [vmem:[%s6246_s12 + $0xc8c] ss:$16 sps:$4 sm:$0xff]  }
 0x1b3   : > { %3747 = vmatpush1.bf16.msra.mxu0 %v5651_v48  ;;  %4091 = vmatpush1.bf16.msra.mxu1 %v5654_v49  ;;  %v5741_v48 = vld [vmem:[%s6246_s12 + $0xc80] ss:$16 sps:$4 sm:$0xff]   ;;  %v5744_v49 = vld [vmem:[%s6246_s12 + $0xc88] ss:$16 sps:$4 sm:$0xff]  }
 0x1b4   : > { %3748 = vmatprep.subr.bf16.mxu0 %v5659_v50  ;;  %4092 = vmatprep.subr.bf16.mxu1 %v5662_v51  ;;  %v5749_v50 = vld [vmem:[%s6246_s12 + $0xca4] ss:$16 sps:$4 sm:$0xff]   ;;  %v5752_v51 = vld [vmem:[%s6246_s12 + $0xcac] ss:$16 sps:$4 sm:$0xff]  }
 0x1b7   : > { %3749 = vmatpush1.bf16.msra.mxu0 %v5657_v52  ;;  %4093 = vmatpush1.bf16.msra.mxu1 %v5660_v53  ;;  %v5747_v52 = vld [vmem:[%s6246_s12 + $0xca0] ss:$16 sps:$4 sm:$0xff]   ;;  %v5750_v53 = vld [vmem:[%s6246_s12 + $0xca8] ss:$16 sps:$4 sm:$0xff]  }
 0x1b8   : > { %3750 = vmatprep.subr.bf16.mxu0 %v5665_v54  ;;  %4094 = vmatprep.subr.bf16.mxu1 %v5668_v55  ;;  %v5755_v54 = vld [vmem:[%s6246_s12 + $0xcc4] ss:$16 sps:$4 sm:$0xff]   ;;  %v5758_v55 = vld [vmem:[%s6246_s12 + $0xccc] ss:$16 sps:$4 sm:$0xff]  }
 0x1bb   : > { %3751 = vmatpush1.bf16.msra.mxu0 %v5663_v56  ;;  %4095 = vmatpush1.bf16.msra.mxu1 %v5666_v57  ;;  %v5753_v56 = vld [vmem:[%s6246_s12 + $0xcc0] ss:$16 sps:$4 sm:$0xff]   ;;  %v5756_v57 = vld [vmem:[%s6246_s12 + $0xcc8] ss:$16 sps:$4 sm:$0xff]  }
 0x1bc   : > { %3752 = vmatprep.subr.bf16.mxu0 %v5671_v58  ;;  %4096 = vmatprep.subr.bf16.mxu1 %v5674_v59  ;;  %v5761_v58 = vld [vmem:[%s6246_s12 + $0xce4] ss:$16 sps:$4 sm:$0xff]   ;;  %v5764_v59 = vld [vmem:[%s6246_s12 + $0xcec] ss:$16 sps:$4 sm:$0xff]  }
 0x1bf   : > { %3753 = vmatpush1.bf16.msra.mxu0 %v5669_v60  ;;  %4097 = vmatpush1.bf16.msra.mxu1 %v5672_v61  ;;  %v5759_v60 = vld [vmem:[%s6246_s12 + $0xce0] ss:$16 sps:$4 sm:$0xff]   ;;  %v5762_v61 = vld [vmem:[%s6246_s12 + $0xce8] ss:$16 sps:$4 sm:$0xff]  }
 0x1c0   : > { %3754 = vmatprep.subr.bf16.mxu0 %v5677_v62  ;;  %4098 = vmatprep.subr.bf16.mxu1 %v5680_v63  ;;  %v5767_v62 = vld [vmem:[%s6246_s12 + $0xd04] ss:$16 sps:$4 sm:$0xff]   ;;  %v5770_v63 = vld [vmem:[%s6246_s12 + $0xd0c] ss:$16 sps:$4 sm:$0xff]  }
 0x1c3   : > { %3755 = vmatpush1.bf16.msra.mxu0 %v5675_v0  ;;  %4099 = vmatpush1.bf16.msra.mxu1 %v5678_v1  ;;  %v5765_v0 = vld [vmem:[%s6246_s12 + $0xd00] ss:$16 sps:$4 sm:$0xff]   ;;  %v5768_v1 = vld [vmem:[%s6246_s12 + $0xd08] ss:$16 sps:$4 sm:$0xff]  }
 0x1c4   : > { %3756 = vmatprep.subr.bf16.mxu0 %v5683_v2  ;;  %4100 = vmatprep.subr.bf16.mxu1 %v5686_v3  ;;  %v5773_v2 = vld [vmem:[%s6246_s12 + $0xd24] ss:$16 sps:$4 sm:$0xff]   ;;  %v5776_v3 = vld [vmem:[%s6246_s12 + $0xd2c] ss:$16 sps:$4 sm:$0xff]  }
 0x1c7   : > { %3757 = vmatpush1.bf16.msra.mxu0 %v5681_v4  ;;  %4101 = vmatpush1.bf16.msra.mxu1 %v5684_v5  ;;  %v5771_v4 = vld [vmem:[%s6246_s12 + $0xd20] ss:$16 sps:$4 sm:$0xff]   ;;  %v5774_v5 = vld [vmem:[%s6246_s12 + $0xd28] ss:$16 sps:$4 sm:$0xff]  }
 0x1c8   : > { %3758 = vmatprep.subr.bf16.mxu0 %v5689_v6  ;;  %4102 = vmatprep.subr.bf16.mxu1 %v5692_v7  ;;  %v5779_v6 = vld [vmem:[%s6246_s12 + $0xd44] ss:$16 sps:$4 sm:$0xff]   ;;  %v5782_v7 = vld [vmem:[%s6246_s12 + $0xd4c] ss:$16 sps:$4 sm:$0xff]  }
 0x1cb   : > { %3759 = vmatpush1.bf16.msra.mxu0 %v5687_v8  ;;  %4103 = vmatpush1.bf16.msra.mxu1 %v5690_v9  ;;  %v5777_v8 = vld [vmem:[%s6246_s12 + $0xd40] ss:$16 sps:$4 sm:$0xff]   ;;  %v5780_v9 = vld [vmem:[%s6246_s12 + $0xd48] ss:$16 sps:$4 sm:$0xff]  }
 0x1cc   : > { %3760 = vmatprep.subr.bf16.mxu0 %v5695_v10  ;;  %4104 = vmatprep.subr.bf16.mxu1 %v5698_v11  ;;  %v5785_v10 = vld [vmem:[%s6246_s12 + $0xd64] ss:$16 sps:$4 sm:$0xff]   ;;  %v5788_v11 = vld [vmem:[%s6246_s12 + $0xd6c] ss:$16 sps:$4 sm:$0xff]  }
 0x1cf   : > { %3761 = vmatpush1.bf16.msra.mxu0 %v5693_v12  ;;  %4105 = vmatpush1.bf16.msra.mxu1 %v5696_v13  ;;  %v5783_v12 = vld [vmem:[%s6246_s12 + $0xd60] ss:$16 sps:$4 sm:$0xff]   ;;  %v5786_v13 = vld [vmem:[%s6246_s12 + $0xd68] ss:$16 sps:$4 sm:$0xff]  }
 0x1d0   : > { %3762 = vmatprep.subr.bf16.mxu0 %v5701_v14  ;;  %4106 = vmatprep.subr.bf16.mxu1 %v5704_v15  ;;  %v5791_v14 = vld [vmem:[%s6246_s12 + $0xd84] ss:$16 sps:$4 sm:$0xff]   ;;  %v5794_v15 = vld [vmem:[%s6246_s12 + $0xd8c] ss:$16 sps:$4 sm:$0xff]  }
 0x1d3   : > { %3763 = vmatpush1.bf16.msra.mxu0 %v5699_v16  ;;  %4107 = vmatpush1.bf16.msra.mxu1 %v5702_v19  ;;  %v5789_v16 = vld [vmem:[%s6246_s12 + $0xd80] ss:$16 sps:$4 sm:$0xff]   ;;  %v5792_v19 = vld [vmem:[%s6246_s12 + $0xd88] ss:$16 sps:$4 sm:$0xff]  }
 0x1d4   : > { %3764 = vmatprep.subr.bf16.mxu0 %v5707_v20  ;;  %4108 = vmatprep.subr.bf16.mxu1 %v5710_v23  ;;  %v5797_v20 = vld [vmem:[%s6246_s12 + $0xda4] ss:$16 sps:$4 sm:$0xff]   ;;  %v5800_v23 = vld [vmem:[%s6246_s12 + $0xdac] ss:$16 sps:$4 sm:$0xff]  }
 0x1d7   : > { %3765 = vmatpush1.bf16.msra.mxu0 %v5705_v25  ;;  %4109 = vmatpush1.bf16.msra.mxu1 %v5708_v18  ;;  %v5795_v25 = vld [vmem:[%s6246_s12 + $0xda0] ss:$16 sps:$4 sm:$0xff]   ;;  %v5798_v18 = vld [vmem:[%s6246_s12 + $0xda8] ss:$16 sps:$4 sm:$0xff]  }
 0x1d8   : > { %3766 = vmatprep.subr.bf16.mxu0 %v5713_v26  ;;  %4110 = vmatprep.subr.bf16.mxu1 %v5716_v27  ;;  %v5803_v26 = vld [vmem:[%s6246_s12 + $0xdc4] ss:$16 sps:$4 sm:$0xff]   ;;  %v5806_v27 = vld [vmem:[%s6246_s12 + $0xdcc] ss:$16 sps:$4 sm:$0xff]  }
 0x1db   : > { %3767 = vmatpush1.bf16.msra.mxu0 %v5711_v21  ;;  %4111 = vmatpush1.bf16.msra.mxu1 %v5714_v22  ;;  %v5801_v21 = vld [vmem:[%s6246_s12 + $0xdc0] ss:$16 sps:$4 sm:$0xff]   ;;  %v5804_v22 = vld [vmem:[%s6246_s12 + $0xdc8] ss:$16 sps:$4 sm:$0xff]  }
 0x1dc   : > { %3779 = vmatprep.subr.bf16.mxu0 %v5719_v30  ;;  %4123 = vmatprep.subr.bf16.mxu1 %v5722_v31  ;;  %v5809_v30 = vld [vmem:[%s6246_s12 + $0xde4] ss:$16 sps:$4 sm:$0xff]   ;;  %v5812_v31 = vld [vmem:[%s6246_s12 + $0xdec] ss:$16 sps:$4 sm:$0xff]  }
 0x1de   : > { %3769 = vmatmul.mubr.bf16.vlgmr.msra.gmra.mrb[0].mxu0 %v4454_v32  ;;  %4113 = vmatmul.mubr.bf16.vlgmr.msra.gmra.mrb[0].mxu1 %v4454_v32  ;;  %v5807_v32 = vld [vmem:[%s6246_s12 + $0xde0] ss:$16 sps:$4 sm:$0xff]  }
 0x1df   : > { %3780 = vmatpush1.bf16.msra.mxu0 %v5717_v17  ;;  %4124 = vmatpush1.bf16.msra.mxu1 %v5720_v34  ;;  %v5810_v17 = vld [vmem:[%s6246_s12 + $0xde8] ss:$16 sps:$4 sm:$0xff]   ;;  %v5815_v34 = vld [vmem:[%s6246_s12 + $0xe04] ss:$16 sps:$4 sm:$0xff]  }
 0x1e0   : > { %3781 = vmatprep.subr.bf16.mxu0 %v5725_v35  ;;  %4125 = vmatprep.subr.bf16.mxu1 %v5728_v36  ;;  %v5818_v35 = vld [vmem:[%s6246_s12 + $0xe0c] ss:$16 sps:$4 sm:$0xff]   ;;  %v4456_v36 = vcombine.low %v6715_v33, %v6718_v24  ;;  %v5819_v24 = vld [vmem:[%s6246_s12 + $0xe20] ss:$16 sps:$4 sm:$0xff]  }
 0x1e1   : > { %3811 = vmatprep.mubr.bf16.mxu0 %v4457_v28  ;;  %4155 = vmatprep.mubr.bf16.mxu1 %v4457_v28  ;;  %v6789_v28 = vld [vmem:[%s6263_s8 + $0x38] sm:$0xff] }
 0x1e3   : > { %3782 = vmatpush1.bf16.msra.mxu0 %v5723_v29  ;;  %4126 = vmatpush1.bf16.msra.mxu1 %v5726_v37  ;;  %v6792_v29 = vld [vmem:[%s6263_s8 + $0x78] sm:$0xff]  ;;  %v5813_v37 = vld [vmem:[%s6246_s12 + $0xe00] ss:$16 sps:$4 sm:$0xff]  }
 0x1e4   : > { %3783 = vmatprep.subr.bf16.mxu0 %v5731_v38  ;;  %4127 = vmatprep.subr.bf16.mxu1 %v5734_v39  ;;  %v5816_v38 = vld [vmem:[%s6246_s12 + $0xe08] ss:$16 sps:$4 sm:$0xff]   ;;  %v5821_v39 = vld [vmem:[%s6246_s12 + $0xe24] ss:$16 sps:$4 sm:$0xff]   ;;  %v4459_v33 = vcombine.high %v6789_v28, %v6792_v29 }
 0x1e7   : > { %3784 = vmatpush1.bf16.msra.mxu0 %v5729_v40  ;;  %4128 = vmatpush1.bf16.msra.mxu1 %v5732_v41  ;;  %v5824_v40 = vld [vmem:[%s6246_s12 + $0xe2c] ss:$16 sps:$4 sm:$0xff]   ;;  %v5822_v41 = vld [vmem:[%s6246_s12 + $0xe28] ss:$16 sps:$4 sm:$0xff]  }
 0x1e8   : > { %3785 = vmatprep.subr.bf16.mxu0 %v5737_v42  ;;  %4129 = vmatprep.subr.bf16.mxu1 %v5740_v43  ;;  %v5827_v42 = vld [vmem:[%s6246_s12 + $0xe44] ss:$16 sps:$4 sm:$0xff]   ;;  %v5830_v43 = vld [vmem:[%s6246_s12 + $0xe4c] ss:$16 sps:$4 sm:$0xff]  }
 0x1eb   : > { %3786 = vmatpush1.bf16.msra.mxu0 %v5735_v44  ;;  %4130 = vmatpush1.bf16.msra.mxu1 %v5738_v45  ;;  %v5825_v44 = vld [vmem:[%s6246_s12 + $0xe40] ss:$16 sps:$4 sm:$0xff]   ;;  %v5828_v45 = vld [vmem:[%s6246_s12 + $0xe48] ss:$16 sps:$4 sm:$0xff]  }
 0x1ec   : > { %3787 = vmatprep.subr.bf16.mxu0 %v5743_v46  ;;  %4131 = vmatprep.subr.bf16.mxu1 %v5746_v47  ;;  %v5833_v46 = vld [vmem:[%s6246_s12 + $0xe64] ss:$16 sps:$4 sm:$0xff]   ;;  %v5836_v47 = vld [vmem:[%s6246_s12 + $0xe6c] ss:$16 sps:$4 sm:$0xff]  }
 0x1ef   : > { %3788 = vmatpush1.bf16.msra.mxu0 %v5741_v48  ;;  %4132 = vmatpush1.bf16.msra.mxu1 %v5744_v49  ;;  %v5831_v48 = vld [vmem:[%s6246_s12 + $0xe60] ss:$16 sps:$4 sm:$0xff]   ;;  %v5834_v49 = vld [vmem:[%s6246_s12 + $0xe68] ss:$16 sps:$4 sm:$0xff]  }
 0x1f0   : > { %3789 = vmatprep.subr.bf16.mxu0 %v5749_v50  ;;  %4133 = vmatprep.subr.bf16.mxu1 %v5752_v51  ;;  %v5839_v50 = vld [vmem:[%s6246_s12 + $0xe84] ss:$16 sps:$4 sm:$0xff]   ;;  %v5842_v51 = vld [vmem:[%s6246_s12 + $0xe8c] ss:$16 sps:$4 sm:$0xff]  }
 0x1f3   : > { %3790 = vmatpush1.bf16.msra.mxu0 %v5747_v52  ;;  %4134 = vmatpush1.bf16.msra.mxu1 %v5750_v53  ;;  %v5837_v52 = vld [vmem:[%s6246_s12 + $0xe80] ss:$16 sps:$4 sm:$0xff]   ;;  %v5840_v53 = vld [vmem:[%s6246_s12 + $0xe88] ss:$16 sps:$4 sm:$0xff]  }
 0x1f4   : > { %3791 = vmatprep.subr.bf16.mxu0 %v5755_v54  ;;  %4135 = vmatprep.subr.bf16.mxu1 %v5758_v55  ;;  %v5845_v54 = vld [vmem:[%s6246_s12 + $0xea4] ss:$16 sps:$4 sm:$0xff]   ;;  %v5848_v55 = vld [vmem:[%s6246_s12 + $0xeac] ss:$16 sps:$4 sm:$0xff]  }
 0x1f7   : > { %3792 = vmatpush1.bf16.msra.mxu0 %v5753_v56  ;;  %4136 = vmatpush1.bf16.msra.mxu1 %v5756_v57  ;;  %v5843_v56 = vld [vmem:[%s6246_s12 + $0xea0] ss:$16 sps:$4 sm:$0xff]   ;;  %v5846_v57 = vld [vmem:[%s6246_s12 + $0xea8] ss:$16 sps:$4 sm:$0xff]  }
 0x1f8   : > { %3793 = vmatprep.subr.bf16.mxu0 %v5761_v58  ;;  %4137 = vmatprep.subr.bf16.mxu1 %v5764_v59  ;;  %v5851_v58 = vld [vmem:[%s6246_s12 + $0xec4] ss:$16 sps:$4 sm:$0xff]   ;;  %v5854_v59 = vld [vmem:[%s6246_s12 + $0xecc] ss:$16 sps:$4 sm:$0xff]  }
 0x1fb   : > { %3794 = vmatpush1.bf16.msra.mxu0 %v5759_v60  ;;  %4138 = vmatpush1.bf16.msra.mxu1 %v5762_v61  ;;  %v5849_v60 = vld [vmem:[%s6246_s12 + $0xec0] ss:$16 sps:$4 sm:$0xff]   ;;  %v5852_v61 = vld [vmem:[%s6246_s12 + $0xec8] ss:$16 sps:$4 sm:$0xff]  }
 0x1fc   : > { %3795 = vmatprep.subr.bf16.mxu0 %v5767_v62  ;;  %4139 = vmatprep.subr.bf16.mxu1 %v5770_v63  ;;  %v5857_v62 = vld [vmem:[%s6246_s12 + $0xee4] ss:$16 sps:$4 sm:$0xff]   ;;  %v5860_v63 = vld [vmem:[%s6246_s12 + $0xeec] ss:$16 sps:$4 sm:$0xff]  }
 0x1ff   : > { %3796 = vmatpush1.bf16.msra.mxu0 %v5765_v0  ;;  %4140 = vmatpush1.bf16.msra.mxu1 %v5768_v1  ;;  %v5855_v0 = vld [vmem:[%s6246_s12 + $0xee0] ss:$16 sps:$4 sm:$0xff]   ;;  %v5858_v1 = vld [vmem:[%s6246_s12 + $0xee8] ss:$16 sps:$4 sm:$0xff]  }
 0x200   : > { %3797 = vmatprep.subr.bf16.mxu0 %v5773_v2  ;;  %4141 = vmatprep.subr.bf16.mxu1 %v5776_v3  ;;  %v5863_v2 = vld [vmem:[%s6246_s12 + $0xf04] ss:$16 sps:$4 sm:$0xff]   ;;  %v5866_v3 = vld [vmem:[%s6246_s12 + $0xf0c] ss:$16 sps:$4 sm:$0xff]  }
 0x203   : > { %3798 = vmatpush1.bf16.msra.mxu0 %v5771_v4  ;;  %4142 = vmatpush1.bf16.msra.mxu1 %v5774_v5  ;;  %v5861_v4 = vld [vmem:[%s6246_s12 + $0xf00] ss:$16 sps:$4 sm:$0xff]   ;;  %v5864_v5 = vld [vmem:[%s6246_s12 + $0xf08] ss:$16 sps:$4 sm:$0xff]  }
 0x204   : > { %3799 = vmatprep.subr.bf16.mxu0 %v5779_v6  ;;  %4143 = vmatprep.subr.bf16.mxu1 %v5782_v7  ;;  %v5869_v6 = vld [vmem:[%s6246_s12 + $0xf24] ss:$16 sps:$4 sm:$0xff]   ;;  %v5872_v7 = vld [vmem:[%s6246_s12 + $0xf2c] ss:$16 sps:$4 sm:$0xff]  }
 0x207   : > { %3800 = vmatpush1.bf16.msra.mxu0 %v5777_v8  ;;  %4144 = vmatpush1.bf16.msra.mxu1 %v5780_v9  ;;  %v5867_v8 = vld [vmem:[%s6246_s12 + $0xf20] ss:$16 sps:$4 sm:$0xff]   ;;  %v5870_v9 = vld [vmem:[%s6246_s12 + $0xf28] ss:$16 sps:$4 sm:$0xff]  }
 0x208   : > { %3801 = vmatprep.subr.bf16.mxu0 %v5785_v10  ;;  %4145 = vmatprep.subr.bf16.mxu1 %v5788_v11  ;;  %v5875_v10 = vld [vmem:[%s6246_s12 + $0xf44] ss:$16 sps:$4 sm:$0xff]   ;;  %v5878_v11 = vld [vmem:[%s6246_s12 + $0xf4c] ss:$16 sps:$4 sm:$0xff]  }
 0x20b   : > { %3802 = vmatpush1.bf16.msra.mxu0 %v5783_v12  ;;  %4146 = vmatpush1.bf16.msra.mxu1 %v5786_v13  ;;  %v5873_v12 = vld [vmem:[%s6246_s12 + $0xf40] ss:$16 sps:$4 sm:$0xff]   ;;  %v5876_v13 = vld [vmem:[%s6246_s12 + $0xf48] ss:$16 sps:$4 sm:$0xff]  }
 0x20c   : > { %3803 = vmatprep.subr.bf16.mxu0 %v5791_v14  ;;  %4147 = vmatprep.subr.bf16.mxu1 %v5794_v15  ;;  %v5881_v14 = vld [vmem:[%s6246_s12 + $0xf64] ss:$16 sps:$4 sm:$0xff]   ;;  %v5884_v15 = vld [vmem:[%s6246_s12 + $0xf6c] ss:$16 sps:$4 sm:$0xff]  }
 0x20f   : > { %3804 = vmatpush1.bf16.msra.mxu0 %v5789_v16  ;;  %4148 = vmatpush1.bf16.msra.mxu1 %v5792_v19  ;;  %v5879_v16 = vld [vmem:[%s6246_s12 + $0xf60] ss:$16 sps:$4 sm:$0xff]   ;;  %v5882_v19 = vld [vmem:[%s6246_s12 + $0xf68] ss:$16 sps:$4 sm:$0xff]  }
 0x210   : > { %3805 = vmatprep.subr.bf16.mxu0 %v5797_v20  ;;  %4149 = vmatprep.subr.bf16.mxu1 %v5800_v23  ;;  %v5887_v20 = vld [vmem:[%s6246_s12 + $0xf84] ss:$16 sps:$4 sm:$0xff]   ;;  %v5890_v23 = vld [vmem:[%s6246_s12 + $0xf8c] ss:$16 sps:$4 sm:$0xff]  }
 0x213   : > { %3806 = vmatpush1.bf16.msra.mxu0 %v5795_v25  ;;  %4150 = vmatpush1.bf16.msra.mxu1 %v5798_v18  ;;  %v5885_v25 = vld [vmem:[%s6246_s12 + $0xf80] ss:$16 sps:$4 sm:$0xff]   ;;  %v5888_v18 = vld [vmem:[%s6246_s12 + $0xf88] ss:$16 sps:$4 sm:$0xff]  }
 0x214   : > { %3807 = vmatprep.subr.bf16.mxu0 %v5803_v26  ;;  %4151 = vmatprep.subr.bf16.mxu1 %v5806_v27  ;;  %v5893_v26 = vld [vmem:[%s6246_s12 + $0xfa4] ss:$16 sps:$4 sm:$0xff]   ;;  %v5896_v27 = vld [vmem:[%s6246_s12 + $0xfac] ss:$16 sps:$4 sm:$0xff]  }
 0x217   : > { %3808 = vmatpush1.bf16.msra.mxu0 %v5801_v21  ;;  %4152 = vmatpush1.bf16.msra.mxu1 %v5804_v22  ;;  %v5891_v21 = vld [vmem:[%s6246_s12 + $0xfa0] ss:$16 sps:$4 sm:$0xff]   ;;  %v5894_v22 = vld [vmem:[%s6246_s12 + $0xfa8] ss:$16 sps:$4 sm:$0xff]  }
 0x218   : > { %3809 = vmatprep.subr.bf16.mxu0 %v5809_v30  ;;  %4153 = vmatprep.subr.bf16.mxu1 %v5812_v31  ;;  %v5899_v30 = vld [vmem:[%s6246_s12 + $0xfc4] ss:$16 sps:$4 sm:$0xff]   ;;  %v5902_v31 = vld [vmem:[%s6246_s12 + $0xfcc] ss:$16 sps:$4 sm:$0xff]  }
 0x21b   : > { %3810 = vmatpush1.bf16.msra.mxu0 %v5807_v32  ;;  %4154 = vmatpush1.bf16.msra.mxu1 %v5810_v17  ;;  %v5897_v32 = vld [vmem:[%s6246_s12 + $0xfc0] ss:$16 sps:$4 sm:$0xff]   ;;  %v5900_v17 = vld [vmem:[%s6246_s12 + $0xfc8] ss:$16 sps:$4 sm:$0xff]  }
 0x21c   : > { %3822 = vmatprep.subr.bf16.mxu0 %v5815_v34  ;;  %4166 = vmatprep.subr.bf16.mxu1 %v5818_v35  ;;  %v5905_v34 = vld [vmem:[%s6246_s12 + $0xfe4] ss:$16 sps:$4 sm:$0xff]   ;;  %v5908_v35 = vld [vmem:[%s6246_s12 + $0xfec] ss:$16 sps:$4 sm:$0xff]  }
 0x21e   : > { %3812 = vmatmul.mubr.bf16.vlgmr.msra.gmra.mrb[0].mxu0 %v4456_v36  ;;  %4156 = vmatmul.mubr.bf16.vlgmr.msra.gmra.mrb[0].mxu1 %v4456_v36  ;;  %v5903_v36 = vld [vmem:[%s6246_s12 + $0xfe0] ss:$16 sps:$4 sm:$0xff]  }
 0x21f   : > { %3823 = vmatpush1.bf16.msra.mxu0 %v5813_v37  ;;  %4167 = vmatpush1.bf16.msra.mxu1 %v5816_v38  ;;  %v5906_v37 = vld [vmem:[%s6246_s12 + $0xfe8] ss:$16 sps:$4 sm:$0xff]   ;;  %v4458_v38 = vcombine.low %v6789_v28, %v6792_v29 }
 0x220   : > { %3824 = vmatprep.subr.bf16.mxu0 %v5821_v39  ;;  %4168 = vmatprep.subr.bf16.mxu1 %v5824_v40  ;;  %v345_v39 = vld [vmem:[#allocation2] sm:$0xff]  ;;  %v347_v40 = vld [vmem:[#allocation2 + $0x10] sm:$0xff] }
 0x221   : > { %3854 = vmatprep.mubr.bf16.mxu0 %v4459_v33  ;;  %4198 = vmatprep.mubr.bf16.mxu1 %v4459_v33  ;;  %v346_v33 = vld [vmem:[#allocation2 + $0x8] sm:$0xff] }
 0x223   : > { %3825 = vmatpush1.bf16.msra.mxu0 %v5819_v24  ;;  %4169 = vmatpush1.bf16.msra.mxu1 %v5822_v41  ;;  %v348_v24 = vld [vmem:[#allocation2 + $0x18] sm:$0xff] }
 0x224   : > { %3826 = vmatprep.subr.bf16.mxu0 %v5827_v42  ;;  %4170 = vmatprep.subr.bf16.mxu1 %v5830_v43  ;;  %v349_v43 = vld [vmem:[#allocation2 + $0x20] sm:$0xff] }
 0x227   : > { %3827 = vmatpush1.bf16.msra.mxu0 %v5825_v44  ;;  %4171 = vmatpush1.bf16.msra.mxu1 %v5828_v45  ;;  %v351_v44 = vld [vmem:[#allocation2 + $0x30] sm:$0xff] }
 0x228   : > { %3828 = vmatprep.subr.bf16.mxu0 %v5833_v46  ;;  %4172 = vmatprep.subr.bf16.mxu1 %v5836_v47 }
 0x22b   : > { %3829 = vmatpush1.bf16.msra.mxu0 %v5831_v48  ;;  %4173 = vmatpush1.bf16.msra.mxu1 %v5834_v49  ;;  %v350_v49 = vld [vmem:[#allocation2 + $0x28] sm:$0xff] }
 0x22c   : > { %3830 = vmatprep.subr.bf16.mxu0 %v5839_v50  ;;  %4174 = vmatprep.subr.bf16.mxu1 %v5842_v51  ;;  %v352_v50 = vld [vmem:[#allocation2 + $0x38] sm:$0xff] }
 0x22f   : > { %3831 = vmatpush1.bf16.msra.mxu0 %v5837_v52  ;;  %4175 = vmatpush1.bf16.msra.mxu1 %v5840_v53 }
 0x230   : > { %3832 = vmatprep.subr.bf16.mxu0 %v5845_v54  ;;  %4176 = vmatprep.subr.bf16.mxu1 %v5848_v55 }
 0x233   : > { %3833 = vmatpush1.bf16.msra.mxu0 %v5843_v56  ;;  %4177 = vmatpush1.bf16.msra.mxu1 %v5846_v57 }
 0x234   : > { %3834 = vmatprep.subr.bf16.mxu0 %v5851_v58  ;;  %4178 = vmatprep.subr.bf16.mxu1 %v5854_v59  ;;  %v4239_v59 = vlaneseq (!%p4972_p0) }
 0x237   : > { %3835 = vmatpush1.bf16.msra.mxu0 %v5849_v60  ;;  %4179 = vmatpush1.bf16.msra.mxu1 %v5852_v61  ;;  %v4240_v60 = vshrl.u32 (!%p4972_p0), %v4239_v59, 7  ;;  %v4267_v61 = vld [vmem:[%s6271_s29] sm:$0xff] (!%p4972_p0) }
 0x238   : > { %3836 = vmatprep.subr.bf16.mxu0 %v5857_v62  ;;  %4180 = vmatprep.subr.bf16.mxu1 %v5860_v63  ;;  %v4237_v63 = vld [vmem:[%s329_s27] sm:$0xf] (!%p4972_p0) }
 0x23b   : > { %3837 = vmatpush1.bf16.msra.mxu0 %v5855_v0  ;;  %4181 = vmatpush1.bf16.msra.mxu1 %v5858_v1  ;;  %v4241_v1 = vsub.s32 (!%p4972_p0), 0, %v4240_v60 }
 0x23c   : > { %3838 = vmatprep.subr.bf16.mxu0 %v5863_v2  ;;  %4182 = vmatprep.subr.bf16.mxu1 %v5866_v3  ;;  %v4249_v2 = vsub.s32 (!%p4972_p0), 2, %v4240_v60  ;;  %v4245_v3 = vsub.s32 (!%p4972_p0), 1, %v4240_v60 }
 0x23f   : > { %3839 = vmatpush1.bf16.msra.mxu0 %v5861_v4  ;;  %4183 = vmatpush1.bf16.msra.mxu1 %v5864_v5  ;;  %v4253_v4 = vsub.s32 (!%p4972_p0), 3, %v4240_v60  ;;  %v4268_v5 = vld [vmem:[%s6271_s29 + $0x8] sm:$0xff] (!%p4972_p0) }
 0x240   : > { %3840 = vmatprep.subr.bf16.mxu0 %v5869_v6  ;;  %4184 = vmatprep.subr.bf16.mxu1 %v5872_v7  ;;  %v4269_v6 = vunpack.c.l.bf16 (!%p4972_p0), %v4267_v61 }
 0x243   : > { %3841 = vmatpush1.bf16.msra.mxu0 %v5867_v8  ;;  %4185 = vmatpush1.bf16.msra.mxu1 %v5870_v9  ;;  %v4270_v9 = vunpack.c.h.bf16 (!%p4972_p0), %v4267_v61 }
 0x244   : > { %3842 = vmatprep.subr.bf16.mxu0 %v5875_v10  ;;  %4186 = vmatprep.subr.bf16.mxu1 %v5878_v11  ;;  %v4242_v11 = vrot.slane (!%p4972_p0), %v4237_v63, %v4241_v1 }
 0x247   : > { %3843 = vmatpush1.bf16.msra.mxu0 %v5873_v12  ;;  %4187 = vmatpush1.bf16.msra.mxu1 %v5876_v13  ;;  %v4250_v12 = vrot.slane (!%p4972_p0), %v4237_v63, %v4249_v2  ;;  %v4246_v13 = vrot.slane (!%p4972_p0), %v4237_v63, %v4245_v3 }
 0x248   : > { %3844 = vmatprep.subr.bf16.mxu0 %v5881_v14  ;;  %4188 = vmatprep.subr.bf16.mxu1 %v5884_v15  ;;  %v4254_v14 = vrot.slane (!%p4972_p0), %v4237_v63, %v4253_v4 }
 0x24b   : > { %3845 = vmatpush1.bf16.msra.mxu0 %v5879_v16  ;;  %4189 = vmatpush1.bf16.msra.mxu1 %v5882_v19 }
 0x24c   : > { %3846 = vmatprep.subr.bf16.mxu0 %v5887_v20  ;;  %4190 = vmatprep.subr.bf16.mxu1 %v5890_v23  ;;  %v4271_v20 = vunpack.c.l.bf16 (!%p4972_p0), %v4268_v5  ;;  %v4272_v23 = vunpack.c.h.bf16 (!%p4972_p0), %v4268_v5 }
 0x24f   : > { %3847 = vmatpush1.bf16.msra.mxu0 %v5885_v25  ;;  %4191 = vmatpush1.bf16.msra.mxu1 %v5888_v18 }
 0x250   : > { %3848 = vmatprep.subr.bf16.mxu0 %v5893_v26  ;;  %4192 = vmatprep.subr.bf16.mxu1 %v5896_v27 }
 0x253   : > { %3849 = vmatpush1.bf16.msra.mxu0 %v5891_v21  ;;  %4193 = vmatpush1.bf16.msra.mxu1 %v5894_v22 }
 0x254   : > { %3850 = vmatprep.subr.bf16.mxu0 %v5899_v30  ;;  %4194 = vmatprep.subr.bf16.mxu1 %v5902_v31 }
 0x257   : > { %3851 = vmatpush1.bf16.msra.mxu0 %v5897_v32  ;;  %4195 = vmatpush1.bf16.msra.mxu1 %v5900_v17 }
 0x258   : > { %3852 = vmatprep.subr.bf16.mxu0 %v5905_v34  ;;  %4196 = vmatprep.subr.bf16.mxu1 %v5908_v35 }
 0x25b   : > { %3853 = vmatpush1.bf16.msra.mxu0 %v5903_v36  ;;  %4197 = vmatpush1.bf16.msra.mxu1 %v5906_v37 }
 0x25e   : > { %3855 = vmatmul.mubr.bf16.vlgmr.msra.gmra.mrb[0].mxu0 %v4458_v38  ;;  %4199 = vmatmul.mubr.bf16.vlgmr.msra.gmra.mrb[0].mxu1 %v4458_v38 }
 0x331   : > { %v3856_v41 = vpop.f32.mrb[0].mxu0  ;;  %v4200_v42 = vpop.f32.mrb[0].mxu1  ;;  %4228 = sbr.rel (%p4972_p0) target bundleno = 838 (0x346), region = 86 }
 0x332   : > { %v4209_v45 = vadd.f32 %v3856_v41, %v345_v39  ;;  %v4211_v46 = vadd.f32 %v4200_v42, %v347_v40  ;;  %v3858_v47 = vpop.f32.mrb[1].mxu0  ;;  %v4202_v48 = vpop.f32.mrb[1].mxu1 }
 0x333   : > { %v4210_v51 = vadd.f32 %v3858_v47, %v346_v33  ;;  %v4212_v28 = vadd.f32 %v4202_v48, %v348_v24  ;;  %v3860_v29 = vpop.f32.mrb[2].mxu0  ;;  %v4204_v52 = vpop.f32.mrb[2].mxu1 }
 0x334   : > { %4217 = vst [vmem:[#allocation2] sm:$0xff] %v4209_v45  ;;  %4219 = vst [vmem:[#allocation2 + $0x10] sm:$0xff] %v4211_v46  ;;  %v4213_v53 = vadd.f32 %v3860_v29, %v349_v43  ;;  %v4215_v54 = vadd.f32 %v4204_v52, %v351_v44  ;;  %v3862_v55 = vpop.f32.mrb[3].mxu0  ;;  %v4206_v56 = vpop.f32.mrb[3].mxu1 }
 0x335   : > { %4218 = vst [vmem:[#allocation2 + $0x8] sm:$0xff] %v4210_v51  ;;  %4220 = vst [vmem:[#allocation2 + $0x18] sm:$0xff] %v4212_v28  ;;  %v4214_v57 = vadd.f32 %v3862_v55, %v350_v49  ;;  %v4216_v58 = vadd.f32 %v4206_v56, %v352_v50 }
 0x336   : > { %4221 = vst [vmem:[#allocation2 + $0x20] sm:$0xff] %v4213_v53  ;;  %4223 = vst [vmem:[#allocation2 + $0x30] sm:$0xff] %v4215_v54 }
 0x337   : > { %4222 = vst [vmem:[#allocation2 + $0x28] sm:$0xff] %v4214_v57  ;;  %4224 = vst [vmem:[#allocation2 + $0x38] sm:$0xff] %v4216_v58 }
 0x33b   : > { %v4229_v62 = vld [vmem:[#allocation2] sm:$0xff]  ;;  %v4231_v0 = vld [vmem:[#allocation2 + $0x10] sm:$0xff] }
 0x33c   : > { %v4230_v7 = vld [vmem:[#allocation2 + $0x8] sm:$0xff]  ;;  %v4232_v8 = vld [vmem:[#allocation2 + $0x18] sm:$0xff]  ;;  %v4259_v25 = vadd.f32 %v4242_v11, %v4229_v62  ;;  %v4261_v18 = vadd.f32 %v4250_v12, %v4231_v0 }
 0x33d   : > { %v4233_v10 = vld [vmem:[#allocation2 + $0x20] sm:$0xff]  ;;  %v4235_v15 = vld [vmem:[#allocation2 + $0x30] sm:$0xff]  ;;  %v4260_v26 = vadd.f32 %v4246_v13, %v4230_v7  ;;  %v4262_v27 = vadd.f32 %v4254_v14, %v4232_v8 }
 0x33e   : > { %v4234_v16 = vld [vmem:[#allocation2 + $0x28] sm:$0xff]  ;;  %v4236_v19 = vld [vmem:[#allocation2 + $0x38] sm:$0xff]  ;;  %v4263_v21 = vadd.f32 %v4242_v11, %v4233_v10  ;;  %v4265_v22 = vadd.f32 %v4250_v12, %v4235_v15  ;;  %v4273_v32 = vmul.f32 %v4269_v6, %v4259_v25 }
 0x33f   : > { %v4264_v30 = vadd.f32 %v4246_v13, %v4234_v16  ;;  %v4266_v31 = vadd.f32 %v4254_v14, %v4236_v19  ;;  %v4274_v17 = vmul.f32 %v4270_v9, %v4260_v26 }
 0x340   : > { %v4275_v34 = vmul.f32 %v4271_v20, %v4263_v21  ;;  %v4277_v36 = vadd.f32 %v4273_v32, %v4261_v18 }
 0x341   : > { %v4276_v35 = vmul.f32 %v4272_v23, %v4264_v30  ;;  %v4278_v37 = vadd.f32 %v4274_v17, %v4262_v27 }
 0x342   : > { %v4279_v38 = vadd.f32 %v4275_v34, %v4265_v22  ;;  %4281 = vst [vmem:[%s6273_s6] sm:$0xff] %v4277_v36 }
 0x343   : > { %v4280_v39 = vadd.f32 %v4276_v35, %v4266_v31  ;;  %4282 = vst [vmem:[%s6273_s6 + $0x8] sm:$0xff] %v4278_v37 }
 0x344   : > { %4283 = vst [vmem:[%s6273_s6 + $0x10] sm:$0xff] %v4279_v38 }
 0x345   : > { %4284 = vst [vmem:[%s6273_s6 + $0x18] sm:$0xff] %v4280_v39 }
 0x346 PF: > { %s4980_s21 = sshll.u32 %s6047_s22, 8  ;;  %s4299_s7 = sshll.u32 %s6273_s6, 4  ;;  %s6879_s7 = int_to_ptr.vmem [resolvable:$true] %s4299_s7 }
 0x347   : > { %s6876_s5 = scalar_lea.hbm %s6946_s4, %s4980_s21  ;;  %s4286_s9 = scalar_lea.sflag [#allocation5], %s6253_s18 }
 0x348   : > { %s5937_s10 = scalar_lea.vmem %s6879_s7, 512  ;;  %p6965_p5 = scmp.ne.s32.totalorder %s6961_s14, 0 }
 0x349   : > { %p5938_p1 = scmp.ne.s32.totalorder %s6879_s7, %s5937_s10  ;;  %s6066_s28 = smov [#allocation7]  }
 0x34a   : > { %s5941_s8 = sshll.u32 %s6066_s28, 4  ;;  %s5942_s8 = int_to_ptr.vmem [resolvable:$false] %s5941_s8 }
 0x34b   : > { %p5939_p2 = pnand %p5938_p1, %p6965_p5  ;;  %s5943_s22 = scalar_lea.vmem %s5942_s8, 1024 }
 0x34c   : > { %p5944_p9 = scmp.lt.s32.totalorder %s6879_s7, %s5942_s8  ;;  %p5945_p10 = scmp.lt.s32.totalorder %s5943_s22, %s5937_s10 }
 0x34d   : > { %p5940_p6 = pneg %p5939_p2 }
 0x34e   : > { %p5946_p3 = por %p5945_p10, %p5944_p9 }
 0x350   : > { %p5947_p7 = pnand %p5946_p3, %p5940_p6 }
 0x352   : > { %5950 = shalt.err (!%p5947_p7)
}
 0x353   : > { %s5951_s13 = scalar_lea.hbm %s6876_s5, 512  ;;  %s5955_s29 = scalar_lea.hbm %s6946_s4, 2048 }
 0x354   : > { %p5952_p12 = scmp.ne.s32.totalorder %s6876_s5, %s5951_s13  ;;  %p5956_p8 = scmp.lt.u32.totalorder %s6876_s5, %s6946_s4 }
 0x355   : > { %p5957_p11 = scmp.lt.u32.totalorder %s5955_s29, %s5951_s13  ;;  %p5959_p1 = scmp.lt.u32.totalorder %s5951_s13, %s6876_s5 }
 0x356   : > { %p5953_p13 = pnand %p5952_p12, %p6965_p5 }
 0x357   : > { %p5958_p0 = por %p5957_p11, %p5956_p8 }
 0x358   : > { %p5954_p4 = pneg %p5953_p13 }
 0x359   : > { %p5960_p2 = por %p5959_p1, %p5958_p0 }
 0x35b   : > { %p5961_p6 = pnand %p5960_p2, %p5954_p4 }
 0x35d   : > { %5964 = shalt.err (!%p5961_p6)
}
 0x35e   : > { %s6067_s12 = smov 256   ;;  %s6068_s21 = smov 1024  }
 0x35f   : > { %s6069_s20 = smov 16  }
 0x360   : > { %5039 = dma.vmem_to_hbm [thread:$0]  (%p6965_p5), %s6879_s7, 512, %s6876_s5, %s4286_s9, %s6067_s12, %s6068_s21, %s6069_s20  }
 0x361 PF: > { %s6966_s30 = sld [smem:[#allocation15_spill]]  ;;  %p5045_p9 = scmp.ge.s32.totalorder %s6059_s25, 2 }
 0x362   : > { %s4314_s10 = sand.u32 1, %s6019_s15  }
 0x363   : > { %s4315_s28 = scalar_lea.sflag [#allocation5], %s4314_s10 }
 0x367   : > { %p6967_p10 = scmp.ne.s32.totalorder %s6966_s30, 0 }
 0x369   : > { %p5042_p3 = pnand %p5045_p9, %p6967_p10 }
 0x36b   : > { %6014 = dma.done.wait (!%p5042_p3), %s4315_s28, 512  }
 0x36c   : > { %6016 = vsyncadd (!%p5042_p3), %s4315_s28, 4294966784  ;;  %s20_s25 = sadd.s32 1, %s6059_s25   ;;  %s6968_s8 = sld [smem:[#allocation13_spill]] }
 0x36d   : > { %p17_p7 = scmp.ge.s32.totalorder %s20_s25, 30   ;;  %s6969_s14 = sld [smem:[#allocation10_spill]] }
 0x36e   : > { %s6970_s20 = sld [smem:[#allocation14_spill]]  ;;  %s6971_s5 = sld [smem:[#allocation11_spill]] }
 0x36f   : > { %s6972_s7 = sld [smem:[#allocation12_spill]]  ;;  %s6973_s15 = smov %s6023_s16 }
 0x370   : > { %s6974_s16 = smov %s6027_s17  ;;  %s6976_s18 = smov %s6035_s19 }
 0x371   : > { %s6978_s21 = smov %s6051_s23  ;;  %s6979_s22 = smov %s6055_s24 }
 0x372   : > { %s6975_s17 = smov %s6968_s8  ;;  %19 = sbr.rel (!%p17_p7) target bundleno = 9 (0x9), region = 141 }
 0x373   : > { %s6977_s19 = smov %s6969_s14 }
 0x374   : > { %s6980_s23 = smov %s6971_s5 }
 0x375   : > { %s6981_s24 = smov %s6972_s7 }
 0x379   :  { %4320 = vsyncpa [#allocation4], 1 }
 0x37a   :  { %4322 = vsyncpa [#allocation4 + $0x1], 1 }
 0x37b   :  { %4323 = vsyncpa [#allocation5], 1 }
 0x37c   :  { %4325 = vsyncpa [#allocation5 + $0x1], 1 }

// kernel: global_conv_forward.2
= control target key start
LH: loop header
LB: loop body
LE: loop exit
PB: predicated region body
PF: predicated region fallthrough
CT: control target
= control target key end

     0   :  { %10 = vsyncpa [#allocation4], 0  ;;  %s22770_s0 = inlined_call_operand.vmem [shape: bf16[2,8,1024], index: 0, kind: input, shape index: {}]   ;;  %s22771_s1 = inlined_call_operand.vmem [shape: bf16[2,2048,256], index: 1, kind: input, shape index: {}]   ;;  %s22772_s2 = inlined_call_operand.vmem [shape: bf16[1024,2048], index: 2, kind: input, shape index: {}]   ;;  %s22773_s3 = inlined_call_operand.hbm [shape: f32[2,8,256], index: 3, kind: output, shape index: {0}]   ;;  %s22774_s4 = inlined_call_operand.vmem [shape: bf16[2,8,2048], index: 4, kind: output, shape index: {1}]  }
   0x1   :  { %12 = vsyncpa [#allocation4 + $0x1], 0  ;;  %s17936_s15 = smov 0   ;;  %s17938_s16 = smov 0  }
   0x2   :  { %s17940_s17 = smov 0   ;;  %s17942_s18 = smov 0  }
   0x3 LB: > { %s17957_s19 = sadd.s32 4294967295, %s17908_s18   ;;  %s14225_s20 = sadd.s32 4294967294, %s17908_s18   ;;  %s17908_s18 = sphi %s17942_s18, %s23432_s18   ;;  %s17904_s17 = sphi %s17940_s17, %s23431_s17   ;;  %s17900_s16 = sphi %s17938_s16, %s23430_s16   ;;  %s17896_s15 = sphi %s17936_s15, %s23429_s15  }
   0x4   : > { %s17961_s21 = sadd.s32 1, %s17908_s18   ;;  %s98_s22 = sadd.s32 1, %s17904_s17 }
   0x5   : > { %s95_s23 = ssub.s32 %s17908_s18, %s17961_s21  ;;  %p108_p0 = scmp.ne.s32.totalorder %s17904_s17, %s17900_s16 }
   0x6   : > { %p96_p1 = scmp.eq.s32.totalorder %s95_s23, 0  ;;  %p109_p2 = scmp.eq.s32.totalorder %s17957_s19, 1 }
   0x7   : > { %p114_p3 = scmp.ne.s32.totalorder %s17900_s16, %s17896_s15  ;;  %p115_p4 = scmp.eq.s32.totalorder %s14225_s20, 1 }
   0x8   : > { %s17972_s24 = scalar_select %p96_p1, %s17904_s17, %s98_s22  }
   0x9   : > { %p17974_p5 = por %p109_p2, %p108_p0  ;;  %p17978_p6 = por %p115_p4, %p114_p3 }
   0xa   : > { %p14228_p7 = scmp.ge.s32.totalorder %s17908_s18, 1  ;;  %p178_p8 = scmp.lt.s32.totalorder %s17908_s18, 3 }
   0xc   : > { %p179_p9 = pnand %p14228_p7, %p178_p8 }
   0xe   : > { %182 = sbr.rel (%p179_p9) target bundleno = 3851 (0xf0b), region = 32 }
  0x15   : > { %p214_p10 = scmp.lt.s32.totalorder %s17957_s19, 1  ;;  %v17988_v0 = vld [vmem:[%s22772_s2] sm:$0xff]  ;;  %v17998_v2 = vld [vmem:[%s22772_s2 + $0x18] sm:$0xff]  ;;  %s15540_s8 = sshll.u32 %s17957_s19, 8 }
  0x16   : > { %v17993_v1 = vld [vmem:[%s22772_s2 + $0x40] sm:$0xff]  ;;  %v18007_v5 = vld [vmem:[%s22772_s2 + $0x58] sm:$0xff]  ;;  %s22730_s14 = scalar_lea.hbm %s22773_s3, %s15540_s8  ;;  %s17910_s27 = smov [#allocation3]  }
  0x17   : > { %v14236_v3 = vcombine.low %v17988_v0, %v17993_v1  ;;  %v14237_v4 = vcombine.high %v17988_v0, %v17993_v1  ;;  %s18010_s9 = scalar_select %p214_p10, %s17957_s19, 1  ;;  %v14242_v6 = vcombine.low %v17998_v2, %v18007_v5  ;;  %v14243_v7 = vcombine.high %v17998_v2, %v18007_v5  ;;  %v264_v0 = vld [vmem:[%s22772_s2 + $0x118] sm:$0xff] }
  0x18   : > { %v272_v2 = vld [vmem:[%s22772_s2 + $0x158] sm:$0xff]  ;;  %s17850_s28 = sshll.u32 %s17910_s27, 4  ;;  %s17851_s28 = int_to_ptr.vmem [resolvable:$false] %s17850_s28 }
  0x19   : > { %7941 = vmatprep.mubr.bf16.mxu1 %v14237_v4  ;;  %s15534_s10 = sshll.u32 %s18010_s9, 11  ;;  %9960 = vmatprep.mubr.bf16.mxu0 %v14243_v7  ;;  %s15533_s11 = sshll.u32 %s18010_s9, 5 }
  0x1a   : > { %s18020_s13 = scalar_lea.vmem %s22771_s1, %s15534_s10  ;;  %s21686_s20 = scalar_lea.vmem %s22770_s0, %s15533_s11 }
  0x1b   : > { %v17416_v8 = vld [vmem:[%s18020_s13 + $0x4] ss:$8 sps:$4 sm:$0xff]   ;;  %v17420_v10 = vld [vmem:[%s18020_s13] ss:$8 sps:$4 sm:$0xff]   ;;  %v17422_v12 = vld [vmem:[%s18020_s13 + $0x14] ss:$8 sps:$4 sm:$0xff]  }
  0x1c   : > { %v17418_v9 = vld [vmem:[%s18020_s13 + $0x304] ss:$8 sps:$4 sm:$0xff]   ;;  %7909 = vmatprep.subr.bf16.mxu1 %v17416_v8  ;;  %v17421_v11 = vld [vmem:[%s18020_s13 + $0x300] ss:$8 sps:$4 sm:$0xff]   ;;  %v17424_v13 = vld [vmem:[%s18020_s13 + $0x314] ss:$8 sps:$4 sm:$0xff]  }
  0x1d   : > { %9928 = vmatprep.subr.bf16.mxu0 %v17418_v9  ;;  %7910 = vmatpush1.bf16.msra.mxu1 %v17420_v10  ;;  %v17426_v14 = vld [vmem:[%s18020_s13 + $0x10] ss:$8 sps:$4 sm:$0xff]   ;;  %v17428_v16 = vld [vmem:[%s18020_s13 + $0x24] ss:$8 sps:$4 sm:$0xff]   ;;  %v17432_v18 = vld [vmem:[%s18020_s13 + $0x20] ss:$8 sps:$4 sm:$0xff]  }
  0x1e   : > { %9929 = vmatpush1.bf16.msra.mxu0 %v17421_v11  ;;  %7911 = vmatprep.subr.bf16.mxu1 %v17422_v12  ;;  %v17427_v15 = vld [vmem:[%s18020_s13 + $0x310] ss:$8 sps:$4 sm:$0xff]   ;;  %v17430_v17 = vld [vmem:[%s18020_s13 + $0x324] ss:$8 sps:$4 sm:$0xff]   ;;  %v17433_v19 = vld [vmem:[%s18020_s13 + $0x320] ss:$8 sps:$4 sm:$0xff]  }
  0x1f   : > { %9930 = vmatprep.subr.bf16.mxu0 %v17424_v13  ;;  %v17434_v20 = vld [vmem:[%s18020_s13 + $0x34] ss:$8 sps:$4 sm:$0xff]   ;;  %v17438_v22 = vld [vmem:[%s18020_s13 + $0x30] ss:$8 sps:$4 sm:$0xff]   ;;  %v17440_v24 = vld [vmem:[%s18020_s13 + $0x44] ss:$8 sps:$4 sm:$0xff]  }
  0x20   : > { %v17436_v21 = vld [vmem:[%s18020_s13 + $0x334] ss:$8 sps:$4 sm:$0xff]   ;;  %v17439_v23 = vld [vmem:[%s18020_s13 + $0x330] ss:$8 sps:$4 sm:$0xff]   ;;  %v17442_v25 = vld [vmem:[%s18020_s13 + $0x344] ss:$8 sps:$4 sm:$0xff]  }
  0x21   : > { %7912 = vmatpush1.bf16.msra.mxu1 %v17426_v14  ;;  %v17444_v26 = vld [vmem:[%s18020_s13 + $0x40] ss:$8 sps:$4 sm:$0xff]   ;;  %v17446_v28 = vld [vmem:[%s18020_s13 + $0x54] ss:$8 sps:$4 sm:$0xff]   ;;  %v17450_v30 = vld [vmem:[%s18020_s13 + $0x50] ss:$8 sps:$4 sm:$0xff]  }
  0x22   : > { %9931 = vmatpush1.bf16.msra.mxu0 %v17427_v15  ;;  %7913 = vmatprep.subr.bf16.mxu1 %v17428_v16  ;;  %v17445_v27 = vld [vmem:[%s18020_s13 + $0x340] ss:$8 sps:$4 sm:$0xff]   ;;  %v17448_v29 = vld [vmem:[%s18020_s13 + $0x354] ss:$8 sps:$4 sm:$0xff]   ;;  %v17451_v31 = vld [vmem:[%s18020_s13 + $0x350] ss:$8 sps:$4 sm:$0xff]  }
  0x23   : > { %9932 = vmatprep.subr.bf16.mxu0 %v17430_v17  ;;  %v17452_v32 = vld [vmem:[%s18020_s13 + $0x64] ss:$8 sps:$4 sm:$0xff]   ;;  %v17456_v34 = vld [vmem:[%s18020_s13 + $0x60] ss:$8 sps:$4 sm:$0xff]   ;;  %v17458_v36 = vld [vmem:[%s18020_s13 + $0x74] ss:$8 sps:$4 sm:$0xff]  }
  0x24   : > { %v17454_v33 = vld [vmem:[%s18020_s13 + $0x364] ss:$8 sps:$4 sm:$0xff]   ;;  %v17457_v35 = vld [vmem:[%s18020_s13 + $0x360] ss:$8 sps:$4 sm:$0xff]   ;;  %v17460_v37 = vld [vmem:[%s18020_s13 + $0x374] ss:$8 sps:$4 sm:$0xff]  }
  0x25   : > { %7914 = vmatpush1.bf16.msra.mxu1 %v17432_v18  ;;  %v17462_v38 = vld [vmem:[%s18020_s13 + $0x70] ss:$8 sps:$4 sm:$0xff]   ;;  %v17464_v40 = vld [vmem:[%s18020_s13 + $0x84] ss:$8 sps:$4 sm:$0xff]   ;;  %v17468_v42 = vld [vmem:[%s18020_s13 + $0x80] ss:$8 sps:$4 sm:$0xff]  }
  0x26   : > { %9933 = vmatpush1.bf16.msra.mxu0 %v17433_v19  ;;  %7915 = vmatprep.subr.bf16.mxu1 %v17434_v20  ;;  %v17463_v39 = vld [vmem:[%s18020_s13 + $0x370] ss:$8 sps:$4 sm:$0xff]   ;;  %v17466_v41 = vld [vmem:[%s18020_s13 + $0x384] ss:$8 sps:$4 sm:$0xff]   ;;  %v17469_v43 = vld [vmem:[%s18020_s13 + $0x380] ss:$8 sps:$4 sm:$0xff]  }
  0x27   : > { %9934 = vmatprep.subr.bf16.mxu0 %v17436_v21  ;;  %v17470_v44 = vld [vmem:[%s18020_s13 + $0x94] ss:$8 sps:$4 sm:$0xff]   ;;  %v17474_v46 = vld [vmem:[%s18020_s13 + $0x90] ss:$8 sps:$4 sm:$0xff]   ;;  %v17476_v48 = vld [vmem:[%s18020_s13 + $0xa4] ss:$8 sps:$4 sm:$0xff]  }
  0x28   : > { %v17472_v45 = vld [vmem:[%s18020_s13 + $0x394] ss:$8 sps:$4 sm:$0xff]   ;;  %v17475_v47 = vld [vmem:[%s18020_s13 + $0x390] ss:$8 sps:$4 sm:$0xff]   ;;  %v17478_v49 = vld [vmem:[%s18020_s13 + $0x3a4] ss:$8 sps:$4 sm:$0xff]  }
  0x29   : > { %7916 = vmatpush1.bf16.msra.mxu1 %v17438_v22  ;;  %v17480_v50 = vld [vmem:[%s18020_s13 + $0xa0] ss:$8 sps:$4 sm:$0xff]   ;;  %v17482_v52 = vld [vmem:[%s18020_s13 + $0xb4] ss:$8 sps:$4 sm:$0xff]   ;;  %v17486_v54 = vld [vmem:[%s18020_s13 + $0xb0] ss:$8 sps:$4 sm:$0xff]  }
  0x2a   : > { %9935 = vmatpush1.bf16.msra.mxu0 %v17439_v23  ;;  %7917 = vmatprep.subr.bf16.mxu1 %v17440_v24  ;;  %v17481_v51 = vld [vmem:[%s18020_s13 + $0x3a0] ss:$8 sps:$4 sm:$0xff]   ;;  %v17484_v53 = vld [vmem:[%s18020_s13 + $0x3b4] ss:$8 sps:$4 sm:$0xff]   ;;  %v17487_v55 = vld [vmem:[%s18020_s13 + $0x3b0] ss:$8 sps:$4 sm:$0xff]  }
  0x2b   : > { %9936 = vmatprep.subr.bf16.mxu0 %v17442_v25  ;;  %v17488_v56 = vld [vmem:[%s18020_s13 + $0xc4] ss:$8 sps:$4 sm:$0xff]   ;;  %v17492_v58 = vld [vmem:[%s18020_s13 + $0xc0] ss:$8 sps:$4 sm:$0xff]   ;;  %v17494_v60 = vld [vmem:[%s18020_s13 + $0xd4] ss:$8 sps:$4 sm:$0xff]  }
  0x2c   : > { %v17490_v57 = vld [vmem:[%s18020_s13 + $0x3c4] ss:$8 sps:$4 sm:$0xff]   ;;  %v17493_v59 = vld [vmem:[%s18020_s13 + $0x3c0] ss:$8 sps:$4 sm:$0xff]   ;;  %v17496_v61 = vld [vmem:[%s18020_s13 + $0x3d4] ss:$8 sps:$4 sm:$0xff]  }
  0x2d   : > { %7918 = vmatpush1.bf16.msra.mxu1 %v17444_v26  ;;  %v17498_v62 = vld [vmem:[%s18020_s13 + $0xd0] ss:$8 sps:$4 sm:$0xff]   ;;  %v17500_v4 = vld [vmem:[%s18020_s13 + $0xe4] ss:$8 sps:$4 sm:$0xff]   ;;  %v17504_v8 = vld [vmem:[%s18020_s13 + $0xe0] ss:$8 sps:$4 sm:$0xff]  }
  0x2e   : > { %9937 = vmatpush1.bf16.msra.mxu0 %v17445_v27  ;;  %7919 = vmatprep.subr.bf16.mxu1 %v17446_v28  ;;  %v17499_v63 = vld [vmem:[%s18020_s13 + $0x3d0] ss:$8 sps:$4 sm:$0xff]   ;;  %v17502_v7 = vld [vmem:[%s18020_s13 + $0x3e4] ss:$8 sps:$4 sm:$0xff]   ;;  %v17505_v9 = vld [vmem:[%s18020_s13 + $0x3e0] ss:$8 sps:$4 sm:$0xff]   ;;  %v14275_v27 = vcombine.high %v264_v0, %v272_v2 }
  0x2f   : > { %9938 = vmatprep.subr.bf16.mxu0 %v17448_v29  ;;  %v17506_v10 = vld [vmem:[%s18020_s13 + $0xf4] ss:$8 sps:$4 sm:$0xff]   ;;  %v17510_v12 = vld [vmem:[%s18020_s13 + $0xf0] ss:$8 sps:$4 sm:$0xff]   ;;  %v17514_v14 = vld [vmem:[%s18020_s13 + $0x404] ss:$8 sps:$4 sm:$0xff]  }
  0x30   : > { %v17508_v11 = vld [vmem:[%s18020_s13 + $0x3f4] ss:$8 sps:$4 sm:$0xff]   ;;  %v17511_v13 = vld [vmem:[%s18020_s13 + $0x3f0] ss:$8 sps:$4 sm:$0xff]   ;;  %v245_v15 = vld [vmem:[%s22772_s2 + $0x80] sm:$0xff]  ;;  %s15535_s29 = sshll.u32 %s18010_s9, 6 }
  0x31   : > { %7920 = vmatpush1.bf16.msra.mxu1 %v17450_v30  ;;  %v253_v16 = vld [vmem:[%s22772_s2 + $0xc0] sm:$0xff]  ;;  %v248_v17 = vld [vmem:[%s22772_s2 + $0x98] sm:$0xff]  ;;  %s21711_s5 = scalar_lea.vmem %s22774_s4, %s15535_s29  ;;  %s17852_s19 = scalar_lea.vmem %s17851_s28, 512 }
  0x32   : > { %9939 = vmatpush1.bf16.msra.mxu0 %v17451_v31  ;;  %7921 = vmatprep.subr.bf16.mxu1 %v17452_v32  ;;  %v256_v18 = vld [vmem:[%s22772_s2 + $0xd8] sm:$0xff]  ;;  %v17512_v19 = vld [vmem:[%s18020_s13 + $0x400] ss:$8 sps:$4 sm:$0xff]   ;;  %v14253_v20 = vcombine.high %v245_v15, %v253_v16  ;;  %v14252_v5 = vcombine.low %v245_v15, %v253_v16 }
  0x33   : > { %9940 = vmatprep.subr.bf16.mxu0 %v17454_v33  ;;  %v14259_v21 = vcombine.high %v248_v17, %v256_v18  ;;  %v17517_v22 = vld [vmem:[%s18020_s13 + $0x414] ss:$8 sps:$4 sm:$0xff]   ;;  %v261_v23 = vld [vmem:[%s22772_s2 + $0x100] sm:$0xff]  ;;  %v17515_v1 = vld [vmem:[%s18020_s13 + $0x410] ss:$8 sps:$4 sm:$0xff]  }
  0x34   : > { %v269_v24 = vld [vmem:[%s22772_s2 + $0x140] sm:$0xff]  ;;  %v17523_v28 = vld [vmem:[%s18020_s13 + $0x434] ss:$8 sps:$4 sm:$0xff]   ;;  %v17521_v33 = vld [vmem:[%s18020_s13 + $0x430] ss:$8 sps:$4 sm:$0xff]  }
  0x35   : > { %7922 = vmatpush1.bf16.msra.mxu1 %v17456_v34  ;;  %v17518_v25 = vld [vmem:[%s18020_s13 + $0x420] ss:$8 sps:$4 sm:$0xff]   ;;  %v14269_v26 = vcombine.high %v261_v23, %v269_v24  ;;  %v280_v31 = vld [vmem:[%s22772_s2 + $0x198] sm:$0xff]  ;;  %v17526_v34 = vld [vmem:[%s18020_s13 + $0x444] ss:$8 sps:$4 sm:$0xff]  }
  0x36   : > { %9941 = vmatpush1.bf16.msra.mxu0 %v17457_v35  ;;  %7923 = vmatprep.subr.bf16.mxu1 %v17458_v36  ;;  %v277_v29 = vld [vmem:[%s22772_s2 + $0x180] sm:$0xff]  ;;  %v288_v32 = vld [vmem:[%s22772_s2 + $0x1d8] sm:$0xff]  ;;  %v14268_v35 = vcombine.low %v261_v23, %v269_v24  ;;  %v14274_v36 = vcombine.low %v264_v0, %v272_v2 }
  0x37   : > { %9942 = vmatprep.subr.bf16.mxu0 %v17460_v37  ;;  %v285_v30 = vld [vmem:[%s22772_s2 + $0x1c0] sm:$0xff]  ;;  %v352_v15 = vld [vmem:[%s22772_s2 + $0x3d8] sm:$0xff] }
  0x38   : > { %v17524_v37 = vld [vmem:[%s18020_s13 + $0x440] ss:$8 sps:$4 sm:$0xff]   ;;  %v360_v24 = vld [vmem:[%s22772_s2 + $0x418] sm:$0xff] }
  0x39   : > { %7924 = vmatpush1.bf16.msra.mxu1 %v17462_v38  ;;  %v14285_v38 = vcombine.high %v277_v29, %v285_v30  ;;  %v365_v23 = vld [vmem:[%s22772_s2 + $0x440] sm:$0xff]  ;;  %v368_v0 = vld [vmem:[%s22772_s2 + $0x458] sm:$0xff] }
  0x3a   : > { %9943 = vmatpush1.bf16.msra.mxu0 %v17463_v39  ;;  %7925 = vmatprep.subr.bf16.mxu1 %v17464_v40  ;;  %v14291_v39 = vcombine.high %v280_v31, %v288_v32  ;;  %v17529_v40 = vld [vmem:[%s18020_s13 + $0x454] ss:$8 sps:$4 sm:$0xff]  }
  0x3b   : > { %9944 = vmatprep.subr.bf16.mxu0 %v17466_v41  ;;  %v293_v41 = vld [vmem:[%s22772_s2 + $0x200] sm:$0xff] }
  0x3d   : > { %7926 = vmatpush1.bf16.msra.mxu1 %v17468_v42  ;;  %v301_v42 = vld [vmem:[%s22772_s2 + $0x240] sm:$0xff] }
  0x3e   : > { %9945 = vmatpush1.bf16.msra.mxu0 %v17469_v43  ;;  %7927 = vmatprep.subr.bf16.mxu1 %v17470_v44  ;;  %v296_v43 = vld [vmem:[%s22772_s2 + $0x218] sm:$0xff] }
  0x3f   : > { %9946 = vmatprep.subr.bf16.mxu0 %v17472_v45  ;;  %v304_v44 = vld [vmem:[%s22772_s2 + $0x258] sm:$0xff] }
  0x40   : > { %v17527_v45 = vld [vmem:[%s18020_s13 + $0x450] ss:$8 sps:$4 sm:$0xff]  }
  0x41   : > { %7928 = vmatpush1.bf16.msra.mxu1 %v17474_v46  ;;  %v17532_v46 = vld [vmem:[%s18020_s13 + $0x464] ss:$8 sps:$4 sm:$0xff]  }
  0x42   : > { %9947 = vmatpush1.bf16.msra.mxu0 %v17475_v47  ;;  %7929 = vmatprep.subr.bf16.mxu1 %v17476_v48  ;;  %v14284_v47 = vcombine.low %v277_v29, %v285_v30  ;;  %v14290_v48 = vcombine.low %v280_v31, %v288_v32  ;;  %v14370_v29 = vcombine.low %v360_v24, %v368_v0  ;;  %v389_v32 = vld [vmem:[%s22772_s2 + $0x500] sm:$0xff] }
  0x43   : > { %9948 = vmatprep.subr.bf16.mxu0 %v17478_v49  ;;  %v17530_v49 = vld [vmem:[%s18020_s13 + $0x460] ss:$8 sps:$4 sm:$0xff]  }
  0x45   : > { %7930 = vmatpush1.bf16.msra.mxu1 %v17480_v50  ;;  %v14301_v50 = vcombine.high %v293_v41, %v301_v42 }
  0x46   : > { %9949 = vmatpush1.bf16.msra.mxu0 %v17481_v51  ;;  %7931 = vmatprep.subr.bf16.mxu1 %v17482_v52  ;;  %v14307_v51 = vcombine.high %v296_v43, %v304_v44  ;;  %v309_v52 = vld [vmem:[%s22772_s2 + $0x280] sm:$0xff] }
  0x47   : > { %9950 = vmatprep.subr.bf16.mxu0 %v17484_v53  ;;  %v317_v53 = vld [vmem:[%s22772_s2 + $0x2c0] sm:$0xff] }
  0x49   : > { %7932 = vmatpush1.bf16.msra.mxu1 %v17486_v54  ;;  %v17535_v54 = vld [vmem:[%s18020_s13 + $0x474] ss:$8 sps:$4 sm:$0xff]  }
  0x4a   : > { %9951 = vmatpush1.bf16.msra.mxu0 %v17487_v55  ;;  %7933 = vmatprep.subr.bf16.mxu1 %v17488_v56  ;;  %v312_v55 = vld [vmem:[%s22772_s2 + $0x298] sm:$0xff] }
  0x4b   : > { %9952 = vmatprep.subr.bf16.mxu0 %v17490_v57  ;;  %v320_v56 = vld [vmem:[%s22772_s2 + $0x2d8] sm:$0xff] }
  0x4c   : > { %v17533_v57 = vld [vmem:[%s18020_s13 + $0x470] ss:$8 sps:$4 sm:$0xff]  }
  0x4d   : > { %7934 = vmatpush1.bf16.msra.mxu1 %v17492_v58  ;;  %v14300_v58 = vcombine.low %v293_v41, %v301_v42  ;;  %v17539_v41 = vld [vmem:[%s18020_s13 + $0x490] ss:$8 sps:$4 sm:$0xff]   ;;  %v17541_v42 = vld [vmem:[%s18020_s13 + $0x494] ss:$8 sps:$4 sm:$0xff]  }
  0x4e   : > { %9953 = vmatpush1.bf16.msra.mxu0 %v17493_v59  ;;  %7935 = vmatprep.subr.bf16.mxu1 %v17494_v60  ;;  %v14306_v59 = vcombine.low %v296_v43, %v304_v44  ;;  %v14317_v60 = vcombine.high %v309_v52, %v317_v53  ;;  %v413_v43 = vld [vmem:[%s22772_s2 + $0x5c0] sm:$0xff]  ;;  %v408_v44 = vld [vmem:[%s22772_s2 + $0x598] sm:$0xff] }
  0x4f   : > { %9954 = vmatprep.subr.bf16.mxu0 %v17496_v61  ;;  %v14323_v61 = vcombine.high %v312_v55, %v320_v56 }
  0x51   : > { %7936 = vmatpush1.bf16.msra.mxu1 %v17498_v62  ;;  %v325_v62 = vld [vmem:[%s22772_s2 + $0x300] sm:$0xff] }
  0x52   : > { %9955 = vmatpush1.bf16.msra.mxu0 %v17499_v63  ;;  %7937 = vmatprep.subr.bf16.mxu1 %v17500_v4  ;;  %v333_v63 = vld [vmem:[%s22772_s2 + $0x340] sm:$0xff]  ;;  %v328_v4 = vld [vmem:[%s22772_s2 + $0x318] sm:$0xff] }
  0x53   : > { %9956 = vmatprep.subr.bf16.mxu0 %v17502_v7  ;;  %v336_v7 = vld [vmem:[%s22772_s2 + $0x358] sm:$0xff]  ;;  %v14332_v16 = vcombine.low %v325_v62, %v333_v63 }
  0x55   : > { %7938 = vmatpush1.bf16.msra.mxu1 %v17504_v8  ;;  %v14316_v8 = vcombine.low %v309_v52, %v317_v53  ;;  %v424_v52 = vld [vmem:[%s22772_s2 + $0x618] sm:$0xff] }
  0x56   : > { %9957 = vmatpush1.bf16.msra.mxu0 %v17505_v9  ;;  %7939 = vmatprep.subr.bf16.mxu1 %v17506_v10  ;;  %v14322_v9 = vcombine.low %v312_v55, %v320_v56  ;;  %v14333_v10 = vcombine.high %v325_v62, %v333_v63  ;;  %v432_v53 = vld [vmem:[%s22772_s2 + $0x658] sm:$0xff] }
  0x57   : > { %9958 = vmatprep.subr.bf16.mxu0 %v17508_v11  ;;  %v14339_v11 = vcombine.high %v328_v4, %v336_v7  ;;  %v14434_v63 = vcombine.low %v424_v52, %v432_v53 }
  0x59   : > { %7940 = vmatpush1.bf16.msra.mxu1 %v17510_v12  ;;  %v341_v12 = vld [vmem:[%s22772_s2 + $0x380] sm:$0xff] }
  0x5a   : > { %9959 = vmatpush1.bf16.msra.mxu0 %v17511_v13  ;;  %v349_v13 = vld [vmem:[%s22772_s2 + $0x3c0] sm:$0xff] }
  0x5b   : > { %10601 = vmatprep.subr.bf16.mxu0 %v17514_v14  ;;  %v344_v14 = vld [vmem:[%s22772_s2 + $0x398] sm:$0xff] }
  0x5c   : > { %7942 = vmatmul.mubr.bf16.vlgmr.msra.gmra.mrb[0].mxu1 %v14236_v3  ;;  %v17520_v3 = vld [vmem:[%s18020_s13 + $0x424] ss:$8 sps:$4 sm:$0xff]   ;;  %v14354_v2 = vcombine.low %v344_v14, %v352_v15 }
  0x5d   : > { %9961 = vmatmul.mubr.bf16.vlgmr.msra.gmra.mrb[0].mxu0 %v14242_v6  ;;  %7951 = vmatprep.mubr.bf16.mxu1 %v14253_v20  ;;  %v14258_v6 = vcombine.low %v248_v17, %v256_v18  ;;  %v14338_v17 = vcombine.low %v328_v4, %v336_v7  ;;  %v14349_v18 = vcombine.high %v341_v12, %v349_v13  ;;  %v357_v20 = vld [vmem:[%s22772_s2 + $0x400] sm:$0xff] }
  0x5e   : > { %10602 = vmatpush1.bf16.msra.mxu0 %v17512_v19  ;;  %9970 = vmatprep.mubr.bf16.mxu0 %v14259_v21  ;;  %v14355_v19 = vcombine.high %v344_v14, %v352_v15  ;;  %v17536_v21 = vld [vmem:[%s18020_s13 + $0x480] ss:$8 sps:$4 sm:$0xff]  }
  0x5f   : > { %10603 = vmatprep.subr.bf16.mxu0 %v17517_v22  ;;  %v17538_v22 = vld [vmem:[%s18020_s13 + $0x484] ss:$8 sps:$4 sm:$0xff]  }
  0x62   : > { %10604 = vmatpush1.bf16.msra.mxu0 %v17515_v1  ;;  %v14348_v1 = vcombine.low %v341_v12, %v349_v13  ;;  %v456_v12 = vld [vmem:[%s22772_s2 + $0x718] sm:$0xff] }
  0x63   : > { %10605 = vmatprep.subr.bf16.mxu0 %v17520_v3  ;;  %v14365_v3 = vcombine.high %v357_v20, %v365_v23  ;;  %v464_v13 = vld [vmem:[%s22772_s2 + $0x758] sm:$0xff] }
  0x64   : > { %7952 = vmatmul.mubr.bf16.gmra.mrb[4].mxu1 %v14252_v5  ;;  %v14371_v5 = vcombine.high %v360_v24, %v368_v0 }
  0x65   : > { %9971 = vmatmul.mubr.bf16.gmra.mrb[4].mxu0 %v14258_v6  ;;  %7961 = vmatprep.mubr.bf16.mxu1 %v14269_v26  ;;  %v373_v6 = vld [vmem:[%s22772_s2 + $0x480] sm:$0xff]  ;;  %v376_v26 = vld [vmem:[%s22772_s2 + $0x498] sm:$0xff] }
  0x66   : > { %9980 = vmatprep.mubr.bf16.mxu0 %v14275_v27  ;;  %10606 = vmatpush1.bf16.msra.mxu0 %v17518_v25  ;;  %v381_v25 = vld [vmem:[%s22772_s2 + $0x4c0] sm:$0xff]  ;;  %v384_v27 = vld [vmem:[%s22772_s2 + $0x4d8] sm:$0xff] }
  0x67   : > { %10607 = vmatprep.subr.bf16.mxu0 %v17523_v28  ;;  %v14364_v28 = vcombine.low %v357_v20, %v365_v23  ;;  %v14381_v30 = vcombine.high %v373_v6, %v381_v25  ;;  %v14387_v31 = vcombine.high %v376_v26, %v384_v27  ;;  %v472_v20 = vld [vmem:[%s22772_s2 + $0x798] sm:$0xff]  ;;  %v14466_v23 = vcombine.low %v456_v12, %v464_v13 }
  0x6a   : > { %10608 = vmatpush1.bf16.msra.mxu0 %v17521_v33  ;;  %v397_v33 = vld [vmem:[%s22772_s2 + $0x540] sm:$0xff] }
  0x6b   : > { %10609 = vmatprep.subr.bf16.mxu0 %v17526_v34  ;;  %v392_v34 = vld [vmem:[%s22772_s2 + $0x518] sm:$0xff] }
  0x6c   : > { %7962 = vmatmul.mubr.bf16.gmra.mrb[8].mxu1 %v14268_v35  ;;  %v400_v35 = vld [vmem:[%s22772_s2 + $0x558] sm:$0xff] }
  0x6d   : > { %9981 = vmatmul.mubr.bf16.gmra.mrb[8].mxu0 %v14274_v36  ;;  %7971 = vmatprep.mubr.bf16.mxu1 %v14285_v38  ;;  %v14380_v36 = vcombine.low %v373_v6, %v381_v25  ;;  %v14397_v38 = vcombine.high %v389_v32, %v397_v33 }
  0x6e   : > { %9990 = vmatprep.mubr.bf16.mxu0 %v14291_v39  ;;  %10610 = vmatpush1.bf16.msra.mxu0 %v17524_v37  ;;  %v14386_v37 = vcombine.low %v376_v26, %v384_v27  ;;  %v14403_v39 = vcombine.high %v392_v34, %v400_v35 }
  0x6f   : > { %10611 = vmatprep.subr.bf16.mxu0 %v17529_v40  ;;  %v405_v40 = vld [vmem:[%s22772_s2 + $0x580] sm:$0xff] }
  0x72   : > { %10612 = vmatpush1.bf16.msra.mxu0 %v17527_v45  ;;  %v416_v45 = vld [vmem:[%s22772_s2 + $0x5d8] sm:$0xff] }
  0x73   : > { %10613 = vmatprep.subr.bf16.mxu0 %v17532_v46  ;;  %v14396_v46 = vcombine.low %v389_v32, %v397_v33  ;;  %v14418_v55 = vcombine.low %v408_v44, %v416_v45  ;;  %v504_v32 = vld [vmem:[%s22772_s2 + $0x898] sm:$0xff] }
  0x74   : > { %7972 = vmatmul.mubr.bf16.gmra.mrb[12].mxu1 %v14284_v47  ;;  %v14402_v47 = vcombine.low %v392_v34, %v400_v35  ;;  %v512_v33 = vld [vmem:[%s22772_s2 + $0x8d8] sm:$0xff] }
  0x75   : > { %9991 = vmatmul.mubr.bf16.gmra.mrb[12].mxu0 %v14290_v48  ;;  %7981 = vmatprep.mubr.bf16.mxu1 %v14301_v50  ;;  %v14413_v48 = vcombine.high %v405_v40, %v413_v43  ;;  %v421_v50 = vld [vmem:[%s22772_s2 + $0x600] sm:$0xff] }
  0x76   : > { %10000 = vmatprep.mubr.bf16.mxu0 %v14307_v51  ;;  %10614 = vmatpush1.bf16.msra.mxu0 %v17530_v49  ;;  %v14419_v49 = vcombine.high %v408_v44, %v416_v45  ;;  %v429_v51 = vld [vmem:[%s22772_s2 + $0x640] sm:$0xff] }
  0x77   : > { %10615 = vmatprep.subr.bf16.mxu0 %v17535_v54  ;;  %v14412_v54 = vcombine.low %v405_v40, %v413_v43  ;;  %v14429_v56 = vcombine.high %v421_v50, %v429_v51  ;;  %v14428_v62 = vcombine.low %v421_v50, %v429_v51  ;;  %v520_v40 = vld [vmem:[%s22772_s2 + $0x918] sm:$0xff]  ;;  %v14514_v43 = vcombine.low %v504_v32, %v512_v33 }
  0x78   : > { %v536_v50 = vld [vmem:[%s22772_s2 + $0x998] sm:$0xff] }
  0x79   : > { %v544_v51 = vld [vmem:[%s22772_s2 + $0x9d8] sm:$0xff] }
  0x7a   : > { %10616 = vmatpush1.bf16.msra.mxu0 %v17533_v57  ;;  %v14435_v57 = vcombine.high %v424_v52, %v432_v53 }
  0x7b   : > { %10617 = vmatprep.subr.bf16.mxu0 %v17538_v22 }
  0x7c   : > { %7982 = vmatmul.mubr.bf16.gmra.mrb[16].mxu1 %v14300_v58  ;;  %v437_v58 = vld [vmem:[%s22772_s2 + $0x680] sm:$0xff] }
  0x7d   : > { %10001 = vmatmul.mubr.bf16.gmra.mrb[16].mxu0 %v14306_v59  ;;  %7991 = vmatprep.mubr.bf16.mxu1 %v14317_v60  ;;  %v445_v59 = vld [vmem:[%s22772_s2 + $0x6c0] sm:$0xff]  ;;  %v440_v60 = vld [vmem:[%s22772_s2 + $0x698] sm:$0xff] }
  0x7e   : > { %10010 = vmatprep.mubr.bf16.mxu0 %v14323_v61  ;;  %10618 = vmatpush1.bf16.msra.mxu0 %v17536_v21  ;;  %v448_v61 = vld [vmem:[%s22772_s2 + $0x6d8] sm:$0xff]  ;;  %v14445_v4 = vcombine.high %v437_v58, %v445_v59  ;;  %v14444_v14 = vcombine.low %v437_v58, %v445_v59 }
  0x7f   : > { %10619 = vmatprep.subr.bf16.mxu0 %v17541_v42  ;;  %v14451_v7 = vcombine.high %v440_v60, %v448_v61  ;;  %v14450_v15 = vcombine.low %v440_v60, %v448_v61  ;;  %v480_v21 = vld [vmem:[%s22772_s2 + $0x7d8] sm:$0xff]  ;;  %v14546_v61 = vcombine.low %v536_v50, %v544_v51 }
  0x80   : > { %v14483_v0 = vcombine.high %v472_v20, %v480_v21  ;;  %v14482_v25 = vcombine.low %v472_v20, %v480_v21  ;;  %v552_v58 = vld [vmem:[%s22772_s2 + $0xa18] sm:$0xff] }
  0x81   : > { %v560_v59 = vld [vmem:[%s22772_s2 + $0xa58] sm:$0xff] }
  0x82   : > { %10620 = vmatpush1.bf16.msra.mxu0 %v17539_v41  ;;  %v528_v41 = vld [vmem:[%s22772_s2 + $0x958] sm:$0xff] }
  0x83   : > { %v14531_v45 = vcombine.high %v520_v40, %v528_v41  ;;  %v14530_v53 = vcombine.low %v520_v40, %v528_v41 }
  0x84   : > { %7992 = vmatmul.mubr.bf16.gmra.mrb[20].mxu1 %v14316_v8  ;;  %v17542_v8 = vld [vmem:[%s18020_s13 + $0x4a0] ss:$8 sps:$4 sm:$0xff]  }
  0x85   : > { %10011 = vmatmul.mubr.bf16.gmra.mrb[20].mxu0 %v14322_v9  ;;  %8001 = vmatprep.mubr.bf16.mxu1 %v14333_v10  ;;  %v17544_v9 = vld [vmem:[%s18020_s13 + $0x4a4] ss:$8 sps:$4 sm:$0xff]  }
  0x86   : > { %10020 = vmatprep.mubr.bf16.mxu0 %v14339_v11  ;;  %v453_v10 = vld [vmem:[%s22772_s2 + $0x700] sm:$0xff]  ;;  %10621 = vmatprep.subr.bf16.mxu0 %v17544_v9  ;;  %v576_v9 = vld [vmem:[%s22772_s2 + $0xad8] sm:$0xff] }
  0x87   : > { %v461_v11 = vld [vmem:[%s22772_s2 + $0x740] sm:$0xff]  ;;  %10622 = vmatpush1.bf16.msra.mxu0 %v17542_v8  ;;  %v568_v8 = vld [vmem:[%s22772_s2 + $0xa98] sm:$0xff] }
  0x88   : > { %v14460_v22 = vcombine.low %v453_v10, %v461_v11  ;;  %v14578_v21 = vcombine.low %v568_v8, %v576_v9 }
  0x8c   : > { %8002 = vmatmul.mubr.bf16.gmra.mrb[24].mxu1 %v14332_v16  ;;  %v14461_v16 = vcombine.high %v453_v10, %v461_v11  ;;  %v14562_v11 = vcombine.low %v552_v58, %v560_v59 }
  0x8d   : > { %10021 = vmatmul.mubr.bf16.gmra.mrb[24].mxu0 %v14338_v17  ;;  %8011 = vmatprep.mubr.bf16.mxu1 %v14349_v18  ;;  %v14467_v17 = vcombine.high %v456_v12, %v464_v13  ;;  %v469_v18 = vld [vmem:[%s22772_s2 + $0x780] sm:$0xff]  ;;  %v14579_v13 = vcombine.high %v568_v8, %v576_v9 }
  0x8e   : > { %10030 = vmatprep.mubr.bf16.mxu0 %v14355_v19  ;;  %v477_v19 = vld [vmem:[%s22772_s2 + $0x7c0] sm:$0xff] }
  0x8f   : > { %v14477_v24 = vcombine.high %v469_v18, %v477_v19  ;;  %v14476_v6 = vcombine.low %v469_v18, %v477_v19  ;;  %v584_v18 = vld [vmem:[%s22772_s2 + $0xb18] sm:$0xff] }
  0x90   : > { %v592_v19 = vld [vmem:[%s22772_s2 + $0xb58] sm:$0xff] }
  0x94   : > { %8012 = vmatmul.mubr.bf16.gmra.mrb[28].mxu1 %v14348_v1  ;;  %v485_v1 = vld [vmem:[%s22772_s2 + $0x800] sm:$0xff] }
  0x95   : > { %10031 = vmatmul.mubr.bf16.gmra.mrb[28].mxu0 %v14354_v2  ;;  %8021 = vmatprep.mubr.bf16.mxu1 %v14365_v3  ;;  %v493_v2 = vld [vmem:[%s22772_s2 + $0x840] sm:$0xff]  ;;  %v488_v3 = vld [vmem:[%s22772_s2 + $0x818] sm:$0xff] }
  0x96   : > { %10040 = vmatprep.mubr.bf16.mxu0 %v14371_v5  ;;  %v496_v5 = vld [vmem:[%s22772_s2 + $0x858] sm:$0xff]  ;;  %v14493_v26 = vcombine.high %v485_v1, %v493_v2  ;;  %v14492_v34 = vcombine.low %v485_v1, %v493_v2 }
  0x97   : > { %v14499_v27 = vcombine.high %v488_v3, %v496_v5  ;;  %v14498_v35 = vcombine.low %v488_v3, %v496_v5  ;;  %v600_v1 = vld [vmem:[%s22772_s2 + $0xb98] sm:$0xff]  ;;  %v14594_v5 = vcombine.low %v584_v18, %v592_v19 }
  0x98   : > { %v608_v2 = vld [vmem:[%s22772_s2 + $0xbd8] sm:$0xff] }
  0x9c   : > { %8022 = vmatmul.mubr.bf16.gmra.mrb[32].mxu1 %v14364_v28  ;;  %v17545_v28 = vld [vmem:[%s18020_s13 + $0x4b0] ss:$8 sps:$4 sm:$0xff]  }
  0x9d   : > { %10041 = vmatmul.mubr.bf16.gmra.mrb[32].mxu0 %v14370_v29  ;;  %8031 = vmatprep.mubr.bf16.mxu1 %v14381_v30  ;;  %v17547_v29 = vld [vmem:[%s18020_s13 + $0x4b4] ss:$8 sps:$4 sm:$0xff]   ;;  %v501_v30 = vld [vmem:[%s22772_s2 + $0x880] sm:$0xff] }
  0x9e   : > { %10050 = vmatprep.mubr.bf16.mxu0 %v14387_v31  ;;  %v509_v31 = vld [vmem:[%s22772_s2 + $0x8c0] sm:$0xff]  ;;  %10623 = vmatprep.subr.bf16.mxu0 %v17547_v29  ;;  %v624_v29 = vld [vmem:[%s22772_s2 + $0xc58] sm:$0xff] }
  0x9f   : > { %10624 = vmatpush1.bf16.msra.mxu0 %v17545_v28  ;;  %v14508_v42 = vcombine.low %v501_v30, %v509_v31  ;;  %v616_v28 = vld [vmem:[%s22772_s2 + $0xc18] sm:$0xff] }
  0xa0   : > { %v14626_v41 = vcombine.low %v616_v28, %v624_v29 }
  0xa4   : > { %8032 = vmatmul.mubr.bf16.gmra.mrb[36].mxu1 %v14380_v36  ;;  %v14509_v36 = vcombine.high %v501_v30, %v509_v31  ;;  %v14610_v31 = vcombine.low %v600_v1, %v608_v2 }
  0xa5   : > { %10051 = vmatmul.mubr.bf16.gmra.mrb[36].mxu0 %v14386_v37  ;;  %8041 = vmatprep.mubr.bf16.mxu1 %v14397_v38  ;;  %v14515_v37 = vcombine.high %v504_v32, %v512_v33  ;;  %v517_v38 = vld [vmem:[%s22772_s2 + $0x900] sm:$0xff]  ;;  %v14627_v33 = vcombine.high %v616_v28, %v624_v29 }
  0xa6   : > { %10060 = vmatprep.mubr.bf16.mxu0 %v14403_v39  ;;  %v525_v39 = vld [vmem:[%s22772_s2 + $0x940] sm:$0xff] }
  0xa7   : > { %v14525_v44 = vcombine.high %v517_v38, %v525_v39  ;;  %v14524_v52 = vcombine.low %v517_v38, %v525_v39  ;;  %v632_v38 = vld [vmem:[%s22772_s2 + $0xc98] sm:$0xff] }
  0xa8   : > { %v640_v39 = vld [vmem:[%s22772_s2 + $0xcd8] sm:$0xff] }
  0xac   : > { %8042 = vmatmul.mubr.bf16.gmra.mrb[40].mxu1 %v14396_v46  ;;  %v17548_v46 = vld [vmem:[%s18020_s13 + $0x4c0] ss:$8 sps:$4 sm:$0xff]  }
  0xad   : > { %10061 = vmatmul.mubr.bf16.gmra.mrb[40].mxu0 %v14402_v47  ;;  %8051 = vmatprep.mubr.bf16.mxu1 %v14413_v48  ;;  %v17550_v47 = vld [vmem:[%s18020_s13 + $0x4c4] ss:$8 sps:$4 sm:$0xff]  }
  0xae   : > { %10070 = vmatprep.mubr.bf16.mxu0 %v14419_v49  ;;  %v533_v48 = vld [vmem:[%s22772_s2 + $0x980] sm:$0xff]  ;;  %10625 = vmatprep.subr.bf16.mxu0 %v17550_v47  ;;  %v656_v47 = vld [vmem:[%s22772_s2 + $0xd58] sm:$0xff] }
  0xaf   : > { %v541_v49 = vld [vmem:[%s22772_s2 + $0x9c0] sm:$0xff]  ;;  %10626 = vmatpush1.bf16.msra.mxu0 %v17548_v46  ;;  %v648_v46 = vld [vmem:[%s22772_s2 + $0xd18] sm:$0xff] }
  0xb0   : > { %v14540_v60 = vcombine.low %v533_v48, %v541_v49 }
  0xb4   : > { %8052 = vmatmul.mubr.bf16.gmra.mrb[44].mxu1 %v14412_v54  ;;  %v14541_v54 = vcombine.high %v533_v48, %v541_v49  ;;  %v14642_v49 = vcombine.low %v632_v38, %v640_v39 }
  0xb5   : > { %10071 = vmatmul.mubr.bf16.gmra.mrb[44].mxu0 %v14418_v55  ;;  %8061 = vmatprep.mubr.bf16.mxu1 %v14429_v56  ;;  %v14547_v55 = vcombine.high %v536_v50, %v544_v51  ;;  %v549_v56 = vld [vmem:[%s22772_s2 + $0xa00] sm:$0xff]  ;;  %v14659_v51 = vcombine.high %v648_v46, %v656_v47 }
  0xb6   : > { %10080 = vmatprep.mubr.bf16.mxu0 %v14435_v57  ;;  %v557_v57 = vld [vmem:[%s22772_s2 + $0xa40] sm:$0xff] }
  0xb7   : > { %v14556_v10 = vcombine.low %v549_v56, %v557_v57 }
  0xbc   : > { %8062 = vmatmul.mubr.bf16.gmra.mrb[48].mxu1 %v14428_v62  ;;  %v14557_v62 = vcombine.high %v549_v56, %v557_v57  ;;  %v14658_v57 = vcombine.low %v648_v46, %v656_v47  ;;  %v773_v47 = vld [vmem:[%s22772_s2 + $0x1100] sm:$0xff] }
  0xbd   : > { %10081 = vmatmul.mubr.bf16.gmra.mrb[48].mxu0 %v14434_v63  ;;  %8071 = vmatprep.mubr.bf16.mxu1 %v14445_v4  ;;  %v14563_v63 = vcombine.high %v552_v58, %v560_v59  ;;  %v565_v4 = vld [vmem:[%s22772_s2 + $0xa80] sm:$0xff] }
  0xbe   : > { %10090 = vmatprep.mubr.bf16.mxu0 %v14451_v7  ;;  %v573_v7 = vld [vmem:[%s22772_s2 + $0xac0] sm:$0xff] }
  0xbf   : > { %v14573_v12 = vcombine.high %v565_v4, %v573_v7  ;;  %v14572_v20 = vcombine.low %v565_v4, %v573_v7  ;;  %v680_v4 = vld [vmem:[%s22772_s2 + $0xe18] sm:$0xff] }
  0xc0   : > { %v688_v7 = vld [vmem:[%s22772_s2 + $0xe58] sm:$0xff] }
  0xc4   : > { %8072 = vmatmul.mubr.bf16.gmra.mrb[52].mxu1 %v14444_v14  ;;  %v17551_v14 = vld [vmem:[%s18020_s13 + $0x4d0] ss:$8 sps:$4 sm:$0xff]  }
  0xc5   : > { %10091 = vmatmul.mubr.bf16.gmra.mrb[52].mxu0 %v14450_v15  ;;  %8081 = vmatprep.mubr.bf16.mxu1 %v14461_v16  ;;  %v17553_v15 = vld [vmem:[%s18020_s13 + $0x4d4] ss:$8 sps:$4 sm:$0xff]   ;;  %v581_v16 = vld [vmem:[%s22772_s2 + $0xb00] sm:$0xff] }
  0xc6   : > { %10100 = vmatprep.mubr.bf16.mxu0 %v14467_v17  ;;  %v589_v17 = vld [vmem:[%s22772_s2 + $0xb40] sm:$0xff]  ;;  %10627 = vmatprep.subr.bf16.mxu0 %v17553_v15  ;;  %v704_v15 = vld [vmem:[%s22772_s2 + $0xed8] sm:$0xff] }
  0xc7   : > { %10628 = vmatpush1.bf16.msra.mxu0 %v17551_v14  ;;  %v14588_v3 = vcombine.low %v581_v16, %v589_v17  ;;  %v696_v14 = vld [vmem:[%s22772_s2 + $0xe98] sm:$0xff] }
  0xcc   : > { %8082 = vmatmul.mubr.bf16.gmra.mrb[56].mxu1 %v14460_v22  ;;  %v14589_v22 = vcombine.high %v581_v16, %v589_v17  ;;  %v14690_v17 = vcombine.low %v680_v4, %v688_v7 }
  0xcd   : > { %10101 = vmatmul.mubr.bf16.gmra.mrb[56].mxu0 %v14466_v23  ;;  %8091 = vmatprep.mubr.bf16.mxu1 %v14477_v24  ;;  %v14595_v23 = vcombine.high %v584_v18, %v592_v19  ;;  %v597_v24 = vld [vmem:[%s22772_s2 + $0xb80] sm:$0xff]  ;;  %v14707_v19 = vcombine.high %v696_v14, %v704_v15 }
  0xce   : > { %10110 = vmatprep.mubr.bf16.mxu0 %v14483_v0  ;;  %v605_v0 = vld [vmem:[%s22772_s2 + $0xbc0] sm:$0xff] }
  0xcf   : > { %v14604_v30 = vcombine.low %v597_v24, %v605_v0 }
  0xd4   : > { %8092 = vmatmul.mubr.bf16.gmra.mrb[60].mxu1 %v14476_v6  ;;  %v14605_v6 = vcombine.high %v597_v24, %v605_v0  ;;  %v14706_v0 = vcombine.low %v696_v14, %v704_v15  ;;  %v829_v14 = vld [vmem:[%s22772_s2 + $0x12c0] sm:$0xff]  ;;  %v824_v15 = vld [vmem:[%s22772_s2 + $0x1298] sm:$0xff] }
  0xd5   : > { %10111 = vmatmul.mubr.bf16.gmra.mrb[60].mxu0 %v14482_v25  ;;  %8101 = vmatprep.mubr.bf16.mxu1 %v14493_v26  ;;  %v14611_v25 = vcombine.high %v600_v1, %v608_v2  ;;  %v613_v26 = vld [vmem:[%s22772_s2 + $0xc00] sm:$0xff] }
  0xd6   : > { %10120 = vmatprep.mubr.bf16.mxu0 %v14499_v27  ;;  %v621_v27 = vld [vmem:[%s22772_s2 + $0xc40] sm:$0xff] }
  0xd7   : > { %v14621_v32 = vcombine.high %v613_v26, %v621_v27  ;;  %v14620_v40 = vcombine.low %v613_v26, %v621_v27  ;;  %v736_v26 = vld [vmem:[%s22772_s2 + $0xfd8] sm:$0xff] }
  0xdc   : > { %8102 = vmatmul.mubr.bf16.gmra.mrb[64].mxu1 %v14492_v34  ;;  %v17554_v34 = vld [vmem:[%s18020_s13 + $0x4e0] ss:$8 sps:$4 sm:$0xff]  }
  0xdd   : > { %10121 = vmatmul.mubr.bf16.gmra.mrb[64].mxu0 %v14498_v35  ;;  %8111 = vmatprep.mubr.bf16.mxu1 %v14509_v36  ;;  %v17556_v35 = vld [vmem:[%s18020_s13 + $0x4e4] ss:$8 sps:$4 sm:$0xff]  }
  0xde   : > { %10130 = vmatprep.mubr.bf16.mxu0 %v14515_v37  ;;  %v629_v36 = vld [vmem:[%s22772_s2 + $0xc80] sm:$0xff]  ;;  %10629 = vmatprep.subr.bf16.mxu0 %v17556_v35 }
  0xdf   : > { %v637_v37 = vld [vmem:[%s22772_s2 + $0xcc0] sm:$0xff]  ;;  %10630 = vmatpush1.bf16.msra.mxu0 %v17554_v34  ;;  %v752_v34 = vld [vmem:[%s22772_s2 + $0x1058] sm:$0xff] }
  0xe0   : > { %v14636_v48 = vcombine.low %v629_v36, %v637_v37 }
  0xe4   : > { %8112 = vmatmul.mubr.bf16.gmra.mrb[68].mxu1 %v14508_v42  ;;  %v14637_v42 = vcombine.high %v629_v36, %v637_v37 }
  0xe5   : > { %10131 = vmatmul.mubr.bf16.gmra.mrb[68].mxu0 %v14514_v43  ;;  %8121 = vmatprep.mubr.bf16.mxu1 %v14525_v44  ;;  %v14643_v43 = vcombine.high %v632_v38, %v640_v39  ;;  %v645_v44 = vld [vmem:[%s22772_s2 + $0xd00] sm:$0xff] }
  0xe6   : > { %10140 = vmatprep.mubr.bf16.mxu0 %v14531_v45  ;;  %v653_v45 = vld [vmem:[%s22772_s2 + $0xd40] sm:$0xff] }
  0xe7   : > { %v14653_v50 = vcombine.high %v645_v44, %v653_v45  ;;  %v14652_v56 = vcombine.low %v645_v44, %v653_v45  ;;  %v757_v39 = vld [vmem:[%s22772_s2 + $0x1080] sm:$0xff] }
  0xec   : > { %8122 = vmatmul.mubr.bf16.gmra.mrb[72].mxu1 %v14524_v52  ;;  %v661_v52 = vld [vmem:[%s22772_s2 + $0xd80] sm:$0xff] }
  0xed   : > { %10141 = vmatmul.mubr.bf16.gmra.mrb[72].mxu0 %v14530_v53  ;;  %8131 = vmatprep.mubr.bf16.mxu1 %v14541_v54  ;;  %v669_v53 = vld [vmem:[%s22772_s2 + $0xdc0] sm:$0xff]  ;;  %v664_v54 = vld [vmem:[%s22772_s2 + $0xd98] sm:$0xff] }
  0xee   : > { %10150 = vmatprep.mubr.bf16.mxu0 %v14547_v55  ;;  %v672_v55 = vld [vmem:[%s22772_s2 + $0xdd8] sm:$0xff]  ;;  %v14669_v58 = vcombine.high %v661_v52, %v669_v53  ;;  %v14668_v8 = vcombine.low %v661_v52, %v669_v53 }
  0xef   : > { %v14675_v59 = vcombine.high %v664_v54, %v672_v55  ;;  %v14674_v9 = vcombine.low %v664_v54, %v672_v55  ;;  %v789_v55 = vld [vmem:[%s22772_s2 + $0x1180] sm:$0xff] }
  0xf4   : > { %8132 = vmatmul.mubr.bf16.gmra.mrb[76].mxu1 %v14540_v60  ;;  %v17557_v60 = vld [vmem:[%s18020_s13 + $0x4f0] ss:$8 sps:$4 sm:$0xff]  }
  0xf5   : > { %10151 = vmatmul.mubr.bf16.gmra.mrb[76].mxu0 %v14546_v61  ;;  %8141 = vmatprep.mubr.bf16.mxu1 %v14557_v62  ;;  %v17559_v61 = vld [vmem:[%s18020_s13 + $0x4f4] ss:$8 sps:$4 sm:$0xff]   ;;  %v677_v62 = vld [vmem:[%s22772_s2 + $0xe00] sm:$0xff] }
  0xf6   : > { %10160 = vmatprep.mubr.bf16.mxu0 %v14563_v63  ;;  %v685_v63 = vld [vmem:[%s22772_s2 + $0xe40] sm:$0xff]  ;;  %10631 = vmatprep.subr.bf16.mxu0 %v17559_v61 }
  0xf7   : > { %10632 = vmatpush1.bf16.msra.mxu0 %v17557_v60  ;;  %v14684_v16 = vcombine.low %v677_v62, %v685_v63 }
  0xfc   : > { %8142 = vmatmul.mubr.bf16.gmra.mrb[80].mxu1 %v14556_v10  ;;  %v14685_v10 = vcombine.high %v677_v62, %v685_v63  ;;  %v805_v63 = vld [vmem:[%s22772_s2 + $0x1200] sm:$0xff] }
  0xfd   : > { %10161 = vmatmul.mubr.bf16.gmra.mrb[80].mxu0 %v14562_v11  ;;  %8151 = vmatprep.mubr.bf16.mxu1 %v14573_v12  ;;  %v14691_v11 = vcombine.high %v680_v4, %v688_v7  ;;  %v693_v12 = vld [vmem:[%s22772_s2 + $0xe80] sm:$0xff]  ;;  %v808_v7 = vld [vmem:[%s22772_s2 + $0x1218] sm:$0xff] }
  0xfe   : > { %10170 = vmatprep.mubr.bf16.mxu0 %v14579_v13  ;;  %v701_v13 = vld [vmem:[%s22772_s2 + $0xec0] sm:$0xff] }
  0xff   : > { %v14701_v18 = vcombine.high %v693_v12, %v701_v13  ;;  %v14700_v24 = vcombine.low %v693_v12, %v701_v13  ;;  %v813_v4 = vld [vmem:[%s22772_s2 + $0x1240] sm:$0xff] }
 0x100   : > { %v821_v13 = vld [vmem:[%s22772_s2 + $0x1280] sm:$0xff] }
 0x104   : > { %8152 = vmatmul.mubr.bf16.gmra.mrb[84].mxu1 %v14572_v20  ;;  %v709_v20 = vld [vmem:[%s22772_s2 + $0xf00] sm:$0xff] }
 0x105   : > { %10171 = vmatmul.mubr.bf16.gmra.mrb[84].mxu0 %v14578_v21  ;;  %8161 = vmatprep.mubr.bf16.mxu1 %v14589_v22  ;;  %v717_v21 = vld [vmem:[%s22772_s2 + $0xf40] sm:$0xff]  ;;  %v712_v22 = vld [vmem:[%s22772_s2 + $0xf18] sm:$0xff] }
 0x106   : > { %10180 = vmatprep.mubr.bf16.mxu0 %v14595_v23  ;;  %v720_v23 = vld [vmem:[%s22772_s2 + $0xf58] sm:$0xff]  ;;  %v14717_v1 = vcombine.high %v709_v20, %v717_v21  ;;  %v14716_v27 = vcombine.low %v709_v20, %v717_v21  ;;  %v837_v21 = vld [vmem:[%s22772_s2 + $0x1300] sm:$0xff] }
 0x107   : > { %v14723_v2 = vcombine.high %v712_v22, %v720_v23  ;;  %v14722_v28 = vcombine.low %v712_v22, %v720_v23  ;;  %v845_v22 = vld [vmem:[%s22772_s2 + $0x1340] sm:$0xff]  ;;  %v840_v23 = vld [vmem:[%s22772_s2 + $0x1318] sm:$0xff] }
 0x10c   : > { %8162 = vmatmul.mubr.bf16.gmra.mrb[88].mxu1 %v14588_v3  ;;  %v17562_v3 = vld [vmem:[%s18020_s13 + $0x504] ss:$8 sps:$4 sm:$0xff]  }
 0x10d   : > { %10181 = vmatmul.mubr.bf16.gmra.mrb[88].mxu0 %v14594_v5  ;;  %8171 = vmatprep.mubr.bf16.mxu1 %v14605_v6  ;;  %v725_v5 = vld [vmem:[%s22772_s2 + $0xf80] sm:$0xff] }
 0x10e   : > { %10190 = vmatprep.mubr.bf16.mxu0 %v14611_v25  ;;  %v733_v6 = vld [vmem:[%s22772_s2 + $0xfc0] sm:$0xff]  ;;  %v728_v25 = vld [vmem:[%s22772_s2 + $0xf98] sm:$0xff]  ;;  %11274 = vmatprep.subr.bf16.mxu0 %v17562_v3 }
 0x10f   : > { %v14733_v29 = vcombine.high %v725_v5, %v733_v6  ;;  %v14732_v35 = vcombine.low %v725_v5, %v733_v6  ;;  %v14738_v36 = vcombine.low %v728_v25, %v736_v26  ;;  %v853_v5 = vld [vmem:[%s22772_s2 + $0x1380] sm:$0xff] }
 0x110   : > { %v861_v6 = vld [vmem:[%s22772_s2 + $0x13c0] sm:$0xff] }
 0x114   : > { %8172 = vmatmul.mubr.bf16.gmra.mrb[92].mxu1 %v14604_v30  ;;  %v14739_v30 = vcombine.high %v728_v25, %v736_v26  ;;  %v856_v25 = vld [vmem:[%s22772_s2 + $0x1398] sm:$0xff] }
 0x115   : > { %10191 = vmatmul.mubr.bf16.gmra.mrb[92].mxu0 %v14610_v31  ;;  %8181 = vmatprep.mubr.bf16.mxu1 %v14621_v32  ;;  %v741_v31 = vld [vmem:[%s22772_s2 + $0x1000] sm:$0xff]  ;;  %v864_v26 = vld [vmem:[%s22772_s2 + $0x13d8] sm:$0xff] }
 0x116   : > { %10200 = vmatprep.mubr.bf16.mxu0 %v14627_v33  ;;  %v749_v32 = vld [vmem:[%s22772_s2 + $0x1040] sm:$0xff]  ;;  %v744_v33 = vld [vmem:[%s22772_s2 + $0x1018] sm:$0xff] }
 0x117   : > { %v14749_v37 = vcombine.high %v741_v31, %v749_v32  ;;  %v14755_v38 = vcombine.high %v744_v33, %v752_v34  ;;  %v14754_v44 = vcombine.low %v744_v33, %v752_v34  ;;  %v872_v33 = vld [vmem:[%s22772_s2 + $0x1418] sm:$0xff] }
 0x118   : > { %v880_v34 = vld [vmem:[%s22772_s2 + $0x1458] sm:$0xff] }
 0x11c   : > { %8182 = vmatmul.mubr.bf16.gmra.mrb[96].mxu1 %v14620_v40  ;;  %v765_v40 = vld [vmem:[%s22772_s2 + $0x10c0] sm:$0xff] }
 0x11d   : > { %10201 = vmatmul.mubr.bf16.gmra.mrb[96].mxu0 %v14626_v41  ;;  %8191 = vmatprep.mubr.bf16.mxu1 %v14637_v42  ;;  %v760_v41 = vld [vmem:[%s22772_s2 + $0x1098] sm:$0xff]  ;;  %v14765_v45 = vcombine.high %v757_v39, %v765_v40 }
 0x11e   : > { %10210 = vmatprep.mubr.bf16.mxu0 %v14643_v43  ;;  %v768_v42 = vld [vmem:[%s22772_s2 + $0x10d8] sm:$0xff]  ;;  %v14748_v43 = vcombine.low %v741_v31, %v749_v32  ;;  %v869_v31 = vld [vmem:[%s22772_s2 + $0x1400] sm:$0xff] }
 0x11f   : > { %v14771_v46 = vcombine.high %v760_v41, %v768_v42  ;;  %v14770_v52 = vcombine.low %v760_v41, %v768_v42  ;;  %v877_v32 = vld [vmem:[%s22772_s2 + $0x1440] sm:$0xff]  ;;  %v888_v41 = vld [vmem:[%s22772_s2 + $0x1498] sm:$0xff] }
 0x120   : > { %v896_v42 = vld [vmem:[%s22772_s2 + $0x14d8] sm:$0xff] }
 0x124   : > { %8192 = vmatmul.mubr.bf16.gmra.mrb[100].mxu1 %v14636_v48  ;;  %v781_v48 = vld [vmem:[%s22772_s2 + $0x1140] sm:$0xff] }
 0x125   : > { %10211 = vmatmul.mubr.bf16.gmra.mrb[100].mxu0 %v14642_v49  ;;  %8201 = vmatprep.mubr.bf16.mxu1 %v14653_v50  ;;  %v776_v49 = vld [vmem:[%s22772_s2 + $0x1118] sm:$0xff]  ;;  %v14781_v53 = vcombine.high %v773_v47, %v781_v48 }
 0x126   : > { %10220 = vmatprep.mubr.bf16.mxu0 %v14659_v51  ;;  %v784_v50 = vld [vmem:[%s22772_s2 + $0x1158] sm:$0xff]  ;;  %v14764_v51 = vcombine.low %v757_v39, %v765_v40  ;;  %v885_v39 = vld [vmem:[%s22772_s2 + $0x1480] sm:$0xff] }
 0x127   : > { %v14787_v54 = vcombine.high %v776_v49, %v784_v50  ;;  %v14786_v60 = vcombine.low %v776_v49, %v784_v50  ;;  %v893_v40 = vld [vmem:[%s22772_s2 + $0x14c0] sm:$0xff]  ;;  %v17574_v49 = vld [vmem:[%s18020_s13 + $0x114] ss:$8 sps:$4 sm:$0xff]  }
 0x128   : > { %v901_v50 = vld [vmem:[%s22772_s2 + $0x1500] sm:$0xff] }
 0x12c   : > { %8202 = vmatmul.mubr.bf16.gmra.mrb[104].mxu1 %v14652_v56  ;;  %v797_v56 = vld [vmem:[%s22772_s2 + $0x11c0] sm:$0xff] }
 0x12d   : > { %10221 = vmatmul.mubr.bf16.gmra.mrb[104].mxu0 %v14658_v57  ;;  %8211 = vmatprep.mubr.bf16.mxu1 %v14669_v58  ;;  %v792_v57 = vld [vmem:[%s22772_s2 + $0x1198] sm:$0xff]  ;;  %v14797_v61 = vcombine.high %v789_v55, %v797_v56 }
 0x12e   : > { %10230 = vmatprep.mubr.bf16.mxu0 %v14675_v59  ;;  %v800_v58 = vld [vmem:[%s22772_s2 + $0x11d8] sm:$0xff]  ;;  %v14780_v59 = vcombine.low %v773_v47, %v781_v48  ;;  %v17571_v47 = vld [vmem:[%s18020_s13 + $0x104] ss:$8 sps:$4 sm:$0xff]   ;;  %v17569_v48 = vld [vmem:[%s18020_s13 + $0x100] ss:$8 sps:$4 sm:$0xff]  }
 0x12f   : > { %v14803_v62 = vcombine.high %v792_v57, %v800_v58  ;;  %8582 = vmatprep.subr.bf16.mxu1 %v17571_v47  ;;  %v17602_v47 = vld [vmem:[%s18020_s13 + $0x1a0] ss:$8 sps:$4 sm:$0xff]  }
 0x130   : > { %8583 = vmatpush1.bf16.msra.mxu1 %v17569_v48  ;;  %v989_v48 = vld [vmem:[%s22772_s2 + $0x17c0] sm:$0xff] }
 0x131   : > { %8584 = vmatprep.subr.bf16.mxu1 %v17574_v49  ;;  %v17563_v49 = vld [vmem:[%s18020_s13 + $0x510] ss:$8 sps:$4 sm:$0xff]  }
 0x134   : > { %8212 = vmatmul.mubr.bf16.gmra.mrb[108].mxu1 %v14668_v8  ;;  %v816_v8 = vld [vmem:[%s22772_s2 + $0x1258] sm:$0xff] }
 0x135   : > { %10231 = vmatmul.mubr.bf16.gmra.mrb[108].mxu0 %v14674_v9  ;;  %8221 = vmatprep.mubr.bf16.mxu1 %v14685_v10  ;;  %v14796_v9 = vcombine.low %v789_v55, %v797_v56  ;;  %v14802_v10 = vcombine.low %v792_v57, %v800_v58  ;;  %v14819_v12 = vcombine.high %v808_v7, %v816_v8 }
 0x136   : > { %10240 = vmatprep.mubr.bf16.mxu0 %v14691_v11  ;;  %v14813_v11 = vcombine.high %v805_v63, %v813_v4  ;;  %v14892_v55 = vcombine.low %v885_v39, %v893_v40  ;;  %v14898_v56 = vcombine.low %v888_v41, %v896_v42 }
 0x13c   : > { %8222 = vmatmul.mubr.bf16.gmra.mrb[112].mxu1 %v14684_v16  ;;  %v832_v16 = vld [vmem:[%s22772_s2 + $0x12d8] sm:$0xff] }
 0x13d   : > { %10241 = vmatmul.mubr.bf16.gmra.mrb[112].mxu0 %v14690_v17  ;;  %8231 = vmatprep.mubr.bf16.mxu1 %v14701_v18  ;;  %v14812_v17 = vcombine.low %v805_v63, %v813_v4  ;;  %v14818_v18 = vcombine.low %v808_v7, %v816_v8  ;;  %v14835_v20 = vcombine.high %v824_v15, %v832_v16  ;;  %v925_v63 = vld [vmem:[%s22772_s2 + $0x15c0] sm:$0xff]  ;;  %v920_v4 = vld [vmem:[%s22772_s2 + $0x1598] sm:$0xff] }
 0x13e   : > { %10250 = vmatprep.mubr.bf16.mxu0 %v14707_v19  ;;  %v14829_v19 = vcombine.high %v821_v13, %v829_v14  ;;  %v928_v7 = vld [vmem:[%s22772_s2 + $0x15d8] sm:$0xff] }
 0x13f   : > { %v17581_v8 = vld [vmem:[%s18020_s13 + $0x130] ss:$8 sps:$4 sm:$0xff]  }
 0x144   : > { %8232 = vmatmul.mubr.bf16.gmra.mrb[116].mxu1 %v14700_v24  ;;  %v848_v24 = vld [vmem:[%s22772_s2 + $0x1358] sm:$0xff] }
 0x145   : > { %10251 = vmatmul.mubr.bf16.gmra.mrb[116].mxu0 %v14706_v0  ;;  %8241 = vmatprep.mubr.bf16.mxu1 %v14717_v1  ;;  %v14828_v0 = vcombine.low %v821_v13, %v829_v14  ;;  %v14834_v1 = vcombine.low %v824_v15, %v832_v16  ;;  %v14851_v3 = vcombine.high %v840_v23, %v848_v24  ;;  %v17586_v13 = vld [vmem:[%s18020_s13 + $0x144] ss:$8 sps:$4 sm:$0xff]   ;;  %v17584_v14 = vld [vmem:[%s18020_s13 + $0x140] ss:$8 sps:$4 sm:$0xff]   ;;  %v17589_v15 = vld [vmem:[%s18020_s13 + $0x154] ss:$8 sps:$4 sm:$0xff]  }
 0x146   : > { %10260 = vmatprep.mubr.bf16.mxu0 %v14723_v2  ;;  %v14845_v2 = vcombine.high %v837_v21, %v845_v22  ;;  %v933_v16 = vld [vmem:[%s22772_s2 + $0x1600] sm:$0xff] }
 0x14c   : > { %8242 = vmatmul.mubr.bf16.gmra.mrb[120].mxu1 %v14716_v27  ;;  %v14844_v27 = vcombine.low %v837_v21, %v845_v22  ;;  %v14930_v22 = vcombine.low %v920_v4, %v928_v7 }
 0x14d   : > { %10261 = vmatmul.mubr.bf16.gmra.mrb[120].mxu0 %v14722_v28  ;;  %8251 = vmatprep.mubr.bf16.mxu1 %v14733_v29  ;;  %v14850_v28 = vcombine.low %v840_v23, %v848_v24  ;;  %v14861_v29 = vcombine.high %v853_v5, %v861_v6 }
 0x14e   : > { %10270 = vmatprep.mubr.bf16.mxu0 %v14739_v30  ;;  %v14867_v30 = vcombine.high %v856_v25, %v864_v26 }
 0x154   : > { %8252 = vmatmul.mubr.bf16.gmra.mrb[124].mxu1 %v14732_v35  ;;  %v14860_v35 = vcombine.low %v853_v5, %v861_v6  ;;  %v957_v5 = vld [vmem:[%s22772_s2 + $0x16c0] sm:$0xff] }
 0x155   : > { %10271 = vmatmul.mubr.bf16.gmra.mrb[124].mxu0 %v14738_v36  ;;  %8261 = vmatprep.mubr.bf16.mxu1 %v14749_v37  ;;  %v14866_v36 = vcombine.low %v856_v25, %v864_v26  ;;  %v14877_v37 = vcombine.high %v869_v31, %v877_v32  ;;  %v233_v6 = vld [vmem:[%s22772_s2 + $0x20] sm:$0xff]  ;;  %v17593_v26 = vld [vmem:[%s18020_s13 + $0x170] ss:$8 sps:$4 sm:$0xff]  }
 0x156   : > { %10280 = vmatprep.mubr.bf16.mxu0 %v14755_v38  ;;  %v14883_v38 = vcombine.high %v872_v33, %v880_v34  ;;  %v241_v25 = vld [vmem:[%s22772_s2 + $0x60] sm:$0xff] }
 0x15c   : > { %8262 = vmatmul.mubr.bf16.gmra.mrb[128].mxu1 %v14748_v43  ;;  %v14876_v43 = vcombine.low %v869_v31, %v877_v32  ;;  %v17598_v31 = vld [vmem:[%s18020_s13 + $0x184] ss:$8 sps:$4 sm:$0xff]   ;;  %v17596_v32 = vld [vmem:[%s18020_s13 + $0x180] ss:$8 sps:$4 sm:$0xff]  }
 0x15d   : > { %10281 = vmatmul.mubr.bf16.gmra.mrb[128].mxu0 %v14754_v44  ;;  %8271 = vmatprep.mubr.bf16.mxu1 %v14765_v45  ;;  %v14882_v44 = vcombine.low %v872_v33, %v880_v34  ;;  %v14893_v45 = vcombine.high %v885_v39, %v893_v40  ;;  %v17601_v33 = vld [vmem:[%s18020_s13 + $0x194] ss:$8 sps:$4 sm:$0xff]   ;;  %v965_v34 = vld [vmem:[%s22772_s2 + $0x1700] sm:$0xff]  ;;  %v14244_v39 = vcombine.low %v233_v6, %v241_v25 }
 0x15e   : > { %10290 = vmatprep.mubr.bf16.mxu0 %v14771_v46  ;;  %v14899_v46 = vcombine.high %v888_v41, %v896_v42  ;;  %v17560_v41 = vld [vmem:[%s18020_s13 + $0x500] ss:$8 sps:$4 sm:$0xff]  }
 0x164   : > { %8272 = vmatmul.mubr.bf16.gmra.mrb[132].mxu1 %v14764_v51  ;;  %v909_v51 = vld [vmem:[%s22772_s2 + $0x1540] sm:$0xff] }
 0x165   : > { %10291 = vmatmul.mubr.bf16.gmra.mrb[132].mxu0 %v14770_v52  ;;  %8281 = vmatprep.mubr.bf16.mxu1 %v14781_v53  ;;  %v904_v52 = vld [vmem:[%s22772_s2 + $0x1518] sm:$0xff]  ;;  %v14909_v57 = vcombine.high %v901_v50, %v909_v51 }
 0x166   : > { %10300 = vmatprep.mubr.bf16.mxu0 %v14787_v54  ;;  %v912_v53 = vld [vmem:[%s22772_s2 + $0x1558] sm:$0xff] }
 0x167   : > { %v17572_v54 = vld [vmem:[%s18020_s13 + $0x110] ss:$8 sps:$4 sm:$0xff]   ;;  %v14915_v58 = vcombine.high %v904_v52, %v912_v53 }
 0x168   : > { %8585 = vmatpush1.bf16.msra.mxu1 %v17572_v54 }
 0x16c   : > { %8282 = vmatmul.mubr.bf16.gmra.mrb[136].mxu1 %v14780_v59  ;;  %v17577_v59 = vld [vmem:[%s18020_s13 + $0x124] ss:$8 sps:$4 sm:$0xff]  }
 0x16d   : > { %10301 = vmatmul.mubr.bf16.gmra.mrb[136].mxu0 %v14786_v60  ;;  %8291 = vmatprep.mubr.bf16.mxu1 %v14797_v61  ;;  %v17575_v60 = vld [vmem:[%s18020_s13 + $0x120] ss:$8 sps:$4 sm:$0xff]  }
 0x16e   : > { %10310 = vmatprep.mubr.bf16.mxu0 %v14803_v62  ;;  %v917_v61 = vld [vmem:[%s22772_s2 + $0x1580] sm:$0xff]  ;;  %v17583_v62 = vld [vmem:[%s18020_s13 + $0x134] ss:$8 sps:$4 sm:$0xff]   ;;  %8586 = vmatprep.subr.bf16.mxu1 %v17577_v59  ;;  %v17608_v59 = vld [vmem:[%s18020_s13 + $0x1b0] ss:$8 sps:$4 sm:$0xff]  }
 0x16f   : > { %8587 = vmatpush1.bf16.msra.mxu1 %v17575_v60  ;;  %v14924_v21 = vcombine.low %v917_v61, %v925_v63  ;;  %v17580_v60 = vld [vmem:[%s18020_s13 + $0x534] ss:$8 sps:$4 sm:$0xff]  }
 0x170   : > { %8588 = vmatprep.subr.bf16.mxu1 %v17583_v62  ;;  %v997_v62 = vld [vmem:[%s22772_s2 + $0x1800] sm:$0xff] }
 0x173   : > { %8589 = vmatpush1.bf16.msra.mxu1 %v17581_v8  ;;  %v17578_v8 = vld [vmem:[%s18020_s13 + $0x530] ss:$8 sps:$4 sm:$0xff]  }
 0x174   : > { %8292 = vmatmul.mubr.bf16.gmra.mrb[140].mxu1 %v14796_v9  ;;  %v14908_v9 = vcombine.low %v901_v50, %v909_v51  ;;  %8590 = vmatprep.subr.bf16.mxu1 %v17586_v13  ;;  %v17610_v50 = vld [vmem:[%s18020_s13 + $0x1b4] ss:$8 sps:$4 sm:$0xff]   ;;  %v265_v51 = vld [vmem:[%s22772_s2 + $0x120] sm:$0xff] }
 0x175   : > { %10311 = vmatmul.mubr.bf16.gmra.mrb[140].mxu0 %v14802_v10  ;;  %8301 = vmatprep.mubr.bf16.mxu1 %v14813_v11  ;;  %v14914_v10 = vcombine.low %v904_v52, %v912_v53  ;;  %v14925_v11 = vcombine.high %v917_v61, %v925_v63  ;;  %v273_v52 = vld [vmem:[%s22772_s2 + $0x160] sm:$0xff] }
 0x176   : > { %10320 = vmatprep.mubr.bf16.mxu0 %v14819_v12  ;;  %v14931_v12 = vcombine.high %v920_v4, %v928_v7  ;;  %v17568_v53 = vld [vmem:[%s18020_s13 + $0x524] ss:$8 sps:$4 sm:$0xff]   ;;  %v14276_v13 = vcombine.low %v265_v51, %v273_v52 }
 0x177   : > { %8591 = vmatpush1.bf16.msra.mxu1 %v17584_v14  ;;  %v17613_v61 = vld [vmem:[%s18020_s13 + $0x1c4] ss:$8 sps:$4 sm:$0xff]  }
 0x178   : > { %8592 = vmatprep.subr.bf16.mxu1 %v17589_v15  ;;  %v1005_v63 = vld [vmem:[%s22772_s2 + $0x1840] sm:$0xff] }
 0x179   : > { %v281_v4 = vld [vmem:[%s22772_s2 + $0x1a0] sm:$0xff]  ;;  %v15005_v14 = vcombine.high %v997_v62, %v1005_v63 }
 0x17a   : > { %v289_v7 = vld [vmem:[%s22772_s2 + $0x1e0] sm:$0xff] }
 0x17b   : > { %v14293_v15 = vcombine.high %v281_v4, %v289_v7 }
 0x17c   : > { %8302 = vmatmul.mubr.bf16.gmra.mrb[144].mxu1 %v14812_v17  ;;  %v941_v17 = vld [vmem:[%s22772_s2 + $0x1640] sm:$0xff] }
 0x17d   : > { %10321 = vmatmul.mubr.bf16.gmra.mrb[144].mxu0 %v14818_v18  ;;  %8311 = vmatprep.mubr.bf16.mxu1 %v14829_v19  ;;  %v936_v18 = vld [vmem:[%s22772_s2 + $0x1618] sm:$0xff]  ;;  %v14941_v23 = vcombine.high %v933_v16, %v941_v17 }
 0x17e   : > { %10330 = vmatprep.mubr.bf16.mxu0 %v14835_v20  ;;  %v944_v19 = vld [vmem:[%s22772_s2 + $0x1658] sm:$0xff] }
 0x17f   : > { %v17587_v20 = vld [vmem:[%s18020_s13 + $0x150] ss:$8 sps:$4 sm:$0xff]   ;;  %v14947_v24 = vcombine.high %v936_v18, %v944_v19 }
 0x180   : > { %8593 = vmatpush1.bf16.msra.mxu1 %v17587_v20  ;;  %v1021_v20 = vld [vmem:[%s22772_s2 + $0x18c0] sm:$0xff] }
 0x184   : > { %8312 = vmatmul.mubr.bf16.gmra.mrb[148].mxu1 %v14828_v0  ;;  %v17592_v0 = vld [vmem:[%s18020_s13 + $0x164] ss:$8 sps:$4 sm:$0xff]  }
 0x185   : > { %10331 = vmatmul.mubr.bf16.gmra.mrb[148].mxu0 %v14834_v1  ;;  %8321 = vmatprep.mubr.bf16.mxu1 %v14845_v2  ;;  %v17590_v1 = vld [vmem:[%s18020_s13 + $0x160] ss:$8 sps:$4 sm:$0xff]   ;;  %v17595_v2 = vld [vmem:[%s18020_s13 + $0x174] ss:$8 sps:$4 sm:$0xff]  }
 0x186   : > { %10340 = vmatprep.mubr.bf16.mxu0 %v14851_v3  ;;  %v949_v3 = vld [vmem:[%s22772_s2 + $0x1680] sm:$0xff]  ;;  %8594 = vmatprep.subr.bf16.mxu1 %v17592_v0  ;;  %v15004_v0 = vcombine.low %v997_v62, %v1005_v63 }
 0x187   : > { %8595 = vmatpush1.bf16.msra.mxu1 %v17590_v1  ;;  %v14956_v40 = vcombine.low %v949_v3, %v957_v5  ;;  %v14292_v1 = vcombine.low %v281_v4, %v289_v7 }
 0x188   : > { %8596 = vmatprep.subr.bf16.mxu1 %v17595_v2 }
 0x18b   : > { %8597 = vmatpush1.bf16.msra.mxu1 %v17593_v26  ;;  %v313_v26 = vld [vmem:[%s22772_s2 + $0x2a0] sm:$0xff] }
 0x18c   : > { %8322 = vmatmul.mubr.bf16.gmra.mrb[152].mxu1 %v14844_v27  ;;  %v14940_v27 = vcombine.low %v933_v16, %v941_v17  ;;  %8598 = vmatprep.subr.bf16.mxu1 %v17598_v31  ;;  %v17605_v16 = vld [vmem:[%s18020_s13 + $0x540] ss:$8 sps:$4 sm:$0xff]   ;;  %v17614_v17 = vld [vmem:[%s18020_s13 + $0x1d0] ss:$8 sps:$4 sm:$0xff]  }
 0x18d   : > { %10341 = vmatmul.mubr.bf16.gmra.mrb[152].mxu0 %v14850_v28  ;;  %8331 = vmatprep.mubr.bf16.mxu1 %v14861_v29  ;;  %v14946_v28 = vcombine.low %v936_v18, %v944_v19  ;;  %v14957_v29 = vcombine.high %v949_v3, %v957_v5  ;;  %v17619_v18 = vld [vmem:[%s18020_s13 + $0x1e4] ss:$8 sps:$4 sm:$0xff]   ;;  %v17620_v5 = vld [vmem:[%s18020_s13 + $0x1f0] ss:$8 sps:$4 sm:$0xff]  }
 0x18e   : > { %10350 = vmatprep.mubr.bf16.mxu0 %v14867_v30  ;;  %v14245_v30 = vcombine.high %v233_v6, %v241_v25  ;;  %v1013_v19 = vld [vmem:[%s22772_s2 + $0x1880] sm:$0xff] }
 0x18f   : > { %8599 = vmatpush1.bf16.msra.mxu1 %v17596_v32  ;;  %v15021_v2 = vcombine.high %v1013_v19, %v1021_v20  ;;  %v1029_v6 = vld [vmem:[%s22772_s2 + $0x1900] sm:$0xff]  ;;  %v17623_v32 = vld [vmem:[%s18020_s13 + $0x550] ss:$8 sps:$4 sm:$0xff]  }
 0x190   : > { %8600 = vmatprep.subr.bf16.mxu1 %v17601_v33  ;;  %v1037_v25 = vld [vmem:[%s22772_s2 + $0x1940] sm:$0xff]  ;;  %v17625_v33 = vld [vmem:[%s18020_s13 + $0x554] ss:$8 sps:$4 sm:$0xff]  }
 0x194   : > { %8332 = vmatmul.mubr.bf16.gmra.mrb[156].mxu1 %v14860_v35  ;;  %v973_v35 = vld [vmem:[%s22772_s2 + $0x1740] sm:$0xff] }
 0x195   : > { %10351 = vmatmul.mubr.bf16.gmra.mrb[156].mxu0 %v14866_v36  ;;  %8341 = vmatprep.mubr.bf16.mxu1 %v14877_v37  ;;  %v249_v36 = vld [vmem:[%s22772_s2 + $0xa0] sm:$0xff]  ;;  %v14973_v42 = vcombine.high %v965_v34, %v973_v35  ;;  %v14972_v54 = vcombine.low %v965_v34, %v973_v35 }
 0x196   : > { %10360 = vmatprep.mubr.bf16.mxu0 %v14883_v38  ;;  %v257_v37 = vld [vmem:[%s22772_s2 + $0xe0] sm:$0xff]  ;;  %v17599_v38 = vld [vmem:[%s18020_s13 + $0x190] ss:$8 sps:$4 sm:$0xff]  }
 0x197   : > { %8601 = vmatpush1.bf16.msra.mxu1 %v17599_v38  ;;  %v1045_v34 = vld [vmem:[%s22772_s2 + $0x1980] sm:$0xff]  ;;  %v15036_v38 = vcombine.low %v1029_v6, %v1037_v25 }
 0x198   : > { %v1053_v35 = vld [vmem:[%s22772_s2 + $0x19c0] sm:$0xff] }
 0x19c   : > { %8342 = vmatmul.mubr.bf16.gmra.mrb[160].mxu1 %v14876_v43  ;;  %v14261_v43 = vcombine.high %v249_v36, %v257_v37 }
 0x19d   : > { %10361 = vmatmul.mubr.bf16.gmra.mrb[160].mxu0 %v14882_v44  ;;  %8351 = vmatprep.mubr.bf16.mxu1 %v14893_v45  ;;  %v17565_v44 = vld [vmem:[%s18020_s13 + $0x514] ss:$8 sps:$4 sm:$0xff]   ;;  %v17604_v45 = vld [vmem:[%s18020_s13 + $0x1a4] ss:$8 sps:$4 sm:$0xff]  }
 0x19e   : > { %10370 = vmatprep.mubr.bf16.mxu0 %v14899_v46  ;;  %v981_v46 = vld [vmem:[%s22772_s2 + $0x1780] sm:$0xff]  ;;  %8602 = vmatprep.subr.bf16.mxu1 %v17604_v45 }
 0x19f   : > { %8603 = vmatpush1.bf16.msra.mxu1 %v17602_v47  ;;  %v353_v45 = vld [vmem:[%s22772_s2 + $0x3e0] sm:$0xff] }
 0x1a0   : > { %8604 = vmatprep.subr.bf16.mxu1 %v17610_v50  ;;  %v1077_v50 = vld [vmem:[%s22772_s2 + $0x1a80] sm:$0xff] }
 0x1a3   : > { %8605 = vmatpush1.bf16.msra.mxu1 %v17608_v59  ;;  %v1101_v59 = vld [vmem:[%s22772_s2 + $0x1b40] sm:$0xff] }
 0x1a4   : > { %8352 = vmatmul.mubr.bf16.gmra.mrb[164].mxu1 %v14892_v55  ;;  %v14260_v55 = vcombine.low %v249_v36, %v257_v37  ;;  %8606 = vmatprep.subr.bf16.mxu1 %v17613_v61  ;;  %v329_v36 = vld [vmem:[%s22772_s2 + $0x320] sm:$0xff] }
 0x1a5   : > { %10371 = vmatmul.mubr.bf16.gmra.mrb[164].mxu0 %v14898_v56  ;;  %8361 = vmatprep.mubr.bf16.mxu1 %v14909_v57  ;;  %v14989_v56 = vcombine.high %v981_v46, %v989_v48  ;;  %v14277_v57 = vcombine.high %v265_v51, %v273_v52  ;;  %v337_v37 = vld [vmem:[%s22772_s2 + $0x360] sm:$0xff] }
 0x1a6   : > { %10380 = vmatprep.mubr.bf16.mxu0 %v14915_v58  ;;  %v17566_v58 = vld [vmem:[%s18020_s13 + $0x520] ss:$8 sps:$4 sm:$0xff]   ;;  %v14340_v47 = vcombine.low %v329_v36, %v337_v37 }
 0x1a7   : > { %v1085_v51 = vld [vmem:[%s22772_s2 + $0x1ac0] sm:$0xff] }
 0x1a8   : > { %v361_v52 = vld [vmem:[%s22772_s2 + $0x420] sm:$0xff]  ;;  %v15084_v62 = vcombine.low %v1077_v50, %v1085_v51 }
 0x1a9   : > { %v385_v61 = vld [vmem:[%s22772_s2 + $0x4e0] sm:$0xff] }
 0x1ac   : > { %8362 = vmatmul.mubr.bf16.gmra.mrb[168].mxu1 %v14908_v9  ;;  %v17611_v9 = vld [vmem:[%s18020_s13 + $0x1c0] ss:$8 sps:$4 sm:$0xff]  }
 0x1ad   : > { %10381 = vmatmul.mubr.bf16.gmra.mrb[168].mxu0 %v14914_v10  ;;  %8371 = vmatprep.mubr.bf16.mxu1 %v14925_v11  ;;  %v17607_v10 = vld [vmem:[%s18020_s13 + $0x544] ss:$8 sps:$4 sm:$0xff]   ;;  %v17616_v11 = vld [vmem:[%s18020_s13 + $0x1d4] ss:$8 sps:$4 sm:$0xff]  }
 0x1ae   : > { %10390 = vmatprep.mubr.bf16.mxu0 %v14931_v12  ;;  %v14988_v12 = vcombine.low %v981_v46, %v989_v48  ;;  %8607 = vmatpush1.bf16.msra.mxu1 %v17611_v9  ;;  %v15052_v46 = vcombine.low %v1045_v34, %v1053_v35  ;;  %v17628_v9 = vld [vmem:[%s18020_s13 + $0x564] ss:$8 sps:$4 sm:$0xff]  }
 0x1af   : > { %8608 = vmatprep.subr.bf16.mxu1 %v17616_v11  ;;  %v1117_v11 = vld [vmem:[%s22772_s2 + $0x1bc0] sm:$0xff] }
 0x1b2   : > { %8609 = vmatpush1.bf16.msra.mxu1 %v17614_v17 }
 0x1b3   : > { %8610 = vmatprep.subr.bf16.mxu1 %v17619_v18  ;;  %v1125_v18 = vld [vmem:[%s22772_s2 + $0x1c00] sm:$0xff] }
 0x1b4   : > { %8372 = vmatmul.mubr.bf16.gmra.mrb[172].mxu1 %v14924_v21  ;;  %v297_v21 = vld [vmem:[%s22772_s2 + $0x220] sm:$0xff] }
 0x1b5   : > { %10391 = vmatmul.mubr.bf16.gmra.mrb[172].mxu0 %v14930_v22  ;;  %8381 = vmatprep.mubr.bf16.mxu1 %v14941_v23  ;;  %v305_v22 = vld [vmem:[%s22772_s2 + $0x260] sm:$0xff] }
 0x1b6   : > { %10400 = vmatprep.mubr.bf16.mxu0 %v14947_v24  ;;  %v17617_v23 = vld [vmem:[%s18020_s13 + $0x1e0] ss:$8 sps:$4 sm:$0xff]   ;;  %v17622_v24 = vld [vmem:[%s18020_s13 + $0x1f4] ss:$8 sps:$4 sm:$0xff]   ;;  %v14309_v3 = vcombine.high %v297_v21, %v305_v22 }
 0x1b7   : > { %8611 = vmatpush1.bf16.msra.mxu1 %v17617_v23 }
 0x1b8   : > { %8612 = vmatprep.subr.bf16.mxu1 %v17622_v24 }
 0x1bb   : > { %8613 = vmatpush1.bf16.msra.mxu1 %v17620_v5  ;;  %v433_v5 = vld [vmem:[%s22772_s2 + $0x660] sm:$0xff] }
 0x1bc   : > { %8382 = vmatmul.mubr.bf16.gmra.mrb[176].mxu1 %v14940_v27  ;;  %v321_v27 = vld [vmem:[%s22772_s2 + $0x2e0] sm:$0xff] }
 0x1bd   : > { %10401 = vmatmul.mubr.bf16.gmra.mrb[176].mxu0 %v14946_v28  ;;  %8391 = vmatprep.mubr.bf16.mxu1 %v14957_v29  ;;  %v15020_v28 = vcombine.low %v1013_v19, %v1021_v20  ;;  %v14308_v29 = vcombine.low %v297_v21, %v305_v22  ;;  %v14325_v31 = vcombine.high %v313_v26, %v321_v27  ;;  %v1133_v19 = vld [vmem:[%s22772_s2 + $0x1c40] sm:$0xff] }
 0x1be   : > { %10633 = vmatprep.mubr.bf16.mxu0 %v14245_v30  ;;  %v15037_v30 = vcombine.high %v1029_v6, %v1037_v25  ;;  %v409_v20 = vld [vmem:[%s22772_s2 + $0x5a0] sm:$0xff]  ;;  %v15133_v24 = vcombine.high %v1125_v18, %v1133_v19  ;;  %v15132_v6 = vcombine.low %v1125_v18, %v1133_v19 }
 0x1bf   : > { %v417_v21 = vld [vmem:[%s22772_s2 + $0x5e0] sm:$0xff] }
 0x1c0   : > { %v14420_v25 = vcombine.low %v409_v20, %v417_v21 }
 0x1c4   : > { %8392 = vmatmul.mubr.bf16.gmra.mrb[180].mxu1 %v14956_v40  ;;  %v15053_v40 = vcombine.high %v1045_v34, %v1053_v35 }
 0x1c5   : > { %10634 = vmatmul.mubr.bf16.vlgmr.msra.gmra.mrb[0].mxu0 %v14244_v39  ;;  %8401 = vmatprep.mubr.bf16.mxu1 %v14973_v42  ;;  %v14324_v39 = vcombine.low %v313_v26, %v321_v27  ;;  %v1061_v42 = vld [vmem:[%s22772_s2 + $0x1a00] sm:$0xff] }
 0x1c6   : > { %11275 = vmatpush1.bf16.msra.mxu0 %v17560_v41  ;;  %10643 = vmatprep.mubr.bf16.mxu0 %v14261_v43  ;;  %v14341_v41 = vcombine.high %v329_v36, %v337_v37  ;;  %v1069_v43 = vld [vmem:[%s22772_s2 + $0x1a40] sm:$0xff]  ;;  %v17629_v36 = vld [vmem:[%s18020_s13 + $0x570] ss:$8 sps:$4 sm:$0xff]   ;;  %v17631_v37 = vld [vmem:[%s18020_s13 + $0x574] ss:$8 sps:$4 sm:$0xff]  }
 0x1c7   : > { %11276 = vmatprep.subr.bf16.mxu0 %v17565_v44  ;;  %v345_v44 = vld [vmem:[%s22772_s2 + $0x3a0] sm:$0xff]  ;;  %v15069_v48 = vcombine.high %v1061_v42, %v1069_v43 }
 0x1ca   : > { %11277 = vmatpush1.bf16.msra.mxu0 %v17563_v49  ;;  %v14357_v49 = vcombine.high %v345_v44, %v353_v45 }
 0x1cb   : > { %11278 = vmatprep.subr.bf16.mxu0 %v17568_v53  ;;  %v369_v53 = vld [vmem:[%s22772_s2 + $0x460] sm:$0xff] }
 0x1cc   : > { %8402 = vmatmul.mubr.bf16.gmra.mrb[184].mxu1 %v14972_v54  ;;  %v15068_v54 = vcombine.low %v1061_v42, %v1069_v43  ;;  %v14372_v63 = vcombine.low %v361_v52, %v369_v53 }
 0x1cd   : > { %10644 = vmatmul.mubr.bf16.gmra.mrb[4].mxu0 %v14260_v55  ;;  %8411 = vmatprep.mubr.bf16.mxu1 %v14989_v56  ;;  %v14356_v55 = vcombine.low %v345_v44, %v353_v45  ;;  %v15085_v56 = vcombine.high %v1077_v50, %v1085_v51 }
 0x1ce   : > { %10653 = vmatprep.mubr.bf16.mxu0 %v14277_v57  ;;  %11279 = vmatpush1.bf16.msra.mxu0 %v17566_v58  ;;  %v14373_v57 = vcombine.high %v361_v52, %v369_v53  ;;  %v1093_v58 = vld [vmem:[%s22772_s2 + $0x1b00] sm:$0xff] }
 0x1cf   : > { %11280 = vmatprep.subr.bf16.mxu0 %v17580_v60  ;;  %v377_v60 = vld [vmem:[%s22772_s2 + $0x4a0] sm:$0xff]  ;;  %v15101_v4 = vcombine.high %v1093_v58, %v1101_v59 }
 0x1d0   : > { %v14389_v7 = vcombine.high %v377_v60, %v385_v61 }
 0x1d2   : > { %11281 = vmatpush1.bf16.msra.mxu0 %v17578_v8  ;;  %v17626_v8 = vld [vmem:[%s18020_s13 + $0x560] ss:$8 sps:$4 sm:$0xff]  }
 0x1d3   : > { %11282 = vmatprep.subr.bf16.mxu0 %v17607_v10  ;;  %v1109_v10 = vld [vmem:[%s22772_s2 + $0x1b80] sm:$0xff] }
 0x1d4   : > { %8412 = vmatmul.mubr.bf16.gmra.mrb[188].mxu1 %v14988_v12  ;;  %v393_v12 = vld [vmem:[%s22772_s2 + $0x520] sm:$0xff]  ;;  %v15116_v22 = vcombine.low %v1109_v10, %v1117_v11 }
 0x1d5   : > { %10654 = vmatmul.mubr.bf16.gmra.mrb[8].mxu0 %v14276_v13  ;;  %8421 = vmatprep.mubr.bf16.mxu1 %v15005_v14  ;;  %v401_v13 = vld [vmem:[%s22772_s2 + $0x560] sm:$0xff]  ;;  %v15100_v14 = vcombine.low %v1093_v58, %v1101_v59 }
 0x1d6   : > { %10663 = vmatprep.mubr.bf16.mxu0 %v14293_v15  ;;  %11283 = vmatpush1.bf16.msra.mxu0 %v17605_v16  ;;  %v14388_v15 = vcombine.low %v377_v60, %v385_v61  ;;  %v15117_v16 = vcombine.high %v1109_v10, %v1117_v11  ;;  %v14405_v17 = vcombine.high %v393_v12, %v401_v13 }
 0x1d7   : > { %11284 = vmatprep.subr.bf16.mxu0 %v17625_v33  ;;  %v14404_v23 = vcombine.low %v393_v12, %v401_v13  ;;  %v17632_v12 = vld [vmem:[%s18020_s13 + $0x580] ss:$8 sps:$4 sm:$0xff]   ;;  %v17634_v13 = vld [vmem:[%s18020_s13 + $0x584] ss:$8 sps:$4 sm:$0xff]  }
 0x1da   : > { %11285 = vmatpush1.bf16.msra.mxu0 %v17623_v32 }
 0x1db   : > { %11286 = vmatprep.subr.bf16.mxu0 %v17628_v9 }
 0x1dc   : > { %8422 = vmatmul.mubr.bf16.gmra.mrb[192].mxu1 %v15004_v0  ;;  %v14421_v0 = vcombine.high %v409_v20, %v417_v21 }
 0x1dd   : > { %10664 = vmatmul.mubr.bf16.gmra.mrb[12].mxu0 %v14292_v1  ;;  %8431 = vmatprep.mubr.bf16.mxu1 %v15021_v2  ;;  %v1141_v1 = vld [vmem:[%s22772_s2 + $0x1c80] sm:$0xff] }
 0x1de   : > { %10673 = vmatprep.mubr.bf16.mxu0 %v14309_v3  ;;  %11287 = vmatpush1.bf16.msra.mxu0 %v17626_v8  ;;  %v1149_v2 = vld [vmem:[%s22772_s2 + $0x1cc0] sm:$0xff] }
 0x1df   : > { %v425_v3 = vld [vmem:[%s22772_s2 + $0x620] sm:$0xff]  ;;  %v15149_v26 = vcombine.high %v1141_v1, %v1149_v2  ;;  %v15148_v32 = vcombine.low %v1141_v1, %v1149_v2  ;;  %11288 = vmatprep.subr.bf16.mxu0 %v17631_v37 }
 0x1e0   : > { %v14437_v27 = vcombine.high %v425_v3, %v433_v5  ;;  %v14436_v33 = vcombine.low %v425_v3, %v433_v5 }
 0x1e2   : > { %11289 = vmatpush1.bf16.msra.mxu0 %v17629_v36 }
 0x1e3   : > { %11290 = vmatprep.subr.bf16.mxu0 %v17634_v13 }
 0x1e4   : > { %8432 = vmatmul.mubr.bf16.gmra.mrb[196].mxu1 %v15020_v28  ;;  %v1157_v28 = vld [vmem:[%s22772_s2 + $0x1d00] sm:$0xff] }
 0x1e5   : > { %10674 = vmatmul.mubr.bf16.gmra.mrb[16].mxu0 %v14308_v29  ;;  %8441 = vmatprep.mubr.bf16.mxu1 %v15037_v30  ;;  %v1165_v29 = vld [vmem:[%s22772_s2 + $0x1d40] sm:$0xff] }
 0x1e6   : > { %10683 = vmatprep.mubr.bf16.mxu0 %v14325_v31  ;;  %v441_v30 = vld [vmem:[%s22772_s2 + $0x6a0] sm:$0xff]  ;;  %v15165_v34 = vcombine.high %v1157_v28, %v1165_v29  ;;  %v15164_v42 = vcombine.low %v1157_v28, %v1165_v29  ;;  %11291 = vmatpush1.bf16.msra.mxu0 %v17632_v12 }
 0x1e7   : > { %v449_v31 = vld [vmem:[%s22772_s2 + $0x6e0] sm:$0xff] }
 0x1e8   : > { %v14453_v35 = vcombine.high %v441_v30, %v449_v31  ;;  %v14452_v43 = vcombine.low %v441_v30, %v449_v31 }
 0x1ec   : > { %8442 = vmatmul.mubr.bf16.gmra.mrb[200].mxu1 %v15036_v38  ;;  %v1173_v38 = vld [vmem:[%s22772_s2 + $0x1d80] sm:$0xff] }
 0x1ed   : > { %10684 = vmatmul.mubr.bf16.gmra.mrb[20].mxu0 %v14324_v39  ;;  %8451 = vmatprep.mubr.bf16.mxu1 %v15053_v40  ;;  %v1181_v39 = vld [vmem:[%s22772_s2 + $0x1dc0] sm:$0xff] }
 0x1ee   : > { %10693 = vmatprep.mubr.bf16.mxu0 %v14341_v41  ;;  %v457_v40 = vld [vmem:[%s22772_s2 + $0x720] sm:$0xff]  ;;  %v15181_v44 = vcombine.high %v1173_v38, %v1181_v39  ;;  %v15180_v50 = vcombine.low %v1173_v38, %v1181_v39 }
 0x1ef   : > { %v465_v41 = vld [vmem:[%s22772_s2 + $0x760] sm:$0xff] }
 0x1f0   : > { %v14469_v45 = vcombine.high %v457_v40, %v465_v41  ;;  %v14468_v51 = vcombine.low %v457_v40, %v465_v41  ;;  %v17635_v40 = vld [vmem:[%s18020_s13 + $0x590] ss:$8 sps:$4 sm:$0xff]   ;;  %v17637_v41 = vld [vmem:[%s18020_s13 + $0x594] ss:$8 sps:$4 sm:$0xff]  }
 0x1f1   : > { %11292 = vmatprep.subr.bf16.mxu0 %v17637_v41 }
 0x1f2   : > { %11293 = vmatpush1.bf16.msra.mxu0 %v17635_v40 }
 0x1f4   : > { %8452 = vmatmul.mubr.bf16.gmra.mrb[204].mxu1 %v15052_v46  ;;  %v1189_v46 = vld [vmem:[%s22772_s2 + $0x1e00] sm:$0xff] }
 0x1f5   : > { %10694 = vmatmul.mubr.bf16.gmra.mrb[24].mxu0 %v14340_v47  ;;  %8461 = vmatprep.mubr.bf16.mxu1 %v15069_v48  ;;  %v1197_v47 = vld [vmem:[%s22772_s2 + $0x1e40] sm:$0xff] }
 0x1f6   : > { %10703 = vmatprep.mubr.bf16.mxu0 %v14357_v49  ;;  %v473_v48 = vld [vmem:[%s22772_s2 + $0x7a0] sm:$0xff]  ;;  %v15197_v52 = vcombine.high %v1189_v46, %v1197_v47  ;;  %v15196_v58 = vcombine.low %v1189_v46, %v1197_v47 }
 0x1f7   : > { %v481_v49 = vld [vmem:[%s22772_s2 + $0x7e0] sm:$0xff] }
 0x1f8   : > { %v14485_v53 = vcombine.high %v473_v48, %v481_v49  ;;  %v14484_v59 = vcombine.low %v473_v48, %v481_v49 }
 0x1fc   : > { %8462 = vmatmul.mubr.bf16.gmra.mrb[208].mxu1 %v15068_v54  ;;  %v1205_v54 = vld [vmem:[%s22772_s2 + $0x1e80] sm:$0xff] }
 0x1fd   : > { %10704 = vmatmul.mubr.bf16.gmra.mrb[28].mxu0 %v14356_v55  ;;  %8471 = vmatprep.mubr.bf16.mxu1 %v15085_v56  ;;  %v1213_v55 = vld [vmem:[%s22772_s2 + $0x1ec0] sm:$0xff] }
 0x1fe   : > { %10713 = vmatprep.mubr.bf16.mxu0 %v14373_v57  ;;  %v489_v56 = vld [vmem:[%s22772_s2 + $0x820] sm:$0xff]  ;;  %v15213_v60 = vcombine.high %v1205_v54, %v1213_v55  ;;  %v15212_v8 = vcombine.low %v1205_v54, %v1213_v55 }
 0x1ff   : > { %v497_v57 = vld [vmem:[%s22772_s2 + $0x860] sm:$0xff] }
 0x200   : > { %v14501_v61 = vcombine.high %v489_v56, %v497_v57  ;;  %v14500_v9 = vcombine.low %v489_v56, %v497_v57 }
 0x204   : > { %8472 = vmatmul.mubr.bf16.gmra.mrb[212].mxu1 %v15084_v62  ;;  %v1221_v62 = vld [vmem:[%s22772_s2 + $0x1f00] sm:$0xff] }
 0x205   : > { %10714 = vmatmul.mubr.bf16.gmra.mrb[32].mxu0 %v14372_v63  ;;  %8481 = vmatprep.mubr.bf16.mxu1 %v15101_v4  ;;  %v1229_v63 = vld [vmem:[%s22772_s2 + $0x1f40] sm:$0xff] }
 0x206   : > { %10723 = vmatprep.mubr.bf16.mxu0 %v14389_v7  ;;  %v505_v4 = vld [vmem:[%s22772_s2 + $0x8a0] sm:$0xff]  ;;  %v15229_v10 = vcombine.high %v1221_v62, %v1229_v63  ;;  %v15228_v18 = vcombine.low %v1221_v62, %v1229_v63 }
 0x207   : > { %v513_v7 = vld [vmem:[%s22772_s2 + $0x8e0] sm:$0xff] }
 0x208   : > { %v14517_v11 = vcombine.high %v505_v4, %v513_v7  ;;  %v14516_v19 = vcombine.low %v505_v4, %v513_v7 }
 0x20c   : > { %8482 = vmatmul.mubr.bf16.gmra.mrb[216].mxu1 %v15100_v14  ;;  %v1237_v14 = vld [vmem:[%s22772_s2 + $0x1f80] sm:$0xff] }
 0x20d   : > { %10724 = vmatmul.mubr.bf16.gmra.mrb[36].mxu0 %v14388_v15  ;;  %8491 = vmatprep.mubr.bf16.mxu1 %v15117_v16  ;;  %v1245_v15 = vld [vmem:[%s22772_s2 + $0x1fc0] sm:$0xff] }
 0x20e   : > { %10733 = vmatprep.mubr.bf16.mxu0 %v14405_v17  ;;  %v521_v16 = vld [vmem:[%s22772_s2 + $0x920] sm:$0xff]  ;;  %v15245_v20 = vcombine.high %v1237_v14, %v1245_v15  ;;  %v15244_v1 = vcombine.low %v1237_v14, %v1245_v15 }
 0x20f   : > { %v529_v17 = vld [vmem:[%s22772_s2 + $0x960] sm:$0xff] }
 0x210   : > { %v14533_v21 = vcombine.high %v521_v16, %v529_v17  ;;  %v14532_v2 = vcombine.low %v521_v16, %v529_v17  ;;  %v17638_v16 = vld [vmem:[%s18020_s13 + $0x5a0] ss:$8 sps:$4 sm:$0xff]   ;;  %v17640_v17 = vld [vmem:[%s18020_s13 + $0x5a4] ss:$8 sps:$4 sm:$0xff]  }
 0x211   : > { %11294 = vmatprep.subr.bf16.mxu0 %v17640_v17 }
 0x212   : > { %11295 = vmatpush1.bf16.msra.mxu0 %v17638_v16 }
 0x214   : > { %8492 = vmatmul.mubr.bf16.gmra.mrb[220].mxu1 %v15116_v22  ;;  %v230_v22 = vld [vmem:[%s22772_s2 + $0x8] sm:$0xff] }
 0x215   : > { %10734 = vmatmul.mubr.bf16.gmra.mrb[40].mxu0 %v14404_v23  ;;  %8501 = vmatprep.mubr.bf16.mxu1 %v15133_v24  ;;  %v238_v23 = vld [vmem:[%s22772_s2 + $0x48] sm:$0xff]  ;;  %v537_v24 = vld [vmem:[%s22772_s2 + $0x9a0] sm:$0xff] }
 0x216   : > { %10743 = vmatprep.mubr.bf16.mxu0 %v14421_v0  ;;  %v545_v0 = vld [vmem:[%s22772_s2 + $0x9e0] sm:$0xff]  ;;  %v14239_v3 = vcombine.high %v230_v22, %v238_v23  ;;  %v14238_v28 = vcombine.low %v230_v22, %v238_v23 }
 0x217   : > { %v14549_v5 = vcombine.high %v537_v24, %v545_v0  ;;  %v14548_v29 = vcombine.low %v537_v24, %v545_v0 }
 0x21c   : > { %8502 = vmatmul.mubr.bf16.gmra.mrb[224].mxu1 %v15132_v6  ;;  %v246_v6 = vld [vmem:[%s22772_s2 + $0x88] sm:$0xff] }
 0x21d   : > { %10744 = vmatmul.mubr.bf16.gmra.mrb[44].mxu0 %v14420_v25  ;;  %8511 = vmatprep.mubr.bf16.mxu1 %v15149_v26  ;;  %v254_v25 = vld [vmem:[%s22772_s2 + $0xc8] sm:$0xff]  ;;  %v553_v26 = vld [vmem:[%s22772_s2 + $0xa20] sm:$0xff] }
 0x21e   : > { %10753 = vmatprep.mubr.bf16.mxu0 %v14437_v27  ;;  %v561_v27 = vld [vmem:[%s22772_s2 + $0xa60] sm:$0xff]  ;;  %v14255_v30 = vcombine.high %v246_v6, %v254_v25  ;;  %v14254_v36 = vcombine.low %v246_v6, %v254_v25 }
 0x21f   : > { %v14565_v31 = vcombine.high %v553_v26, %v561_v27  ;;  %v14564_v37 = vcombine.low %v553_v26, %v561_v27 }
 0x224   : > { %8512 = vmatmul.mubr.bf16.gmra.mrb[228].mxu1 %v15148_v32  ;;  %v262_v32 = vld [vmem:[%s22772_s2 + $0x108] sm:$0xff] }
 0x225   : > { %10754 = vmatmul.mubr.bf16.gmra.mrb[48].mxu0 %v14436_v33  ;;  %8521 = vmatprep.mubr.bf16.mxu1 %v15165_v34  ;;  %v270_v33 = vld [vmem:[%s22772_s2 + $0x148] sm:$0xff]  ;;  %v569_v34 = vld [vmem:[%s22772_s2 + $0xaa0] sm:$0xff] }
 0x226   : > { %10763 = vmatprep.mubr.bf16.mxu0 %v14453_v35  ;;  %v577_v35 = vld [vmem:[%s22772_s2 + $0xae0] sm:$0xff]  ;;  %v14271_v38 = vcombine.high %v262_v32, %v270_v33  ;;  %v14270_v46 = vcombine.low %v262_v32, %v270_v33 }
 0x227   : > { %v14581_v39 = vcombine.high %v569_v34, %v577_v35  ;;  %v14580_v47 = vcombine.low %v569_v34, %v577_v35 }
 0x22c   : > { %8522 = vmatmul.mubr.bf16.gmra.mrb[232].mxu1 %v15164_v42  ;;  %v278_v42 = vld [vmem:[%s22772_s2 + $0x188] sm:$0xff] }
 0x22d   : > { %10764 = vmatmul.mubr.bf16.gmra.mrb[52].mxu0 %v14452_v43  ;;  %8531 = vmatprep.mubr.bf16.mxu1 %v15181_v44  ;;  %v286_v43 = vld [vmem:[%s22772_s2 + $0x1c8] sm:$0xff]  ;;  %v585_v44 = vld [vmem:[%s22772_s2 + $0xb20] sm:$0xff] }
 0x22e   : > { %10773 = vmatprep.mubr.bf16.mxu0 %v14469_v45  ;;  %v593_v45 = vld [vmem:[%s22772_s2 + $0xb60] sm:$0xff]  ;;  %v14287_v48 = vcombine.high %v278_v42, %v286_v43  ;;  %v14286_v54 = vcombine.low %v278_v42, %v286_v43 }
 0x22f   : > { %v14597_v49 = vcombine.high %v585_v44, %v593_v45  ;;  %v14596_v55 = vcombine.low %v585_v44, %v593_v45  ;;  %v17641_v44 = vld [vmem:[%s18020_s13 + $0x5b0] ss:$8 sps:$4 sm:$0xff]   ;;  %v17643_v45 = vld [vmem:[%s18020_s13 + $0x5b4] ss:$8 sps:$4 sm:$0xff]  }
 0x230   : > { %11296 = vmatprep.subr.bf16.mxu0 %v17643_v45 }
 0x231   : > { %11297 = vmatpush1.bf16.msra.mxu0 %v17641_v44 }
 0x234   : > { %8532 = vmatmul.mubr.bf16.gmra.mrb[236].mxu1 %v15180_v50  ;;  %v294_v50 = vld [vmem:[%s22772_s2 + $0x208] sm:$0xff] }
 0x235   : > { %10774 = vmatmul.mubr.bf16.gmra.mrb[56].mxu0 %v14468_v51  ;;  %8541 = vmatprep.mubr.bf16.mxu1 %v15197_v52  ;;  %v302_v51 = vld [vmem:[%s22772_s2 + $0x248] sm:$0xff]  ;;  %v601_v52 = vld [vmem:[%s22772_s2 + $0xba0] sm:$0xff] }
 0x236   : > { %10783 = vmatprep.mubr.bf16.mxu0 %v14485_v53  ;;  %v609_v53 = vld [vmem:[%s22772_s2 + $0xbe0] sm:$0xff]  ;;  %v14303_v56 = vcombine.high %v294_v50, %v302_v51  ;;  %v14302_v62 = vcombine.low %v294_v50, %v302_v51 }
 0x237   : > { %v14613_v57 = vcombine.high %v601_v52, %v609_v53  ;;  %v14612_v63 = vcombine.low %v601_v52, %v609_v53 }
 0x23c   : > { %8542 = vmatmul.mubr.bf16.gmra.mrb[240].mxu1 %v15196_v58  ;;  %v310_v58 = vld [vmem:[%s22772_s2 + $0x288] sm:$0xff] }
 0x23d   : > { %10784 = vmatmul.mubr.bf16.gmra.mrb[60].mxu0 %v14484_v59  ;;  %8551 = vmatprep.mubr.bf16.mxu1 %v15213_v60  ;;  %v318_v59 = vld [vmem:[%s22772_s2 + $0x2c8] sm:$0xff]  ;;  %v617_v60 = vld [vmem:[%s22772_s2 + $0xc20] sm:$0xff] }
 0x23e   : > { %10793 = vmatprep.mubr.bf16.mxu0 %v14501_v61  ;;  %v625_v61 = vld [vmem:[%s22772_s2 + $0xc60] sm:$0xff]  ;;  %v14319_v4 = vcombine.high %v310_v58, %v318_v59  ;;  %v14318_v12 = vcombine.low %v310_v58, %v318_v59 }
 0x23f   : > { %v14629_v7 = vcombine.high %v617_v60, %v625_v61  ;;  %v14628_v13 = vcombine.low %v617_v60, %v625_v61 }
 0x244   : > { %8552 = vmatmul.mubr.bf16.gmra.mrb[244].mxu1 %v15212_v8  ;;  %v326_v8 = vld [vmem:[%s22772_s2 + $0x308] sm:$0xff] }
 0x245   : > { %10794 = vmatmul.mubr.bf16.gmra.mrb[64].mxu0 %v14500_v9  ;;  %8561 = vmatprep.mubr.bf16.mxu1 %v15229_v10  ;;  %v334_v9 = vld [vmem:[%s22772_s2 + $0x348] sm:$0xff]  ;;  %v633_v10 = vld [vmem:[%s22772_s2 + $0xca0] sm:$0xff] }
 0x246   : > { %10803 = vmatprep.mubr.bf16.mxu0 %v14517_v11  ;;  %v641_v11 = vld [vmem:[%s22772_s2 + $0xce0] sm:$0xff]  ;;  %v14335_v14 = vcombine.high %v326_v8, %v334_v9  ;;  %v14334_v22 = vcombine.low %v326_v8, %v334_v9 }
 0x247   : > { %v14645_v15 = vcombine.high %v633_v10, %v641_v11  ;;  %v14644_v23 = vcombine.low %v633_v10, %v641_v11 }
 0x24c   : > { %8562 = vmatmul.mubr.bf16.gmra.mrb[248].mxu1 %v15228_v18  ;;  %v342_v18 = vld [vmem:[%s22772_s2 + $0x388] sm:$0xff] }
 0x24d   : > { %10804 = vmatmul.mubr.bf16.gmra.mrb[68].mxu0 %v14516_v19  ;;  %8571 = vmatprep.mubr.bf16.mxu1 %v15245_v20  ;;  %v350_v19 = vld [vmem:[%s22772_s2 + $0x3c8] sm:$0xff]  ;;  %v649_v20 = vld [vmem:[%s22772_s2 + $0xd20] sm:$0xff] }
 0x24e   : > { %10813 = vmatprep.mubr.bf16.mxu0 %v14533_v21  ;;  %v657_v21 = vld [vmem:[%s22772_s2 + $0xd60] sm:$0xff]  ;;  %v14351_v24 = vcombine.high %v342_v18, %v350_v19  ;;  %v14350_v6 = vcombine.low %v342_v18, %v350_v19 }
 0x24f   : > { %v14661_v0 = vcombine.high %v649_v20, %v657_v21  ;;  %v14660_v25 = vcombine.low %v649_v20, %v657_v21  ;;  %v17644_v20 = vld [vmem:[%s18020_s13 + $0x5c0] ss:$8 sps:$4 sm:$0xff]   ;;  %v17646_v21 = vld [vmem:[%s18020_s13 + $0x5c4] ss:$8 sps:$4 sm:$0xff]  }
 0x250   : > { %11298 = vmatprep.subr.bf16.mxu0 %v17646_v21 }
 0x251   : > { %11299 = vmatpush1.bf16.msra.mxu0 %v17644_v20 }
 0x254   : > { %8572 = vmatmul.mubr.bf16.gmra.mrb[252].mxu1 %v15244_v1  ;;  %v358_v1 = vld [vmem:[%s22772_s2 + $0x408] sm:$0xff] }
 0x255   : > { %10814 = vmatmul.mubr.bf16.gmra.mrb[72].mxu0 %v14532_v2  ;;  %8614 = vmatprep.mubr.bf16.mxu1 %v14239_v3  ;;  %v366_v2 = vld [vmem:[%s22772_s2 + $0x448] sm:$0xff]  ;;  %v665_v3 = vld [vmem:[%s22772_s2 + $0xda0] sm:$0xff] }
 0x256   : > { %10823 = vmatprep.mubr.bf16.mxu0 %v14549_v5  ;;  %v673_v5 = vld [vmem:[%s22772_s2 + $0xde0] sm:$0xff]  ;;  %v14367_v26 = vcombine.high %v358_v1, %v366_v2  ;;  %v14366_v32 = vcombine.low %v358_v1, %v366_v2 }
 0x257   : > { %v14677_v27 = vcombine.high %v665_v3, %v673_v5  ;;  %v14676_v33 = vcombine.low %v665_v3, %v673_v5 }
 0x25c   : > { %8615 = vmatmul.mubr.bf16.vlgmr.msra.gmra.mrb[0].mxu1 %v14238_v28  ;;  %v374_v28 = vld [vmem:[%s22772_s2 + $0x488] sm:$0xff] }
 0x25d   : > { %10824 = vmatmul.mubr.bf16.gmra.mrb[76].mxu0 %v14548_v29  ;;  %8624 = vmatprep.mubr.bf16.mxu1 %v14255_v30  ;;  %v382_v29 = vld [vmem:[%s22772_s2 + $0x4c8] sm:$0xff]  ;;  %v681_v30 = vld [vmem:[%s22772_s2 + $0xe20] sm:$0xff] }
 0x25e   : > { %10833 = vmatprep.mubr.bf16.mxu0 %v14565_v31  ;;  %v689_v31 = vld [vmem:[%s22772_s2 + $0xe60] sm:$0xff]  ;;  %v14383_v34 = vcombine.high %v374_v28, %v382_v29  ;;  %v14382_v40 = vcombine.low %v374_v28, %v382_v29 }
 0x25f   : > { %v14693_v35 = vcombine.high %v681_v30, %v689_v31  ;;  %v14692_v41 = vcombine.low %v681_v30, %v689_v31 }
 0x264   : > { %8625 = vmatmul.mubr.bf16.gmra.mrb[4].mxu1 %v14254_v36  ;;  %v390_v36 = vld [vmem:[%s22772_s2 + $0x508] sm:$0xff] }
 0x265   : > { %10834 = vmatmul.mubr.bf16.gmra.mrb[80].mxu0 %v14564_v37  ;;  %8634 = vmatprep.mubr.bf16.mxu1 %v14271_v38  ;;  %v398_v37 = vld [vmem:[%s22772_s2 + $0x548] sm:$0xff]  ;;  %v697_v38 = vld [vmem:[%s22772_s2 + $0xea0] sm:$0xff] }
 0x266   : > { %10843 = vmatprep.mubr.bf16.mxu0 %v14581_v39  ;;  %v705_v39 = vld [vmem:[%s22772_s2 + $0xee0] sm:$0xff]  ;;  %v14399_v42 = vcombine.high %v390_v36, %v398_v37  ;;  %v14398_v50 = vcombine.low %v390_v36, %v398_v37 }
 0x267   : > { %v14709_v43 = vcombine.high %v697_v38, %v705_v39  ;;  %v14708_v51 = vcombine.low %v697_v38, %v705_v39 }
 0x26c   : > { %8635 = vmatmul.mubr.bf16.gmra.mrb[8].mxu1 %v14270_v46  ;;  %v406_v46 = vld [vmem:[%s22772_s2 + $0x588] sm:$0xff] }
 0x26d   : > { %10844 = vmatmul.mubr.bf16.gmra.mrb[84].mxu0 %v14580_v47  ;;  %8644 = vmatprep.mubr.bf16.mxu1 %v14287_v48  ;;  %v414_v47 = vld [vmem:[%s22772_s2 + $0x5c8] sm:$0xff]  ;;  %v713_v48 = vld [vmem:[%s22772_s2 + $0xf20] sm:$0xff] }
 0x26e   : > { %10853 = vmatprep.mubr.bf16.mxu0 %v14597_v49  ;;  %v721_v49 = vld [vmem:[%s22772_s2 + $0xf60] sm:$0xff]  ;;  %v14415_v52 = vcombine.high %v406_v46, %v414_v47  ;;  %v14414_v58 = vcombine.low %v406_v46, %v414_v47 }
 0x26f   : > { %v14725_v53 = vcombine.high %v713_v48, %v721_v49  ;;  %v14724_v59 = vcombine.low %v713_v48, %v721_v49  ;;  %v17647_v48 = vld [vmem:[%s18020_s13 + $0x5d0] ss:$8 sps:$4 sm:$0xff]   ;;  %v17649_v49 = vld [vmem:[%s18020_s13 + $0x5d4] ss:$8 sps:$4 sm:$0xff]  }
 0x270   : > { %11300 = vmatprep.subr.bf16.mxu0 %v17649_v49 }
 0x271   : > { %11301 = vmatpush1.bf16.msra.mxu0 %v17647_v48 }
 0x274   : > { %8645 = vmatmul.mubr.bf16.gmra.mrb[12].mxu1 %v14286_v54  ;;  %v422_v54 = vld [vmem:[%s22772_s2 + $0x608] sm:$0xff] }
 0x275   : > { %10854 = vmatmul.mubr.bf16.gmra.mrb[88].mxu0 %v14596_v55  ;;  %8654 = vmatprep.mubr.bf16.mxu1 %v14303_v56  ;;  %v430_v55 = vld [vmem:[%s22772_s2 + $0x648] sm:$0xff]  ;;  %v729_v56 = vld [vmem:[%s22772_s2 + $0xfa0] sm:$0xff] }
 0x276   : > { %10863 = vmatprep.mubr.bf16.mxu0 %v14613_v57  ;;  %v737_v57 = vld [vmem:[%s22772_s2 + $0xfe0] sm:$0xff]  ;;  %v14431_v60 = vcombine.high %v422_v54, %v430_v55  ;;  %v14430_v8 = vcombine.low %v422_v54, %v430_v55 }
 0x277   : > { %v14741_v61 = vcombine.high %v729_v56, %v737_v57  ;;  %v14740_v9 = vcombine.low %v729_v56, %v737_v57 }
 0x27c   : > { %8655 = vmatmul.mubr.bf16.gmra.mrb[16].mxu1 %v14302_v62  ;;  %v438_v62 = vld [vmem:[%s22772_s2 + $0x688] sm:$0xff] }
 0x27d   : > { %10864 = vmatmul.mubr.bf16.gmra.mrb[92].mxu0 %v14612_v63  ;;  %8664 = vmatprep.mubr.bf16.mxu1 %v14319_v4  ;;  %v446_v63 = vld [vmem:[%s22772_s2 + $0x6c8] sm:$0xff]  ;;  %v745_v4 = vld [vmem:[%s22772_s2 + $0x1020] sm:$0xff] }
 0x27e   : > { %10873 = vmatprep.mubr.bf16.mxu0 %v14629_v7  ;;  %v753_v7 = vld [vmem:[%s22772_s2 + $0x1060] sm:$0xff]  ;;  %v14447_v10 = vcombine.high %v438_v62, %v446_v63  ;;  %v14446_v16 = vcombine.low %v438_v62, %v446_v63 }
 0x27f   : > { %v14757_v11 = vcombine.high %v745_v4, %v753_v7  ;;  %v14756_v17 = vcombine.low %v745_v4, %v753_v7 }
 0x284   : > { %8665 = vmatmul.mubr.bf16.gmra.mrb[20].mxu1 %v14318_v12  ;;  %v454_v12 = vld [vmem:[%s22772_s2 + $0x708] sm:$0xff] }
 0x285   : > { %10874 = vmatmul.mubr.bf16.gmra.mrb[96].mxu0 %v14628_v13  ;;  %8674 = vmatprep.mubr.bf16.mxu1 %v14335_v14  ;;  %v462_v13 = vld [vmem:[%s22772_s2 + $0x748] sm:$0xff]  ;;  %v761_v14 = vld [vmem:[%s22772_s2 + $0x10a0] sm:$0xff] }
 0x286   : > { %10883 = vmatprep.mubr.bf16.mxu0 %v14645_v15  ;;  %v769_v15 = vld [vmem:[%s22772_s2 + $0x10e0] sm:$0xff]  ;;  %v14463_v18 = vcombine.high %v454_v12, %v462_v13  ;;  %v14462_v1 = vcombine.low %v454_v12, %v462_v13 }
 0x287   : > { %v14773_v19 = vcombine.high %v761_v14, %v769_v15  ;;  %v14772_v2 = vcombine.low %v761_v14, %v769_v15 }
 0x28c   : > { %8675 = vmatmul.mubr.bf16.gmra.mrb[24].mxu1 %v14334_v22  ;;  %v470_v22 = vld [vmem:[%s22772_s2 + $0x788] sm:$0xff] }
 0x28d   : > { %10884 = vmatmul.mubr.bf16.gmra.mrb[100].mxu0 %v14644_v23  ;;  %8684 = vmatprep.mubr.bf16.mxu1 %v14351_v24  ;;  %v478_v23 = vld [vmem:[%s22772_s2 + $0x7c8] sm:$0xff]  ;;  %v777_v24 = vld [vmem:[%s22772_s2 + $0x1120] sm:$0xff] }
 0x28e   : > { %10893 = vmatprep.mubr.bf16.mxu0 %v14661_v0  ;;  %v785_v0 = vld [vmem:[%s22772_s2 + $0x1160] sm:$0xff]  ;;  %v14479_v3 = vcombine.high %v470_v22, %v478_v23  ;;  %v14478_v28 = vcombine.low %v470_v22, %v478_v23 }
 0x28f   : > { %v14789_v5 = vcombine.high %v777_v24, %v785_v0  ;;  %v14788_v29 = vcombine.low %v777_v24, %v785_v0  ;;  %v17650_v24 = vld [vmem:[%s18020_s13 + $0x5e0] ss:$8 sps:$4 sm:$0xff]   ;;  %v17652_v0 = vld [vmem:[%s18020_s13 + $0x5e4] ss:$8 sps:$4 sm:$0xff]  }
 0x290   : > { %11302 = vmatprep.subr.bf16.mxu0 %v17652_v0 }
 0x291   : > { %11303 = vmatpush1.bf16.msra.mxu0 %v17650_v24 }
 0x294   : > { %8685 = vmatmul.mubr.bf16.gmra.mrb[28].mxu1 %v14350_v6  ;;  %v486_v6 = vld [vmem:[%s22772_s2 + $0x808] sm:$0xff] }
 0x295   : > { %10894 = vmatmul.mubr.bf16.gmra.mrb[104].mxu0 %v14660_v25  ;;  %8694 = vmatprep.mubr.bf16.mxu1 %v14367_v26  ;;  %v494_v25 = vld [vmem:[%s22772_s2 + $0x848] sm:$0xff]  ;;  %v793_v26 = vld [vmem:[%s22772_s2 + $0x11a0] sm:$0xff] }
 0x296   : > { %10903 = vmatprep.mubr.bf16.mxu0 %v14677_v27  ;;  %v801_v27 = vld [vmem:[%s22772_s2 + $0x11e0] sm:$0xff]  ;;  %v14495_v30 = vcombine.high %v486_v6, %v494_v25  ;;  %v14494_v36 = vcombine.low %v486_v6, %v494_v25 }
 0x297   : > { %v14805_v31 = vcombine.high %v793_v26, %v801_v27  ;;  %v14804_v37 = vcombine.low %v793_v26, %v801_v27 }
 0x29c   : > { %8695 = vmatmul.mubr.bf16.gmra.mrb[32].mxu1 %v14366_v32  ;;  %v502_v32 = vld [vmem:[%s22772_s2 + $0x888] sm:$0xff] }
 0x29d   : > { %10904 = vmatmul.mubr.bf16.gmra.mrb[108].mxu0 %v14676_v33  ;;  %8704 = vmatprep.mubr.bf16.mxu1 %v14383_v34  ;;  %v510_v33 = vld [vmem:[%s22772_s2 + $0x8c8] sm:$0xff]  ;;  %v809_v34 = vld [vmem:[%s22772_s2 + $0x1220] sm:$0xff] }
 0x29e   : > { %10913 = vmatprep.mubr.bf16.mxu0 %v14693_v35  ;;  %v817_v35 = vld [vmem:[%s22772_s2 + $0x1260] sm:$0xff]  ;;  %v14511_v38 = vcombine.high %v502_v32, %v510_v33  ;;  %v14510_v44 = vcombine.low %v502_v32, %v510_v33 }
 0x29f   : > { %v14821_v39 = vcombine.high %v809_v34, %v817_v35  ;;  %v14820_v45 = vcombine.low %v809_v34, %v817_v35 }
 0x2a4   : > { %8705 = vmatmul.mubr.bf16.gmra.mrb[36].mxu1 %v14382_v40  ;;  %v518_v40 = vld [vmem:[%s22772_s2 + $0x908] sm:$0xff] }
 0x2a5   : > { %10914 = vmatmul.mubr.bf16.gmra.mrb[112].mxu0 %v14692_v41  ;;  %8714 = vmatprep.mubr.bf16.mxu1 %v14399_v42  ;;  %v526_v41 = vld [vmem:[%s22772_s2 + $0x948] sm:$0xff]  ;;  %v825_v42 = vld [vmem:[%s22772_s2 + $0x12a0] sm:$0xff] }
 0x2a6   : > { %10923 = vmatprep.mubr.bf16.mxu0 %v14709_v43  ;;  %v833_v43 = vld [vmem:[%s22772_s2 + $0x12e0] sm:$0xff]  ;;  %v14527_v46 = vcombine.high %v518_v40, %v526_v41  ;;  %v14526_v54 = vcombine.low %v518_v40, %v526_v41 }
 0x2a7   : > { %v14837_v47 = vcombine.high %v825_v42, %v833_v43  ;;  %v14836_v55 = vcombine.low %v825_v42, %v833_v43 }
 0x2ac   : > { %8715 = vmatmul.mubr.bf16.gmra.mrb[40].mxu1 %v14398_v50  ;;  %v534_v50 = vld [vmem:[%s22772_s2 + $0x988] sm:$0xff] }
 0x2ad   : > { %10924 = vmatmul.mubr.bf16.gmra.mrb[116].mxu0 %v14708_v51  ;;  %8724 = vmatprep.mubr.bf16.mxu1 %v14415_v52  ;;  %v542_v51 = vld [vmem:[%s22772_s2 + $0x9c8] sm:$0xff]  ;;  %v841_v52 = vld [vmem:[%s22772_s2 + $0x1320] sm:$0xff] }
 0x2ae   : > { %10933 = vmatprep.mubr.bf16.mxu0 %v14725_v53  ;;  %v849_v53 = vld [vmem:[%s22772_s2 + $0x1360] sm:$0xff]  ;;  %v14543_v56 = vcombine.high %v534_v50, %v542_v51  ;;  %v14542_v62 = vcombine.low %v534_v50, %v542_v51 }
 0x2af   : > { %v14853_v57 = vcombine.high %v841_v52, %v849_v53  ;;  %v14852_v63 = vcombine.low %v841_v52, %v849_v53  ;;  %v17653_v52 = vld [vmem:[%s18020_s13 + $0x5f0] ss:$8 sps:$4 sm:$0xff]   ;;  %v17655_v53 = vld [vmem:[%s18020_s13 + $0x5f4] ss:$8 sps:$4 sm:$0xff]  }
 0x2b0   : > { %11304 = vmatprep.subr.bf16.mxu0 %v17655_v53 }
 0x2b1   : > { %11305 = vmatpush1.bf16.msra.mxu0 %v17653_v52 }
 0x2b4   : > { %8725 = vmatmul.mubr.bf16.gmra.mrb[44].mxu1 %v14414_v58  ;;  %v550_v58 = vld [vmem:[%s22772_s2 + $0xa08] sm:$0xff] }
 0x2b5   : > { %10934 = vmatmul.mubr.bf16.gmra.mrb[120].mxu0 %v14724_v59  ;;  %8734 = vmatprep.mubr.bf16.mxu1 %v14431_v60  ;;  %v558_v59 = vld [vmem:[%s22772_s2 + $0xa48] sm:$0xff]  ;;  %v857_v60 = vld [vmem:[%s22772_s2 + $0x13a0] sm:$0xff] }
 0x2b6   : > { %10943 = vmatprep.mubr.bf16.mxu0 %v14741_v61  ;;  %v865_v61 = vld [vmem:[%s22772_s2 + $0x13e0] sm:$0xff]  ;;  %v14559_v4 = vcombine.high %v550_v58, %v558_v59  ;;  %v14558_v12 = vcombine.low %v550_v58, %v558_v59 }
 0x2b7   : > { %v14869_v7 = vcombine.high %v857_v60, %v865_v61  ;;  %v14868_v13 = vcombine.low %v857_v60, %v865_v61 }
 0x2bc   : > { %8735 = vmatmul.mubr.bf16.gmra.mrb[48].mxu1 %v14430_v8  ;;  %v566_v8 = vld [vmem:[%s22772_s2 + $0xa88] sm:$0xff] }
 0x2bd   : > { %10944 = vmatmul.mubr.bf16.gmra.mrb[124].mxu0 %v14740_v9  ;;  %8744 = vmatprep.mubr.bf16.mxu1 %v14447_v10  ;;  %v574_v9 = vld [vmem:[%s22772_s2 + $0xac8] sm:$0xff]  ;;  %v873_v10 = vld [vmem:[%s22772_s2 + $0x1420] sm:$0xff] }
 0x2be   : > { %10953 = vmatprep.mubr.bf16.mxu0 %v14757_v11  ;;  %v881_v11 = vld [vmem:[%s22772_s2 + $0x1460] sm:$0xff]  ;;  %v14575_v14 = vcombine.high %v566_v8, %v574_v9  ;;  %v14574_v20 = vcombine.low %v566_v8, %v574_v9 }
 0x2bf   : > { %v14885_v15 = vcombine.high %v873_v10, %v881_v11  ;;  %v14884_v21 = vcombine.low %v873_v10, %v881_v11 }
 0x2c4   : > { %8745 = vmatmul.mubr.bf16.gmra.mrb[52].mxu1 %v14446_v16  ;;  %v582_v16 = vld [vmem:[%s22772_s2 + $0xb08] sm:$0xff] }
 0x2c5   : > { %10954 = vmatmul.mubr.bf16.gmra.mrb[128].mxu0 %v14756_v17  ;;  %8754 = vmatprep.mubr.bf16.mxu1 %v14463_v18  ;;  %v590_v17 = vld [vmem:[%s22772_s2 + $0xb48] sm:$0xff]  ;;  %v889_v18 = vld [vmem:[%s22772_s2 + $0x14a0] sm:$0xff] }
 0x2c6   : > { %10963 = vmatprep.mubr.bf16.mxu0 %v14773_v19  ;;  %v897_v19 = vld [vmem:[%s22772_s2 + $0x14e0] sm:$0xff]  ;;  %v14591_v22 = vcombine.high %v582_v16, %v590_v17  ;;  %v14590_v6 = vcombine.low %v582_v16, %v590_v17 }
 0x2c7   : > { %v14901_v23 = vcombine.high %v889_v18, %v897_v19  ;;  %v14900_v25 = vcombine.low %v889_v18, %v897_v19 }
 0x2cc   : > { %8755 = vmatmul.mubr.bf16.gmra.mrb[56].mxu1 %v14462_v1  ;;  %v598_v1 = vld [vmem:[%s22772_s2 + $0xb88] sm:$0xff] }
 0x2cd   : > { %10964 = vmatmul.mubr.bf16.gmra.mrb[132].mxu0 %v14772_v2  ;;  %8764 = vmatprep.mubr.bf16.mxu1 %v14479_v3  ;;  %v606_v2 = vld [vmem:[%s22772_s2 + $0xbc8] sm:$0xff]  ;;  %v905_v3 = vld [vmem:[%s22772_s2 + $0x1520] sm:$0xff] }
 0x2ce   : > { %10973 = vmatprep.mubr.bf16.mxu0 %v14789_v5  ;;  %v913_v5 = vld [vmem:[%s22772_s2 + $0x1560] sm:$0xff]  ;;  %v14607_v26 = vcombine.high %v598_v1, %v606_v2  ;;  %v14606_v32 = vcombine.low %v598_v1, %v606_v2 }
 0x2cf   : > { %v14917_v27 = vcombine.high %v905_v3, %v913_v5  ;;  %v14916_v33 = vcombine.low %v905_v3, %v913_v5  ;;  %v17658_v3 = vld [vmem:[%s18020_s13 + $0x604] ss:$8 sps:$4 sm:$0xff]  }
 0x2d0   : > { %v726_v5 = vld [vmem:[%s22772_s2 + $0xf88] sm:$0xff]  ;;  %11947 = vmatprep.subr.bf16.mxu0 %v17658_v3 }
 0x2d4   : > { %8765 = vmatmul.mubr.bf16.gmra.mrb[60].mxu1 %v14478_v28  ;;  %v614_v28 = vld [vmem:[%s22772_s2 + $0xc08] sm:$0xff] }
 0x2d5   : > { %10974 = vmatmul.mubr.bf16.gmra.mrb[136].mxu0 %v14788_v29  ;;  %8774 = vmatprep.mubr.bf16.mxu1 %v14495_v30  ;;  %v622_v29 = vld [vmem:[%s22772_s2 + $0xc48] sm:$0xff]  ;;  %v921_v30 = vld [vmem:[%s22772_s2 + $0x15a0] sm:$0xff] }
 0x2d6   : > { %10983 = vmatprep.mubr.bf16.mxu0 %v14805_v31  ;;  %v929_v31 = vld [vmem:[%s22772_s2 + $0x15e0] sm:$0xff]  ;;  %v14623_v34 = vcombine.high %v614_v28, %v622_v29  ;;  %v14622_v40 = vcombine.low %v614_v28, %v622_v29 }
 0x2d7   : > { %v14933_v35 = vcombine.high %v921_v30, %v929_v31  ;;  %v14932_v41 = vcombine.low %v921_v30, %v929_v31  ;;  %v742_v31 = vld [vmem:[%s22772_s2 + $0x1008] sm:$0xff] }
 0x2dc   : > { %8775 = vmatmul.mubr.bf16.gmra.mrb[64].mxu1 %v14494_v36  ;;  %v630_v36 = vld [vmem:[%s22772_s2 + $0xc88] sm:$0xff] }
 0x2dd   : > { %10984 = vmatmul.mubr.bf16.gmra.mrb[140].mxu0 %v14804_v37  ;;  %8784 = vmatprep.mubr.bf16.mxu1 %v14511_v38  ;;  %v638_v37 = vld [vmem:[%s22772_s2 + $0xcc8] sm:$0xff]  ;;  %v937_v38 = vld [vmem:[%s22772_s2 + $0x1620] sm:$0xff] }
 0x2de   : > { %10993 = vmatprep.mubr.bf16.mxu0 %v14821_v39  ;;  %v945_v39 = vld [vmem:[%s22772_s2 + $0x1660] sm:$0xff]  ;;  %v14639_v42 = vcombine.high %v630_v36, %v638_v37  ;;  %v14638_v48 = vcombine.low %v630_v36, %v638_v37 }
 0x2df   : > { %v14949_v43 = vcombine.high %v937_v38, %v945_v39  ;;  %v14948_v49 = vcombine.low %v937_v38, %v945_v39  ;;  %v758_v39 = vld [vmem:[%s22772_s2 + $0x1088] sm:$0xff] }
 0x2e4   : > { %8785 = vmatmul.mubr.bf16.gmra.mrb[68].mxu1 %v14510_v44  ;;  %v646_v44 = vld [vmem:[%s22772_s2 + $0xd08] sm:$0xff] }
 0x2e5   : > { %10994 = vmatmul.mubr.bf16.gmra.mrb[144].mxu0 %v14820_v45  ;;  %8794 = vmatprep.mubr.bf16.mxu1 %v14527_v46  ;;  %v654_v45 = vld [vmem:[%s22772_s2 + $0xd48] sm:$0xff]  ;;  %v953_v46 = vld [vmem:[%s22772_s2 + $0x16a0] sm:$0xff] }
 0x2e6   : > { %11003 = vmatprep.mubr.bf16.mxu0 %v14837_v47  ;;  %v961_v47 = vld [vmem:[%s22772_s2 + $0x16e0] sm:$0xff]  ;;  %v14655_v50 = vcombine.high %v646_v44, %v654_v45  ;;  %v14654_v58 = vcombine.low %v646_v44, %v654_v45 }
 0x2e7   : > { %v14965_v51 = vcombine.high %v953_v46, %v961_v47  ;;  %v14964_v59 = vcombine.low %v953_v46, %v961_v47  ;;  %v774_v47 = vld [vmem:[%s22772_s2 + $0x1108] sm:$0xff] }
 0x2ec   : > { %8795 = vmatmul.mubr.bf16.gmra.mrb[72].mxu1 %v14526_v54  ;;  %v662_v54 = vld [vmem:[%s22772_s2 + $0xd88] sm:$0xff] }
 0x2ed   : > { %11004 = vmatmul.mubr.bf16.gmra.mrb[148].mxu0 %v14836_v55  ;;  %8804 = vmatprep.mubr.bf16.mxu1 %v14543_v56  ;;  %v670_v55 = vld [vmem:[%s22772_s2 + $0xdc8] sm:$0xff]  ;;  %v969_v56 = vld [vmem:[%s22772_s2 + $0x1720] sm:$0xff] }
 0x2ee   : > { %11013 = vmatprep.mubr.bf16.mxu0 %v14853_v57  ;;  %v977_v57 = vld [vmem:[%s22772_s2 + $0x1760] sm:$0xff]  ;;  %v14671_v60 = vcombine.high %v662_v54, %v670_v55  ;;  %v14670_v8 = vcombine.low %v662_v54, %v670_v55  ;;  %v790_v55 = vld [vmem:[%s22772_s2 + $0x1188] sm:$0xff] }
 0x2ef   : > { %v14981_v61 = vcombine.high %v969_v56, %v977_v57  ;;  %v14980_v9 = vcombine.low %v969_v56, %v977_v57  ;;  %v798_v56 = vld [vmem:[%s22772_s2 + $0x11c8] sm:$0xff]  ;;  %v1097_v57 = vld [vmem:[%s22772_s2 + $0x1b20] sm:$0xff] }
 0x2f4   : > { %8805 = vmatmul.mubr.bf16.gmra.mrb[76].mxu1 %v14542_v62  ;;  %v678_v62 = vld [vmem:[%s22772_s2 + $0xe08] sm:$0xff] }
 0x2f5   : > { %11014 = vmatmul.mubr.bf16.gmra.mrb[152].mxu0 %v14852_v63  ;;  %8814 = vmatprep.mubr.bf16.mxu1 %v14559_v4  ;;  %v686_v63 = vld [vmem:[%s22772_s2 + $0xe48] sm:$0xff]  ;;  %v985_v4 = vld [vmem:[%s22772_s2 + $0x17a0] sm:$0xff] }
 0x2f6   : > { %11023 = vmatprep.mubr.bf16.mxu0 %v14869_v7  ;;  %v993_v7 = vld [vmem:[%s22772_s2 + $0x17e0] sm:$0xff]  ;;  %v14687_v10 = vcombine.high %v678_v62, %v686_v63  ;;  %v14686_v16 = vcombine.low %v678_v62, %v686_v63  ;;  %v806_v63 = vld [vmem:[%s22772_s2 + $0x1208] sm:$0xff] }
 0x2f7   : > { %v14997_v11 = vcombine.high %v985_v4, %v993_v7  ;;  %v14996_v17 = vcombine.low %v985_v4, %v993_v7  ;;  %v814_v4 = vld [vmem:[%s22772_s2 + $0x1248] sm:$0xff]  ;;  %v1113_v7 = vld [vmem:[%s22772_s2 + $0x1ba0] sm:$0xff] }
 0x2fc   : > { %8815 = vmatmul.mubr.bf16.gmra.mrb[80].mxu1 %v14558_v12  ;;  %v694_v12 = vld [vmem:[%s22772_s2 + $0xe88] sm:$0xff] }
 0x2fd   : > { %11024 = vmatmul.mubr.bf16.gmra.mrb[156].mxu0 %v14868_v13  ;;  %8824 = vmatprep.mubr.bf16.mxu1 %v14575_v14  ;;  %v702_v13 = vld [vmem:[%s22772_s2 + $0xec8] sm:$0xff]  ;;  %v1001_v14 = vld [vmem:[%s22772_s2 + $0x1820] sm:$0xff] }
 0x2fe   : > { %11033 = vmatprep.mubr.bf16.mxu0 %v14885_v15  ;;  %v1009_v15 = vld [vmem:[%s22772_s2 + $0x1860] sm:$0xff]  ;;  %v14703_v18 = vcombine.high %v694_v12, %v702_v13  ;;  %v14702_v24 = vcombine.low %v694_v12, %v702_v13  ;;  %v822_v13 = vld [vmem:[%s22772_s2 + $0x1288] sm:$0xff] }
 0x2ff   : > { %v15013_v19 = vcombine.high %v1001_v14, %v1009_v15  ;;  %v15012_v0 = vcombine.low %v1001_v14, %v1009_v15  ;;  %v830_v14 = vld [vmem:[%s22772_s2 + $0x12c8] sm:$0xff]  ;;  %v1129_v15 = vld [vmem:[%s22772_s2 + $0x1c20] sm:$0xff] }
 0x304   : > { %8825 = vmatmul.mubr.bf16.gmra.mrb[84].mxu1 %v14574_v20  ;;  %v710_v20 = vld [vmem:[%s22772_s2 + $0xf08] sm:$0xff] }
 0x305   : > { %11034 = vmatmul.mubr.bf16.gmra.mrb[160].mxu0 %v14884_v21  ;;  %8834 = vmatprep.mubr.bf16.mxu1 %v14591_v22  ;;  %v718_v21 = vld [vmem:[%s22772_s2 + $0xf48] sm:$0xff]  ;;  %v1017_v22 = vld [vmem:[%s22772_s2 + $0x18a0] sm:$0xff] }
 0x306   : > { %11043 = vmatprep.mubr.bf16.mxu0 %v14901_v23  ;;  %v1025_v23 = vld [vmem:[%s22772_s2 + $0x18e0] sm:$0xff]  ;;  %v14719_v1 = vcombine.high %v710_v20, %v718_v21 }
 0x307   : > { %v15029_v2 = vcombine.high %v1017_v22, %v1025_v23  ;;  %v15028_v28 = vcombine.low %v1017_v22, %v1025_v23  ;;  %v846_v22 = vld [vmem:[%s22772_s2 + $0x1348] sm:$0xff]  ;;  %v1145_v23 = vld [vmem:[%s22772_s2 + $0x1ca0] sm:$0xff] }
 0x30c   : > { %8835 = vmatmul.mubr.bf16.gmra.mrb[88].mxu1 %v14590_v6  ;;  %v734_v6 = vld [vmem:[%s22772_s2 + $0xfc8] sm:$0xff] }
 0x30d   : > { %11044 = vmatmul.mubr.bf16.gmra.mrb[164].mxu0 %v14900_v25  ;;  %8844 = vmatprep.mubr.bf16.mxu1 %v14607_v26  ;;  %v1033_v25 = vld [vmem:[%s22772_s2 + $0x1920] sm:$0xff]  ;;  %v14735_v29 = vcombine.high %v726_v5, %v734_v6 }
 0x30e   : > { %11053 = vmatprep.mubr.bf16.mxu0 %v14917_v27  ;;  %v1041_v26 = vld [vmem:[%s22772_s2 + $0x1960] sm:$0xff]  ;;  %v14718_v27 = vcombine.low %v710_v20, %v718_v21  ;;  %v838_v21 = vld [vmem:[%s22772_s2 + $0x1308] sm:$0xff] }
 0x30f   : > { %v15045_v30 = vcombine.high %v1033_v25, %v1041_v26  ;;  %v15044_v36 = vcombine.low %v1033_v25, %v1041_v26  ;;  %v1161_v25 = vld [vmem:[%s22772_s2 + $0x1d20] sm:$0xff] }
 0x310   : > { %v1169_v26 = vld [vmem:[%s22772_s2 + $0x1d60] sm:$0xff] }
 0x314   : > { %8845 = vmatmul.mubr.bf16.gmra.mrb[92].mxu1 %v14606_v32  ;;  %v750_v32 = vld [vmem:[%s22772_s2 + $0x1048] sm:$0xff] }
 0x315   : > { %11054 = vmatmul.mubr.bf16.gmra.mrb[168].mxu0 %v14916_v33  ;;  %8854 = vmatprep.mubr.bf16.mxu1 %v14623_v34  ;;  %v1049_v33 = vld [vmem:[%s22772_s2 + $0x19a0] sm:$0xff]  ;;  %v14751_v37 = vcombine.high %v742_v31, %v750_v32 }
 0x316   : > { %11063 = vmatprep.mubr.bf16.mxu0 %v14933_v35  ;;  %v1057_v34 = vld [vmem:[%s22772_s2 + $0x19e0] sm:$0xff]  ;;  %v14734_v35 = vcombine.low %v726_v5, %v734_v6  ;;  %v854_v5 = vld [vmem:[%s22772_s2 + $0x1388] sm:$0xff] }
 0x317   : > { %v15061_v38 = vcombine.high %v1049_v33, %v1057_v34  ;;  %v15060_v44 = vcombine.low %v1049_v33, %v1057_v34  ;;  %v862_v6 = vld [vmem:[%s22772_s2 + $0x13c8] sm:$0xff]  ;;  %v1177_v33 = vld [vmem:[%s22772_s2 + $0x1da0] sm:$0xff] }
 0x318   : > { %v1185_v34 = vld [vmem:[%s22772_s2 + $0x1de0] sm:$0xff] }
 0x31c   : > { %8855 = vmatmul.mubr.bf16.gmra.mrb[96].mxu1 %v14622_v40  ;;  %v766_v40 = vld [vmem:[%s22772_s2 + $0x10c8] sm:$0xff] }
 0x31d   : > { %11064 = vmatmul.mubr.bf16.gmra.mrb[172].mxu0 %v14932_v41  ;;  %8864 = vmatprep.mubr.bf16.mxu1 %v14639_v42  ;;  %v1065_v41 = vld [vmem:[%s22772_s2 + $0x1a20] sm:$0xff]  ;;  %v14767_v45 = vcombine.high %v758_v39, %v766_v40 }
 0x31e   : > { %11073 = vmatprep.mubr.bf16.mxu0 %v14949_v43  ;;  %v1073_v42 = vld [vmem:[%s22772_s2 + $0x1a60] sm:$0xff]  ;;  %v14750_v43 = vcombine.low %v742_v31, %v750_v32  ;;  %v870_v31 = vld [vmem:[%s22772_s2 + $0x1408] sm:$0xff] }
 0x31f   : > { %v15077_v46 = vcombine.high %v1065_v41, %v1073_v42  ;;  %v15076_v52 = vcombine.low %v1065_v41, %v1073_v42  ;;  %v878_v32 = vld [vmem:[%s22772_s2 + $0x1448] sm:$0xff]  ;;  %v1193_v41 = vld [vmem:[%s22772_s2 + $0x1e20] sm:$0xff] }
 0x320   : > { %v1201_v42 = vld [vmem:[%s22772_s2 + $0x1e60] sm:$0xff] }
 0x324   : > { %8865 = vmatmul.mubr.bf16.gmra.mrb[100].mxu1 %v14638_v48  ;;  %v782_v48 = vld [vmem:[%s22772_s2 + $0x1148] sm:$0xff] }
 0x325   : > { %11074 = vmatmul.mubr.bf16.gmra.mrb[176].mxu0 %v14948_v49  ;;  %8874 = vmatprep.mubr.bf16.mxu1 %v14655_v50  ;;  %v1081_v49 = vld [vmem:[%s22772_s2 + $0x1aa0] sm:$0xff]  ;;  %v14783_v53 = vcombine.high %v774_v47, %v782_v48 }
 0x326   : > { %11083 = vmatprep.mubr.bf16.mxu0 %v14965_v51  ;;  %v1089_v50 = vld [vmem:[%s22772_s2 + $0x1ae0] sm:$0xff]  ;;  %v14766_v51 = vcombine.low %v758_v39, %v766_v40  ;;  %v886_v39 = vld [vmem:[%s22772_s2 + $0x1488] sm:$0xff] }
 0x327   : > { %v15093_v54 = vcombine.high %v1081_v49, %v1089_v50  ;;  %v894_v40 = vld [vmem:[%s22772_s2 + $0x14c8] sm:$0xff] }
 0x32c   : > { %8875 = vmatmul.mubr.bf16.gmra.mrb[104].mxu1 %v14654_v58  ;;  %v1105_v58 = vld [vmem:[%s22772_s2 + $0x1b60] sm:$0xff] }
 0x32d   : > { %11084 = vmatmul.mubr.bf16.gmra.mrb[180].mxu0 %v14964_v59  ;;  %8884 = vmatprep.mubr.bf16.mxu1 %v14671_v60  ;;  %v14782_v59 = vcombine.low %v774_v47, %v782_v48  ;;  %v15092_v60 = vcombine.low %v1081_v49, %v1089_v50  ;;  %v15109_v62 = vcombine.high %v1097_v57, %v1105_v58  ;;  %v17667_v47 = vld [vmem:[%s18020_s13 + $0x204] ss:$8 sps:$4 sm:$0xff]   ;;  %v17665_v48 = vld [vmem:[%s18020_s13 + $0x200] ss:$8 sps:$4 sm:$0xff]   ;;  %v17670_v49 = vld [vmem:[%s18020_s13 + $0x214] ss:$8 sps:$4 sm:$0xff]  }
 0x32e   : > { %11093 = vmatprep.mubr.bf16.mxu0 %v14981_v61  ;;  %v14799_v61 = vcombine.high %v790_v55, %v798_v56  ;;  %v902_v50 = vld [vmem:[%s22772_s2 + $0x1508] sm:$0xff]  ;;  %9255 = vmatprep.subr.bf16.mxu1 %v17667_v47 }
 0x32f   : > { %9256 = vmatpush1.bf16.msra.mxu1 %v17665_v48  ;;  %v17698_v47 = vld [vmem:[%s18020_s13 + $0x2a0] ss:$8 sps:$4 sm:$0xff]  }
 0x330   : > { %9257 = vmatprep.subr.bf16.mxu1 %v17670_v49  ;;  %v990_v48 = vld [vmem:[%s22772_s2 + $0x17c8] sm:$0xff]  ;;  %v17659_v49 = vld [vmem:[%s18020_s13 + $0x610] ss:$8 sps:$4 sm:$0xff]  }
 0x334   : > { %8885 = vmatmul.mubr.bf16.gmra.mrb[108].mxu1 %v14670_v8  ;;  %v1121_v8 = vld [vmem:[%s22772_s2 + $0x1be0] sm:$0xff] }
 0x335   : > { %11094 = vmatmul.mubr.bf16.gmra.mrb[184].mxu0 %v14980_v9  ;;  %8894 = vmatprep.mubr.bf16.mxu1 %v14687_v10  ;;  %v14798_v9 = vcombine.low %v790_v55, %v798_v56  ;;  %v15108_v10 = vcombine.low %v1097_v57, %v1105_v58  ;;  %v15125_v12 = vcombine.high %v1113_v7, %v1121_v8 }
 0x336   : > { %11103 = vmatprep.mubr.bf16.mxu0 %v14997_v11  ;;  %v14815_v11 = vcombine.high %v806_v63, %v814_v4  ;;  %v14894_v55 = vcombine.low %v886_v39, %v894_v40  ;;  %v15204_v56 = vcombine.low %v1193_v41, %v1201_v42 }
 0x33c   : > { %8895 = vmatmul.mubr.bf16.gmra.mrb[112].mxu1 %v14686_v16  ;;  %v1137_v16 = vld [vmem:[%s22772_s2 + $0x1c60] sm:$0xff] }
 0x33d   : > { %11104 = vmatmul.mubr.bf16.gmra.mrb[188].mxu0 %v14996_v17  ;;  %8904 = vmatprep.mubr.bf16.mxu1 %v14703_v18  ;;  %v14814_v17 = vcombine.low %v806_v63, %v814_v4  ;;  %v15124_v18 = vcombine.low %v1113_v7, %v1121_v8  ;;  %v15141_v20 = vcombine.high %v1129_v15, %v1137_v16  ;;  %v926_v63 = vld [vmem:[%s22772_s2 + $0x15c8] sm:$0xff]  ;;  %v1225_v4 = vld [vmem:[%s22772_s2 + $0x1f20] sm:$0xff]  ;;  %v17677_v8 = vld [vmem:[%s18020_s13 + $0x230] ss:$8 sps:$4 sm:$0xff]  }
 0x33e   : > { %11113 = vmatprep.mubr.bf16.mxu0 %v15013_v19  ;;  %v14831_v19 = vcombine.high %v822_v13, %v830_v14  ;;  %v1233_v7 = vld [vmem:[%s22772_s2 + $0x1f60] sm:$0xff] }
 0x344   : > { %8905 = vmatmul.mubr.bf16.gmra.mrb[116].mxu1 %v14702_v24  ;;  %v1153_v24 = vld [vmem:[%s22772_s2 + $0x1ce0] sm:$0xff] }
 0x345   : > { %11114 = vmatmul.mubr.bf16.gmra.mrb[192].mxu0 %v15012_v0  ;;  %8914 = vmatprep.mubr.bf16.mxu1 %v14719_v1  ;;  %v14830_v0 = vcombine.low %v822_v13, %v830_v14  ;;  %v15140_v1 = vcombine.low %v1129_v15, %v1137_v16  ;;  %v15157_v3 = vcombine.high %v1145_v23, %v1153_v24  ;;  %v17682_v13 = vld [vmem:[%s18020_s13 + $0x244] ss:$8 sps:$4 sm:$0xff]   ;;  %v17680_v14 = vld [vmem:[%s18020_s13 + $0x240] ss:$8 sps:$4 sm:$0xff]   ;;  %v17685_v15 = vld [vmem:[%s18020_s13 + $0x254] ss:$8 sps:$4 sm:$0xff]  }
 0x346   : > { %11123 = vmatprep.mubr.bf16.mxu0 %v15029_v2  ;;  %v14847_v2 = vcombine.high %v838_v21, %v846_v22  ;;  %v934_v16 = vld [vmem:[%s22772_s2 + $0x1608] sm:$0xff] }
 0x34c   : > { %8915 = vmatmul.mubr.bf16.gmra.mrb[120].mxu1 %v14718_v27  ;;  %v14846_v27 = vcombine.low %v838_v21, %v846_v22  ;;  %v15236_v22 = vcombine.low %v1225_v4, %v1233_v7 }
 0x34d   : > { %11124 = vmatmul.mubr.bf16.gmra.mrb[196].mxu0 %v15028_v28  ;;  %8924 = vmatprep.mubr.bf16.mxu1 %v14735_v29  ;;  %v15156_v28 = vcombine.low %v1145_v23, %v1153_v24  ;;  %v14863_v29 = vcombine.high %v854_v5, %v862_v6 }
 0x34e   : > { %11133 = vmatprep.mubr.bf16.mxu0 %v15045_v30  ;;  %v15173_v30 = vcombine.high %v1161_v25, %v1169_v26 }
 0x354   : > { %8925 = vmatmul.mubr.bf16.gmra.mrb[124].mxu1 %v14734_v35  ;;  %v14862_v35 = vcombine.low %v854_v5, %v862_v6  ;;  %v958_v5 = vld [vmem:[%s22772_s2 + $0x16c8] sm:$0xff] }
 0x355   : > { %11134 = vmatmul.mubr.bf16.gmra.mrb[200].mxu0 %v15044_v36  ;;  %8934 = vmatprep.mubr.bf16.mxu1 %v14751_v37  ;;  %v15172_v36 = vcombine.low %v1161_v25, %v1169_v26  ;;  %v14879_v37 = vcombine.high %v870_v31, %v878_v32  ;;  %v234_v6 = vld [vmem:[%s22772_s2 + $0x28] sm:$0xff]  ;;  %v17689_v26 = vld [vmem:[%s18020_s13 + $0x270] ss:$8 sps:$4 sm:$0xff]  }
 0x356   : > { %11143 = vmatprep.mubr.bf16.mxu0 %v15061_v38  ;;  %v15189_v38 = vcombine.high %v1177_v33, %v1185_v34  ;;  %v242_v25 = vld [vmem:[%s22772_s2 + $0x68] sm:$0xff] }
 0x35c   : > { %8935 = vmatmul.mubr.bf16.gmra.mrb[128].mxu1 %v14750_v43  ;;  %v14878_v43 = vcombine.low %v870_v31, %v878_v32  ;;  %v17694_v31 = vld [vmem:[%s18020_s13 + $0x284] ss:$8 sps:$4 sm:$0xff]   ;;  %v17692_v32 = vld [vmem:[%s18020_s13 + $0x280] ss:$8 sps:$4 sm:$0xff]  }
 0x35d   : > { %11144 = vmatmul.mubr.bf16.gmra.mrb[204].mxu0 %v15060_v44  ;;  %8944 = vmatprep.mubr.bf16.mxu1 %v14767_v45  ;;  %v15188_v44 = vcombine.low %v1177_v33, %v1185_v34  ;;  %v14895_v45 = vcombine.high %v886_v39, %v894_v40  ;;  %v17697_v33 = vld [vmem:[%s18020_s13 + $0x294] ss:$8 sps:$4 sm:$0xff]   ;;  %v966_v34 = vld [vmem:[%s22772_s2 + $0x1708] sm:$0xff]  ;;  %v14246_v39 = vcombine.low %v234_v6, %v242_v25 }
 0x35e   : > { %11153 = vmatprep.mubr.bf16.mxu0 %v15077_v46  ;;  %v15205_v46 = vcombine.high %v1193_v41, %v1201_v42  ;;  %v17656_v41 = vld [vmem:[%s18020_s13 + $0x600] ss:$8 sps:$4 sm:$0xff]  }
 0x364   : > { %8945 = vmatmul.mubr.bf16.gmra.mrb[132].mxu1 %v14766_v51  ;;  %v910_v51 = vld [vmem:[%s22772_s2 + $0x1548] sm:$0xff] }
 0x365   : > { %11154 = vmatmul.mubr.bf16.gmra.mrb[208].mxu0 %v15076_v52  ;;  %8954 = vmatprep.mubr.bf16.mxu1 %v14783_v53  ;;  %v1209_v52 = vld [vmem:[%s22772_s2 + $0x1ea0] sm:$0xff]  ;;  %v14911_v57 = vcombine.high %v902_v50, %v910_v51 }
 0x366   : > { %11163 = vmatprep.mubr.bf16.mxu0 %v15093_v54  ;;  %v1217_v53 = vld [vmem:[%s22772_s2 + $0x1ee0] sm:$0xff]  ;;  %v17668_v54 = vld [vmem:[%s18020_s13 + $0x210] ss:$8 sps:$4 sm:$0xff]  }
 0x367   : > { %v15221_v58 = vcombine.high %v1209_v52, %v1217_v53  ;;  %9258 = vmatpush1.bf16.msra.mxu1 %v17668_v54 }
 0x36c   : > { %8955 = vmatmul.mubr.bf16.gmra.mrb[136].mxu1 %v14782_v59  ;;  %v17673_v59 = vld [vmem:[%s18020_s13 + $0x224] ss:$8 sps:$4 sm:$0xff]  }
 0x36d   : > { %11164 = vmatmul.mubr.bf16.gmra.mrb[212].mxu0 %v15092_v60  ;;  %8964 = vmatprep.mubr.bf16.mxu1 %v14799_v61  ;;  %v17671_v60 = vld [vmem:[%s18020_s13 + $0x220] ss:$8 sps:$4 sm:$0xff]  }
 0x36e   : > { %11173 = vmatprep.mubr.bf16.mxu0 %v15109_v62  ;;  %v918_v61 = vld [vmem:[%s22772_s2 + $0x1588] sm:$0xff]  ;;  %v17679_v62 = vld [vmem:[%s18020_s13 + $0x234] ss:$8 sps:$4 sm:$0xff]   ;;  %9259 = vmatprep.subr.bf16.mxu1 %v17673_v59  ;;  %v17704_v59 = vld [vmem:[%s18020_s13 + $0x2b0] ss:$8 sps:$4 sm:$0xff]  }
 0x36f   : > { %9260 = vmatpush1.bf16.msra.mxu1 %v17671_v60  ;;  %v14926_v21 = vcombine.low %v918_v61, %v926_v63  ;;  %v17676_v60 = vld [vmem:[%s18020_s13 + $0x634] ss:$8 sps:$4 sm:$0xff]  }
 0x370   : > { %9261 = vmatprep.subr.bf16.mxu1 %v17679_v62  ;;  %v998_v62 = vld [vmem:[%s22772_s2 + $0x1808] sm:$0xff] }
 0x373   : > { %9262 = vmatpush1.bf16.msra.mxu1 %v17677_v8  ;;  %v17674_v8 = vld [vmem:[%s18020_s13 + $0x630] ss:$8 sps:$4 sm:$0xff]  }
 0x374   : > { %8965 = vmatmul.mubr.bf16.gmra.mrb[140].mxu1 %v14798_v9  ;;  %v14910_v9 = vcombine.low %v902_v50, %v910_v51  ;;  %9263 = vmatprep.subr.bf16.mxu1 %v17682_v13  ;;  %v17706_v50 = vld [vmem:[%s18020_s13 + $0x2b4] ss:$8 sps:$4 sm:$0xff]   ;;  %v266_v51 = vld [vmem:[%s22772_s2 + $0x128] sm:$0xff] }
 0x375   : > { %11174 = vmatmul.mubr.bf16.gmra.mrb[216].mxu0 %v15108_v10  ;;  %8974 = vmatprep.mubr.bf16.mxu1 %v14815_v11  ;;  %v15220_v10 = vcombine.low %v1209_v52, %v1217_v53  ;;  %v14927_v11 = vcombine.high %v918_v61, %v926_v63  ;;  %v274_v52 = vld [vmem:[%s22772_s2 + $0x168] sm:$0xff] }
 0x376   : > { %11183 = vmatprep.mubr.bf16.mxu0 %v15125_v12  ;;  %v15237_v12 = vcombine.high %v1225_v4, %v1233_v7  ;;  %v17664_v53 = vld [vmem:[%s18020_s13 + $0x624] ss:$8 sps:$4 sm:$0xff]   ;;  %v14278_v13 = vcombine.low %v266_v51, %v274_v52 }
 0x377   : > { %9264 = vmatpush1.bf16.msra.mxu1 %v17680_v14  ;;  %v17709_v61 = vld [vmem:[%s18020_s13 + $0x2c4] ss:$8 sps:$4 sm:$0xff]  }
 0x378   : > { %9265 = vmatprep.subr.bf16.mxu1 %v17685_v15  ;;  %v1006_v63 = vld [vmem:[%s22772_s2 + $0x1848] sm:$0xff] }
 0x379   : > { %v282_v4 = vld [vmem:[%s22772_s2 + $0x1a8] sm:$0xff]  ;;  %v15007_v14 = vcombine.high %v998_v62, %v1006_v63 }
 0x37a   : > { %v290_v7 = vld [vmem:[%s22772_s2 + $0x1e8] sm:$0xff] }
 0x37b   : > { %v14295_v15 = vcombine.high %v282_v4, %v290_v7 }
 0x37c   : > { %8975 = vmatmul.mubr.bf16.gmra.mrb[144].mxu1 %v14814_v17  ;;  %v942_v17 = vld [vmem:[%s22772_s2 + $0x1648] sm:$0xff] }
 0x37d   : > { %11184 = vmatmul.mubr.bf16.gmra.mrb[220].mxu0 %v15124_v18  ;;  %8984 = vmatprep.mubr.bf16.mxu1 %v14831_v19  ;;  %v1241_v18 = vld [vmem:[%s22772_s2 + $0x1fa0] sm:$0xff]  ;;  %v14943_v23 = vcombine.high %v934_v16, %v942_v17 }
 0x37e   : > { %11193 = vmatprep.mubr.bf16.mxu0 %v15141_v20  ;;  %v1249_v19 = vld [vmem:[%s22772_s2 + $0x1fe0] sm:$0xff]  ;;  %v17683_v20 = vld [vmem:[%s18020_s13 + $0x250] ss:$8 sps:$4 sm:$0xff]  }
 0x37f   : > { %v15253_v24 = vcombine.high %v1241_v18, %v1249_v19  ;;  %9266 = vmatpush1.bf16.msra.mxu1 %v17683_v20  ;;  %v1022_v20 = vld [vmem:[%s22772_s2 + $0x18c8] sm:$0xff] }
 0x384   : > { %8985 = vmatmul.mubr.bf16.gmra.mrb[148].mxu1 %v14830_v0  ;;  %v17688_v0 = vld [vmem:[%s18020_s13 + $0x264] ss:$8 sps:$4 sm:$0xff]  }
 0x385   : > { %11194 = vmatmul.mubr.bf16.gmra.mrb[224].mxu0 %v15140_v1  ;;  %8994 = vmatprep.mubr.bf16.mxu1 %v14847_v2  ;;  %v17686_v1 = vld [vmem:[%s18020_s13 + $0x260] ss:$8 sps:$4 sm:$0xff]   ;;  %v17691_v2 = vld [vmem:[%s18020_s13 + $0x274] ss:$8 sps:$4 sm:$0xff]  }
 0x386   : > { %11203 = vmatprep.mubr.bf16.mxu0 %v15157_v3  ;;  %v950_v3 = vld [vmem:[%s22772_s2 + $0x1688] sm:$0xff]  ;;  %9267 = vmatprep.subr.bf16.mxu1 %v17688_v0  ;;  %v15006_v0 = vcombine.low %v998_v62, %v1006_v63 }
 0x387   : > { %9268 = vmatpush1.bf16.msra.mxu1 %v17686_v1  ;;  %v14958_v40 = vcombine.low %v950_v3, %v958_v5  ;;  %v14294_v1 = vcombine.low %v282_v4, %v290_v7  ;;  %v386_v62 = vld [vmem:[%s22772_s2 + $0x4e8] sm:$0xff] }
 0x388   : > { %9269 = vmatprep.subr.bf16.mxu1 %v17691_v2 }
 0x38b   : > { %9270 = vmatpush1.bf16.msra.mxu1 %v17689_v26  ;;  %v314_v26 = vld [vmem:[%s22772_s2 + $0x2a8] sm:$0xff] }
 0x38c   : > { %8995 = vmatmul.mubr.bf16.gmra.mrb[152].mxu1 %v14846_v27  ;;  %v14942_v27 = vcombine.low %v934_v16, %v942_v17  ;;  %9271 = vmatprep.subr.bf16.mxu1 %v17694_v31  ;;  %v17701_v16 = vld [vmem:[%s18020_s13 + $0x640] ss:$8 sps:$4 sm:$0xff]   ;;  %v17710_v17 = vld [vmem:[%s18020_s13 + $0x2d0] ss:$8 sps:$4 sm:$0xff]  }
 0x38d   : > { %11204 = vmatmul.mubr.bf16.gmra.mrb[228].mxu0 %v15156_v28  ;;  %9004 = vmatprep.mubr.bf16.mxu1 %v14863_v29  ;;  %v15252_v28 = vcombine.low %v1241_v18, %v1249_v19  ;;  %v14959_v29 = vcombine.high %v950_v3, %v958_v5  ;;  %v17715_v18 = vld [vmem:[%s18020_s13 + $0x2e4] ss:$8 sps:$4 sm:$0xff]   ;;  %v17716_v5 = vld [vmem:[%s18020_s13 + $0x2f0] ss:$8 sps:$4 sm:$0xff]  }
 0x38e   : > { %11213 = vmatprep.mubr.bf16.mxu0 %v15173_v30  ;;  %v14247_v30 = vcombine.high %v234_v6, %v242_v25  ;;  %v1014_v19 = vld [vmem:[%s22772_s2 + $0x1888] sm:$0xff] }
 0x38f   : > { %9272 = vmatpush1.bf16.msra.mxu1 %v17692_v32  ;;  %v15023_v2 = vcombine.high %v1014_v19, %v1022_v20  ;;  %v1030_v6 = vld [vmem:[%s22772_s2 + $0x1908] sm:$0xff] }
 0x390   : > { %9273 = vmatprep.subr.bf16.mxu1 %v17697_v33  ;;  %v1038_v25 = vld [vmem:[%s22772_s2 + $0x1948] sm:$0xff]  ;;  %v17719_v33 = vld [vmem:[%s18020_s13 + $0x650] ss:$8 sps:$4 sm:$0xff]  }
 0x391   : > { %v15039_v31 = vcombine.high %v1030_v6, %v1038_v25 }
 0x394   : > { %9005 = vmatmul.mubr.bf16.gmra.mrb[156].mxu1 %v14862_v35  ;;  %v974_v35 = vld [vmem:[%s22772_s2 + $0x1748] sm:$0xff] }
 0x395   : > { %11214 = vmatmul.mubr.bf16.gmra.mrb[232].mxu0 %v15172_v36  ;;  %9014 = vmatprep.mubr.bf16.mxu1 %v14879_v37  ;;  %v250_v36 = vld [vmem:[%s22772_s2 + $0xa8] sm:$0xff]  ;;  %v14975_v42 = vcombine.high %v966_v34, %v974_v35  ;;  %v14974_v54 = vcombine.low %v966_v34, %v974_v35  ;;  %v17721_v34 = vld [vmem:[%s18020_s13 + $0x654] ss:$8 sps:$4 sm:$0xff]  }
 0x396   : > { %11223 = vmatprep.mubr.bf16.mxu0 %v15189_v38  ;;  %v258_v37 = vld [vmem:[%s22772_s2 + $0xe8] sm:$0xff]  ;;  %v17695_v38 = vld [vmem:[%s18020_s13 + $0x290] ss:$8 sps:$4 sm:$0xff]  }
 0x397   : > { %9274 = vmatpush1.bf16.msra.mxu1 %v17695_v38  ;;  %v1046_v35 = vld [vmem:[%s22772_s2 + $0x1988] sm:$0xff] }
 0x398   : > { %v338_v38 = vld [vmem:[%s22772_s2 + $0x368] sm:$0xff] }
 0x39c   : > { %9015 = vmatmul.mubr.bf16.gmra.mrb[160].mxu1 %v14878_v43  ;;  %v14263_v43 = vcombine.high %v250_v36, %v258_v37 }
 0x39d   : > { %11224 = vmatmul.mubr.bf16.gmra.mrb[236].mxu0 %v15188_v44  ;;  %9024 = vmatprep.mubr.bf16.mxu1 %v14895_v45  ;;  %v17661_v44 = vld [vmem:[%s18020_s13 + $0x614] ss:$8 sps:$4 sm:$0xff]   ;;  %v17700_v45 = vld [vmem:[%s18020_s13 + $0x2a4] ss:$8 sps:$4 sm:$0xff]  }
 0x39e   : > { %11233 = vmatprep.mubr.bf16.mxu0 %v15205_v46  ;;  %v982_v46 = vld [vmem:[%s22772_s2 + $0x1788] sm:$0xff]  ;;  %9275 = vmatprep.subr.bf16.mxu1 %v17700_v45 }
 0x39f   : > { %9276 = vmatpush1.bf16.msra.mxu1 %v17698_v47  ;;  %v346_v45 = vld [vmem:[%s22772_s2 + $0x3a8] sm:$0xff] }
 0x3a0   : > { %9277 = vmatprep.subr.bf16.mxu1 %v17706_v50 }
 0x3a3   : > { %9278 = vmatpush1.bf16.msra.mxu1 %v17704_v59  ;;  %v1094_v59 = vld [vmem:[%s22772_s2 + $0x1b08] sm:$0xff] }
 0x3a4   : > { %9025 = vmatmul.mubr.bf16.gmra.mrb[164].mxu1 %v14894_v55  ;;  %v14262_v55 = vcombine.low %v250_v36, %v258_v37  ;;  %9279 = vmatprep.subr.bf16.mxu1 %v17709_v61  ;;  %v1054_v36 = vld [vmem:[%s22772_s2 + $0x19c8] sm:$0xff] }
 0x3a5   : > { %11234 = vmatmul.mubr.bf16.gmra.mrb[240].mxu0 %v15204_v56  ;;  %9034 = vmatprep.mubr.bf16.mxu1 %v14911_v57  ;;  %v14991_v56 = vcombine.high %v982_v46, %v990_v48  ;;  %v14279_v57 = vcombine.high %v266_v51, %v274_v52  ;;  %v330_v37 = vld [vmem:[%s22772_s2 + $0x328] sm:$0xff]  ;;  %v15054_v47 = vcombine.low %v1046_v35, %v1054_v36 }
 0x3a6   : > { %11243 = vmatprep.mubr.bf16.mxu0 %v15221_v58  ;;  %v17662_v58 = vld [vmem:[%s18020_s13 + $0x620] ss:$8 sps:$4 sm:$0xff]  }
 0x3a7   : > { %v1078_v51 = vld [vmem:[%s22772_s2 + $0x1a88] sm:$0xff] }
 0x3a8   : > { %v1086_v52 = vld [vmem:[%s22772_s2 + $0x1ac8] sm:$0xff] }
 0x3a9   : > { %v378_v61 = vld [vmem:[%s22772_s2 + $0x4a8] sm:$0xff]  ;;  %v15086_v63 = vcombine.low %v1078_v51, %v1086_v52 }
 0x3ac   : > { %9035 = vmatmul.mubr.bf16.gmra.mrb[168].mxu1 %v14910_v9  ;;  %v17707_v9 = vld [vmem:[%s18020_s13 + $0x2c0] ss:$8 sps:$4 sm:$0xff]  }
 0x3ad   : > { %11244 = vmatmul.mubr.bf16.gmra.mrb[244].mxu0 %v15220_v10  ;;  %9044 = vmatprep.mubr.bf16.mxu1 %v14927_v11  ;;  %v17703_v10 = vld [vmem:[%s18020_s13 + $0x644] ss:$8 sps:$4 sm:$0xff]   ;;  %v17712_v11 = vld [vmem:[%s18020_s13 + $0x2d4] ss:$8 sps:$4 sm:$0xff]  }
 0x3ae   : > { %11253 = vmatprep.mubr.bf16.mxu0 %v15237_v12  ;;  %v14990_v12 = vcombine.low %v982_v46, %v990_v48  ;;  %9280 = vmatpush1.bf16.msra.mxu1 %v17707_v9  ;;  %v354_v46 = vld [vmem:[%s22772_s2 + $0x3e8] sm:$0xff]  ;;  %v14342_v48 = vcombine.low %v330_v37, %v338_v38 }
 0x3af   : > { %9281 = vmatprep.subr.bf16.mxu1 %v17712_v11  ;;  %v14359_v50 = vcombine.high %v346_v45, %v354_v46  ;;  %v17722_v9 = vld [vmem:[%s18020_s13 + $0x660] ss:$8 sps:$4 sm:$0xff]  }
 0x3b0   : > { %v1110_v11 = vld [vmem:[%s22772_s2 + $0x1b88] sm:$0xff] }
 0x3b2   : > { %9282 = vmatpush1.bf16.msra.mxu1 %v17710_v17 }
 0x3b3   : > { %9283 = vmatprep.subr.bf16.mxu1 %v17715_v18 }
 0x3b4   : > { %9045 = vmatmul.mubr.bf16.gmra.mrb[172].mxu1 %v14926_v21  ;;  %v298_v21 = vld [vmem:[%s22772_s2 + $0x228] sm:$0xff] }
 0x3b5   : > { %11254 = vmatmul.mubr.bf16.gmra.mrb[248].mxu0 %v15236_v22  ;;  %9054 = vmatprep.mubr.bf16.mxu1 %v14943_v23  ;;  %v306_v22 = vld [vmem:[%s22772_s2 + $0x268] sm:$0xff] }
 0x3b6   : > { %11263 = vmatprep.mubr.bf16.mxu0 %v15253_v24  ;;  %v17713_v23 = vld [vmem:[%s18020_s13 + $0x2e0] ss:$8 sps:$4 sm:$0xff]   ;;  %v17718_v24 = vld [vmem:[%s18020_s13 + $0x2f4] ss:$8 sps:$4 sm:$0xff]   ;;  %v14311_v3 = vcombine.high %v298_v21, %v306_v22 }
 0x3b7   : > { %9284 = vmatpush1.bf16.msra.mxu1 %v17713_v23 }
 0x3b8   : > { %9285 = vmatprep.subr.bf16.mxu1 %v17718_v24 }
 0x3bb   : > { %9286 = vmatpush1.bf16.msra.mxu1 %v17716_v5  ;;  %v426_v5 = vld [vmem:[%s22772_s2 + $0x628] sm:$0xff] }
 0x3bc   : > { %9055 = vmatmul.mubr.bf16.gmra.mrb[176].mxu1 %v14942_v27  ;;  %v322_v27 = vld [vmem:[%s22772_s2 + $0x2e8] sm:$0xff] }
 0x3bd   : > { %11264 = vmatmul.mubr.bf16.gmra.mrb[252].mxu0 %v15252_v28  ;;  %9064 = vmatprep.mubr.bf16.mxu1 %v14959_v29  ;;  %v17814_v28 = vld [vmem:[%s18020_s13 + $0x304] ss:$8 sps:$4 sm:$0xff]   ;;  %v15022_v29 = vcombine.low %v1014_v19, %v1022_v20  ;;  %v14327_v32 = vcombine.high %v314_v26, %v322_v27 }
 0x3be   : > { %11306 = vmatprep.mubr.bf16.mxu0 %v14247_v30  ;;  %15541 = vmatprep.subr.bf16.mxu1 %v17814_v28  ;;  %v14310_v30 = vcombine.low %v298_v21, %v306_v22  ;;  %v1126_v19 = vld [vmem:[%s22772_s2 + $0x1c08] sm:$0xff] }
 0x3bf   : > { %v1134_v20 = vld [vmem:[%s22772_s2 + $0x1c48] sm:$0xff] }
 0x3c0   : > { %v410_v21 = vld [vmem:[%s22772_s2 + $0x5a8] sm:$0xff] }
 0x3c1   : > { %v418_v22 = vld [vmem:[%s22772_s2 + $0x5e8] sm:$0xff] }
 0x3c4   : > { %9065 = vmatmul.mubr.bf16.gmra.mrb[180].mxu1 %v14958_v40  ;;  %v14326_v40 = vcombine.low %v314_v26, %v322_v27  ;;  %v14422_v26 = vcombine.low %v410_v21, %v418_v22 }
 0x3c5   : > { %11307 = vmatmul.mubr.bf16.vlgmr.msra.gmra.mrb[0].mxu0 %v14246_v39  ;;  %9074 = vmatprep.mubr.bf16.mxu1 %v14975_v42  ;;  %v15038_v39 = vcombine.low %v1030_v6, %v1038_v25  ;;  %v14343_v42 = vcombine.high %v330_v37, %v338_v38  ;;  %v434_v6 = vld [vmem:[%s22772_s2 + $0x668] sm:$0xff]  ;;  %v15134_v25 = vcombine.low %v1126_v19, %v1134_v20  ;;  %v17725_v37 = vld [vmem:[%s18020_s13 + $0x670] ss:$8 sps:$4 sm:$0xff]   ;;  %v17727_v38 = vld [vmem:[%s18020_s13 + $0x674] ss:$8 sps:$4 sm:$0xff]  }
 0x3c6   : > { %11948 = vmatpush1.bf16.msra.mxu0 %v17656_v41  ;;  %11316 = vmatprep.mubr.bf16.mxu0 %v14263_v43  ;;  %v15055_v41 = vcombine.high %v1046_v35, %v1054_v36  ;;  %v1062_v43 = vld [vmem:[%s22772_s2 + $0x1a08] sm:$0xff]  ;;  %v14439_v28 = vcombine.high %v426_v5, %v434_v6 }
 0x3c7   : > { %11949 = vmatprep.subr.bf16.mxu0 %v17661_v44  ;;  %v1070_v44 = vld [vmem:[%s22772_s2 + $0x1a48] sm:$0xff] }
 0x3ca   : > { %11950 = vmatpush1.bf16.msra.mxu0 %v17659_v49  ;;  %v15071_v49 = vcombine.high %v1062_v43, %v1070_v44 }
 0x3cb   : > { %11951 = vmatprep.subr.bf16.mxu0 %v17664_v53  ;;  %v362_v53 = vld [vmem:[%s22772_s2 + $0x428] sm:$0xff] }
 0x3cc   : > { %9075 = vmatmul.mubr.bf16.gmra.mrb[184].mxu1 %v14974_v54  ;;  %v370_v54 = vld [vmem:[%s22772_s2 + $0x468] sm:$0xff] }
 0x3cd   : > { %11317 = vmatmul.mubr.bf16.gmra.mrb[4].mxu0 %v14262_v55  ;;  %9084 = vmatprep.mubr.bf16.mxu1 %v14991_v56  ;;  %v15070_v55 = vcombine.low %v1062_v43, %v1070_v44  ;;  %v14358_v56 = vcombine.low %v346_v45, %v354_v46  ;;  %v14374_v4 = vcombine.low %v362_v53, %v370_v54 }
 0x3ce   : > { %11326 = vmatprep.mubr.bf16.mxu0 %v14279_v57  ;;  %11952 = vmatpush1.bf16.msra.mxu0 %v17662_v58  ;;  %v15087_v57 = vcombine.high %v1078_v51, %v1086_v52  ;;  %v14375_v58 = vcombine.high %v362_v53, %v370_v54 }
 0x3cf   : > { %11953 = vmatprep.subr.bf16.mxu0 %v17676_v60  ;;  %v1102_v60 = vld [vmem:[%s22772_s2 + $0x1b48] sm:$0xff] }
 0x3d0   : > { %v15103_v7 = vcombine.high %v1094_v59, %v1102_v60 }
 0x3d2   : > { %11954 = vmatpush1.bf16.msra.mxu0 %v17674_v8  ;;  %v14391_v8 = vcombine.high %v378_v61, %v386_v62 }
 0x3d3   : > { %11955 = vmatprep.subr.bf16.mxu0 %v17703_v10  ;;  %v17724_v10 = vld [vmem:[%s18020_s13 + $0x664] ss:$8 sps:$4 sm:$0xff]  }
 0x3d4   : > { %9085 = vmatmul.mubr.bf16.gmra.mrb[188].mxu1 %v14990_v12  ;;  %v1118_v12 = vld [vmem:[%s22772_s2 + $0x1bc8] sm:$0xff] }
 0x3d5   : > { %11327 = vmatmul.mubr.bf16.gmra.mrb[8].mxu0 %v14278_v13  ;;  %9094 = vmatprep.mubr.bf16.mxu1 %v15007_v14  ;;  %v394_v13 = vld [vmem:[%s22772_s2 + $0x528] sm:$0xff]  ;;  %v15119_v17 = vcombine.high %v1110_v11, %v1118_v12  ;;  %v15118_v23 = vcombine.low %v1110_v11, %v1118_v12 }
 0x3d6   : > { %11336 = vmatprep.mubr.bf16.mxu0 %v14295_v15  ;;  %11956 = vmatpush1.bf16.msra.mxu0 %v17701_v16  ;;  %v402_v14 = vld [vmem:[%s22772_s2 + $0x568] sm:$0xff]  ;;  %v15102_v15 = vcombine.low %v1094_v59, %v1102_v60  ;;  %v14390_v16 = vcombine.low %v378_v61, %v386_v62 }
 0x3d7   : > { %11957 = vmatprep.subr.bf16.mxu0 %v17721_v34  ;;  %v14407_v18 = vcombine.high %v394_v13, %v402_v14  ;;  %v14406_v24 = vcombine.low %v394_v13, %v402_v14  ;;  %v14438_v34 = vcombine.low %v426_v5, %v434_v6  ;;  %v17728_v13 = vld [vmem:[%s18020_s13 + $0x680] ss:$8 sps:$4 sm:$0xff]   ;;  %v17730_v14 = vld [vmem:[%s18020_s13 + $0x684] ss:$8 sps:$4 sm:$0xff]  }
 0x3da   : > { %11958 = vmatpush1.bf16.msra.mxu0 %v17719_v33 }
 0x3db   : > { %11959 = vmatprep.subr.bf16.mxu0 %v17724_v10 }
 0x3dc   : > { %9095 = vmatmul.mubr.bf16.gmra.mrb[192].mxu1 %v15006_v0  ;;  %v15135_v0 = vcombine.high %v1126_v19, %v1134_v20 }
 0x3dd   : > { %11337 = vmatmul.mubr.bf16.gmra.mrb[12].mxu0 %v14294_v1  ;;  %9104 = vmatprep.mubr.bf16.mxu1 %v15023_v2  ;;  %v14423_v1 = vcombine.high %v410_v21, %v418_v22  ;;  %v1142_v2 = vld [vmem:[%s22772_s2 + $0x1c88] sm:$0xff] }
 0x3de   : > { %11346 = vmatprep.mubr.bf16.mxu0 %v14311_v3  ;;  %11960 = vmatpush1.bf16.msra.mxu0 %v17722_v9  ;;  %v1150_v3 = vld [vmem:[%s22772_s2 + $0x1cc8] sm:$0xff] }
 0x3df   : > { %v15151_v27 = vcombine.high %v1142_v2, %v1150_v3  ;;  %v15150_v33 = vcombine.low %v1142_v2, %v1150_v3  ;;  %11961 = vmatprep.subr.bf16.mxu0 %v17727_v38  ;;  %v17816_v38 = vld [vmem:[%s18020_s13 + $0x314] ss:$8 sps:$4 sm:$0xff]  }
 0x3e2   : > { %11962 = vmatpush1.bf16.msra.mxu0 %v17725_v37  ;;  %v17815_v37 = vld [vmem:[%s18020_s13 + $0x300] ss:$8 sps:$4 sm:$0xff]  }
 0x3e3   : > { %11963 = vmatprep.subr.bf16.mxu0 %v17730_v14  ;;  %v319_v14 = vld [vmem:[%s22772_s2 + $0x2d0] sm:$0xff] }
 0x3e4   : > { %9105 = vmatmul.mubr.bf16.gmra.mrb[196].mxu1 %v15022_v29  ;;  %v1158_v29 = vld [vmem:[%s22772_s2 + $0x1d08] sm:$0xff] }
 0x3e5   : > { %11347 = vmatmul.mubr.bf16.gmra.mrb[16].mxu0 %v14310_v30  ;;  %9114 = vmatprep.mubr.bf16.mxu1 %v15039_v31  ;;  %v1166_v30 = vld [vmem:[%s22772_s2 + $0x1d48] sm:$0xff] }
 0x3e6   : > { %11356 = vmatprep.mubr.bf16.mxu0 %v14327_v32  ;;  %v442_v31 = vld [vmem:[%s22772_s2 + $0x6a8] sm:$0xff]  ;;  %v15167_v35 = vcombine.high %v1158_v29, %v1166_v30  ;;  %v15166_v43 = vcombine.low %v1158_v29, %v1166_v30  ;;  %11964 = vmatpush1.bf16.msra.mxu0 %v17728_v13  ;;  %v311_v13 = vld [vmem:[%s22772_s2 + $0x290] sm:$0xff] }
 0x3e7   : > { %v450_v32 = vld [vmem:[%s22772_s2 + $0x6e8] sm:$0xff] }
 0x3e8   : > { %v14455_v36 = vcombine.high %v442_v31, %v450_v32  ;;  %v14454_v44 = vcombine.low %v442_v31, %v450_v32 }
 0x3ec   : > { %9115 = vmatmul.mubr.bf16.gmra.mrb[200].mxu1 %v15038_v39  ;;  %v1174_v39 = vld [vmem:[%s22772_s2 + $0x1d88] sm:$0xff] }
 0x3ed   : > { %11357 = vmatmul.mubr.bf16.gmra.mrb[20].mxu0 %v14326_v40  ;;  %9124 = vmatprep.mubr.bf16.mxu1 %v15055_v41  ;;  %v1182_v40 = vld [vmem:[%s22772_s2 + $0x1dc8] sm:$0xff] }
 0x3ee   : > { %11366 = vmatprep.mubr.bf16.mxu0 %v14343_v42  ;;  %v458_v41 = vld [vmem:[%s22772_s2 + $0x728] sm:$0xff]  ;;  %v15183_v45 = vcombine.high %v1174_v39, %v1182_v40  ;;  %v15182_v51 = vcombine.low %v1174_v39, %v1182_v40 }
 0x3ef   : > { %v466_v42 = vld [vmem:[%s22772_s2 + $0x768] sm:$0xff] }
 0x3f0   : > { %v14471_v46 = vcombine.high %v458_v41, %v466_v42  ;;  %v14470_v52 = vcombine.low %v458_v41, %v466_v42 }
 0x3f4   : > { %9125 = vmatmul.mubr.bf16.gmra.mrb[204].mxu1 %v15054_v47  ;;  %v1190_v47 = vld [vmem:[%s22772_s2 + $0x1e08] sm:$0xff] }
 0x3f5   : > { %11367 = vmatmul.mubr.bf16.gmra.mrb[24].mxu0 %v14342_v48  ;;  %9134 = vmatprep.mubr.bf16.mxu1 %v15071_v49  ;;  %v1198_v48 = vld [vmem:[%s22772_s2 + $0x1e48] sm:$0xff] }
 0x3f6   : > { %11376 = vmatprep.mubr.bf16.mxu0 %v14359_v50  ;;  %v474_v49 = vld [vmem:[%s22772_s2 + $0x7a8] sm:$0xff]  ;;  %v15199_v53 = vcombine.high %v1190_v47, %v1198_v48  ;;  %v15198_v59 = vcombine.low %v1190_v47, %v1198_v48  ;;  %v279_v47 = vld [vmem:[%s22772_s2 + $0x190] sm:$0xff] }
 0x3f7   : > { %v482_v50 = vld [vmem:[%s22772_s2 + $0x7e8] sm:$0xff]  ;;  %v287_v48 = vld [vmem:[%s22772_s2 + $0x1d0] sm:$0xff] }
 0x3f8   : > { %v14487_v54 = vcombine.high %v474_v49, %v482_v50  ;;  %v14486_v60 = vcombine.low %v474_v49, %v482_v50  ;;  %v586_v49 = vld [vmem:[%s22772_s2 + $0xb28] sm:$0xff] }
 0x3f9   : > { %v594_v50 = vld [vmem:[%s22772_s2 + $0xb68] sm:$0xff] }
 0x3fc   : > { %9135 = vmatmul.mubr.bf16.gmra.mrb[208].mxu1 %v15070_v55  ;;  %v1206_v55 = vld [vmem:[%s22772_s2 + $0x1e88] sm:$0xff] }
 0x3fd   : > { %11377 = vmatmul.mubr.bf16.gmra.mrb[28].mxu0 %v14358_v56  ;;  %9144 = vmatprep.mubr.bf16.mxu1 %v15087_v57  ;;  %v1214_v56 = vld [vmem:[%s22772_s2 + $0x1ec8] sm:$0xff] }
 0x3fe   : > { %11386 = vmatprep.mubr.bf16.mxu0 %v14375_v58  ;;  %v490_v57 = vld [vmem:[%s22772_s2 + $0x828] sm:$0xff]  ;;  %v15215_v61 = vcombine.high %v1206_v55, %v1214_v56  ;;  %v15214_v9 = vcombine.low %v1206_v55, %v1214_v56  ;;  %v14289_v55 = vcombine.high %v279_v47, %v287_v48  ;;  %v14599_v56 = vcombine.high %v586_v49, %v594_v50 }
 0x3ff   : > { %v498_v58 = vld [vmem:[%s22772_s2 + $0x868] sm:$0xff] }
 0x400   : > { %v14503_v62 = vcombine.high %v490_v57, %v498_v58  ;;  %v14502_v10 = vcombine.low %v490_v57, %v498_v58  ;;  %v17821_v57 = vld [vmem:[%s18020_s13 + $0x330] ss:$8 sps:$4 sm:$0xff]   ;;  %v17822_v58 = vld [vmem:[%s18020_s13 + $0x344] ss:$8 sps:$4 sm:$0xff]  }
 0x404   : > { %9145 = vmatmul.mubr.bf16.gmra.mrb[212].mxu1 %v15086_v63  ;;  %v1222_v63 = vld [vmem:[%s22772_s2 + $0x1f08] sm:$0xff] }
 0x405   : > { %11387 = vmatmul.mubr.bf16.gmra.mrb[32].mxu0 %v14374_v4  ;;  %9154 = vmatprep.mubr.bf16.mxu1 %v15103_v7  ;;  %v1230_v4 = vld [vmem:[%s22772_s2 + $0x1f48] sm:$0xff] }
 0x406   : > { %11396 = vmatprep.mubr.bf16.mxu0 %v14391_v8  ;;  %v506_v7 = vld [vmem:[%s22772_s2 + $0x8a8] sm:$0xff]  ;;  %v15231_v11 = vcombine.high %v1222_v63, %v1230_v4  ;;  %v15230_v19 = vcombine.low %v1222_v63, %v1230_v4  ;;  %v17824_v4 = vld [vmem:[%s18020_s13 + $0x354] ss:$8 sps:$4 sm:$0xff]  }
 0x407   : > { %v514_v8 = vld [vmem:[%s22772_s2 + $0x8e8] sm:$0xff] }
 0x408   : > { %v14519_v12 = vcombine.high %v506_v7, %v514_v8  ;;  %v14518_v20 = vcombine.low %v506_v7, %v514_v8  ;;  %v17823_v63 = vld [vmem:[%s18020_s13 + $0x340] ss:$8 sps:$4 sm:$0xff]   ;;  %v14288_v7 = vcombine.low %v279_v47, %v287_v48  ;;  %v14598_v8 = vcombine.low %v586_v49, %v594_v50  ;;  %v17840_v50 = vld [vmem:[%s18020_s13 + $0x3d4] ss:$8 sps:$4 sm:$0xff]  }
 0x409   : > { %v666_v47 = vld [vmem:[%s22772_s2 + $0xda8] sm:$0xff] }
 0x40a   : > { %v674_v48 = vld [vmem:[%s22772_s2 + $0xde8] sm:$0xff] }
 0x40b   : > { %v17839_v49 = vld [vmem:[%s18020_s13 + $0x3c0] ss:$8 sps:$4 sm:$0xff]  }
 0x40c   : > { %9155 = vmatmul.mubr.bf16.gmra.mrb[216].mxu1 %v15102_v15  ;;  %v1238_v15 = vld [vmem:[%s22772_s2 + $0x1f88] sm:$0xff] }
 0x40d   : > { %11397 = vmatmul.mubr.bf16.gmra.mrb[36].mxu0 %v14390_v16  ;;  %9164 = vmatprep.mubr.bf16.mxu1 %v15119_v17  ;;  %v1246_v16 = vld [vmem:[%s22772_s2 + $0x1fc8] sm:$0xff] }
 0x40e   : > { %11406 = vmatprep.mubr.bf16.mxu0 %v14407_v18  ;;  %v522_v17 = vld [vmem:[%s22772_s2 + $0x928] sm:$0xff]  ;;  %v15247_v21 = vcombine.high %v1238_v15, %v1246_v16  ;;  %v15246_v2 = vcombine.low %v1238_v15, %v1246_v16 }
 0x40f   : > { %v530_v18 = vld [vmem:[%s22772_s2 + $0x968] sm:$0xff] }
 0x410   : > { %v14535_v22 = vcombine.high %v522_v17, %v530_v18  ;;  %v14534_v3 = vcombine.low %v522_v17, %v530_v18  ;;  %v618_v15 = vld [vmem:[%s22772_s2 + $0xc28] sm:$0xff]  ;;  %v17828_v18 = vld [vmem:[%s18020_s13 + $0x374] ss:$8 sps:$4 sm:$0xff]  }
 0x411   : > { %v626_v16 = vld [vmem:[%s22772_s2 + $0xc68] sm:$0xff] }
 0x412   : > { %v17827_v17 = vld [vmem:[%s18020_s13 + $0x360] ss:$8 sps:$4 sm:$0xff]  }
 0x414   : > { %9165 = vmatmul.mubr.bf16.gmra.mrb[220].mxu1 %v15118_v23  ;;  %v231_v23 = vld [vmem:[%s22772_s2 + $0x10] sm:$0xff] }
 0x415   : > { %11407 = vmatmul.mubr.bf16.gmra.mrb[40].mxu0 %v14406_v24  ;;  %9174 = vmatprep.mubr.bf16.mxu1 %v15135_v0  ;;  %v239_v24 = vld [vmem:[%s22772_s2 + $0x50] sm:$0xff]  ;;  %v538_v0 = vld [vmem:[%s22772_s2 + $0x9a8] sm:$0xff] }
 0x416   : > { %11416 = vmatprep.mubr.bf16.mxu0 %v14423_v1  ;;  %v546_v1 = vld [vmem:[%s22772_s2 + $0x9e8] sm:$0xff]  ;;  %v14241_v5 = vcombine.high %v231_v23, %v239_v24  ;;  %v14240_v29 = vcombine.low %v231_v23, %v239_v24  ;;  %v17829_v23 = vld [vmem:[%s18020_s13 + $0x370] ss:$8 sps:$4 sm:$0xff]  }
 0x417   : > { %v14551_v6 = vcombine.high %v538_v0, %v546_v1  ;;  %v14550_v30 = vcombine.low %v538_v0, %v546_v1  ;;  %v17830_v24 = vld [vmem:[%s18020_s13 + $0x384] ss:$8 sps:$4 sm:$0xff]   ;;  %v327_v0 = vld [vmem:[%s22772_s2 + $0x310] sm:$0xff] }
 0x418   : > { %v335_v1 = vld [vmem:[%s22772_s2 + $0x350] sm:$0xff] }
 0x41c   : > { %9175 = vmatmul.mubr.bf16.gmra.mrb[224].mxu1 %v15134_v25  ;;  %v247_v25 = vld [vmem:[%s22772_s2 + $0x90] sm:$0xff] }
 0x41d   : > { %11417 = vmatmul.mubr.bf16.gmra.mrb[44].mxu0 %v14422_v26  ;;  %9184 = vmatprep.mubr.bf16.mxu1 %v15151_v27  ;;  %v255_v26 = vld [vmem:[%s22772_s2 + $0xd0] sm:$0xff]  ;;  %v554_v27 = vld [vmem:[%s22772_s2 + $0xa28] sm:$0xff] }
 0x41e   : > { %11426 = vmatprep.mubr.bf16.mxu0 %v14439_v28  ;;  %v562_v28 = vld [vmem:[%s22772_s2 + $0xa68] sm:$0xff]  ;;  %v14257_v31 = vcombine.high %v247_v25, %v255_v26  ;;  %v14256_v39 = vcombine.low %v247_v25, %v255_v26  ;;  %v14320_v25 = vcombine.low %v311_v13, %v319_v14  ;;  %v14630_v26 = vcombine.low %v618_v15, %v626_v16 }
 0x41f   : > { %v14567_v32 = vcombine.high %v554_v27, %v562_v28  ;;  %v14566_v40 = vcombine.low %v554_v27, %v562_v28  ;;  %v14337_v27 = vcombine.high %v327_v0, %v335_v1 }
 0x424   : > { %9185 = vmatmul.mubr.bf16.gmra.mrb[228].mxu1 %v15150_v33  ;;  %v263_v33 = vld [vmem:[%s22772_s2 + $0x110] sm:$0xff] }
 0x425   : > { %11427 = vmatmul.mubr.bf16.gmra.mrb[48].mxu0 %v14438_v34  ;;  %9194 = vmatprep.mubr.bf16.mxu1 %v15167_v35  ;;  %v271_v34 = vld [vmem:[%s22772_s2 + $0x150] sm:$0xff]  ;;  %v570_v35 = vld [vmem:[%s22772_s2 + $0xaa8] sm:$0xff] }
 0x426   : > { %11436 = vmatprep.mubr.bf16.mxu0 %v14455_v36  ;;  %v578_v36 = vld [vmem:[%s22772_s2 + $0xae8] sm:$0xff]  ;;  %v14273_v41 = vcombine.high %v263_v33, %v271_v34 }
 0x427   : > { %v14583_v42 = vcombine.high %v570_v35, %v578_v36 }
 0x42c   : > { %9195 = vmatmul.mubr.bf16.gmra.mrb[232].mxu1 %v15166_v43  ;;  %v17817_v43 = vld [vmem:[%s18020_s13 + $0x310] ss:$8 sps:$4 sm:$0xff]  }
 0x42d   : > { %11437 = vmatmul.mubr.bf16.gmra.mrb[52].mxu0 %v14454_v44  ;;  %9204 = vmatprep.mubr.bf16.mxu1 %v15183_v45  ;;  %v17818_v44 = vld [vmem:[%s18020_s13 + $0x324] ss:$8 sps:$4 sm:$0xff]   ;;  %v17731_v45 = vld [vmem:[%s18020_s13 + $0x690] ss:$8 sps:$4 sm:$0xff]  }
 0x42e   : > { %11446 = vmatprep.mubr.bf16.mxu0 %v14471_v46  ;;  %v17733_v46 = vld [vmem:[%s18020_s13 + $0x694] ss:$8 sps:$4 sm:$0xff]  }
 0x42f   : > { %11965 = vmatprep.subr.bf16.mxu0 %v17733_v46  ;;  %v367_v46 = vld [vmem:[%s22772_s2 + $0x450] sm:$0xff] }
 0x430   : > { %11966 = vmatpush1.bf16.msra.mxu0 %v17731_v45  ;;  %v359_v45 = vld [vmem:[%s22772_s2 + $0x410] sm:$0xff] }
 0x434   : > { %9205 = vmatmul.mubr.bf16.gmra.mrb[236].mxu1 %v15182_v51  ;;  %v17819_v51 = vld [vmem:[%s18020_s13 + $0x320] ss:$8 sps:$4 sm:$0xff]  }
 0x435   : > { %11447 = vmatmul.mubr.bf16.gmra.mrb[56].mxu0 %v14470_v52  ;;  %9214 = vmatprep.mubr.bf16.mxu1 %v15199_v53  ;;  %v17820_v52 = vld [vmem:[%s18020_s13 + $0x334] ss:$8 sps:$4 sm:$0xff]   ;;  %v14272_v53 = vcombine.low %v263_v33, %v271_v34 }
 0x436   : > { %11456 = vmatprep.mubr.bf16.mxu0 %v14487_v54  ;;  %v14582_v54 = vcombine.low %v570_v35, %v578_v36  ;;  %v343_v33 = vld [vmem:[%s22772_s2 + $0x390] sm:$0xff]  ;;  %v650_v35 = vld [vmem:[%s22772_s2 + $0xd28] sm:$0xff] }
 0x437   : > { %v351_v34 = vld [vmem:[%s22772_s2 + $0x3d0] sm:$0xff]  ;;  %v658_v36 = vld [vmem:[%s22772_s2 + $0xd68] sm:$0xff] }
 0x43c   : > { %9215 = vmatmul.mubr.bf16.gmra.mrb[240].mxu1 %v15198_v59  ;;  %v295_v59 = vld [vmem:[%s22772_s2 + $0x210] sm:$0xff] }
 0x43d   : > { %11457 = vmatmul.mubr.bf16.gmra.mrb[60].mxu0 %v14486_v60  ;;  %9224 = vmatprep.mubr.bf16.mxu1 %v15215_v61  ;;  %v303_v60 = vld [vmem:[%s22772_s2 + $0x250] sm:$0xff]  ;;  %v602_v61 = vld [vmem:[%s22772_s2 + $0xba8] sm:$0xff] }
 0x43e   : > { %11466 = vmatprep.mubr.bf16.mxu0 %v14503_v62  ;;  %v610_v62 = vld [vmem:[%s22772_s2 + $0xbe8] sm:$0xff] }
 0x444   : > { %9225 = vmatmul.mubr.bf16.gmra.mrb[244].mxu1 %v15214_v9  ;;  %v14305_v9 = vcombine.high %v295_v59, %v303_v60 }
 0x445   : > { %11467 = vmatmul.mubr.bf16.gmra.mrb[64].mxu0 %v14502_v10  ;;  %9234 = vmatprep.mubr.bf16.mxu1 %v15231_v11  ;;  %v14615_v10 = vcombine.high %v602_v61, %v610_v62  ;;  %v17825_v11 = vld [vmem:[%s18020_s13 + $0x350] ss:$8 sps:$4 sm:$0xff]  }
 0x446   : > { %11476 = vmatprep.mubr.bf16.mxu0 %v14519_v12  ;;  %v17826_v12 = vld [vmem:[%s18020_s13 + $0x364] ss:$8 sps:$4 sm:$0xff]  }
 0x44c   : > { %9235 = vmatmul.mubr.bf16.gmra.mrb[248].mxu1 %v15230_v19  ;;  %v14304_v19 = vcombine.low %v295_v59, %v303_v60  ;;  %v682_v59 = vld [vmem:[%s22772_s2 + $0xe28] sm:$0xff] }
 0x44d   : > { %11477 = vmatmul.mubr.bf16.gmra.mrb[68].mxu0 %v14518_v20  ;;  %9244 = vmatprep.mubr.bf16.mxu1 %v15247_v21  ;;  %v14614_v20 = vcombine.low %v602_v61, %v610_v62  ;;  %v14321_v21 = vcombine.high %v311_v13, %v319_v14  ;;  %v690_v60 = vld [vmem:[%s22772_s2 + $0xe68] sm:$0xff]  ;;  %v17844_v62 = vld [vmem:[%s18020_s13 + $0x3f4] ss:$8 sps:$4 sm:$0xff]  }
 0x44e   : > { %11486 = vmatprep.mubr.bf16.mxu0 %v14535_v22  ;;  %v14631_v22 = vcombine.high %v618_v15, %v626_v16  ;;  %v17843_v61 = vld [vmem:[%s18020_s13 + $0x3e0] ss:$8 sps:$4 sm:$0xff]   ;;  %v14694_v15 = vcombine.low %v682_v59, %v690_v60 }
 0x44f   : > { %v706_v13 = vld [vmem:[%s22772_s2 + $0xee8] sm:$0xff] }
 0x454   : > { %9245 = vmatmul.mubr.bf16.gmra.mrb[252].mxu1 %v15246_v2  ;;  %v634_v2 = vld [vmem:[%s22772_s2 + $0xca8] sm:$0xff] }
 0x455   : > { %11487 = vmatmul.mubr.bf16.gmra.mrb[72].mxu0 %v14534_v3  ;;  %9287 = vmatprep.mubr.bf16.mxu1 %v14241_v5  ;;  %v642_v3 = vld [vmem:[%s22772_s2 + $0xce8] sm:$0xff] }
 0x456   : > { %11496 = vmatprep.mubr.bf16.mxu0 %v14551_v6  ;;  %v17831_v5 = vld [vmem:[%s18020_s13 + $0x380] ss:$8 sps:$4 sm:$0xff]   ;;  %v17832_v6 = vld [vmem:[%s18020_s13 + $0x394] ss:$8 sps:$4 sm:$0xff]   ;;  %v14647_v28 = vcombine.high %v634_v2, %v642_v3 }
 0x45c   : > { %9288 = vmatmul.mubr.bf16.vlgmr.msra.gmra.mrb[0].mxu1 %v14240_v29  ;;  %v17833_v29 = vld [vmem:[%s18020_s13 + $0x390] ss:$8 sps:$4 sm:$0xff]  }
 0x45d   : > { %11497 = vmatmul.mubr.bf16.gmra.mrb[76].mxu0 %v14550_v30  ;;  %9297 = vmatprep.mubr.bf16.mxu1 %v14257_v31  ;;  %v17834_v30 = vld [vmem:[%s18020_s13 + $0x3a4] ss:$8 sps:$4 sm:$0xff]   ;;  %v17734_v31 = vld [vmem:[%s18020_s13 + $0x6a0] ss:$8 sps:$4 sm:$0xff]  }
 0x45e   : > { %11506 = vmatprep.mubr.bf16.mxu0 %v14567_v32  ;;  %15557 = vmatpush1.bf16.msra.mxu1 %v17815_v37  ;;  %v17736_v32 = vld [vmem:[%s18020_s13 + $0x6a4] ss:$8 sps:$4 sm:$0xff]   ;;  %v17835_v37 = vld [vmem:[%s18020_s13 + $0x3a0] ss:$8 sps:$4 sm:$0xff]  }
 0x45f   : > { %15542 = vmatprep.subr.bf16.mxu1 %v17816_v38  ;;  %11967 = vmatprep.subr.bf16.mxu0 %v17736_v32  ;;  %v17836_v38 = vld [vmem:[%s18020_s13 + $0x3b4] ss:$8 sps:$4 sm:$0xff]   ;;  %v746_v32 = vld [vmem:[%s22772_s2 + $0x1028] sm:$0xff] }
 0x460   : > { %11968 = vmatpush1.bf16.msra.mxu0 %v17734_v31  ;;  %v447_v31 = vld [vmem:[%s22772_s2 + $0x6d0] sm:$0xff] }
 0x462   : > { %15558 = vmatpush1.bf16.msra.mxu1 %v17817_v43  ;;  %v17837_v43 = vld [vmem:[%s18020_s13 + $0x3b0] ss:$8 sps:$4 sm:$0xff]  }
 0x463   : > { %15543 = vmatprep.subr.bf16.mxu1 %v17818_v44  ;;  %v17838_v44 = vld [vmem:[%s18020_s13 + $0x3c4] ss:$8 sps:$4 sm:$0xff]  }
 0x464   : > { %9298 = vmatmul.mubr.bf16.gmra.mrb[4].mxu1 %v14256_v39  ;;  %v14336_v39 = vcombine.low %v327_v0, %v335_v1 }
 0x465   : > { %11507 = vmatmul.mubr.bf16.gmra.mrb[80].mxu0 %v14566_v40  ;;  %9307 = vmatprep.mubr.bf16.mxu1 %v14273_v41  ;;  %v14646_v40 = vcombine.low %v634_v2, %v642_v3  ;;  %v14353_v41 = vcombine.high %v343_v33, %v351_v34  ;;  %v423_v3 = vld [vmem:[%s22772_s2 + $0x610] sm:$0xff] }
 0x466   : > { %11516 = vmatprep.mubr.bf16.mxu0 %v14583_v42  ;;  %15559 = vmatpush1.bf16.msra.mxu1 %v17819_v51  ;;  %v14663_v42 = vcombine.high %v650_v35, %v658_v36  ;;  %v14352_v51 = vcombine.low %v343_v33, %v351_v34  ;;  %v754_v33 = vld [vmem:[%s22772_s2 + $0x1068] sm:$0xff] }
 0x467   : > { %15544 = vmatprep.subr.bf16.mxu1 %v17820_v52  ;;  %v14662_v52 = vcombine.low %v650_v35, %v658_v36 }
 0x46a   : > { %15560 = vmatpush1.bf16.msra.mxu1 %v17821_v57  ;;  %v375_v57 = vld [vmem:[%s22772_s2 + $0x490] sm:$0xff] }
 0x46b   : > { %15545 = vmatprep.subr.bf16.mxu1 %v17822_v58  ;;  %v383_v58 = vld [vmem:[%s22772_s2 + $0x4d0] sm:$0xff] }
 0x46c   : > { %9308 = vmatmul.mubr.bf16.gmra.mrb[8].mxu1 %v14272_v53  ;;  %v14369_v53 = vcombine.high %v359_v45, %v367_v46  ;;  %v14384_v14 = vcombine.low %v375_v57, %v383_v58 }
 0x46d   : > { %11517 = vmatmul.mubr.bf16.gmra.mrb[84].mxu0 %v14582_v54  ;;  %9317 = vmatprep.mubr.bf16.mxu1 %v14289_v55  ;;  %v14679_v54 = vcombine.high %v666_v47, %v674_v48  ;;  %v17841_v55 = vld [vmem:[%s18020_s13 + $0x3d0] ss:$8 sps:$4 sm:$0xff]  }
 0x46e   : > { %11526 = vmatprep.mubr.bf16.mxu0 %v14599_v56  ;;  %15561 = vmatpush1.bf16.msra.mxu1 %v17823_v63  ;;  %v17842_v56 = vld [vmem:[%s18020_s13 + $0x3e4] ss:$8 sps:$4 sm:$0xff]   ;;  %v14368_v63 = vcombine.low %v359_v45, %v367_v46  ;;  %v17740_v46 = vld [vmem:[%s18020_s13 + $0x6c0] ss:$8 sps:$4 sm:$0xff]  }
 0x46f   : > { %15546 = vmatprep.subr.bf16.mxu1 %v17824_v4  ;;  %v14678_v4 = vcombine.low %v666_v47, %v674_v48  ;;  %v17742_v47 = vld [vmem:[%s18020_s13 + $0x6c4] ss:$8 sps:$4 sm:$0xff]   ;;  %v471_v48 = vld [vmem:[%s22772_s2 + $0x790] sm:$0xff] }
 0x472   : > { %15562 = vmatpush1.bf16.msra.mxu1 %v17825_v11  ;;  %v399_v11 = vld [vmem:[%s22772_s2 + $0x550] sm:$0xff] }
 0x473   : > { %15547 = vmatprep.subr.bf16.mxu1 %v17826_v12  ;;  %v698_v12 = vld [vmem:[%s22772_s2 + $0xea8] sm:$0xff] }
 0x474   : > { %9318 = vmatmul.mubr.bf16.gmra.mrb[12].mxu1 %v14288_v7  ;;  %v14385_v7 = vcombine.high %v375_v57, %v383_v58  ;;  %v14710_v0 = vcombine.low %v698_v12, %v706_v13  ;;  %v495_v57 = vld [vmem:[%s22772_s2 + $0x850] sm:$0xff]  ;;  %v794_v58 = vld [vmem:[%s22772_s2 + $0x11a8] sm:$0xff] }
 0x475   : > { %11527 = vmatmul.mubr.bf16.gmra.mrb[88].mxu0 %v14598_v8  ;;  %9327 = vmatprep.mubr.bf16.mxu1 %v14305_v9  ;;  %v14695_v8 = vcombine.high %v682_v59, %v690_v60  ;;  %v17845_v9 = vld [vmem:[%s18020_s13 + $0x3f0] ss:$8 sps:$4 sm:$0xff]   ;;  %v802_v59 = vld [vmem:[%s22772_s2 + $0x11e8] sm:$0xff] }
 0x476   : > { %11536 = vmatprep.mubr.bf16.mxu0 %v14615_v10  ;;  %15563 = vmatpush1.bf16.msra.mxu1 %v17827_v17  ;;  %v391_v10 = vld [vmem:[%s22772_s2 + $0x510] sm:$0xff]  ;;  %v14711_v17 = vcombine.high %v698_v12, %v706_v13 }
 0x477   : > { %15548 = vmatprep.subr.bf16.mxu1 %v17828_v18  ;;  %v14401_v16 = vcombine.high %v391_v10, %v399_v11  ;;  %v17737_v18 = vld [vmem:[%s18020_s13 + $0x6b0] ss:$8 sps:$4 sm:$0xff]  }
 0x47a   : > { %15564 = vmatpush1.bf16.msra.mxu1 %v17829_v23  ;;  %v722_v23 = vld [vmem:[%s22772_s2 + $0xf68] sm:$0xff] }
 0x47b   : > { %15549 = vmatprep.subr.bf16.mxu1 %v17830_v24  ;;  %v14400_v24 = vcombine.low %v391_v10, %v399_v11  ;;  %v14806_v11 = vcombine.low %v794_v58, %v802_v59 }
 0x47c   : > { %9328 = vmatmul.mubr.bf16.gmra.mrb[16].mxu1 %v14304_v19  ;;  %v17739_v19 = vld [vmem:[%s18020_s13 + $0x6b4] ss:$8 sps:$4 sm:$0xff]  }
 0x47d   : > { %11537 = vmatmul.mubr.bf16.gmra.mrb[92].mxu0 %v14614_v20  ;;  %9337 = vmatprep.mubr.bf16.mxu1 %v14321_v21  ;;  %v407_v20 = vld [vmem:[%s22772_s2 + $0x590] sm:$0xff] }
 0x47e   : > { %11546 = vmatprep.mubr.bf16.mxu0 %v14631_v22  ;;  %15565 = vmatpush1.bf16.msra.mxu1 %v17831_v5  ;;  %v415_v21 = vld [vmem:[%s22772_s2 + $0x5d0] sm:$0xff]  ;;  %v714_v22 = vld [vmem:[%s22772_s2 + $0xf28] sm:$0xff] }
 0x47f   : > { %15550 = vmatprep.subr.bf16.mxu1 %v17832_v6  ;;  %11969 = vmatprep.subr.bf16.mxu0 %v17739_v19  ;;  %v14417_v1 = vcombine.high %v407_v20, %v415_v21  ;;  %v14727_v2 = vcombine.high %v714_v22, %v722_v23  ;;  %v431_v5 = vld [vmem:[%s22772_s2 + $0x650] sm:$0xff]  ;;  %v730_v6 = vld [vmem:[%s22772_s2 + $0xfa8] sm:$0xff] }
 0x480   : > { %11970 = vmatpush1.bf16.msra.mxu0 %v17737_v18  ;;  %v14432_v34 = vcombine.low %v423_v3, %v431_v5 }
 0x481   : > { %11971 = vmatprep.subr.bf16.mxu0 %v17742_v47 }
 0x482   : > { %15566 = vmatpush1.bf16.msra.mxu1 %v17833_v29 }
 0x483   : > { %15551 = vmatprep.subr.bf16.mxu1 %v17834_v30  ;;  %v439_v30 = vld [vmem:[%s22772_s2 + $0x690] sm:$0xff] }
 0x484   : > { %9338 = vmatmul.mubr.bf16.gmra.mrb[20].mxu1 %v14320_v25  ;;  %v738_v25 = vld [vmem:[%s22772_s2 + $0xfe8] sm:$0xff]  ;;  %v14449_v36 = vcombine.high %v439_v30, %v447_v31  ;;  %11972 = vmatpush1.bf16.msra.mxu0 %v17740_v46 }
 0x485   : > { %11547 = vmatmul.mubr.bf16.gmra.mrb[96].mxu0 %v14630_v26  ;;  %9347 = vmatprep.mubr.bf16.mxu1 %v14337_v27  ;;  %v14416_v26 = vcombine.low %v407_v20, %v415_v21  ;;  %v14726_v27 = vcombine.low %v714_v22, %v722_v23  ;;  %v14743_v29 = vcombine.high %v730_v6, %v738_v25  ;;  %v17743_v22 = vld [vmem:[%s18020_s13 + $0x6d0] ss:$8 sps:$4 sm:$0xff]   ;;  %v17745_v23 = vld [vmem:[%s18020_s13 + $0x6d4] ss:$8 sps:$4 sm:$0xff]  }
 0x486   : > { %11556 = vmatprep.mubr.bf16.mxu0 %v14647_v28  ;;  %15567 = vmatpush1.bf16.msra.mxu1 %v17835_v37  ;;  %v14433_v28 = vcombine.high %v423_v3, %v431_v5  ;;  %v14742_v35 = vcombine.low %v730_v6, %v738_v25  ;;  %v14759_v37 = vcombine.high %v746_v32, %v754_v33 }
 0x487   : > { %15552 = vmatprep.subr.bf16.mxu1 %v17836_v38  ;;  %v455_v38 = vld [vmem:[%s22772_s2 + $0x710] sm:$0xff]  ;;  %11973 = vmatprep.subr.bf16.mxu0 %v17745_v23 }
 0x488   : > { %11974 = vmatpush1.bf16.msra.mxu0 %v17743_v22 }
 0x48a   : > { %15568 = vmatpush1.bf16.msra.mxu1 %v17837_v43  ;;  %v14758_v43 = vcombine.low %v746_v32, %v754_v33 }
 0x48b   : > { %15553 = vmatprep.subr.bf16.mxu1 %v17838_v44 }
 0x48c   : > { %9348 = vmatmul.mubr.bf16.gmra.mrb[24].mxu1 %v14336_v39  ;;  %v463_v39 = vld [vmem:[%s22772_s2 + $0x750] sm:$0xff] }
 0x48d   : > { %11557 = vmatmul.mubr.bf16.gmra.mrb[100].mxu0 %v14646_v40  ;;  %9357 = vmatprep.mubr.bf16.mxu1 %v14353_v41  ;;  %v762_v40 = vld [vmem:[%s22772_s2 + $0x10a8] sm:$0xff]  ;;  %v14465_v44 = vcombine.high %v455_v38, %v463_v39 }
 0x48e   : > { %11566 = vmatprep.mubr.bf16.mxu0 %v14663_v42  ;;  %15569 = vmatpush1.bf16.msra.mxu1 %v17839_v49  ;;  %v770_v41 = vld [vmem:[%s22772_s2 + $0x10e8] sm:$0xff]  ;;  %v14448_v42 = vcombine.low %v439_v30, %v447_v31  ;;  %v479_v49 = vld [vmem:[%s22772_s2 + $0x7d0] sm:$0xff] }
 0x48f   : > { %15554 = vmatprep.subr.bf16.mxu1 %v17840_v50  ;;  %v14775_v45 = vcombine.high %v762_v40, %v770_v41  ;;  %v778_v50 = vld [vmem:[%s22772_s2 + $0x1128] sm:$0xff]  ;;  %v14480_v60 = vcombine.low %v471_v48, %v479_v49 }
 0x492   : > { %15570 = vmatpush1.bf16.msra.mxu1 %v17841_v55 }
 0x493   : > { %15555 = vmatprep.subr.bf16.mxu1 %v17842_v56  ;;  %v487_v56 = vld [vmem:[%s22772_s2 + $0x810] sm:$0xff] }
 0x494   : > { %9358 = vmatmul.mubr.bf16.gmra.mrb[28].mxu1 %v14352_v51  ;;  %v786_v51 = vld [vmem:[%s22772_s2 + $0x1168] sm:$0xff]  ;;  %v14496_v10 = vcombine.low %v487_v56, %v495_v57 }
 0x495   : > { %11567 = vmatmul.mubr.bf16.gmra.mrb[104].mxu0 %v14662_v52  ;;  %9367 = vmatprep.mubr.bf16.mxu1 %v14369_v53  ;;  %v14464_v52 = vcombine.low %v455_v38, %v463_v39  ;;  %v14774_v53 = vcombine.low %v762_v40, %v770_v41  ;;  %v14791_v55 = vcombine.high %v778_v50, %v786_v51 }
 0x496   : > { %11576 = vmatprep.mubr.bf16.mxu0 %v14679_v54  ;;  %15571 = vmatpush1.bf16.msra.mxu1 %v17843_v61  ;;  %v14481_v54 = vcombine.high %v471_v48, %v479_v49  ;;  %v14790_v61 = vcombine.low %v778_v50, %v786_v51  ;;  %v17746_v50 = vld [vmem:[%s18020_s13 + $0x6e0] ss:$8 sps:$4 sm:$0xff]   ;;  %v17748_v51 = vld [vmem:[%s18020_s13 + $0x6e4] ss:$8 sps:$4 sm:$0xff]  }
 0x497   : > { %15556 = vmatprep.subr.bf16.mxu1 %v17844_v62  ;;  %v14497_v62 = vcombine.high %v487_v56, %v495_v57  ;;  %11975 = vmatprep.subr.bf16.mxu0 %v17748_v51 }
 0x498   : > { %11976 = vmatpush1.bf16.msra.mxu0 %v17746_v50 }
 0x49a   : > { %15572 = vmatpush1.bf16.msra.mxu1 %v17845_v9  ;;  %v818_v9 = vld [vmem:[%s22772_s2 + $0x1268] sm:$0xff] }
 0x49c   : > { %9368 = vmatmul.mubr.bf16.gmra.mrb[32].mxu1 %v14368_v63  ;;  %v14807_v63 = vcombine.high %v794_v58, %v802_v59 }
 0x49d   : > { %11577 = vmatmul.mubr.bf16.gmra.mrb[108].mxu0 %v14678_v4  ;;  %9377 = vmatprep.mubr.bf16.mxu1 %v14385_v7  ;;  %v503_v4 = vld [vmem:[%s22772_s2 + $0x890] sm:$0xff] }
 0x49e   : > { %11586 = vmatprep.mubr.bf16.mxu0 %v14695_v8  ;;  %v511_v7 = vld [vmem:[%s22772_s2 + $0x8d0] sm:$0xff]  ;;  %v810_v8 = vld [vmem:[%s22772_s2 + $0x1228] sm:$0xff] }
 0x49f   : > { %v14513_v12 = vcombine.high %v503_v4, %v511_v7  ;;  %v14823_v13 = vcombine.high %v810_v8, %v818_v9  ;;  %v14512_v18 = vcombine.low %v503_v4, %v511_v7  ;;  %v14822_v19 = vcombine.low %v810_v8, %v818_v9 }
 0x4a4   : > { %9378 = vmatmul.mubr.bf16.gmra.mrb[36].mxu1 %v14384_v14  ;;  %v519_v14 = vld [vmem:[%s22772_s2 + $0x910] sm:$0xff] }
 0x4a5   : > { %11587 = vmatmul.mubr.bf16.gmra.mrb[112].mxu0 %v14694_v15  ;;  %9387 = vmatprep.mubr.bf16.mxu1 %v14401_v16  ;;  %v527_v15 = vld [vmem:[%s22772_s2 + $0x950] sm:$0xff]  ;;  %v826_v16 = vld [vmem:[%s22772_s2 + $0x12a8] sm:$0xff] }
 0x4a6   : > { %11596 = vmatprep.mubr.bf16.mxu0 %v14711_v17  ;;  %v834_v17 = vld [vmem:[%s22772_s2 + $0x12e8] sm:$0xff]  ;;  %v14529_v20 = vcombine.high %v519_v14, %v527_v15  ;;  %v14528_v3 = vcombine.low %v519_v14, %v527_v15 }
 0x4a7   : > { %v14839_v21 = vcombine.high %v826_v16, %v834_v17  ;;  %v14838_v5 = vcombine.low %v826_v16, %v834_v17 }
 0x4ac   : > { %9388 = vmatmul.mubr.bf16.gmra.mrb[40].mxu1 %v14400_v24  ;;  %v535_v24 = vld [vmem:[%s22772_s2 + $0x990] sm:$0xff] }
 0x4ad   : > { %11597 = vmatmul.mubr.bf16.gmra.mrb[116].mxu0 %v14710_v0  ;;  %9397 = vmatprep.mubr.bf16.mxu1 %v14417_v1  ;;  %v543_v0 = vld [vmem:[%s22772_s2 + $0x9d0] sm:$0xff]  ;;  %v842_v1 = vld [vmem:[%s22772_s2 + $0x1328] sm:$0xff] }
 0x4ae   : > { %11606 = vmatprep.mubr.bf16.mxu0 %v14727_v2  ;;  %v850_v2 = vld [vmem:[%s22772_s2 + $0x1368] sm:$0xff]  ;;  %v14545_v6 = vcombine.high %v535_v24, %v543_v0  ;;  %v14544_v30 = vcombine.low %v535_v24, %v543_v0 }
 0x4af   : > { %v14855_v25 = vcombine.high %v842_v1, %v850_v2  ;;  %v14854_v31 = vcombine.low %v842_v1, %v850_v2  ;;  %v17749_v1 = vld [vmem:[%s18020_s13 + $0x6f0] ss:$8 sps:$4 sm:$0xff]   ;;  %v17751_v2 = vld [vmem:[%s18020_s13 + $0x6f4] ss:$8 sps:$4 sm:$0xff]  }
 0x4b0   : > { %11977 = vmatprep.subr.bf16.mxu0 %v17751_v2 }
 0x4b1   : > { %11978 = vmatpush1.bf16.msra.mxu0 %v17749_v1 }
 0x4b4   : > { %9398 = vmatmul.mubr.bf16.gmra.mrb[44].mxu1 %v14416_v26  ;;  %v551_v26 = vld [vmem:[%s22772_s2 + $0xa10] sm:$0xff] }
 0x4b5   : > { %11607 = vmatmul.mubr.bf16.gmra.mrb[120].mxu0 %v14726_v27  ;;  %9407 = vmatprep.mubr.bf16.mxu1 %v14433_v28  ;;  %v559_v27 = vld [vmem:[%s22772_s2 + $0xa50] sm:$0xff]  ;;  %v858_v28 = vld [vmem:[%s22772_s2 + $0x13a8] sm:$0xff] }
 0x4b6   : > { %11616 = vmatprep.mubr.bf16.mxu0 %v14743_v29  ;;  %v866_v29 = vld [vmem:[%s22772_s2 + $0x13e8] sm:$0xff]  ;;  %v14561_v32 = vcombine.high %v551_v26, %v559_v27  ;;  %v14560_v38 = vcombine.low %v551_v26, %v559_v27 }
 0x4b7   : > { %v14871_v33 = vcombine.high %v858_v28, %v866_v29  ;;  %v14870_v39 = vcombine.low %v858_v28, %v866_v29 }
 0x4bc   : > { %9408 = vmatmul.mubr.bf16.gmra.mrb[48].mxu1 %v14432_v34  ;;  %v567_v34 = vld [vmem:[%s22772_s2 + $0xa90] sm:$0xff] }
 0x4bd   : > { %11617 = vmatmul.mubr.bf16.gmra.mrb[124].mxu0 %v14742_v35  ;;  %9417 = vmatprep.mubr.bf16.mxu1 %v14449_v36  ;;  %v575_v35 = vld [vmem:[%s22772_s2 + $0xad0] sm:$0xff]  ;;  %v874_v36 = vld [vmem:[%s22772_s2 + $0x1428] sm:$0xff] }
 0x4be   : > { %11626 = vmatprep.mubr.bf16.mxu0 %v14759_v37  ;;  %v882_v37 = vld [vmem:[%s22772_s2 + $0x1468] sm:$0xff]  ;;  %v14577_v40 = vcombine.high %v567_v34, %v575_v35  ;;  %v14576_v46 = vcombine.low %v567_v34, %v575_v35 }
 0x4bf   : > { %v14887_v41 = vcombine.high %v874_v36, %v882_v37  ;;  %v14886_v47 = vcombine.low %v874_v36, %v882_v37 }
 0x4c4   : > { %9418 = vmatmul.mubr.bf16.gmra.mrb[52].mxu1 %v14448_v42  ;;  %v583_v42 = vld [vmem:[%s22772_s2 + $0xb10] sm:$0xff] }
 0x4c5   : > { %11627 = vmatmul.mubr.bf16.gmra.mrb[128].mxu0 %v14758_v43  ;;  %9427 = vmatprep.mubr.bf16.mxu1 %v14465_v44  ;;  %v591_v43 = vld [vmem:[%s22772_s2 + $0xb50] sm:$0xff]  ;;  %v890_v44 = vld [vmem:[%s22772_s2 + $0x14a8] sm:$0xff] }
 0x4c6   : > { %11636 = vmatprep.mubr.bf16.mxu0 %v14775_v45  ;;  %v898_v45 = vld [vmem:[%s22772_s2 + $0x14e8] sm:$0xff]  ;;  %v14593_v48 = vcombine.high %v583_v42, %v591_v43  ;;  %v14592_v56 = vcombine.low %v583_v42, %v591_v43  ;;  %v695_v42 = vld [vmem:[%s22772_s2 + $0xe90] sm:$0xff] }
 0x4c7   : > { %v14903_v49 = vcombine.high %v890_v44, %v898_v45  ;;  %v14902_v57 = vcombine.low %v890_v44, %v898_v45  ;;  %v703_v43 = vld [vmem:[%s22772_s2 + $0xed0] sm:$0xff]  ;;  %v1002_v44 = vld [vmem:[%s22772_s2 + $0x1828] sm:$0xff] }
 0x4c8   : > { %v1010_v45 = vld [vmem:[%s22772_s2 + $0x1868] sm:$0xff]  ;;  %v14705_v51 = vcombine.high %v695_v42, %v703_v43 }
 0x4cc   : > { %9428 = vmatmul.mubr.bf16.gmra.mrb[56].mxu1 %v14464_v52  ;;  %v599_v52 = vld [vmem:[%s22772_s2 + $0xb90] sm:$0xff] }
 0x4cd   : > { %11637 = vmatmul.mubr.bf16.gmra.mrb[132].mxu0 %v14774_v53  ;;  %9437 = vmatprep.mubr.bf16.mxu1 %v14481_v54  ;;  %v607_v53 = vld [vmem:[%s22772_s2 + $0xbd0] sm:$0xff]  ;;  %v906_v54 = vld [vmem:[%s22772_s2 + $0x1528] sm:$0xff] }
 0x4ce   : > { %11646 = vmatprep.mubr.bf16.mxu0 %v14791_v55  ;;  %v914_v55 = vld [vmem:[%s22772_s2 + $0x1568] sm:$0xff]  ;;  %v14609_v58 = vcombine.high %v599_v52, %v607_v53  ;;  %v14608_v4 = vcombine.low %v599_v52, %v607_v53  ;;  %v15015_v52 = vcombine.high %v1002_v44, %v1010_v45 }
 0x4cf   : > { %v14919_v59 = vcombine.high %v906_v54, %v914_v55  ;;  %v14918_v7 = vcombine.low %v906_v54, %v914_v55  ;;  %v711_v54 = vld [vmem:[%s22772_s2 + $0xf10] sm:$0xff] }
 0x4d0   : > { %v719_v55 = vld [vmem:[%s22772_s2 + $0xf50] sm:$0xff] }
 0x4d4   : > { %9438 = vmatmul.mubr.bf16.gmra.mrb[60].mxu1 %v14480_v60  ;;  %v615_v60 = vld [vmem:[%s22772_s2 + $0xc10] sm:$0xff] }
 0x4d5   : > { %11647 = vmatmul.mubr.bf16.gmra.mrb[136].mxu0 %v14790_v61  ;;  %9447 = vmatprep.mubr.bf16.mxu1 %v14497_v62  ;;  %v623_v61 = vld [vmem:[%s22772_s2 + $0xc50] sm:$0xff]  ;;  %v922_v62 = vld [vmem:[%s22772_s2 + $0x15a8] sm:$0xff] }
 0x4d6   : > { %11656 = vmatprep.mubr.bf16.mxu0 %v14807_v63  ;;  %v930_v63 = vld [vmem:[%s22772_s2 + $0x15e8] sm:$0xff]  ;;  %v14625_v8 = vcombine.high %v615_v60, %v623_v61  ;;  %v14624_v14 = vcombine.low %v615_v60, %v623_v61  ;;  %v14704_v60 = vcombine.low %v695_v42, %v703_v43  ;;  %v15014_v61 = vcombine.low %v1002_v44, %v1010_v45  ;;  %v775_v43 = vld [vmem:[%s22772_s2 + $0x1110] sm:$0xff] }
 0x4d7   : > { %v14935_v9 = vcombine.high %v922_v62, %v930_v63  ;;  %v14934_v15 = vcombine.low %v922_v62, %v930_v63  ;;  %v14721_v63 = vcombine.high %v711_v54, %v719_v55  ;;  %v783_v44 = vld [vmem:[%s22772_s2 + $0x1150] sm:$0xff]  ;;  %v1082_v45 = vld [vmem:[%s22772_s2 + $0x1aa8] sm:$0xff] }
 0x4dc   : > { %9448 = vmatmul.mubr.bf16.gmra.mrb[64].mxu1 %v14496_v10  ;;  %v631_v10 = vld [vmem:[%s22772_s2 + $0xc90] sm:$0xff] }
 0x4dd   : > { %11657 = vmatmul.mubr.bf16.gmra.mrb[140].mxu0 %v14806_v11  ;;  %9457 = vmatprep.mubr.bf16.mxu1 %v14513_v12  ;;  %v639_v11 = vld [vmem:[%s22772_s2 + $0xcd0] sm:$0xff]  ;;  %v938_v12 = vld [vmem:[%s22772_s2 + $0x1628] sm:$0xff] }
 0x4de   : > { %11666 = vmatprep.mubr.bf16.mxu0 %v14823_v13  ;;  %v946_v13 = vld [vmem:[%s22772_s2 + $0x1668] sm:$0xff]  ;;  %v14641_v16 = vcombine.high %v631_v10, %v639_v11  ;;  %v14640_v22 = vcombine.low %v631_v10, %v639_v11  ;;  %v735_v10 = vld [vmem:[%s22772_s2 + $0xfd0] sm:$0xff] }
 0x4df   : > { %v14951_v17 = vcombine.high %v938_v12, %v946_v13  ;;  %v14950_v23 = vcombine.low %v938_v12, %v946_v13  ;;  %v1034_v11 = vld [vmem:[%s22772_s2 + $0x1928] sm:$0xff] }
 0x4e0   : > { %v1042_v12 = vld [vmem:[%s22772_s2 + $0x1968] sm:$0xff] }
 0x4e4   : > { %9458 = vmatmul.mubr.bf16.gmra.mrb[68].mxu1 %v14512_v18  ;;  %v647_v18 = vld [vmem:[%s22772_s2 + $0xd10] sm:$0xff] }
 0x4e5   : > { %11667 = vmatmul.mubr.bf16.gmra.mrb[144].mxu0 %v14822_v19  ;;  %9467 = vmatprep.mubr.bf16.mxu1 %v14529_v20  ;;  %v655_v19 = vld [vmem:[%s22772_s2 + $0xd50] sm:$0xff]  ;;  %v954_v20 = vld [vmem:[%s22772_s2 + $0x16a8] sm:$0xff] }
 0x4e6   : > { %11676 = vmatprep.mubr.bf16.mxu0 %v14839_v21  ;;  %v962_v21 = vld [vmem:[%s22772_s2 + $0x16e8] sm:$0xff]  ;;  %v14657_v24 = vcombine.high %v647_v18, %v655_v19  ;;  %v14656_v26 = vcombine.low %v647_v18, %v655_v19  ;;  %v15047_v19 = vcombine.high %v1034_v11, %v1042_v12 }
 0x4e7   : > { %v14967_v0 = vcombine.high %v954_v20, %v962_v21  ;;  %v14966_v27 = vcombine.low %v954_v20, %v962_v21  ;;  %v743_v21 = vld [vmem:[%s22772_s2 + $0x1010] sm:$0xff] }
 0x4ec   : > { %9468 = vmatmul.mubr.bf16.gmra.mrb[72].mxu1 %v14528_v3  ;;  %v663_v3 = vld [vmem:[%s22772_s2 + $0xd90] sm:$0xff] }
 0x4ed   : > { %11677 = vmatmul.mubr.bf16.gmra.mrb[148].mxu0 %v14838_v5  ;;  %9477 = vmatprep.mubr.bf16.mxu1 %v14545_v6  ;;  %v671_v5 = vld [vmem:[%s22772_s2 + $0xdd0] sm:$0xff]  ;;  %v970_v6 = vld [vmem:[%s22772_s2 + $0x1728] sm:$0xff] }
 0x4ee   : > { %11686 = vmatprep.mubr.bf16.mxu0 %v14855_v25  ;;  %v978_v25 = vld [vmem:[%s22772_s2 + $0x1768] sm:$0xff]  ;;  %v14673_v28 = vcombine.high %v663_v3, %v671_v5  ;;  %v14672_v36 = vcombine.low %v663_v3, %v671_v5  ;;  %v15046_v3 = vcombine.low %v1034_v11, %v1042_v12  ;;  %v14784_v11 = vcombine.low %v775_v43, %v783_v44 }
 0x4ef   : > { %v14983_v29 = vcombine.high %v970_v6, %v978_v25  ;;  %v14982_v37 = vcombine.low %v970_v6, %v978_v25 }
 0x4f4   : > { %9478 = vmatmul.mubr.bf16.gmra.mrb[76].mxu1 %v14544_v30  ;;  %v679_v30 = vld [vmem:[%s22772_s2 + $0xe10] sm:$0xff] }
 0x4f5   : > { %11687 = vmatmul.mubr.bf16.gmra.mrb[152].mxu0 %v14854_v31  ;;  %9487 = vmatprep.mubr.bf16.mxu1 %v14561_v32  ;;  %v687_v31 = vld [vmem:[%s22772_s2 + $0xe50] sm:$0xff]  ;;  %v986_v32 = vld [vmem:[%s22772_s2 + $0x17a8] sm:$0xff] }
 0x4f6   : > { %11696 = vmatprep.mubr.bf16.mxu0 %v14871_v33  ;;  %v994_v33 = vld [vmem:[%s22772_s2 + $0x17e8] sm:$0xff] }
 0x4fc   : > { %9488 = vmatmul.mubr.bf16.gmra.mrb[80].mxu1 %v14560_v38 }
 0x4fd   : > { %11697 = vmatmul.mubr.bf16.gmra.mrb[156].mxu0 %v14870_v39  ;;  %9497 = vmatprep.mubr.bf16.mxu1 %v14577_v40  ;;  %v14689_v39 = vcombine.high %v679_v30, %v687_v31  ;;  %v14999_v40 = vcombine.high %v986_v32, %v994_v33 }
 0x4fe   : > { %11706 = vmatprep.mubr.bf16.mxu0 %v14887_v41 }
 0x504   : > { %9498 = vmatmul.mubr.bf16.gmra.mrb[84].mxu1 %v14576_v46 }
 0x505   : > { %11707 = vmatmul.mubr.bf16.gmra.mrb[160].mxu0 %v14886_v47  ;;  %9507 = vmatprep.mubr.bf16.mxu1 %v14593_v48  ;;  %v14688_v48 = vcombine.low %v679_v30, %v687_v31  ;;  %v1074_v30 = vld [vmem:[%s22772_s2 + $0x1a68] sm:$0xff] }
 0x506   : > { %11716 = vmatprep.mubr.bf16.mxu0 %v14903_v49  ;;  %v14998_v49 = vcombine.low %v986_v32, %v994_v33 }
 0x50c   : > { %9508 = vmatmul.mubr.bf16.gmra.mrb[88].mxu1 %v14592_v56  ;;  %v1018_v56 = vld [vmem:[%s22772_s2 + $0x18a8] sm:$0xff] }
 0x50d   : > { %11717 = vmatmul.mubr.bf16.gmra.mrb[164].mxu0 %v14902_v57  ;;  %9517 = vmatprep.mubr.bf16.mxu1 %v14609_v58  ;;  %v1026_v57 = vld [vmem:[%s22772_s2 + $0x18e8] sm:$0xff] }
 0x50e   : > { %11726 = vmatprep.mubr.bf16.mxu0 %v14919_v59 }
 0x514   : > { %9518 = vmatmul.mubr.bf16.gmra.mrb[92].mxu1 %v14608_v4  ;;  %v15031_v4 = vcombine.high %v1018_v56, %v1026_v57 }
 0x515   : > { %11727 = vmatmul.mubr.bf16.gmra.mrb[168].mxu0 %v14918_v7  ;;  %9527 = vmatprep.mubr.bf16.mxu1 %v14625_v8  ;;  %v17754_v8 = vld [vmem:[%s18020_s13 + $0x704] ss:$8 sps:$4 sm:$0xff]  }
 0x516   : > { %11736 = vmatprep.mubr.bf16.mxu0 %v14935_v9  ;;  %v727_v9 = vld [vmem:[%s22772_s2 + $0xf90] sm:$0xff]  ;;  %12620 = vmatprep.subr.bf16.mxu0 %v17754_v8  ;;  %v1106_v8 = vld [vmem:[%s22772_s2 + $0x1b68] sm:$0xff] }
 0x517   : > { %v14737_v18 = vcombine.high %v727_v9, %v735_v10  ;;  %v14736_v2 = vcombine.low %v727_v9, %v735_v10 }
 0x51c   : > { %9528 = vmatmul.mubr.bf16.gmra.mrb[96].mxu1 %v14624_v14 }
 0x51d   : > { %11737 = vmatmul.mubr.bf16.gmra.mrb[172].mxu0 %v14934_v15  ;;  %9537 = vmatprep.mubr.bf16.mxu1 %v14641_v16  ;;  %v14720_v15 = vcombine.low %v711_v54, %v719_v55  ;;  %v15030_v16 = vcombine.low %v1018_v56, %v1026_v57  ;;  %v14785_v56 = vcombine.high %v775_v43, %v783_v44 }
 0x51e   : > { %11746 = vmatprep.mubr.bf16.mxu0 %v14951_v17 }
 0x524   : > { %9538 = vmatmul.mubr.bf16.gmra.mrb[100].mxu1 %v14640_v22  ;;  %v751_v22 = vld [vmem:[%s22772_s2 + $0x1050] sm:$0xff] }
 0x525   : > { %11747 = vmatmul.mubr.bf16.gmra.mrb[176].mxu0 %v14950_v23  ;;  %9547 = vmatprep.mubr.bf16.mxu1 %v14657_v24  ;;  %v1050_v23 = vld [vmem:[%s22772_s2 + $0x19a8] sm:$0xff]  ;;  %v14753_v6 = vcombine.high %v743_v21, %v751_v22  ;;  %v14752_v33 = vcombine.low %v743_v21, %v751_v22  ;;  %v807_v21 = vld [vmem:[%s22772_s2 + $0x1210] sm:$0xff] }
 0x526   : > { %11756 = vmatprep.mubr.bf16.mxu0 %v14967_v0  ;;  %v1058_v24 = vld [vmem:[%s22772_s2 + $0x19e8] sm:$0xff]  ;;  %v815_v22 = vld [vmem:[%s22772_s2 + $0x1250] sm:$0xff] }
 0x527   : > { %v15063_v25 = vcombine.high %v1050_v23, %v1058_v24 }
 0x52c   : > { %9548 = vmatmul.mubr.bf16.gmra.mrb[104].mxu1 %v14656_v26 }
 0x52d   : > { %11757 = vmatmul.mubr.bf16.gmra.mrb[180].mxu0 %v14966_v27  ;;  %9557 = vmatprep.mubr.bf16.mxu1 %v14673_v28  ;;  %v759_v27 = vld [vmem:[%s22772_s2 + $0x1090] sm:$0xff] }
 0x52e   : > { %11766 = vmatprep.mubr.bf16.mxu0 %v14983_v29  ;;  %v767_v28 = vld [vmem:[%s22772_s2 + $0x10d0] sm:$0xff]  ;;  %v1066_v29 = vld [vmem:[%s22772_s2 + $0x1a28] sm:$0xff] }
 0x52f   : > { %v20156_v34 = vpop.f32.mrb[0].mxu1  ;;  %v15078_v54 = vcombine.low %v1066_v29, %v1074_v30 }
 0x530   : > { %v20158_v35 = vpop.f32.mrb[1].mxu1 }
 0x531   : > { %v20160_v38 = vpop.f32.mrb[2].mxu1 }
 0x532   : > { %v20162_v41 = vpop.f32.mrb[3].mxu1 }
 0x534   : > { %9558 = vmatmul.mubr.bf16.gmra.mrb[108].mxu1 %v14672_v36  ;;  %v15062_v36 = vcombine.low %v1050_v23, %v1058_v24  ;;  %v1114_v23 = vld [vmem:[%s22772_s2 + $0x1ba8] sm:$0xff] }
 0x535   : > { %11767 = vmatmul.mubr.bf16.gmra.mrb[184].mxu0 %v14982_v37  ;;  %9567 = vmatprep.mubr.bf16.mxu1 %v14689_v39  ;;  %v14769_v39 = vcombine.high %v759_v27, %v767_v28  ;;  %v1122_v24 = vld [vmem:[%s22772_s2 + $0x1be8] sm:$0xff] }
 0x536   : > { %11776 = vmatprep.mubr.bf16.mxu0 %v14999_v40  ;;  %v15079_v40 = vcombine.high %v1066_v29, %v1074_v30  ;;  %v15127_v29 = vcombine.high %v1114_v23, %v1122_v24 }
 0x537   : > { %v20176_v46 = vpop.f32.mrb[4].mxu1 }
 0x538   : > { %v20178_v47 = vpop.f32.mrb[5].mxu1 }
 0x539   : > { %v20180_v50 = vpop.f32.mrb[6].mxu1 }
 0x53a   : > { %v20182_v53 = vpop.f32.mrb[7].mxu1 }
 0x53c   : > { %9568 = vmatmul.mubr.bf16.gmra.mrb[112].mxu1 %v14688_v48  ;;  %v1090_v48 = vld [vmem:[%s22772_s2 + $0x1ae8] sm:$0xff] }
 0x53d   : > { %11777 = vmatmul.mubr.bf16.gmra.mrb[188].mxu0 %v14998_v49  ;;  %9577 = vmatprep.mubr.bf16.mxu1 %v14705_v51  ;;  %v15095_v57 = vcombine.high %v1082_v45, %v1090_v48  ;;  %v15094_v12 = vcombine.low %v1082_v45, %v1090_v48  ;;  %v14816_v45 = vcombine.low %v807_v21, %v815_v22 }
 0x53e   : > { %11786 = vmatprep.mubr.bf16.mxu0 %v15015_v52  ;;  %v14768_v52 = vcombine.low %v759_v27, %v767_v28  ;;  %v14817_v28 = vcombine.high %v807_v21, %v815_v22  ;;  %v15126_v48 = vcombine.low %v1114_v23, %v1122_v24 }
 0x53f   : > { %v20196_v58 = vpop.f32.mrb[8].mxu1 }
 0x540   : > { %v20198_v59 = vpop.f32.mrb[9].mxu1 }
 0x541   : > { %v20200_v62 = vpop.f32.mrb[10].mxu1 }
 0x542   : > { %v20202_v7 = vpop.f32.mrb[11].mxu1 }
 0x544   : > { %9578 = vmatmul.mubr.bf16.gmra.mrb[116].mxu1 %v14704_v60 }
 0x545   : > { %11787 = vmatmul.mubr.bf16.gmra.mrb[192].mxu0 %v15014_v61  ;;  %9587 = vmatprep.mubr.bf16.mxu1 %v14721_v63  ;;  %v791_v61 = vld [vmem:[%s22772_s2 + $0x1190] sm:$0xff] }
 0x546   : > { %11796 = vmatprep.mubr.bf16.mxu0 %v15031_v4  ;;  %v799_v63 = vld [vmem:[%s22772_s2 + $0x11d0] sm:$0xff]  ;;  %v1098_v4 = vld [vmem:[%s22772_s2 + $0x1b28] sm:$0xff] }
 0x547   : > { %v20217_v13 = vpop.f32.mrb[12].mxu1 }
 0x548   : > { %v20219_v14 = vpop.f32.mrb[13].mxu1 }
 0x549   : > { %v20221_v17 = vpop.f32.mrb[14].mxu1 }
 0x54a   : > { %v20223_v20 = vpop.f32.mrb[15].mxu1 }
 0x54c   : > { %9588 = vmatmul.mubr.bf16.gmra.mrb[120].mxu1 %v14720_v15 }
 0x54d   : > { %11797 = vmatmul.mubr.bf16.gmra.mrb[196].mxu0 %v15030_v16  ;;  %9597 = vmatprep.mubr.bf16.mxu1 %v14737_v18  ;;  %v14801_v16 = vcombine.high %v791_v61, %v799_v63  ;;  %v15111_v18 = vcombine.high %v1098_v4, %v1106_v8 }
 0x54e   : > { %11806 = vmatprep.mubr.bf16.mxu0 %v15047_v19 }
 0x54f   : > { %v20237_v0 = vpop.f32.mrb[16].mxu1 }
 0x550   : > { %v20239_v1 = vpop.f32.mrb[17].mxu1 }
 0x551   : > { %v20241_v5 = vpop.f32.mrb[18].mxu1 }
 0x552   : > { %v20243_v26 = vpop.f32.mrb[19].mxu1 }
 0x554   : > { %9598 = vmatmul.mubr.bf16.gmra.mrb[124].mxu1 %v14736_v2 }
 0x555   : > { %11807 = vmatmul.mubr.bf16.gmra.mrb[200].mxu0 %v15046_v3  ;;  %9607 = vmatprep.mubr.bf16.mxu1 %v14753_v6  ;;  %v14800_v6 = vcombine.low %v791_v61, %v799_v63  ;;  %v839_v61 = vld [vmem:[%s22772_s2 + $0x1310] sm:$0xff] }
 0x556   : > { %11816 = vmatprep.mubr.bf16.mxu0 %v15063_v25  ;;  %v15110_v25 = vcombine.low %v1098_v4, %v1106_v8  ;;  %v847_v63 = vld [vmem:[%s22772_s2 + $0x1350] sm:$0xff]  ;;  %v1146_v4 = vld [vmem:[%s22772_s2 + $0x1ca8] sm:$0xff] }
 0x557   : > { %v20257_v31 = vpop.f32.mrb[20].mxu1  ;;  %v1154_v8 = vld [vmem:[%s22772_s2 + $0x1ce8] sm:$0xff]  ;;  %v14849_v22 = vcombine.high %v839_v61, %v847_v63 }
 0x558   : > { %v20259_v32 = vpop.f32.mrb[21].mxu1  ;;  %v15159_v23 = vcombine.high %v1146_v4, %v1154_v8 }
 0x559   : > { %v20261_v37 = vpop.f32.mrb[22].mxu1 }
 0x55a   : > { %v20263_v42 = vpop.f32.mrb[23].mxu1 }
 0x55c   : > { %9608 = vmatmul.mubr.bf16.gmra.mrb[128].mxu1 %v14752_v33  ;;  %v823_v33 = vld [vmem:[%s22772_s2 + $0x1290] sm:$0xff] }
 0x55d   : > { %11817 = vmatmul.mubr.bf16.gmra.mrb[204].mxu0 %v15062_v36  ;;  %9617 = vmatprep.mubr.bf16.mxu1 %v14769_v39  ;;  %v831_v36 = vld [vmem:[%s22772_s2 + $0x12d0] sm:$0xff]  ;;  %v1130_v39 = vld [vmem:[%s22772_s2 + $0x1c28] sm:$0xff] }
 0x55e   : > { %11826 = vmatprep.mubr.bf16.mxu0 %v15079_v40  ;;  %v1138_v40 = vld [vmem:[%s22772_s2 + $0x1c68] sm:$0xff] }
 0x55f   : > { %v20277_v49 = vpop.f32.mrb[24].mxu1 }
 0x560   : > { %v20279_v51 = vpop.f32.mrb[25].mxu1 }
 0x561   : > { %v20281_v55 = vpop.f32.mrb[26].mxu1 }
 0x562   : > { %v20283_v60 = vpop.f32.mrb[27].mxu1 }
 0x564   : > { %9618 = vmatmul.mubr.bf16.gmra.mrb[132].mxu1 %v14768_v52 }
 0x565   : > { %11827 = vmatmul.mubr.bf16.gmra.mrb[208].mxu0 %v15078_v54  ;;  %9627 = vmatprep.mubr.bf16.mxu1 %v14785_v56  ;;  %v14833_v54 = vcombine.high %v823_v33, %v831_v36  ;;  %v15143_v56 = vcombine.high %v1130_v39, %v1138_v40 }
 0x566   : > { %11836 = vmatprep.mubr.bf16.mxu0 %v15095_v57 }
 0x567   : > { %v20297_v9 = vpop.f32.mrb[28].mxu1 }
 0x568   : > { %v20299_v10 = vpop.f32.mrb[29].mxu1 }
 0x569   : > { %v20301_v15 = vpop.f32.mrb[30].mxu1 }
 0x56a   : > { %v20303_v19 = vpop.f32.mrb[31].mxu1 }
 0x56c   : > { %9628 = vmatmul.mubr.bf16.gmra.mrb[136].mxu1 %v14784_v11 }
 0x56d   : > { %11837 = vmatmul.mubr.bf16.gmra.mrb[212].mxu0 %v15094_v12  ;;  %9637 = vmatprep.mubr.bf16.mxu1 %v14801_v16  ;;  %v14832_v16 = vcombine.low %v823_v33, %v831_v36 }
 0x56e   : > { %11846 = vmatprep.mubr.bf16.mxu0 %v15111_v18  ;;  %v15142_v18 = vcombine.low %v1130_v39, %v1138_v40  ;;  %v14848_v39 = vcombine.low %v839_v61, %v847_v63  ;;  %v15158_v40 = vcombine.low %v1146_v4, %v1154_v8  ;;  %v1178_v61 = vld [vmem:[%s22772_s2 + $0x1da8] sm:$0xff] }
 0x56f   : > { %v20317_v2 = vpop.f32.mrb[32].mxu1  ;;  %v1186_v63 = vld [vmem:[%s22772_s2 + $0x1de8] sm:$0xff] }
 0x570   : > { %v20319_v3 = vpop.f32.mrb[33].mxu1 }
 0x571   : > { %v20321_v27 = vpop.f32.mrb[34].mxu1 }
 0x572   : > { %v20323_v30 = vpop.f32.mrb[35].mxu1 }
 0x574   : > { %9638 = vmatmul.mubr.bf16.gmra.mrb[140].mxu1 %v14800_v6  ;;  %v855_v6 = vld [vmem:[%s22772_s2 + $0x1390] sm:$0xff] }
 0x575   : > { %11847 = vmatmul.mubr.bf16.gmra.mrb[216].mxu0 %v15110_v25  ;;  %9647 = vmatprep.mubr.bf16.mxu1 %v14817_v28  ;;  %v863_v25 = vld [vmem:[%s22772_s2 + $0x13d0] sm:$0xff]  ;;  %v1162_v28 = vld [vmem:[%s22772_s2 + $0x1d28] sm:$0xff] }
 0x576   : > { %11856 = vmatprep.mubr.bf16.mxu0 %v15127_v29  ;;  %v1170_v29 = vld [vmem:[%s22772_s2 + $0x1d68] sm:$0xff] }
 0x577   : > { %v20337_v43 = vpop.f32.mrb[36].mxu1 }
 0x578   : > { %v20339_v44 = vpop.f32.mrb[37].mxu1 }
 0x579   : > { %v20341_v52 = vpop.f32.mrb[38].mxu1 }
 0x57a   : > { %v20343_v57 = vpop.f32.mrb[39].mxu1 }
 0x57c   : > { %9648 = vmatmul.mubr.bf16.gmra.mrb[144].mxu1 %v14816_v45 }
 0x57d   : > { %11857 = vmatmul.mubr.bf16.gmra.mrb[220].mxu0 %v15126_v48  ;;  %9657 = vmatprep.mubr.bf16.mxu1 %v14833_v54  ;;  %v14865_v48 = vcombine.high %v855_v6, %v863_v25  ;;  %v15175_v54 = vcombine.high %v1162_v28, %v1170_v29 }
 0x57e   : > { %11866 = vmatprep.mubr.bf16.mxu0 %v15143_v56 }
 0x57f   : > { %v20357_v11 = vpop.f32.mrb[40].mxu1 }
 0x580   : > { %v20359_v12 = vpop.f32.mrb[41].mxu1 }
 0x581   : > { %v20361_v21 = vpop.f32.mrb[42].mxu1 }
 0x582   : > { %v20363_v24 = vpop.f32.mrb[43].mxu1 }
 0x583   : > { %22857 = vst [vmem:[#allocation6_spill] sm:$0xff] %v20363_v24  ;;  %v17763_v24 = vld [vmem:[%s18020_s13 + $0x734] ss:$8 sps:$4 sm:$0xff]  }
 0x584   : > { %9658 = vmatmul.mubr.bf16.gmra.mrb[148].mxu1 %v14832_v16  ;;  %v871_v16 = vld [vmem:[%s22772_s2 + $0x1410] sm:$0xff] }
 0x585   : > { %11867 = vmatmul.mubr.bf16.gmra.mrb[224].mxu0 %v15142_v18  ;;  %9667 = vmatprep.mubr.bf16.mxu1 %v14849_v22  ;;  %v879_v18 = vld [vmem:[%s22772_s2 + $0x1450] sm:$0xff]  ;;  %v14864_v22 = vcombine.low %v855_v6, %v863_v25  ;;  %v1194_v6 = vld [vmem:[%s22772_s2 + $0x1e28] sm:$0xff] }
 0x586   : > { %11876 = vmatprep.mubr.bf16.mxu0 %v15159_v23  ;;  %v15174_v23 = vcombine.low %v1162_v28, %v1170_v29  ;;  %v1202_v25 = vld [vmem:[%s22772_s2 + $0x1e68] sm:$0xff] }
 0x587   : > { %v20377_v33 = vpop.f32.mrb[44].mxu1 }
 0x588   : > { %22858 = vst [vmem:[#allocation7_spill] sm:$0xff] %v20377_v33  ;;  %v20379_v36 = vpop.f32.mrb[45].mxu1  ;;  %v17758_v33 = vld [vmem:[%s18020_s13 + $0x720] ss:$8 sps:$4 sm:$0xff]  }
 0x589   : > { %22859 = vst [vmem:[#allocation8_spill] sm:$0xff] %v20379_v36  ;;  %v20381_v45 = vpop.f32.mrb[46].mxu1 }
 0x58a   : > { %22860 = vst [vmem:[#allocation9_spill] sm:$0xff] %v20381_v45  ;;  %v20383_v56 = vpop.f32.mrb[47].mxu1  ;;  %v983_v45 = vld [vmem:[%s22772_s2 + $0x1790] sm:$0xff] }
 0x58b   : > { %22861 = vst [vmem:[#allocation10_spill] sm:$0xff] %v20383_v56  ;;  %v887_v56 = vld [vmem:[%s22772_s2 + $0x1490] sm:$0xff] }
 0x58c   : > { %9668 = vmatmul.mubr.bf16.gmra.mrb[152].mxu1 %v14848_v39 }
 0x58d   : > { %11877 = vmatmul.mubr.bf16.gmra.mrb[228].mxu0 %v15158_v40  ;;  %9677 = vmatprep.mubr.bf16.mxu1 %v14865_v48  ;;  %v14881_v40 = vcombine.high %v871_v16, %v879_v18  ;;  %v15191_v48 = vcombine.high %v1178_v61, %v1186_v63 }
 0x58e   : > { %11886 = vmatprep.mubr.bf16.mxu0 %v15175_v54 }
 0x58f   : > { %v20397_v4 = vpop.f32.mrb[48].mxu1 }
 0x590   : > { %22862 = vst [vmem:[#allocation11_spill] sm:$0xff] %v20397_v4  ;;  %v20399_v8 = vpop.f32.mrb[49].mxu1  ;;  %v903_v4 = vld [vmem:[%s22772_s2 + $0x1510] sm:$0xff] }
 0x591   : > { %22863 = vst [vmem:[#allocation12_spill] sm:$0xff] %v20399_v8  ;;  %v20401_v39 = vpop.f32.mrb[50].mxu1  ;;  %v895_v8 = vld [vmem:[%s22772_s2 + $0x14d0] sm:$0xff] }
 0x592   : > { %22864 = vst [vmem:[#allocation13_spill] sm:$0xff] %v20401_v39  ;;  %v20403_v54 = vpop.f32.mrb[51].mxu1 }
 0x593   : > { %22865 = vst [vmem:[#allocation14_spill] sm:$0xff] %v20403_v54  ;;  %v15207_v54 = vcombine.high %v1194_v6, %v1202_v25 }
 0x594   : > { %9678 = vmatmul.mubr.bf16.gmra.mrb[156].mxu1 %v14864_v22  ;;  %v14880_v22 = vcombine.low %v871_v16, %v879_v18  ;;  %v1210_v16 = vld [vmem:[%s22772_s2 + $0x1ea8] sm:$0xff] }
 0x595   : > { %11887 = vmatmul.mubr.bf16.gmra.mrb[232].mxu0 %v15174_v23  ;;  %9687 = vmatprep.mubr.bf16.mxu1 %v14881_v40  ;;  %v15190_v23 = vcombine.low %v1178_v61, %v1186_v63  ;;  %v1218_v18 = vld [vmem:[%s22772_s2 + $0x1ee8] sm:$0xff] }
 0x596   : > { %11896 = vmatprep.mubr.bf16.mxu0 %v15191_v48  ;;  %v14897_v48 = vcombine.high %v887_v56, %v895_v8 }
 0x597   : > { %v20417_v28 = vpop.f32.mrb[52].mxu1 }
 0x598   : > { %22866 = vst [vmem:[#allocation15_spill] sm:$0xff] %v20417_v28  ;;  %v20419_v29 = vpop.f32.mrb[53].mxu1  ;;  %v919_v28 = vld [vmem:[%s22772_s2 + $0x1590] sm:$0xff] }
 0x599   : > { %22867 = vst [vmem:[#allocation16_spill] sm:$0xff] %v20419_v29  ;;  %v20421_v40 = vpop.f32.mrb[54].mxu1  ;;  %v911_v29 = vld [vmem:[%s22772_s2 + $0x1550] sm:$0xff] }
 0x59a   : > { %22868 = vst [vmem:[#allocation17_spill] sm:$0xff] %v20421_v40  ;;  %v20423_v39 = vpop.f32.mrb[55].mxu1 }
 0x59b   : > { %22869 = vst [vmem:[#allocation18_spill] sm:$0xff] %v20423_v39  ;;  %v15223_v39 = vcombine.high %v1210_v16, %v1218_v18 }
 0x59c   : > { %9688 = vmatmul.mubr.bf16.gmra.mrb[160].mxu1 %v14880_v22  ;;  %v15206_v22 = vcombine.low %v1194_v6, %v1202_v25 }
 0x59d   : > { %11897 = vmatmul.mubr.bf16.gmra.mrb[236].mxu0 %v15190_v23  ;;  %9697 = vmatprep.mubr.bf16.mxu1 %v14897_v48  ;;  %v14913_v48 = vcombine.high %v903_v4, %v911_v29 }
 0x59e   : > { %11906 = vmatprep.mubr.bf16.mxu0 %v15207_v54  ;;  %v14896_v54 = vcombine.low %v887_v56, %v895_v8  ;;  %v1226_v56 = vld [vmem:[%s22772_s2 + $0x1f28] sm:$0xff] }
 0x59f   : > { %v20437_v61 = vpop.f32.mrb[56].mxu1  ;;  %v1234_v8 = vld [vmem:[%s22772_s2 + $0x1f68] sm:$0xff] }
 0x5a0   : > { %22870 = vst [vmem:[#allocation19_spill] sm:$0xff] %v20437_v61  ;;  %v20439_v63 = vpop.f32.mrb[57].mxu1  ;;  %v935_v61 = vld [vmem:[%s22772_s2 + $0x1610] sm:$0xff] }
 0x5a1   : > { %22871 = vst [vmem:[#allocation20_spill] sm:$0xff] %v20439_v63  ;;  %v20441_v23 = vpop.f32.mrb[58].mxu1  ;;  %v927_v63 = vld [vmem:[%s22772_s2 + $0x15d0] sm:$0xff] }
 0x5a2   : > { %22872 = vst [vmem:[#allocation21_spill] sm:$0xff] %v20441_v23  ;;  %v20443_v40 = vpop.f32.mrb[59].mxu1 }
 0x5a3   : > { %22873 = vst [vmem:[#allocation22_spill] sm:$0xff] %v20443_v40  ;;  %v15239_v40 = vcombine.high %v1226_v56, %v1234_v8 }
 0x5a4   : > { %9698 = vmatmul.mubr.bf16.gmra.mrb[164].mxu1 %v14896_v54  ;;  %v15222_v54 = vcombine.low %v1210_v16, %v1218_v18 }
 0x5a5   : > { %11907 = vmatmul.mubr.bf16.gmra.mrb[240].mxu0 %v15206_v22  ;;  %9707 = vmatprep.mubr.bf16.mxu1 %v14913_v48  ;;  %v14929_v48 = vcombine.high %v919_v28, %v927_v63 }
 0x5a6   : > { %11916 = vmatprep.mubr.bf16.mxu0 %v15223_v39  ;;  %v14912_v39 = vcombine.low %v903_v4, %v911_v29  ;;  %v1242_v4 = vld [vmem:[%s22772_s2 + $0x1fa8] sm:$0xff] }
 0x5a7   : > { %v20457_v6 = vpop.f32.mrb[60].mxu1  ;;  %v1250_v29 = vld [vmem:[%s22772_s2 + $0x1fe8] sm:$0xff] }
 0x5a8   : > { %22874 = vst [vmem:[#allocation23_spill] sm:$0xff] %v20457_v6  ;;  %v20459_v25 = vpop.f32.mrb[61].mxu1  ;;  %v951_v6 = vld [vmem:[%s22772_s2 + $0x1690] sm:$0xff] }
 0x5a9   : > { %22875 = vst [vmem:[#allocation24_spill] sm:$0xff] %v20459_v25  ;;  %v20461_v22 = vpop.f32.mrb[62].mxu1  ;;  %v943_v25 = vld [vmem:[%s22772_s2 + $0x1650] sm:$0xff] }
 0x5aa   : > { %22876 = vst [vmem:[#allocation25_spill] sm:$0xff] %v20461_v22  ;;  %v20463_v23 = vpop.f32.mrb[63].mxu1 }
 0x5ab   : > { %22877 = vst [vmem:[#allocation26_spill] sm:$0xff] %v20463_v23  ;;  %v15255_v23 = vcombine.high %v1242_v4, %v1250_v29 }
 0x5ac   : > { %9708 = vmatmul.mubr.bf16.gmra.mrb[168].mxu1 %v14912_v39  ;;  %v15238_v39 = vcombine.low %v1226_v56, %v1234_v8 }
 0x5ad   : > { %11917 = vmatmul.mubr.bf16.gmra.mrb[244].mxu0 %v15222_v54  ;;  %9717 = vmatprep.mubr.bf16.mxu1 %v14929_v48  ;;  %v14945_v48 = vcombine.high %v935_v61, %v943_v25 }
 0x5ae   : > { %11926 = vmatprep.mubr.bf16.mxu0 %v15239_v40  ;;  %v14928_v40 = vcombine.low %v919_v28, %v927_v63  ;;  %v235_v28 = vld [vmem:[%s22772_s2 + $0x30] sm:$0xff] }
 0x5af   : > { %v20477_v16 = vpop.f32.mrb[64].mxu1  ;;  %v243_v63 = vld [vmem:[%s22772_s2 + $0x70] sm:$0xff] }
 0x5b0   : > { %22878 = vst [vmem:[#allocation27_spill] sm:$0xff] %v20477_v16  ;;  %v20479_v18 = vpop.f32.mrb[65].mxu1  ;;  %v17757_v16 = vld [vmem:[%s18020_s13 + $0x714] ss:$8 sps:$4 sm:$0xff]  }
 0x5b1   : > { %22879 = vst [vmem:[#allocation28_spill] sm:$0xff] %v20479_v18  ;;  %v20481_v54 = vpop.f32.mrb[66].mxu1  ;;  %v959_v18 = vld [vmem:[%s22772_s2 + $0x16d0] sm:$0xff] }
 0x5b2   : > { %22880 = vst [vmem:[#allocation29_spill] sm:$0xff] %v20481_v54  ;;  %v20483_v22 = vpop.f32.mrb[67].mxu1 }
 0x5b3   : > { %22881 = vst [vmem:[#allocation30_spill] sm:$0xff] %v20483_v22  ;;  %v14249_v22 = vcombine.high %v235_v28, %v243_v63 }
 0x5b4   : > { %9718 = vmatmul.mubr.bf16.gmra.mrb[172].mxu1 %v14928_v40  ;;  %v15254_v40 = vcombine.low %v1242_v4, %v1250_v29  ;;  %v251_v4 = vld [vmem:[%s22772_s2 + $0xb0] sm:$0xff] }
 0x5b5   : > { %11927 = vmatmul.mubr.bf16.gmra.mrb[248].mxu0 %v15238_v39  ;;  %9727 = vmatprep.mubr.bf16.mxu1 %v14945_v48  ;;  %v14961_v48 = vcombine.high %v951_v6, %v959_v18  ;;  %v259_v29 = vld [vmem:[%s22772_s2 + $0xf0] sm:$0xff] }
 0x5b6   : > { %11936 = vmatprep.mubr.bf16.mxu0 %v15255_v23  ;;  %v14944_v23 = vcombine.low %v935_v61, %v943_v25  ;;  %v975_v61 = vld [vmem:[%s22772_s2 + $0x1750] sm:$0xff] }
 0x5b7   : > { %v20497_v56 = vpop.f32.mrb[68].mxu1 }
 0x5b8   : > { %22882 = vst [vmem:[#allocation31_spill] sm:$0xff] %v20497_v56  ;;  %v20499_v8 = vpop.f32.mrb[69].mxu1  ;;  %v967_v56 = vld [vmem:[%s22772_s2 + $0x1710] sm:$0xff] }
 0x5b9   : > { %22883 = vst [vmem:[#allocation32_spill] sm:$0xff] %v20499_v8  ;;  %v20501_v39 = vpop.f32.mrb[70].mxu1 }
 0x5ba   : > { %22884 = vst [vmem:[#allocation33_spill] sm:$0xff] %v20501_v39  ;;  %v20503_v54 = vpop.f32.mrb[71].mxu1  ;;  %v14977_v39 = vcombine.high %v967_v56, %v975_v61 }
 0x5bb   : > { %22885 = vst [vmem:[#allocation34_spill] sm:$0xff] %v20503_v54  ;;  %v17752_v54 = vld [vmem:[%s18020_s13 + $0x700] ss:$8 sps:$4 sm:$0xff]  }
 0x5bc   : > { %9728 = vmatmul.mubr.bf16.gmra.mrb[176].mxu1 %v14944_v23  ;;  %v14248_v23 = vcombine.low %v235_v28, %v243_v63  ;;  %v267_v28 = vld [vmem:[%s22772_s2 + $0x130] sm:$0xff]  ;;  %v17760_v63 = vld [vmem:[%s18020_s13 + $0x724] ss:$8 sps:$4 sm:$0xff]  }
 0x5bd   : > { %11937 = vmatmul.mubr.bf16.gmra.mrb[252].mxu0 %v15254_v40  ;;  %9737 = vmatprep.mubr.bf16.mxu1 %v14961_v48  ;;  %v14960_v40 = vcombine.low %v951_v6, %v959_v18  ;;  %v991_v6 = vld [vmem:[%s22772_s2 + $0x17d0] sm:$0xff] }
 0x5be   : > { %11979 = vmatprep.mubr.bf16.mxu0 %v14249_v22  ;;  %v17755_v18 = vld [vmem:[%s18020_s13 + $0x710] ss:$8 sps:$4 sm:$0xff]  }
 0x5bf   : > { %v20511_v25 = vpop.f32.mrb[72].mxu1 }
 0x5c0   : > { %22886 = vst [vmem:[#allocation35_spill] sm:$0xff] %v20511_v25  ;;  %v20519_v22 = vpop.f32.mrb[73].mxu1  ;;  %v14265_v25 = vcombine.high %v251_v4, %v259_v29 }
 0x5c1   : > { %22887 = vst [vmem:[#allocation36_spill] sm:$0xff] %v20519_v22  ;;  %v20521_v48 = vpop.f32.mrb[74].mxu1 }
 0x5c2   : > { %22888 = vst [vmem:[#allocation37_spill] sm:$0xff] %v20521_v48  ;;  %v20524_v8 = vpop.f32.mrb[75].mxu1 }
 0x5c3   : > { %22889 = vst [vmem:[#allocation38_spill] sm:$0xff] %v20524_v8  ;;  %v14264_v8 = vcombine.low %v251_v4, %v259_v29  ;;  %v291_v4 = vld [vmem:[%s22772_s2 + $0x1f0] sm:$0xff] }
 0x5c4   : > { %9738 = vmatmul.mubr.bf16.gmra.mrb[180].mxu1 %v14960_v40  ;;  %v14976_v40 = vcombine.low %v967_v56, %v975_v61  ;;  %v1007_v56 = vld [vmem:[%s22772_s2 + $0x1850] sm:$0xff] }
 0x5c5   : > { %11980 = vmatmul.mubr.bf16.vlgmr.msra.gmra.mrb[0].mxu0 %v14248_v23  ;;  %9747 = vmatprep.mubr.bf16.mxu1 %v14977_v39  ;;  %v283_v61 = vld [vmem:[%s22772_s2 + $0x1b0] sm:$0xff] }
 0x5c6   : > { %12621 = vmatpush1.bf16.msra.mxu0 %v17752_v54  ;;  %11989 = vmatprep.mubr.bf16.mxu0 %v14265_v25  ;;  %v275_v54 = vld [vmem:[%s22772_s2 + $0x170] sm:$0xff]  ;;  %v14993_v25 = vcombine.high %v983_v45, %v991_v6 }
 0x5c7   : > { %12622 = vmatprep.subr.bf16.mxu0 %v17757_v16  ;;  %v20541_v39 = vpop.f32.mrb[76].mxu1  ;;  %v14281_v22 = vcombine.high %v267_v28, %v275_v54  ;;  %v999_v16 = vld [vmem:[%s22772_s2 + $0x1810] sm:$0xff] }
 0x5c8   : > { %22890 = vst [vmem:[#allocation39_spill] sm:$0xff] %v20541_v39  ;;  %v20543_v23 = vpop.f32.mrb[77].mxu1  ;;  %v17764_v39 = vld [vmem:[%s18020_s13 + $0x740] ss:$8 sps:$4 sm:$0xff]  }
 0x5c9   : > { %22891 = vst [vmem:[#allocation40_spill] sm:$0xff] %v20543_v23  ;;  %v20545_v48 = vpop.f32.mrb[78].mxu1 }
 0x5ca   : > { %22892 = vst [vmem:[#allocation41_spill] sm:$0xff] %v20545_v48  ;;  %12623 = vmatpush1.bf16.msra.mxu0 %v17755_v18  ;;  %v20547_v36 = vpop.f32.mrb[79].mxu1  ;;  %v14297_v48 = vcombine.high %v283_v61, %v291_v4 }
 0x5cb   : > { %22893 = vst [vmem:[#allocation42_spill] sm:$0xff] %v20547_v36  ;;  %12624 = vmatprep.subr.bf16.mxu0 %v17760_v63  ;;  %v14992_v63 = vcombine.low %v983_v45, %v991_v6  ;;  %v15009_v36 = vcombine.high %v999_v16, %v1007_v56  ;;  %v299_v45 = vld [vmem:[%s22772_s2 + $0x230] sm:$0xff] }
 0x5cc   : > { %9748 = vmatmul.mubr.bf16.gmra.mrb[184].mxu1 %v14976_v40  ;;  %v14280_v40 = vcombine.low %v267_v28, %v275_v54  ;;  %v307_v6 = vld [vmem:[%s22772_s2 + $0x270] sm:$0xff]  ;;  %v14296_v54 = vcombine.low %v283_v61, %v291_v4 }
 0x5cd   : > { %11990 = vmatmul.mubr.bf16.gmra.mrb[4].mxu0 %v14264_v8  ;;  %9757 = vmatprep.mubr.bf16.mxu1 %v14993_v25  ;;  %v17761_v8 = vld [vmem:[%s18020_s13 + $0x730] ss:$8 sps:$4 sm:$0xff]  }
 0x5ce   : > { %11999 = vmatprep.mubr.bf16.mxu0 %v14281_v22  ;;  %12625 = vmatpush1.bf16.msra.mxu0 %v17758_v33  ;;  %v17766_v22 = vld [vmem:[%s18020_s13 + $0x744] ss:$8 sps:$4 sm:$0xff]   ;;  %v1023_v33 = vld [vmem:[%s22772_s2 + $0x18d0] sm:$0xff] }
 0x5cf   : > { %v20564_v29 = vpop.f32.mrb[80].mxu1  ;;  %12626 = vmatprep.subr.bf16.mxu0 %v17763_v24  ;;  %v1015_v24 = vld [vmem:[%s22772_s2 + $0x1890] sm:$0xff] }
 0x5d0   : > { %v20567_v18 = vpop.f32.mrb[81].mxu1  ;;  %v323_v61 = vld [vmem:[%s22772_s2 + $0x2f0] sm:$0xff] }
 0x5d1   : > { %v20569_v25 = vpop.f32.mrb[82].mxu1 }
 0x5d2   : > { %v20571_v23 = vpop.f32.mrb[83].mxu1  ;;  %12627 = vmatpush1.bf16.msra.mxu0 %v17761_v8 }
 0x5d3   : > { %22894 = vst [vmem:[#allocation43_spill] sm:$0xff] %v20571_v23  ;;  %12628 = vmatprep.subr.bf16.mxu0 %v17766_v22  ;;  %v15025_v22 = vcombine.high %v1015_v24, %v1023_v33  ;;  %v17769_v23 = vld [vmem:[%s18020_s13 + $0x754] ss:$8 sps:$4 sm:$0xff]  }
 0x5d4   : > { %9758 = vmatmul.mubr.bf16.gmra.mrb[188].mxu1 %v14992_v63  ;;  %v14313_v63 = vcombine.high %v299_v45, %v307_v6 }
 0x5d5   : > { %12000 = vmatmul.mubr.bf16.gmra.mrb[8].mxu0 %v14280_v40  ;;  %9767 = vmatprep.mubr.bf16.mxu1 %v15009_v36 }
 0x5d6   : > { %12009 = vmatprep.mubr.bf16.mxu0 %v14297_v48  ;;  %12629 = vmatpush1.bf16.msra.mxu0 %v17764_v39  ;;  %v15008_v48 = vcombine.low %v999_v16, %v1007_v56  ;;  %v1031_v39 = vld [vmem:[%s22772_s2 + $0x1910] sm:$0xff] }
 0x5d7   : > { %v20586_v28 = vpop.f32.mrb[84].mxu1  ;;  %v1039_v16 = vld [vmem:[%s22772_s2 + $0x1950] sm:$0xff]  ;;  %12630 = vmatprep.subr.bf16.mxu0 %v17769_v23 }
 0x5d8   : > { %22895 = vst [vmem:[#allocation44_spill] sm:$0xff] %v20586_v28  ;;  %v20588_v36 = vpop.f32.mrb[85].mxu1  ;;  %v315_v56 = vld [vmem:[%s22772_s2 + $0x2b0] sm:$0xff] }
 0x5d9   : > { %22896 = vst [vmem:[#allocation45_spill] sm:$0xff] %v20588_v36  ;;  %v20590_v8 = vpop.f32.mrb[86].mxu1  ;;  %v17767_v28 = vld [vmem:[%s18020_s13 + $0x750] ss:$8 sps:$4 sm:$0xff]  }
 0x5da   : > { %22897 = vst [vmem:[#allocation46_spill] sm:$0xff] %v20590_v8  ;;  %v20592_v40 = vpop.f32.mrb[87].mxu1  ;;  %v14329_v8 = vcombine.high %v315_v56, %v323_v61  ;;  %12631 = vmatpush1.bf16.msra.mxu0 %v17767_v28  ;;  %v1063_v23 = vld [vmem:[%s22772_s2 + $0x1a10] sm:$0xff] }
 0x5db   : > { %22898 = vst [vmem:[#allocation47_spill] sm:$0xff] %v20592_v40  ;;  %v15041_v40 = vcombine.high %v1031_v39, %v1039_v16  ;;  %v1071_v28 = vld [vmem:[%s22772_s2 + $0x1a50] sm:$0xff] }
 0x5dc   : > { %9768 = vmatmul.mubr.bf16.gmra.mrb[192].mxu1 %v15008_v48 }
 0x5dd   : > { %12010 = vmatmul.mubr.bf16.gmra.mrb[12].mxu0 %v14296_v54  ;;  %9777 = vmatprep.mubr.bf16.mxu1 %v15025_v22  ;;  %v15024_v54 = vcombine.low %v1015_v24, %v1023_v33  ;;  %v14312_v22 = vcombine.low %v299_v45, %v307_v6  ;;  %v1055_v24 = vld [vmem:[%s22772_s2 + $0x19d0] sm:$0xff] }
 0x5de   : > { %12019 = vmatprep.mubr.bf16.mxu0 %v14313_v63  ;;  %v331_v33 = vld [vmem:[%s22772_s2 + $0x330] sm:$0xff] }
 0x5df   : > { %v20606_v4 = vpop.f32.mrb[88].mxu1  ;;  %v339_v45 = vld [vmem:[%s22772_s2 + $0x370] sm:$0xff] }
 0x5e0   : > { %22899 = vst [vmem:[#allocation48_spill] sm:$0xff] %v20606_v4  ;;  %v20608_v48 = vpop.f32.mrb[89].mxu1  ;;  %v1047_v4 = vld [vmem:[%s22772_s2 + $0x1990] sm:$0xff] }
 0x5e1   : > { %22900 = vst [vmem:[#allocation49_spill] sm:$0xff] %v20608_v48  ;;  %v20610_v63 = vpop.f32.mrb[90].mxu1 }
 0x5e2   : > { %22901 = vst [vmem:[#allocation50_spill] sm:$0xff] %v20610_v63  ;;  %v20612_v36 = vpop.f32.mrb[91].mxu1  ;;  %v14345_v63 = vcombine.high %v331_v33, %v339_v45 }
 0x5e3   : > { %22902 = vst [vmem:[#allocation51_spill] sm:$0xff] %v20612_v36  ;;  %v15057_v36 = vcombine.high %v1047_v4, %v1055_v24 }
 0x5e4   : > { %9778 = vmatmul.mubr.bf16.gmra.mrb[196].mxu1 %v15024_v54  ;;  %v14328_v54 = vcombine.low %v315_v56, %v323_v61  ;;  %v15056_v61 = vcombine.low %v1047_v4, %v1055_v24  ;;  %v363_v4 = vld [vmem:[%s22772_s2 + $0x430] sm:$0xff] }
 0x5e5   : > { %12020 = vmatmul.mubr.bf16.gmra.mrb[16].mxu0 %v14312_v22  ;;  %9787 = vmatprep.mubr.bf16.mxu1 %v15041_v40  ;;  %v15040_v40 = vcombine.low %v1031_v39, %v1039_v16  ;;  %v347_v39 = vld [vmem:[%s22772_s2 + $0x3b0] sm:$0xff] }
 0x5e6   : > { %12029 = vmatprep.mubr.bf16.mxu0 %v14329_v8  ;;  %v355_v16 = vld [vmem:[%s22772_s2 + $0x3f0] sm:$0xff] }
 0x5e7   : > { %v20628_v6 = vpop.f32.mrb[92].mxu1  ;;  %v371_v24 = vld [vmem:[%s22772_s2 + $0x470] sm:$0xff] }
 0x5e8   : > { %22903 = vst [vmem:[#allocation52_spill] sm:$0xff] %v20628_v6  ;;  %v20630_v8 = vpop.f32.mrb[93].mxu1  ;;  %v17772_v6 = vld [vmem:[%s18020_s13 + $0x764] ss:$8 sps:$4 sm:$0xff]  }
 0x5e9   : > { %22904 = vst [vmem:[#allocation53_spill] sm:$0xff] %v20630_v8  ;;  %v20632_v22 = vpop.f32.mrb[94].mxu1  ;;  %v1079_v8 = vld [vmem:[%s22772_s2 + $0x1a90] sm:$0xff]  ;;  %12632 = vmatprep.subr.bf16.mxu0 %v17772_v6 }
 0x5ea   : > { %22905 = vst [vmem:[#allocation54_spill] sm:$0xff] %v20632_v22  ;;  %v20634_v48 = vpop.f32.mrb[95].mxu1  ;;  %v1127_v6 = vld [vmem:[%s22772_s2 + $0x1c10] sm:$0xff] }
 0x5eb   : > { %22906 = vst [vmem:[#allocation55_spill] sm:$0xff] %v20634_v48  ;;  %v14361_v48 = vcombine.high %v347_v39, %v355_v16 }
 0x5ec   : > { %9788 = vmatmul.mubr.bf16.gmra.mrb[200].mxu1 %v15040_v40 }
 0x5ed   : > { %12030 = vmatmul.mubr.bf16.gmra.mrb[20].mxu0 %v14328_v54  ;;  %9797 = vmatprep.mubr.bf16.mxu1 %v15057_v36  ;;  %v15073_v54 = vcombine.high %v1063_v23, %v1071_v28 }
 0x5ee   : > { %12039 = vmatprep.mubr.bf16.mxu0 %v14345_v63  ;;  %v14344_v63 = vcombine.low %v331_v33, %v339_v45 }
 0x5ef   : > { %v20648_v56 = vpop.f32.mrb[96].mxu1 }
 0x5f0   : > { %22907 = vst [vmem:[#allocation56_spill] sm:$0xff] %v20648_v56  ;;  %v20650_v36 = vpop.f32.mrb[97].mxu1  ;;  %v17770_v56 = vld [vmem:[%s18020_s13 + $0x760] ss:$8 sps:$4 sm:$0xff]  }
 0x5f1   : > { %22908 = vst [vmem:[#allocation57_spill] sm:$0xff] %v20650_v36  ;;  %v20652_v40 = vpop.f32.mrb[98].mxu1  ;;  %v1087_v36 = vld [vmem:[%s22772_s2 + $0x1ad0] sm:$0xff]  ;;  %12633 = vmatpush1.bf16.msra.mxu0 %v17770_v56 }
 0x5f2   : > { %22909 = vst [vmem:[#allocation58_spill] sm:$0xff] %v20652_v40  ;;  %v20654_v22 = vpop.f32.mrb[99].mxu1  ;;  %v1135_v56 = vld [vmem:[%s22772_s2 + $0x1c50] sm:$0xff] }
 0x5f3   : > { %22910 = vst [vmem:[#allocation59_spill] sm:$0xff] %v20654_v22  ;;  %v14377_v22 = vcombine.high %v363_v4, %v371_v24 }
 0x5f4   : > { %9798 = vmatmul.mubr.bf16.gmra.mrb[204].mxu1 %v15056_v61  ;;  %v14360_v61 = vcombine.low %v347_v39, %v355_v16  ;;  %v387_v39 = vld [vmem:[%s22772_s2 + $0x4f0] sm:$0xff] }
 0x5f5   : > { %12040 = vmatmul.mubr.bf16.gmra.mrb[24].mxu0 %v14344_v63  ;;  %9807 = vmatprep.mubr.bf16.mxu1 %v15073_v54  ;;  %v15089_v54 = vcombine.high %v1079_v8, %v1087_v36 }
 0x5f6   : > { %12049 = vmatprep.mubr.bf16.mxu0 %v14361_v48  ;;  %v15072_v48 = vcombine.low %v1063_v23, %v1071_v28  ;;  %v1103_v23 = vld [vmem:[%s22772_s2 + $0x1b50] sm:$0xff] }
 0x5f7   : > { %v20668_v33 = vpop.f32.mrb[100].mxu1  ;;  %v379_v28 = vld [vmem:[%s22772_s2 + $0x4b0] sm:$0xff] }
 0x5f8   : > { %22911 = vst [vmem:[#allocation60_spill] sm:$0xff] %v20668_v33  ;;  %v20670_v45 = vpop.f32.mrb[101].mxu1  ;;  %v1095_v33 = vld [vmem:[%s22772_s2 + $0x1b10] sm:$0xff] }
 0x5f9   : > { %22912 = vst [vmem:[#allocation61_spill] sm:$0xff] %v20670_v45  ;;  %v20672_v63 = vpop.f32.mrb[102].mxu1 }
 0x5fa   : > { %22913 = vst [vmem:[#allocation62_spill] sm:$0xff] %v20672_v63  ;;  %v20674_v40 = vpop.f32.mrb[103].mxu1  ;;  %v14393_v63 = vcombine.high %v379_v28, %v387_v39 }
 0x5fb   : > { %22914 = vst [vmem:[#allocation63_spill] sm:$0xff] %v20674_v40  ;;  %v15105_v40 = vcombine.high %v1095_v33, %v1103_v23 }
 0x5fc   : > { %9808 = vmatmul.mubr.bf16.gmra.mrb[208].mxu1 %v15072_v48  ;;  %v15088_v48 = vcombine.low %v1079_v8, %v1087_v36  ;;  %v1119_v8 = vld [vmem:[%s22772_s2 + $0x1bd0] sm:$0xff] }
 0x5fd   : > { %12050 = vmatmul.mubr.bf16.gmra.mrb[28].mxu0 %v14360_v61  ;;  %9817 = vmatprep.mubr.bf16.mxu1 %v15089_v54  ;;  %v14376_v61 = vcombine.low %v363_v4, %v371_v24  ;;  %v395_v36 = vld [vmem:[%s22772_s2 + $0x530] sm:$0xff] }
 0x5fe   : > { %12059 = vmatprep.mubr.bf16.mxu0 %v14377_v22  ;;  %v403_v4 = vld [vmem:[%s22772_s2 + $0x570] sm:$0xff] }
 0x5ff   : > { %v20688_v16 = vpop.f32.mrb[104].mxu1 }
 0x600   : > { %22915 = vst [vmem:[#allocation64_spill] sm:$0xff] %v20688_v16  ;;  %v20690_v22 = vpop.f32.mrb[105].mxu1  ;;  %v1111_v16 = vld [vmem:[%s22772_s2 + $0x1b90] sm:$0xff] }
 0x601   : > { %22916 = vst [vmem:[#allocation65_spill] sm:$0xff] %v20690_v22  ;;  %v20692_v54 = vpop.f32.mrb[106].mxu1 }
 0x602   : > { %22917 = vst [vmem:[#allocation66_spill] sm:$0xff] %v20692_v54  ;;  %v20694_v45 = vpop.f32.mrb[107].mxu1  ;;  %v14409_v54 = vcombine.high %v395_v36, %v403_v4 }
 0x603   : > { %22918 = vst [vmem:[#allocation67_spill] sm:$0xff] %v20694_v45  ;;  %v15121_v45 = vcombine.high %v1111_v16, %v1119_v8 }
 0x604   : > { %9818 = vmatmul.mubr.bf16.gmra.mrb[212].mxu1 %v15088_v48  ;;  %v14392_v48 = vcombine.low %v379_v28, %v387_v39  ;;  %v15120_v39 = vcombine.low %v1111_v16, %v1119_v8  ;;  %v427_v16 = vld [vmem:[%s22772_s2 + $0x630] sm:$0xff] }
 0x605   : > { %12060 = vmatmul.mubr.bf16.gmra.mrb[32].mxu0 %v14376_v61  ;;  %9827 = vmatprep.mubr.bf16.mxu1 %v15105_v40  ;;  %v435_v8 = vld [vmem:[%s22772_s2 + $0x670] sm:$0xff] }
 0x606   : > { %12069 = vmatprep.mubr.bf16.mxu0 %v14393_v63  ;;  %v15104_v63 = vcombine.low %v1095_v33, %v1103_v23  ;;  %v411_v33 = vld [vmem:[%s22772_s2 + $0x5b0] sm:$0xff] }
 0x607   : > { %v20710_v24 = vpop.f32.mrb[108].mxu1  ;;  %v419_v23 = vld [vmem:[%s22772_s2 + $0x5f0] sm:$0xff] }
 0x608   : > { %22919 = vst [vmem:[#allocation68_spill] sm:$0xff] %v20710_v24  ;;  %v20712_v40 = vpop.f32.mrb[109].mxu1  ;;  %v17775_v24 = vld [vmem:[%s18020_s13 + $0x774] ss:$8 sps:$4 sm:$0xff]  }
 0x609   : > { %22920 = vst [vmem:[#allocation69_spill] sm:$0xff] %v20712_v40  ;;  %v20714_v61 = vpop.f32.mrb[110].mxu1  ;;  %v1143_v40 = vld [vmem:[%s22772_s2 + $0x1c90] sm:$0xff]  ;;  %12634 = vmatprep.subr.bf16.mxu0 %v17775_v24 }
 0x60a   : > { %22921 = vst [vmem:[#allocation70_spill] sm:$0xff] %v20714_v61  ;;  %v20716_v22 = vpop.f32.mrb[111].mxu1  ;;  %v1191_v24 = vld [vmem:[%s22772_s2 + $0x1e10] sm:$0xff] }
 0x60b   : > { %22922 = vst [vmem:[#allocation71_spill] sm:$0xff] %v20716_v22  ;;  %v14425_v22 = vcombine.high %v411_v33, %v419_v23 }
 0x60c   : > { %9828 = vmatmul.mubr.bf16.gmra.mrb[216].mxu1 %v15104_v63 }
 0x60d   : > { %12070 = vmatmul.mubr.bf16.gmra.mrb[36].mxu0 %v14392_v48  ;;  %9837 = vmatprep.mubr.bf16.mxu1 %v15121_v45  ;;  %v15137_v48 = vcombine.high %v1127_v6, %v1135_v56 }
 0x60e   : > { %12079 = vmatprep.mubr.bf16.mxu0 %v14409_v54  ;;  %v14408_v54 = vcombine.low %v395_v36, %v403_v4 }
 0x60f   : > { %v20730_v28 = vpop.f32.mrb[112].mxu1 }
 0x610   : > { %22923 = vst [vmem:[#allocation72_spill] sm:$0xff] %v20730_v28  ;;  %v20732_v45 = vpop.f32.mrb[113].mxu1  ;;  %v17773_v28 = vld [vmem:[%s18020_s13 + $0x770] ss:$8 sps:$4 sm:$0xff]  }
 0x611   : > { %22924 = vst [vmem:[#allocation73_spill] sm:$0xff] %v20732_v45  ;;  %v20734_v63 = vpop.f32.mrb[114].mxu1  ;;  %v1151_v45 = vld [vmem:[%s22772_s2 + $0x1cd0] sm:$0xff]  ;;  %12635 = vmatpush1.bf16.msra.mxu0 %v17773_v28 }
 0x612   : > { %22925 = vst [vmem:[#allocation74_spill] sm:$0xff] %v20734_v63  ;;  %v20736_v61 = vpop.f32.mrb[115].mxu1  ;;  %v1199_v28 = vld [vmem:[%s22772_s2 + $0x1e50] sm:$0xff] }
 0x613   : > { %22926 = vst [vmem:[#allocation75_spill] sm:$0xff] %v20736_v61  ;;  %v14441_v61 = vcombine.high %v427_v16, %v435_v8 }
 0x614   : > { %9838 = vmatmul.mubr.bf16.gmra.mrb[220].mxu1 %v15120_v39  ;;  %v14424_v39 = vcombine.low %v411_v33, %v419_v23  ;;  %v451_v33 = vld [vmem:[%s22772_s2 + $0x6f0] sm:$0xff] }
 0x615   : > { %12080 = vmatmul.mubr.bf16.gmra.mrb[40].mxu0 %v14408_v54  ;;  %9847 = vmatprep.mubr.bf16.mxu1 %v15137_v48  ;;  %v15153_v48 = vcombine.high %v1143_v40, %v1151_v45 }
 0x616   : > { %12089 = vmatprep.mubr.bf16.mxu0 %v14425_v22  ;;  %v15136_v22 = vcombine.low %v1127_v6, %v1135_v56  ;;  %v1167_v6 = vld [vmem:[%s22772_s2 + $0x1d50] sm:$0xff] }
 0x617   : > { %v20750_v36 = vpop.f32.mrb[116].mxu1  ;;  %v443_v56 = vld [vmem:[%s22772_s2 + $0x6b0] sm:$0xff] }
 0x618   : > { %22927 = vst [vmem:[#allocation76_spill] sm:$0xff] %v20750_v36  ;;  %v20752_v4 = vpop.f32.mrb[117].mxu1  ;;  %v1159_v36 = vld [vmem:[%s22772_s2 + $0x1d10] sm:$0xff] }
 0x619   : > { %22928 = vst [vmem:[#allocation77_spill] sm:$0xff] %v20752_v4  ;;  %v20754_v54 = vpop.f32.mrb[118].mxu1 }
 0x61a   : > { %22929 = vst [vmem:[#allocation78_spill] sm:$0xff] %v20754_v54  ;;  %v20756_v63 = vpop.f32.mrb[119].mxu1  ;;  %v14457_v54 = vcombine.high %v443_v56, %v451_v33 }
 0x61b   : > { %22930 = vst [vmem:[#allocation79_spill] sm:$0xff] %v20756_v63  ;;  %v15169_v63 = vcombine.high %v1159_v36, %v1167_v6 }
 0x61c   : > { %9848 = vmatmul.mubr.bf16.gmra.mrb[224].mxu1 %v15136_v22  ;;  %v15152_v22 = vcombine.low %v1143_v40, %v1151_v45  ;;  %v1183_v40 = vld [vmem:[%s22772_s2 + $0x1dd0] sm:$0xff] }
 0x61d   : > { %12090 = vmatmul.mubr.bf16.gmra.mrb[44].mxu0 %v14424_v39  ;;  %9857 = vmatprep.mubr.bf16.mxu1 %v15153_v48  ;;  %v14440_v39 = vcombine.low %v427_v16, %v435_v8  ;;  %v459_v45 = vld [vmem:[%s22772_s2 + $0x730] sm:$0xff] }
 0x61e   : > { %12099 = vmatprep.mubr.bf16.mxu0 %v14441_v61  ;;  %v467_v16 = vld [vmem:[%s22772_s2 + $0x770] sm:$0xff] }
 0x61f   : > { %v20770_v23 = vpop.f32.mrb[120].mxu1 }
 0x620   : > { %22931 = vst [vmem:[#allocation80_spill] sm:$0xff] %v20770_v23  ;;  %v20772_v61 = vpop.f32.mrb[121].mxu1  ;;  %v1175_v23 = vld [vmem:[%s22772_s2 + $0x1d90] sm:$0xff] }
 0x621   : > { %22932 = vst [vmem:[#allocation81_spill] sm:$0xff] %v20772_v61  ;;  %v20774_v48 = vpop.f32.mrb[122].mxu1 }
 0x622   : > { %22933 = vst [vmem:[#allocation82_spill] sm:$0xff] %v20774_v48  ;;  %v20776_v4 = vpop.f32.mrb[123].mxu1  ;;  %v14473_v48 = vcombine.high %v459_v45, %v467_v16 }
 0x623   : > { %22934 = vst [vmem:[#allocation83_spill] sm:$0xff] %v20776_v4  ;;  %v15185_v4 = vcombine.high %v1175_v23, %v1183_v40 }
 0x624   : > { %9858 = vmatmul.mubr.bf16.gmra.mrb[228].mxu1 %v15152_v22  ;;  %v14456_v22 = vcombine.low %v443_v56, %v451_v33  ;;  %v15184_v33 = vcombine.low %v1175_v23, %v1183_v40  ;;  %v491_v23 = vld [vmem:[%s22772_s2 + $0x830] sm:$0xff] }
 0x625   : > { %12100 = vmatmul.mubr.bf16.gmra.mrb[48].mxu0 %v14440_v39  ;;  %9867 = vmatprep.mubr.bf16.mxu1 %v15169_v63  ;;  %v499_v40 = vld [vmem:[%s22772_s2 + $0x870] sm:$0xff] }
 0x626   : > { %12109 = vmatprep.mubr.bf16.mxu0 %v14457_v54  ;;  %v15168_v54 = vcombine.low %v1159_v36, %v1167_v6  ;;  %v475_v36 = vld [vmem:[%s22772_s2 + $0x7b0] sm:$0xff] }
 0x627   : > { %v20792_v8 = vpop.f32.mrb[124].mxu1  ;;  %v483_v6 = vld [vmem:[%s22772_s2 + $0x7f0] sm:$0xff] }
 0x628   : > { %22935 = vst [vmem:[#allocation84_spill] sm:$0xff] %v20792_v8  ;;  %v20794_v63 = vpop.f32.mrb[125].mxu1  ;;  %v17778_v8 = vld [vmem:[%s18020_s13 + $0x784] ss:$8 sps:$4 sm:$0xff]  }
 0x629   : > { %22936 = vst [vmem:[#allocation85_spill] sm:$0xff] %v20794_v63  ;;  %v20796_v39 = vpop.f32.mrb[126].mxu1  ;;  %v1207_v63 = vld [vmem:[%s22772_s2 + $0x1e90] sm:$0xff]  ;;  %12636 = vmatprep.subr.bf16.mxu0 %v17778_v8  ;;  %v952_v8 = vld [vmem:[%s22772_s2 + $0x1698] sm:$0xff] }
 0x62a   : > { %22937 = vst [vmem:[#allocation86_spill] sm:$0xff] %v20796_v39  ;;  %v20798_v61 = vpop.f32.mrb[127].mxu1 }
 0x62b   : > { %22938 = vst [vmem:[#allocation87_spill] sm:$0xff] %v20798_v61  ;;  %v14489_v61 = vcombine.high %v475_v36, %v483_v6 }
 0x62c   : > { %9868 = vmatmul.mubr.bf16.gmra.mrb[232].mxu1 %v15168_v54 }
 0x62d   : > { %12110 = vmatmul.mubr.bf16.gmra.mrb[52].mxu0 %v14456_v22  ;;  %9877 = vmatprep.mubr.bf16.mxu1 %v15185_v4  ;;  %v15201_v22 = vcombine.high %v1191_v24, %v1199_v28 }
 0x62e   : > { %12119 = vmatprep.mubr.bf16.mxu0 %v14473_v48  ;;  %v14472_v48 = vcombine.low %v459_v45, %v467_v16 }
 0x62f   : > { %v20812_v56 = vpop.f32.mrb[128].mxu1 }
 0x630   : > { %22939 = vst [vmem:[#allocation88_spill] sm:$0xff] %v20812_v56  ;;  %v20814_v4 = vpop.f32.mrb[129].mxu1  ;;  %v17776_v56 = vld [vmem:[%s18020_s13 + $0x780] ss:$8 sps:$4 sm:$0xff]  }
 0x631   : > { %22940 = vst [vmem:[#allocation89_spill] sm:$0xff] %v20814_v4  ;;  %v20816_v54 = vpop.f32.mrb[130].mxu1  ;;  %v1215_v4 = vld [vmem:[%s22772_s2 + $0x1ed0] sm:$0xff]  ;;  %12637 = vmatpush1.bf16.msra.mxu0 %v17776_v56  ;;  %v960_v56 = vld [vmem:[%s22772_s2 + $0x16d8] sm:$0xff] }
 0x632   : > { %22941 = vst [vmem:[#allocation90_spill] sm:$0xff] %v20816_v54  ;;  %v20818_v39 = vpop.f32.mrb[131].mxu1 }
 0x633   : > { %22942 = vst [vmem:[#allocation91_spill] sm:$0xff] %v20818_v39  ;;  %v14505_v39 = vcombine.high %v491_v23, %v499_v40 }
 0x634   : > { %9878 = vmatmul.mubr.bf16.gmra.mrb[236].mxu1 %v15184_v33  ;;  %v14488_v33 = vcombine.low %v475_v36, %v483_v6  ;;  %v515_v36 = vld [vmem:[%s22772_s2 + $0x8f0] sm:$0xff] }
 0x635   : > { %12120 = vmatmul.mubr.bf16.gmra.mrb[56].mxu0 %v14472_v48  ;;  %9887 = vmatprep.mubr.bf16.mxu1 %v15201_v22  ;;  %v15217_v22 = vcombine.high %v1207_v63, %v1215_v4 }
 0x636   : > { %12129 = vmatprep.mubr.bf16.mxu0 %v14489_v61  ;;  %v15200_v61 = vcombine.low %v1191_v24, %v1199_v28  ;;  %v1231_v24 = vld [vmem:[%s22772_s2 + $0x1f50] sm:$0xff] }
 0x637   : > { %v20832_v45 = vpop.f32.mrb[132].mxu1  ;;  %v507_v28 = vld [vmem:[%s22772_s2 + $0x8b0] sm:$0xff] }
 0x638   : > { %22943 = vst [vmem:[#allocation92_spill] sm:$0xff] %v20832_v45  ;;  %v20834_v16 = vpop.f32.mrb[133].mxu1  ;;  %v1223_v45 = vld [vmem:[%s22772_s2 + $0x1f10] sm:$0xff] }
 0x639   : > { %22944 = vst [vmem:[#allocation93_spill] sm:$0xff] %v20834_v16  ;;  %v20836_v48 = vpop.f32.mrb[134].mxu1 }
 0x63a   : > { %22945 = vst [vmem:[#allocation94_spill] sm:$0xff] %v20836_v48  ;;  %v20838_v54 = vpop.f32.mrb[135].mxu1  ;;  %v14521_v48 = vcombine.high %v507_v28, %v515_v36 }
 0x63b   : > { %22946 = vst [vmem:[#allocation95_spill] sm:$0xff] %v20838_v54  ;;  %v15233_v54 = vcombine.high %v1223_v45, %v1231_v24 }
 0x63c   : > { %9888 = vmatmul.mubr.bf16.gmra.mrb[240].mxu1 %v15200_v61  ;;  %v15216_v61 = vcombine.low %v1207_v63, %v1215_v4  ;;  %v1247_v63 = vld [vmem:[%s22772_s2 + $0x1fd0] sm:$0xff] }
 0x63d   : > { %12130 = vmatmul.mubr.bf16.gmra.mrb[60].mxu0 %v14488_v33  ;;  %9897 = vmatprep.mubr.bf16.mxu1 %v15217_v22  ;;  %v14504_v33 = vcombine.low %v491_v23, %v499_v40  ;;  %v523_v4 = vld [vmem:[%s22772_s2 + $0x930] sm:$0xff] }
 0x63e   : > { %12139 = vmatprep.mubr.bf16.mxu0 %v14505_v39  ;;  %v531_v23 = vld [vmem:[%s22772_s2 + $0x970] sm:$0xff] }
 0x63f   : > { %v20852_v6 = vpop.f32.mrb[136].mxu1 }
 0x640   : > { %22947 = vst [vmem:[#allocation96_spill] sm:$0xff] %v20852_v6  ;;  %v20854_v39 = vpop.f32.mrb[137].mxu1  ;;  %v1239_v6 = vld [vmem:[%s22772_s2 + $0x1f90] sm:$0xff] }
 0x641   : > { %22948 = vst [vmem:[#allocation97_spill] sm:$0xff] %v20854_v39  ;;  %v20856_v22 = vpop.f32.mrb[138].mxu1 }
 0x642   : > { %22949 = vst [vmem:[#allocation98_spill] sm:$0xff] %v20856_v22  ;;  %v20858_v16 = vpop.f32.mrb[139].mxu1  ;;  %v14537_v22 = vcombine.high %v523_v4, %v531_v23 }
 0x643   : > { %22950 = vst [vmem:[#allocation99_spill] sm:$0xff] %v20858_v16  ;;  %v15249_v16 = vcombine.high %v1239_v6, %v1247_v63 }
 0x644   : > { %9898 = vmatmul.mubr.bf16.gmra.mrb[244].mxu1 %v15216_v61  ;;  %v14520_v61 = vcombine.low %v507_v28, %v515_v36  ;;  %v15248_v36 = vcombine.low %v1239_v6, %v1247_v63  ;;  %v555_v6 = vld [vmem:[%s22772_s2 + $0xa30] sm:$0xff] }
 0x645   : > { %12140 = vmatmul.mubr.bf16.gmra.mrb[64].mxu0 %v14504_v33  ;;  %9907 = vmatprep.mubr.bf16.mxu1 %v15233_v54  ;;  %v563_v63 = vld [vmem:[%s22772_s2 + $0xa70] sm:$0xff] }
 0x646   : > { %12149 = vmatprep.mubr.bf16.mxu0 %v14521_v48  ;;  %v15232_v48 = vcombine.low %v1223_v45, %v1231_v24  ;;  %v539_v45 = vld [vmem:[%s22772_s2 + $0x9b0] sm:$0xff] }
 0x647   : > { %v20874_v40 = vpop.f32.mrb[140].mxu1  ;;  %v547_v24 = vld [vmem:[%s22772_s2 + $0x9f0] sm:$0xff] }
 0x648   : > { %22951 = vst [vmem:[#allocation100_spill] sm:$0xff] %v20874_v40  ;;  %v20876_v54 = vpop.f32.mrb[141].mxu1  ;;  %v17781_v40 = vld [vmem:[%s18020_s13 + $0x794] ss:$8 sps:$4 sm:$0xff]  }
 0x649   : > { %22952 = vst [vmem:[#allocation101_spill] sm:$0xff] %v20876_v54  ;;  %v20878_v33 = vpop.f32.mrb[142].mxu1  ;;  %v968_v54 = vld [vmem:[%s22772_s2 + $0x1718] sm:$0xff]  ;;  %12638 = vmatprep.subr.bf16.mxu0 %v17781_v40 }
 0x64a   : > { %22953 = vst [vmem:[#allocation102_spill] sm:$0xff] %v20878_v33  ;;  %v20880_v39 = vpop.f32.mrb[143].mxu1  ;;  %v1016_v40 = vld [vmem:[%s22772_s2 + $0x1898] sm:$0xff] }
 0x64b   : > { %22954 = vst [vmem:[#allocation103_spill] sm:$0xff] %v20880_v39  ;;  %v14553_v39 = vcombine.high %v539_v45, %v547_v24 }
 0x64c   : > { %9908 = vmatmul.mubr.bf16.gmra.mrb[248].mxu1 %v15232_v48 }
 0x64d   : > { %12150 = vmatmul.mubr.bf16.gmra.mrb[68].mxu0 %v14520_v61  ;;  %9917 = vmatprep.mubr.bf16.mxu1 %v15249_v16  ;;  %v14963_v61 = vcombine.high %v952_v8, %v960_v56 }
 0x64e   : > { %12159 = vmatprep.mubr.bf16.mxu0 %v14537_v22  ;;  %v14536_v22 = vcombine.low %v523_v4, %v531_v23 }
 0x64f   : > { %v20894_v28 = vpop.f32.mrb[144].mxu1 }
 0x650   : > { %22955 = vst [vmem:[#allocation104_spill] sm:$0xff] %v20894_v28  ;;  %v20896_v16 = vpop.f32.mrb[145].mxu1  ;;  %v17779_v28 = vld [vmem:[%s18020_s13 + $0x790] ss:$8 sps:$4 sm:$0xff]  }
 0x651   : > { %22956 = vst [vmem:[#allocation105_spill] sm:$0xff] %v20896_v16  ;;  %v20898_v48 = vpop.f32.mrb[146].mxu1  ;;  %v976_v16 = vld [vmem:[%s22772_s2 + $0x1758] sm:$0xff]  ;;  %12639 = vmatpush1.bf16.msra.mxu0 %v17779_v28 }
 0x652   : > { %22957 = vst [vmem:[#allocation106_spill] sm:$0xff] %v20898_v48  ;;  %v20900_v33 = vpop.f32.mrb[147].mxu1  ;;  %v1024_v28 = vld [vmem:[%s22772_s2 + $0x18d8] sm:$0xff] }
 0x653   : > { %22958 = vst [vmem:[#allocation107_spill] sm:$0xff] %v20900_v33  ;;  %v14569_v33 = vcombine.high %v555_v6, %v563_v63 }
 0x654   : > { %9918 = vmatmul.mubr.bf16.gmra.mrb[252].mxu1 %v15248_v36  ;;  %v14552_v36 = vcombine.low %v539_v45, %v547_v24  ;;  %v579_v45 = vld [vmem:[%s22772_s2 + $0xaf0] sm:$0xff] }
 0x655   : > { %12160 = vmatmul.mubr.bf16.gmra.mrb[72].mxu0 %v14536_v22  ;;  %10410 = vmatprep.mubr.bf16.mxu1 %v14963_v61  ;;  %v14979_v61 = vcombine.high %v968_v54, %v976_v16 }
 0x656   : > { %12169 = vmatprep.mubr.bf16.mxu0 %v14553_v39  ;;  %v14962_v39 = vcombine.low %v952_v8, %v960_v56  ;;  %v992_v8 = vld [vmem:[%s22772_s2 + $0x17d8] sm:$0xff]  ;;  %v571_v56 = vld [vmem:[%s22772_s2 + $0xab0] sm:$0xff] }
 0x657   : > { %v20914_v4 = vpop.f32.mrb[148].mxu1 }
 0x658   : > { %22959 = vst [vmem:[#allocation108_spill] sm:$0xff] %v20914_v4  ;;  %v20916_v23 = vpop.f32.mrb[149].mxu1  ;;  %v984_v4 = vld [vmem:[%s22772_s2 + $0x1798] sm:$0xff] }
 0x659   : > { %22960 = vst [vmem:[#allocation109_spill] sm:$0xff] %v20916_v23  ;;  %v20918_v22 = vpop.f32.mrb[150].mxu1 }
 0x65a   : > { %22961 = vst [vmem:[#allocation110_spill] sm:$0xff] %v20918_v22  ;;  %v20920_v48 = vpop.f32.mrb[151].mxu1  ;;  %v14585_v22 = vcombine.high %v571_v56, %v579_v45 }
 0x65b   : > { %22962 = vst [vmem:[#allocation111_spill] sm:$0xff] %v20920_v48  ;;  %v14995_v48 = vcombine.high %v984_v4, %v992_v8 }
 0x65c   : > { %10411 = vmatmul.mubr.bf16.vlgmr.msra.gmra.mrb[180].mxu1 %v14962_v39  ;;  %v14978_v39 = vcombine.low %v968_v54, %v976_v16  ;;  %v1008_v54 = vld [vmem:[%s22772_s2 + $0x1858] sm:$0xff]  ;;  %v587_v16 = vld [vmem:[%s22772_s2 + $0xb30] sm:$0xff] }
 0x65d   : > { %12170 = vmatmul.mubr.bf16.gmra.mrb[76].mxu0 %v14552_v36  ;;  %10420 = vmatprep.mubr.bf16.mxu1 %v14979_v61  ;;  %v14568_v36 = vcombine.low %v555_v6, %v563_v63  ;;  %v595_v6 = vld [vmem:[%s22772_s2 + $0xb70] sm:$0xff] }
 0x65e   : > { %12179 = vmatprep.mubr.bf16.mxu0 %v14569_v33 }
 0x65f   : > { %v20934_v24 = vpop.f32.mrb[152].mxu1 }
 0x660   : > { %22963 = vst [vmem:[#allocation112_spill] sm:$0xff] %v20934_v24  ;;  %v20936_v33 = vpop.f32.mrb[153].mxu1  ;;  %v1000_v24 = vld [vmem:[%s22772_s2 + $0x1818] sm:$0xff] }
 0x661   : > { %22964 = vst [vmem:[#allocation113_spill] sm:$0xff] %v20936_v33  ;;  %v20938_v61 = vpop.f32.mrb[154].mxu1 }
 0x662   : > { %22965 = vst [vmem:[#allocation114_spill] sm:$0xff] %v20938_v61  ;;  %v20940_v23 = vpop.f32.mrb[155].mxu1  ;;  %v14601_v61 = vcombine.high %v587_v16, %v595_v6 }
 0x663   : > { %22966 = vst [vmem:[#allocation115_spill] sm:$0xff] %v20940_v23  ;;  %v15011_v23 = vcombine.high %v1000_v24, %v1008_v54 }
 0x664   : > { %10421 = vmatmul.mubr.bf16.gmra.mrb[184].mxu1 %v14978_v39  ;;  %v14584_v39 = vcombine.low %v571_v56, %v579_v45  ;;  %v15010_v45 = vcombine.low %v1000_v24, %v1008_v54  ;;  %v619_v24 = vld [vmem:[%s22772_s2 + $0xc30] sm:$0xff] }
 0x665   : > { %12180 = vmatmul.mubr.bf16.gmra.mrb[80].mxu0 %v14568_v36  ;;  %10430 = vmatprep.mubr.bf16.mxu1 %v14995_v48  ;;  %v627_v54 = vld [vmem:[%s22772_s2 + $0xc70] sm:$0xff] }
 0x666   : > { %12189 = vmatprep.mubr.bf16.mxu0 %v14585_v22  ;;  %v14994_v22 = vcombine.low %v984_v4, %v992_v8  ;;  %v603_v4 = vld [vmem:[%s22772_s2 + $0xbb0] sm:$0xff] }
 0x667   : > { %v20956_v63 = vpop.f32.mrb[156].mxu1  ;;  %v611_v8 = vld [vmem:[%s22772_s2 + $0xbf0] sm:$0xff] }
 0x668   : > { %22967 = vst [vmem:[#allocation116_spill] sm:$0xff] %v20956_v63  ;;  %v20958_v48 = vpop.f32.mrb[157].mxu1  ;;  %v17784_v63 = vld [vmem:[%s18020_s13 + $0x7a4] ss:$8 sps:$4 sm:$0xff]  }
 0x669   : > { %22968 = vst [vmem:[#allocation117_spill] sm:$0xff] %v20958_v48  ;;  %v20960_v36 = vpop.f32.mrb[158].mxu1  ;;  %v1032_v48 = vld [vmem:[%s22772_s2 + $0x1918] sm:$0xff]  ;;  %12640 = vmatprep.subr.bf16.mxu0 %v17784_v63 }
 0x66a   : > { %22969 = vst [vmem:[#allocation118_spill] sm:$0xff] %v20960_v36  ;;  %v20962_v33 = vpop.f32.mrb[159].mxu1  ;;  %v1080_v63 = vld [vmem:[%s22772_s2 + $0x1a98] sm:$0xff] }
 0x66b   : > { %22970 = vst [vmem:[#allocation119_spill] sm:$0xff] %v20962_v33  ;;  %v14617_v33 = vcombine.high %v603_v4, %v611_v8 }
 0x66c   : > { %10431 = vmatmul.mubr.bf16.gmra.mrb[188].mxu1 %v14994_v22 }
 0x66d   : > { %12190 = vmatmul.mubr.bf16.gmra.mrb[84].mxu0 %v14584_v39  ;;  %10440 = vmatprep.mubr.bf16.mxu1 %v15011_v23  ;;  %v15027_v39 = vcombine.high %v1016_v40, %v1024_v28 }
 0x66e   : > { %12199 = vmatprep.mubr.bf16.mxu0 %v14601_v61  ;;  %v14600_v61 = vcombine.low %v587_v16, %v595_v6 }
 0x66f   : > { %v20976_v56 = vpop.f32.mrb[160].mxu1 }
 0x670   : > { %22971 = vst [vmem:[#allocation120_spill] sm:$0xff] %v20976_v56  ;;  %v20978_v23 = vpop.f32.mrb[161].mxu1  ;;  %v17782_v56 = vld [vmem:[%s18020_s13 + $0x7a0] ss:$8 sps:$4 sm:$0xff]  }
 0x671   : > { %22972 = vst [vmem:[#allocation121_spill] sm:$0xff] %v20978_v23  ;;  %v20980_v22 = vpop.f32.mrb[162].mxu1  ;;  %v1040_v23 = vld [vmem:[%s22772_s2 + $0x1958] sm:$0xff]  ;;  %12641 = vmatpush1.bf16.msra.mxu0 %v17782_v56 }
 0x672   : > { %22973 = vst [vmem:[#allocation122_spill] sm:$0xff] %v20980_v22  ;;  %v20982_v36 = vpop.f32.mrb[163].mxu1  ;;  %v1088_v56 = vld [vmem:[%s22772_s2 + $0x1ad8] sm:$0xff] }
 0x673   : > { %22974 = vst [vmem:[#allocation123_spill] sm:$0xff] %v20982_v36  ;;  %v14633_v36 = vcombine.high %v619_v24, %v627_v54 }
 0x674   : > { %10441 = vmatmul.mubr.bf16.gmra.mrb[192].mxu1 %v15010_v45  ;;  %v14616_v45 = vcombine.low %v603_v4, %v611_v8  ;;  %v643_v4 = vld [vmem:[%s22772_s2 + $0xcf0] sm:$0xff] }
 0x675   : > { %12200 = vmatmul.mubr.bf16.gmra.mrb[88].mxu0 %v14600_v61  ;;  %10450 = vmatprep.mubr.bf16.mxu1 %v15027_v39  ;;  %v15043_v39 = vcombine.high %v1032_v48, %v1040_v23 }
 0x676   : > { %12209 = vmatprep.mubr.bf16.mxu0 %v14617_v33  ;;  %v15026_v33 = vcombine.low %v1016_v40, %v1024_v28  ;;  %v1056_v40 = vld [vmem:[%s22772_s2 + $0x19d8] sm:$0xff]  ;;  %v635_v28 = vld [vmem:[%s22772_s2 + $0xcb0] sm:$0xff] }
 0x677   : > { %v20996_v16 = vpop.f32.mrb[164].mxu1 }
 0x678   : > { %22975 = vst [vmem:[#allocation124_spill] sm:$0xff] %v20996_v16  ;;  %v20998_v6 = vpop.f32.mrb[165].mxu1  ;;  %v1048_v16 = vld [vmem:[%s22772_s2 + $0x1998] sm:$0xff] }
 0x679   : > { %22976 = vst [vmem:[#allocation125_spill] sm:$0xff] %v20998_v6  ;;  %v21000_v61 = vpop.f32.mrb[166].mxu1 }
 0x67a   : > { %22977 = vst [vmem:[#allocation126_spill] sm:$0xff] %v21000_v61  ;;  %v21002_v22 = vpop.f32.mrb[167].mxu1  ;;  %v14649_v61 = vcombine.high %v635_v28, %v643_v4 }
 0x67b   : > { %22978 = vst [vmem:[#allocation127_spill] sm:$0xff] %v21002_v22  ;;  %v15059_v22 = vcombine.high %v1048_v16, %v1056_v40 }
 0x67c   : > { %10451 = vmatmul.mubr.bf16.gmra.mrb[196].mxu1 %v15026_v33  ;;  %v15042_v33 = vcombine.low %v1032_v48, %v1040_v23  ;;  %v1072_v48 = vld [vmem:[%s22772_s2 + $0x1a58] sm:$0xff]  ;;  %v651_v23 = vld [vmem:[%s22772_s2 + $0xd30] sm:$0xff] }
 0x67d   : > { %12210 = vmatmul.mubr.bf16.gmra.mrb[92].mxu0 %v14616_v45  ;;  %10460 = vmatprep.mubr.bf16.mxu1 %v15043_v39  ;;  %v14632_v45 = vcombine.low %v619_v24, %v627_v54  ;;  %v659_v24 = vld [vmem:[%s22772_s2 + $0xd70] sm:$0xff] }
 0x67e   : > { %12219 = vmatprep.mubr.bf16.mxu0 %v14633_v36 }
 0x67f   : > { %v21016_v8 = vpop.f32.mrb[168].mxu1 }
 0x680   : > { %22979 = vst [vmem:[#allocation128_spill] sm:$0xff] %v21016_v8  ;;  %v21018_v36 = vpop.f32.mrb[169].mxu1  ;;  %v1064_v8 = vld [vmem:[%s22772_s2 + $0x1a18] sm:$0xff] }
 0x681   : > { %22980 = vst [vmem:[#allocation129_spill] sm:$0xff] %v21018_v36  ;;  %v21020_v39 = vpop.f32.mrb[170].mxu1 }
 0x682   : > { %22981 = vst [vmem:[#allocation130_spill] sm:$0xff] %v21020_v39  ;;  %v21022_v6 = vpop.f32.mrb[171].mxu1  ;;  %v14665_v39 = vcombine.high %v651_v23, %v659_v24 }
 0x683   : > { %22982 = vst [vmem:[#allocation131_spill] sm:$0xff] %v21022_v6  ;;  %v15075_v6 = vcombine.high %v1064_v8, %v1072_v48 }
 0x684   : > { %10461 = vmatmul.mubr.bf16.gmra.mrb[200].mxu1 %v15042_v33  ;;  %v14648_v33 = vcombine.low %v635_v28, %v643_v4  ;;  %v15074_v4 = vcombine.low %v1064_v8, %v1072_v48  ;;  %v683_v8 = vld [vmem:[%s22772_s2 + $0xe30] sm:$0xff] }
 0x685   : > { %12220 = vmatmul.mubr.bf16.gmra.mrb[96].mxu0 %v14632_v45  ;;  %10470 = vmatprep.mubr.bf16.mxu1 %v15059_v22  ;;  %v691_v48 = vld [vmem:[%s22772_s2 + $0xe70] sm:$0xff] }
 0x686   : > { %12229 = vmatprep.mubr.bf16.mxu0 %v14649_v61  ;;  %v15058_v61 = vcombine.low %v1048_v16, %v1056_v40  ;;  %v667_v16 = vld [vmem:[%s22772_s2 + $0xdb0] sm:$0xff] }
 0x687   : > { %v21038_v54 = vpop.f32.mrb[172].mxu1  ;;  %v675_v40 = vld [vmem:[%s22772_s2 + $0xdf0] sm:$0xff] }
 0x688   : > { %v21040_v22 = vpop.f32.mrb[173].mxu1 }
 0x689   : > { %22983 = vst [vmem:[#allocation132_spill] sm:$0xff] %v21040_v22  ;;  %v21042_v45 = vpop.f32.mrb[174].mxu1  ;;  %v1096_v22 = vld [vmem:[%s22772_s2 + $0x1b18] sm:$0xff] }
 0x68a   : > { %22984 = vst [vmem:[#allocation133_spill] sm:$0xff] %v21042_v45  ;;  %v21044_v36 = vpop.f32.mrb[175].mxu1 }
 0x68b   : > { %22985 = vst [vmem:[#allocation134_spill] sm:$0xff] %v21044_v36  ;;  %v14681_v36 = vcombine.high %v667_v16, %v675_v40 }
 0x68c   : > { %10471 = vmatmul.mubr.bf16.gmra.mrb[204].mxu1 %v15058_v61 }
 0x68d   : > { %12230 = vmatmul.mubr.bf16.gmra.mrb[100].mxu0 %v14648_v33  ;;  %10480 = vmatprep.mubr.bf16.mxu1 %v15075_v6  ;;  %v15091_v33 = vcombine.high %v1080_v63, %v1088_v56 }
 0x68e   : > { %12239 = vmatprep.mubr.bf16.mxu0 %v14665_v39  ;;  %v14664_v39 = vcombine.low %v651_v23, %v659_v24  ;;  %v15090_v23 = vcombine.low %v1080_v63, %v1088_v56  ;;  %v14680_v24 = vcombine.low %v667_v16, %v675_v40  ;;  %v699_v63 = vld [vmem:[%s22772_s2 + $0xeb0] sm:$0xff]  ;;  %v14696_v40 = vcombine.low %v683_v8, %v691_v48 }
 0x68f   : > { %v21058_v28 = vpop.f32.mrb[176].mxu1  ;;  %v707_v56 = vld [vmem:[%s22772_s2 + $0xef0] sm:$0xff] }
 0x690   : > { %v21060_v6 = vpop.f32.mrb[177].mxu1 }
 0x691   : > { %22986 = vst [vmem:[#allocation135_spill] sm:$0xff] %v21060_v6  ;;  %v21062_v61 = vpop.f32.mrb[178].mxu1  ;;  %v1104_v6 = vld [vmem:[%s22772_s2 + $0x1b58] sm:$0xff] }
 0x692   : > { %22987 = vst [vmem:[#allocation136_spill] sm:$0xff] %v21062_v61  ;;  %v21064_v45 = vpop.f32.mrb[179].mxu1  ;;  %v15106_v16 = vcombine.low %v1096_v22, %v1104_v6  ;;  %v1136_v61 = vld [vmem:[%s22772_s2 + $0x1c58] sm:$0xff] }
 0x693   : > { %22988 = vst [vmem:[#allocation137_spill] sm:$0xff] %v21064_v45  ;;  %v1128_v45 = vld [vmem:[%s22772_s2 + $0x1c18] sm:$0xff] }
 0x694   : > { %10481 = vmatmul.mubr.bf16.gmra.mrb[208].mxu1 %v15074_v4  ;;  %v15107_v4 = vcombine.high %v1096_v22, %v1104_v6  ;;  %v715_v22 = vld [vmem:[%s22772_s2 + $0xf30] sm:$0xff] }
 0x695   : > { %12240 = vmatmul.mubr.bf16.gmra.mrb[104].mxu0 %v14664_v39  ;;  %10490 = vmatprep.mubr.bf16.mxu1 %v15091_v33  ;;  %v1112_v39 = vld [vmem:[%s22772_s2 + $0x1b98] sm:$0xff]  ;;  %v723_v6 = vld [vmem:[%s22772_s2 + $0xf70] sm:$0xff] }
 0x696   : > { %12249 = vmatprep.mubr.bf16.mxu0 %v14681_v36  ;;  %v14697_v36 = vcombine.high %v683_v8, %v691_v48  ;;  %v1120_v33 = vld [vmem:[%s22772_s2 + $0x1bd8] sm:$0xff]  ;;  %v14712_v48 = vcombine.low %v699_v63, %v707_v56 }
 0x697   : > { %v15122_v8 = vcombine.low %v1112_v39, %v1120_v33 }
 0x69c   : > { %10491 = vmatmul.mubr.bf16.gmra.mrb[212].mxu1 %v15090_v23  ;;  %v15123_v23 = vcombine.high %v1112_v39, %v1120_v33  ;;  %v739_v39 = vld [vmem:[%s22772_s2 + $0xff0] sm:$0xff]  ;;  %v15138_v33 = vcombine.low %v1128_v45, %v1136_v61 }
 0x69d   : > { %12250 = vmatmul.mubr.bf16.gmra.mrb[108].mxu0 %v14680_v24  ;;  %10500 = vmatprep.mubr.bf16.mxu1 %v15107_v4  ;;  %v14713_v24 = vcombine.high %v699_v63, %v707_v56  ;;  %v17785_v4 = vld [vmem:[%s18020_s13 + $0x7b0] ss:$8 sps:$4 sm:$0xff]   ;;  %v14728_v63 = vcombine.low %v715_v22, %v723_v6 }
 0x69e   : > { %12259 = vmatprep.mubr.bf16.mxu0 %v14697_v36  ;;  %v17787_v36 = vld [vmem:[%s18020_s13 + $0x7b4] ss:$8 sps:$4 sm:$0xff]  }
 0x69f   : > { %12642 = vmatprep.subr.bf16.mxu0 %v17787_v36 }
 0x6a0   : > { %12643 = vmatpush1.bf16.msra.mxu0 %v17785_v4  ;;  %v731_v4 = vld [vmem:[%s22772_s2 + $0xfb0] sm:$0xff] }
 0x6a1   : > { %v14745_v36 = vcombine.high %v731_v4, %v739_v39 }
 0x6a4   : > { %10501 = vmatmul.mubr.bf16.gmra.mrb[216].mxu1 %v15106_v16  ;;  %v15139_v16 = vcombine.high %v1128_v45, %v1136_v61  ;;  %v755_v45 = vld [vmem:[%s22772_s2 + $0x1070] sm:$0xff] }
 0x6a5   : > { %12260 = vmatmul.mubr.bf16.gmra.mrb[112].mxu0 %v14696_v40  ;;  %10510 = vmatprep.mubr.bf16.mxu1 %v15123_v23  ;;  %v14729_v40 = vcombine.high %v715_v22, %v723_v6  ;;  %v1144_v23 = vld [vmem:[%s22772_s2 + $0x1c98] sm:$0xff]  ;;  %v14744_v22 = vcombine.low %v731_v4, %v739_v39 }
 0x6a6   : > { %12269 = vmatprep.mubr.bf16.mxu0 %v14713_v24  ;;  %v1152_v24 = vld [vmem:[%s22772_s2 + $0x1cd8] sm:$0xff] }
 0x6a7   : > { %v15155_v56 = vcombine.high %v1144_v23, %v1152_v24  ;;  %v15154_v61 = vcombine.low %v1144_v23, %v1152_v24  ;;  %v763_v23 = vld [vmem:[%s22772_s2 + $0x10b0] sm:$0xff] }
 0x6a8   : > { %v771_v24 = vld [vmem:[%s22772_s2 + $0x10f0] sm:$0xff] }
 0x6ac   : > { %10511 = vmatmul.mubr.bf16.gmra.mrb[220].mxu1 %v15122_v8  ;;  %v1160_v8 = vld [vmem:[%s22772_s2 + $0x1d18] sm:$0xff] }
 0x6ad   : > { %12270 = vmatmul.mubr.bf16.gmra.mrb[116].mxu0 %v14712_v48  ;;  %10520 = vmatprep.mubr.bf16.mxu1 %v15139_v16  ;;  %v1168_v48 = vld [vmem:[%s22772_s2 + $0x1d58] sm:$0xff]  ;;  %v747_v16 = vld [vmem:[%s22772_s2 + $0x1030] sm:$0xff] }
 0x6ae   : > { %12279 = vmatprep.mubr.bf16.mxu0 %v14729_v40  ;;  %v15171_v6 = vcombine.high %v1160_v8, %v1168_v48  ;;  %v14761_v40 = vcombine.high %v747_v16, %v755_v45  ;;  %v15170_v4 = vcombine.low %v1160_v8, %v1168_v48  ;;  %v14760_v39 = vcombine.low %v747_v16, %v755_v45  ;;  %v779_v8 = vld [vmem:[%s22772_s2 + $0x1130] sm:$0xff] }
 0x6af   : > { %v787_v48 = vld [vmem:[%s22772_s2 + $0x1170] sm:$0xff]  ;;  %v14776_v45 = vcombine.low %v763_v23, %v771_v24 }
 0x6b4   : > { %10521 = vmatmul.mubr.bf16.gmra.mrb[224].mxu1 %v15138_v33  ;;  %v1176_v33 = vld [vmem:[%s22772_s2 + $0x1d98] sm:$0xff] }
 0x6b5   : > { %12280 = vmatmul.mubr.bf16.gmra.mrb[120].mxu0 %v14728_v63  ;;  %10530 = vmatprep.mubr.bf16.mxu1 %v15155_v56  ;;  %v1184_v63 = vld [vmem:[%s22772_s2 + $0x1dd8] sm:$0xff] }
 0x6b6   : > { %12289 = vmatprep.mubr.bf16.mxu0 %v14745_v36  ;;  %v15187_v56 = vcombine.high %v1176_v33, %v1184_v63  ;;  %v14777_v36 = vcombine.high %v763_v23, %v771_v24  ;;  %v15186_v16 = vcombine.low %v1176_v33, %v1184_v63  ;;  %v803_v33 = vld [vmem:[%s22772_s2 + $0x11f0] sm:$0xff]  ;;  %v14792_v23 = vcombine.low %v779_v8, %v787_v48 }
 0x6bc   : > { %10531 = vmatmul.mubr.bf16.gmra.mrb[228].mxu1 %v15154_v61  ;;  %v17788_v61 = vld [vmem:[%s18020_s13 + $0x7c0] ss:$8 sps:$4 sm:$0xff]  }
 0x6bd   : > { %12290 = vmatmul.mubr.bf16.gmra.mrb[124].mxu0 %v14744_v22  ;;  %10540 = vmatprep.mubr.bf16.mxu1 %v15171_v6  ;;  %v17790_v22 = vld [vmem:[%s18020_s13 + $0x7c4] ss:$8 sps:$4 sm:$0xff]   ;;  %v1192_v6 = vld [vmem:[%s22772_s2 + $0x1e18] sm:$0xff] }
 0x6be   : > { %12299 = vmatprep.mubr.bf16.mxu0 %v14761_v40  ;;  %v1200_v40 = vld [vmem:[%s22772_s2 + $0x1e58] sm:$0xff]  ;;  %12644 = vmatprep.subr.bf16.mxu0 %v17790_v22 }
 0x6bf   : > { %12645 = vmatpush1.bf16.msra.mxu0 %v17788_v61  ;;  %v795_v61 = vld [vmem:[%s22772_s2 + $0x11b0] sm:$0xff]  ;;  %v15202_v63 = vcombine.low %v1192_v6, %v1200_v40 }
 0x6c0   : > { %v14809_v22 = vcombine.high %v795_v61, %v803_v33 }
 0x6c4   : > { %10541 = vmatmul.mubr.bf16.gmra.mrb[232].mxu1 %v15170_v4  ;;  %v15203_v4 = vcombine.high %v1192_v6, %v1200_v40  ;;  %v819_v6 = vld [vmem:[%s22772_s2 + $0x1270] sm:$0xff] }
 0x6c5   : > { %12300 = vmatmul.mubr.bf16.gmra.mrb[128].mxu0 %v14760_v39  ;;  %10550 = vmatprep.mubr.bf16.mxu1 %v15187_v56  ;;  %v14793_v39 = vcombine.high %v779_v8, %v787_v48  ;;  %v1208_v56 = vld [vmem:[%s22772_s2 + $0x1e98] sm:$0xff]  ;;  %v14808_v8 = vcombine.low %v795_v61, %v803_v33 }
 0x6c6   : > { %12309 = vmatprep.mubr.bf16.mxu0 %v14777_v36  ;;  %v1216_v36 = vld [vmem:[%s22772_s2 + $0x1ed8] sm:$0xff] }
 0x6c7   : > { %v15219_v24 = vcombine.high %v1208_v56, %v1216_v36  ;;  %v15218_v40 = vcombine.low %v1208_v56, %v1216_v36  ;;  %v827_v56 = vld [vmem:[%s22772_s2 + $0x12b0] sm:$0xff] }
 0x6c8   : > { %v835_v36 = vld [vmem:[%s22772_s2 + $0x12f0] sm:$0xff] }
 0x6cc   : > { %10551 = vmatmul.mubr.bf16.gmra.mrb[236].mxu1 %v15186_v16  ;;  %v1224_v16 = vld [vmem:[%s22772_s2 + $0x1f18] sm:$0xff] }
 0x6cd   : > { %12310 = vmatmul.mubr.bf16.gmra.mrb[132].mxu0 %v14776_v45  ;;  %10560 = vmatprep.mubr.bf16.mxu1 %v15203_v4  ;;  %v1232_v45 = vld [vmem:[%s22772_s2 + $0x1f58] sm:$0xff]  ;;  %v811_v4 = vld [vmem:[%s22772_s2 + $0x1230] sm:$0xff] }
 0x6ce   : > { %12319 = vmatprep.mubr.bf16.mxu0 %v14793_v39  ;;  %v15235_v48 = vcombine.high %v1224_v16, %v1232_v45  ;;  %v14825_v39 = vcombine.high %v811_v4, %v819_v6  ;;  %v15234_v61 = vcombine.low %v1224_v16, %v1232_v45  ;;  %v14824_v33 = vcombine.low %v811_v4, %v819_v6  ;;  %v859_v6 = vld [vmem:[%s22772_s2 + $0x13b0] sm:$0xff] }
 0x6cf   : > { %v14840_v45 = vcombine.low %v827_v56, %v835_v36 }
 0x6d4   : > { %10561 = vmatmul.mubr.bf16.gmra.mrb[240].mxu1 %v15202_v63  ;;  %v1240_v63 = vld [vmem:[%s22772_s2 + $0x1f98] sm:$0xff] }
 0x6d5   : > { %12320 = vmatmul.mubr.bf16.gmra.mrb[136].mxu0 %v14792_v23  ;;  %10570 = vmatprep.mubr.bf16.mxu1 %v15219_v24  ;;  %v1248_v23 = vld [vmem:[%s22772_s2 + $0x1fd8] sm:$0xff] }
 0x6d6   : > { %12329 = vmatprep.mubr.bf16.mxu0 %v14809_v22  ;;  %v15251_v24 = vcombine.high %v1240_v63, %v1248_v23  ;;  %v14841_v22 = vcombine.high %v827_v56, %v835_v36  ;;  %v15250_v16 = vcombine.low %v1240_v63, %v1248_v23  ;;  %v875_v63 = vld [vmem:[%s22772_s2 + $0x1430] sm:$0xff] }
 0x6d7   : > { %v883_v23 = vld [vmem:[%s22772_s2 + $0x1470] sm:$0xff] }
 0x6d8   : > { %v14889_v36 = vcombine.high %v875_v63, %v883_v23 }
 0x6dc   : > { %10571 = vmatmul.mubr.bf16.gmra.mrb[244].mxu1 %v15218_v40  ;;  %v17791_v40 = vld [vmem:[%s18020_s13 + $0x7d0] ss:$8 sps:$4 sm:$0xff]  }
 0x6dd   : > { %12330 = vmatmul.mubr.bf16.gmra.mrb[140].mxu0 %v14808_v8  ;;  %10580 = vmatprep.mubr.bf16.mxu1 %v15235_v48  ;;  %v17793_v8 = vld [vmem:[%s18020_s13 + $0x7d4] ss:$8 sps:$4 sm:$0xff]  }
 0x6de   : > { %12339 = vmatprep.mubr.bf16.mxu0 %v14825_v39  ;;  %v843_v48 = vld [vmem:[%s22772_s2 + $0x1330] sm:$0xff]  ;;  %12646 = vmatprep.subr.bf16.mxu0 %v17793_v8  ;;  %v14888_v8 = vcombine.low %v875_v63, %v883_v23 }
 0x6df   : > { %v851_v39 = vld [vmem:[%s22772_s2 + $0x1370] sm:$0xff]  ;;  %12647 = vmatpush1.bf16.msra.mxu0 %v17791_v40 }
 0x6e0   : > { %v14857_v4 = vcombine.high %v843_v48, %v851_v39  ;;  %v899_v40 = vld [vmem:[%s22772_s2 + $0x14f0] sm:$0xff] }
 0x6e4   : > { %10581 = vmatmul.mubr.bf16.gmra.mrb[248].mxu1 %v15234_v61  ;;  %v867_v61 = vld [vmem:[%s22772_s2 + $0x13f0] sm:$0xff] }
 0x6e5   : > { %12340 = vmatmul.mubr.bf16.gmra.mrb[144].mxu0 %v14824_v33  ;;  %10590 = vmatprep.mubr.bf16.mxu1 %v15251_v24  ;;  %v14856_v33 = vcombine.low %v843_v48, %v851_v39  ;;  %v14873_v24 = vcombine.high %v859_v6, %v867_v61  ;;  %v14872_v56 = vcombine.low %v859_v6, %v867_v61  ;;  %v17794_v39 = vld [vmem:[%s18020_s13 + $0x7e0] ss:$8 sps:$4 sm:$0xff]  }
 0x6e6   : > { %12349 = vmatprep.mubr.bf16.mxu0 %v14841_v22  ;;  %v891_v22 = vld [vmem:[%s22772_s2 + $0x14b0] sm:$0xff] }
 0x6e7   : > { %v14905_v48 = vcombine.high %v891_v22, %v899_v40  ;;  %v14904_v6 = vcombine.low %v891_v22, %v899_v40 }
 0x6ec   : > { %10591 = vmatmul.mubr.bf16.gmra.mrb[252].mxu1 %v15250_v16  ;;  %v17796_v16 = vld [vmem:[%s18020_s13 + $0x7e4] ss:$8 sps:$4 sm:$0xff]  }
 0x6ed   : > { %12350 = vmatmul.mubr.bf16.gmra.mrb[148].mxu0 %v14840_v45  ;;  %v907_v45 = vld [vmem:[%s22772_s2 + $0x1530] sm:$0xff]  ;;  %12648 = vmatprep.subr.bf16.mxu0 %v17796_v16 }
 0x6ee   : > { %12359 = vmatprep.mubr.bf16.mxu0 %v14857_v4  ;;  %v915_v4 = vld [vmem:[%s22772_s2 + $0x1570] sm:$0xff]  ;;  %12649 = vmatpush1.bf16.msra.mxu0 %v17794_v39 }
 0x6ef   : > { %v14921_v61 = vcombine.high %v907_v45, %v915_v4  ;;  %v14920_v63 = vcombine.low %v907_v45, %v915_v4  ;;  %v17797_v45 = vld [vmem:[%s18020_s13 + $0x7f0] ss:$8 sps:$4 sm:$0xff]   ;;  %v17799_v4 = vld [vmem:[%s18020_s13 + $0x7f4] ss:$8 sps:$4 sm:$0xff]  }
 0x6f0   : > { %12650 = vmatprep.subr.bf16.mxu0 %v17799_v4 }
 0x6f2   : > { %12651 = vmatpush1.bf16.msra.mxu0 %v17797_v45 }
 0x6f5   : > { %12360 = vmatmul.mubr.bf16.gmra.mrb[152].mxu0 %v14856_v33  ;;  %v923_v33 = vld [vmem:[%s22772_s2 + $0x15b0] sm:$0xff] }
 0x6f6   : > { %12369 = vmatprep.mubr.bf16.mxu0 %v14873_v24  ;;  %v931_v24 = vld [vmem:[%s22772_s2 + $0x15f0] sm:$0xff] }
 0x6f7   : > { %v14937_v23 = vcombine.high %v923_v33, %v931_v24  ;;  %v14936_v22 = vcombine.low %v923_v33, %v931_v24 }
 0x6fd   : > { %12370 = vmatmul.mubr.bf16.gmra.mrb[156].mxu0 %v14872_v56  ;;  %v939_v56 = vld [vmem:[%s22772_s2 + $0x1630] sm:$0xff] }
 0x6fe   : > { %12379 = vmatprep.mubr.bf16.mxu0 %v14889_v36  ;;  %v947_v36 = vld [vmem:[%s22772_s2 + $0x1670] sm:$0xff] }
 0x6ff   : > { %v14953_v40 = vcombine.high %v939_v56, %v947_v36  ;;  %v14952_v39 = vcombine.low %v939_v56, %v947_v36 }
 0x705   : > { %12380 = vmatmul.mubr.bf16.gmra.mrb[160].mxu0 %v14888_v8  ;;  %v955_v8 = vld [vmem:[%s22772_s2 + $0x16b0] sm:$0xff] }
 0x706   : > { %12389 = vmatprep.mubr.bf16.mxu0 %v14905_v48  ;;  %v963_v48 = vld [vmem:[%s22772_s2 + $0x16f0] sm:$0xff] }
 0x707   : > { %v14969_v16 = vcombine.high %v955_v8, %v963_v48  ;;  %v14968_v33 = vcombine.low %v955_v8, %v963_v48  ;;  %v1003_v48 = vld [vmem:[%s22772_s2 + $0x1830] sm:$0xff] }
 0x70d   : > { %12390 = vmatmul.mubr.bf16.gmra.mrb[164].mxu0 %v14904_v6  ;;  %v971_v6 = vld [vmem:[%s22772_s2 + $0x1730] sm:$0xff] }
 0x70e   : > { %12399 = vmatprep.mubr.bf16.mxu0 %v14921_v61  ;;  %v979_v61 = vld [vmem:[%s22772_s2 + $0x1770] sm:$0xff] }
 0x70f   : > { %v14985_v24 = vcombine.high %v971_v6, %v979_v61 }
 0x715   : > { %12400 = vmatmul.mubr.bf16.gmra.mrb[168].mxu0 %v14920_v63  ;;  %v987_v63 = vld [vmem:[%s22772_s2 + $0x17b0] sm:$0xff] }
 0x716   : > { %12409 = vmatprep.mubr.bf16.mxu0 %v14937_v23  ;;  %v995_v23 = vld [vmem:[%s22772_s2 + $0x17f0] sm:$0xff] }
 0x71d   : > { %12410 = vmatmul.mubr.bf16.gmra.mrb[172].mxu0 %v14936_v22  ;;  %v14984_v22 = vcombine.low %v971_v6, %v979_v61  ;;  %v15000_v6 = vcombine.low %v987_v63, %v995_v23 }
 0x71e   : > { %12419 = vmatprep.mubr.bf16.mxu0 %v14953_v40 }
 0x725   : > { %12420 = vmatmul.mubr.bf16.gmra.mrb[176].mxu0 %v14952_v39  ;;  %v15001_v39 = vcombine.high %v987_v63, %v995_v23 }
 0x726   : > { %12429 = vmatprep.mubr.bf16.mxu0 %v14969_v16  ;;  %v1011_v16 = vld [vmem:[%s22772_s2 + $0x1870] sm:$0xff] }
 0x727   : > { %v15016_v63 = vcombine.low %v1003_v48, %v1011_v16 }
 0x72d   : > { %12430 = vmatmul.mubr.bf16.gmra.mrb[180].mxu0 %v14968_v33  ;;  %v15017_v33 = vcombine.high %v1003_v48, %v1011_v16 }
 0x72e   : > { %12439 = vmatprep.mubr.bf16.mxu0 %v14985_v24 }
 0x72f   : > { %v21256_v56 = vpop.f32.mrb[180].mxu1 }
 0x730   : > { %v21258_v36 = vpop.f32.mrb[181].mxu1 }
 0x731   : > { %v21260_v40 = vpop.f32.mrb[182].mxu1 }
 0x732   : > { %22989 = vst [vmem:[#allocation138_spill] sm:$0xff] %v21260_v40  ;;  %v21262_v8 = vpop.f32.mrb[183].mxu1 }
 0x733   : > { %22990 = vst [vmem:[#allocation139_spill] sm:$0xff] %v21262_v8 }
 0x735   : > { %12440 = vmatmul.mubr.bf16.gmra.mrb[184].mxu0 %v14984_v22  ;;  %v1019_v22 = vld [vmem:[%s22772_s2 + $0x18b0] sm:$0xff] }
 0x736   : > { %12449 = vmatprep.mubr.bf16.mxu0 %v15001_v39  ;;  %v1027_v39 = vld [vmem:[%s22772_s2 + $0x18f0] sm:$0xff] }
 0x737   : > { %v21270_v45 = vpop.f32.mrb[184].mxu1  ;;  %v15032_v48 = vcombine.low %v1019_v22, %v1027_v39 }
 0x738   : > { %22991 = vst [vmem:[#allocation140_spill] sm:$0xff] %v21270_v45  ;;  %v21272_v4 = vpop.f32.mrb[185].mxu1 }
 0x739   : > { %22992 = vst [vmem:[#allocation141_spill] sm:$0xff] %v21272_v4  ;;  %v21274_v61 = vpop.f32.mrb[186].mxu1 }
 0x73a   : > { %22993 = vst [vmem:[#allocation142_spill] sm:$0xff] %v21274_v61  ;;  %v21276_v24 = vpop.f32.mrb[187].mxu1  ;;  %v15033_v61 = vcombine.high %v1019_v22, %v1027_v39 }
 0x73b   : > { %22994 = vst [vmem:[#allocation143_spill] sm:$0xff] %v21276_v24 }
 0x73d   : > { %12450 = vmatmul.mubr.bf16.gmra.mrb[188].mxu0 %v15000_v6  ;;  %v1035_v6 = vld [vmem:[%s22772_s2 + $0x1930] sm:$0xff] }
 0x73e   : > { %12459 = vmatprep.mubr.bf16.mxu0 %v15017_v33  ;;  %v1043_v33 = vld [vmem:[%s22772_s2 + $0x1970] sm:$0xff] }
 0x73f   : > { %v21284_v8 = vpop.f32.mrb[188].mxu1  ;;  %v15048_v22 = vcombine.low %v1035_v6, %v1043_v33 }
 0x740   : > { %22995 = vst [vmem:[#allocation144_spill] sm:$0xff] %v21284_v8  ;;  %v21286_v45 = vpop.f32.mrb[189].mxu1 }
 0x741   : > { %22996 = vst [vmem:[#allocation145_spill] sm:$0xff] %v21286_v45  ;;  %v21288_v23 = vpop.f32.mrb[190].mxu1 }
 0x742   : > { %22997 = vst [vmem:[#allocation146_spill] sm:$0xff] %v21288_v23  ;;  %v21290_v4 = vpop.f32.mrb[191].mxu1  ;;  %v15049_v23 = vcombine.high %v1035_v6, %v1043_v33 }
 0x743   : > { %22998 = vst [vmem:[#allocation147_spill] sm:$0xff] %v21290_v4 }
 0x745   : > { %12460 = vmatmul.mubr.bf16.gmra.mrb[192].mxu0 %v15016_v63  ;;  %v1059_v63 = vld [vmem:[%s22772_s2 + $0x19f0] sm:$0xff] }
 0x746   : > { %12469 = vmatprep.mubr.bf16.mxu0 %v15033_v61  ;;  %v1051_v61 = vld [vmem:[%s22772_s2 + $0x19b0] sm:$0xff] }
 0x747   : > { %v21298_v24 = vpop.f32.mrb[192].mxu1  ;;  %v15064_v6 = vcombine.low %v1051_v61, %v1059_v63 }
 0x748   : > { %22999 = vst [vmem:[#allocation148_spill] sm:$0xff] %v21298_v24  ;;  %v21300_v8 = vpop.f32.mrb[193].mxu1 }
 0x749   : > { %23000 = vst [vmem:[#allocation149_spill] sm:$0xff] %v21300_v8  ;;  %v21302_v16 = vpop.f32.mrb[194].mxu1 }
 0x74a   : > { %23001 = vst [vmem:[#allocation150_spill] sm:$0xff] %v21302_v16  ;;  %v21304_v45 = vpop.f32.mrb[195].mxu1  ;;  %v15065_v16 = vcombine.high %v1051_v61, %v1059_v63 }
 0x74b   : > { %23002 = vst [vmem:[#allocation151_spill] sm:$0xff] %v21304_v45 }
 0x74d   : > { %12470 = vmatmul.mubr.bf16.gmra.mrb[196].mxu0 %v15032_v48  ;;  %v1075_v48 = vld [vmem:[%s22772_s2 + $0x1a70] sm:$0xff] }
 0x74e   : > { %12479 = vmatprep.mubr.bf16.mxu0 %v15049_v23  ;;  %v1067_v23 = vld [vmem:[%s22772_s2 + $0x1a30] sm:$0xff] }
 0x74f   : > { %v21312_v4 = vpop.f32.mrb[196].mxu1  ;;  %v15080_v61 = vcombine.low %v1067_v23, %v1075_v48 }
 0x750   : > { %23003 = vst [vmem:[#allocation152_spill] sm:$0xff] %v21312_v4  ;;  %v21314_v24 = vpop.f32.mrb[197].mxu1 }
 0x751   : > { %23004 = vst [vmem:[#allocation153_spill] sm:$0xff] %v21314_v24  ;;  %v21316_v39 = vpop.f32.mrb[198].mxu1 }
 0x752   : > { %23005 = vst [vmem:[#allocation154_spill] sm:$0xff] %v21316_v39  ;;  %v21318_v8 = vpop.f32.mrb[199].mxu1  ;;  %v15081_v39 = vcombine.high %v1067_v23, %v1075_v48 }
 0x753   : > { %23006 = vst [vmem:[#allocation155_spill] sm:$0xff] %v21318_v8 }
 0x755   : > { %12480 = vmatmul.mubr.bf16.gmra.mrb[200].mxu0 %v15048_v22  ;;  %v1091_v22 = vld [vmem:[%s22772_s2 + $0x1af0] sm:$0xff] }
 0x756   : > { %12489 = vmatprep.mubr.bf16.mxu0 %v15065_v16  ;;  %v1083_v16 = vld [vmem:[%s22772_s2 + $0x1ab0] sm:$0xff] }
 0x757   : > { %v21326_v45 = vpop.f32.mrb[200].mxu1  ;;  %v15096_v23 = vcombine.low %v1083_v16, %v1091_v22 }
 0x758   : > { %23007 = vst [vmem:[#allocation156_spill] sm:$0xff] %v21326_v45  ;;  %v21328_v4 = vpop.f32.mrb[201].mxu1 }
 0x759   : > { %23008 = vst [vmem:[#allocation157_spill] sm:$0xff] %v21328_v4  ;;  %v21330_v33 = vpop.f32.mrb[202].mxu1 }
 0x75a   : > { %23009 = vst [vmem:[#allocation158_spill] sm:$0xff] %v21330_v33  ;;  %v21332_v24 = vpop.f32.mrb[203].mxu1  ;;  %v15097_v33 = vcombine.high %v1083_v16, %v1091_v22 }
 0x75b   : > { %23010 = vst [vmem:[#allocation159_spill] sm:$0xff] %v21332_v24 }
 0x75d   : > { %12490 = vmatmul.mubr.bf16.gmra.mrb[204].mxu0 %v15064_v6  ;;  %v1107_v6 = vld [vmem:[%s22772_s2 + $0x1b70] sm:$0xff] }
 0x75e   : > { %12499 = vmatprep.mubr.bf16.mxu0 %v15081_v39  ;;  %v1099_v39 = vld [vmem:[%s22772_s2 + $0x1b30] sm:$0xff] }
 0x75f   : > { %v21340_v8 = vpop.f32.mrb[204].mxu1  ;;  %v15112_v16 = vcombine.low %v1099_v39, %v1107_v6 }
 0x760   : > { %23011 = vst [vmem:[#allocation160_spill] sm:$0xff] %v21340_v8  ;;  %v21342_v45 = vpop.f32.mrb[205].mxu1 }
 0x761   : > { %23012 = vst [vmem:[#allocation161_spill] sm:$0xff] %v21342_v45  ;;  %v21344_v63 = vpop.f32.mrb[206].mxu1 }
 0x762   : > { %23013 = vst [vmem:[#allocation162_spill] sm:$0xff] %v21344_v63  ;;  %v21346_v4 = vpop.f32.mrb[207].mxu1  ;;  %v15113_v63 = vcombine.high %v1099_v39, %v1107_v6 }
 0x763   : > { %23014 = vst [vmem:[#allocation163_spill] sm:$0xff] %v21346_v4 }
 0x765   : > { %12500 = vmatmul.mubr.bf16.gmra.mrb[208].mxu0 %v15080_v61  ;;  %v1123_v61 = vld [vmem:[%s22772_s2 + $0x1bf0] sm:$0xff] }
 0x766   : > { %12509 = vmatprep.mubr.bf16.mxu0 %v15097_v33  ;;  %v1115_v33 = vld [vmem:[%s22772_s2 + $0x1bb0] sm:$0xff] }
 0x767   : > { %v21354_v24 = vpop.f32.mrb[208].mxu1  ;;  %v15128_v39 = vcombine.low %v1115_v33, %v1123_v61 }
 0x768   : > { %23015 = vst [vmem:[#allocation164_spill] sm:$0xff] %v21354_v24  ;;  %v21356_v8 = vpop.f32.mrb[209].mxu1 }
 0x769   : > { %23016 = vst [vmem:[#allocation165_spill] sm:$0xff] %v21356_v8  ;;  %v21358_v48 = vpop.f32.mrb[210].mxu1 }
 0x76a   : > { %23017 = vst [vmem:[#allocation166_spill] sm:$0xff] %v21358_v48  ;;  %v21360_v45 = vpop.f32.mrb[211].mxu1  ;;  %v15129_v48 = vcombine.high %v1115_v33, %v1123_v61 }
 0x76b   : > { %23018 = vst [vmem:[#allocation167_spill] sm:$0xff] %v21360_v45 }
 0x76d   : > { %12510 = vmatmul.mubr.bf16.gmra.mrb[212].mxu0 %v15096_v23  ;;  %v1139_v23 = vld [vmem:[%s22772_s2 + $0x1c70] sm:$0xff] }
 0x76e   : > { %12519 = vmatprep.mubr.bf16.mxu0 %v15113_v63  ;;  %v1131_v63 = vld [vmem:[%s22772_s2 + $0x1c30] sm:$0xff] }
 0x76f   : > { %v21368_v4 = vpop.f32.mrb[212].mxu1  ;;  %v15144_v33 = vcombine.low %v1131_v63, %v1139_v23 }
 0x770   : > { %23019 = vst [vmem:[#allocation168_spill] sm:$0xff] %v21368_v4  ;;  %v21370_v24 = vpop.f32.mrb[213].mxu1 }
 0x771   : > { %23020 = vst [vmem:[#allocation169_spill] sm:$0xff] %v21370_v24  ;;  %v21372_v22 = vpop.f32.mrb[214].mxu1 }
 0x772   : > { %23021 = vst [vmem:[#allocation170_spill] sm:$0xff] %v21372_v22  ;;  %v21374_v8 = vpop.f32.mrb[215].mxu1  ;;  %v15145_v22 = vcombine.high %v1131_v63, %v1139_v23 }
 0x773   : > { %23022 = vst [vmem:[#allocation171_spill] sm:$0xff] %v21374_v8 }
 0x775   : > { %12520 = vmatmul.mubr.bf16.gmra.mrb[216].mxu0 %v15112_v16  ;;  %v1155_v16 = vld [vmem:[%s22772_s2 + $0x1cf0] sm:$0xff] }
 0x776   : > { %12529 = vmatprep.mubr.bf16.mxu0 %v15129_v48  ;;  %v1147_v48 = vld [vmem:[%s22772_s2 + $0x1cb0] sm:$0xff] }
 0x777   : > { %v21382_v45 = vpop.f32.mrb[216].mxu1  ;;  %v15160_v63 = vcombine.low %v1147_v48, %v1155_v16 }
 0x778   : > { %23023 = vst [vmem:[#allocation172_spill] sm:$0xff] %v21382_v45  ;;  %v21384_v4 = vpop.f32.mrb[217].mxu1 }
 0x779   : > { %23024 = vst [vmem:[#allocation173_spill] sm:$0xff] %v21384_v4  ;;  %v21386_v6 = vpop.f32.mrb[218].mxu1 }
 0x77a   : > { %23025 = vst [vmem:[#allocation174_spill] sm:$0xff] %v21386_v6  ;;  %v21388_v24 = vpop.f32.mrb[219].mxu1  ;;  %v15161_v6 = vcombine.high %v1147_v48, %v1155_v16 }
 0x77b   : > { %23026 = vst [vmem:[#allocation175_spill] sm:$0xff] %v21388_v24 }
 0x77d   : > { %12530 = vmatmul.mubr.bf16.gmra.mrb[220].mxu0 %v15128_v39  ;;  %v1171_v39 = vld [vmem:[%s22772_s2 + $0x1d70] sm:$0xff] }
 0x77e   : > { %12539 = vmatprep.mubr.bf16.mxu0 %v15145_v22  ;;  %v1163_v22 = vld [vmem:[%s22772_s2 + $0x1d30] sm:$0xff] }
 0x77f   : > { %v21396_v8 = vpop.f32.mrb[220].mxu1  ;;  %v15176_v48 = vcombine.low %v1163_v22, %v1171_v39 }
 0x780   : > { %23027 = vst [vmem:[#allocation176_spill] sm:$0xff] %v21396_v8  ;;  %v21398_v45 = vpop.f32.mrb[221].mxu1 }
 0x781   : > { %23028 = vst [vmem:[#allocation177_spill] sm:$0xff] %v21398_v45  ;;  %v21400_v61 = vpop.f32.mrb[222].mxu1 }
 0x782   : > { %23029 = vst [vmem:[#allocation178_spill] sm:$0xff] %v21400_v61  ;;  %v21402_v4 = vpop.f32.mrb[223].mxu1  ;;  %v15177_v61 = vcombine.high %v1163_v22, %v1171_v39 }
 0x783   : > { %23030 = vst [vmem:[#allocation179_spill] sm:$0xff] %v21402_v4 }
 0x785   : > { %12540 = vmatmul.mubr.bf16.gmra.mrb[224].mxu0 %v15144_v33  ;;  %v1187_v33 = vld [vmem:[%s22772_s2 + $0x1df0] sm:$0xff] }
 0x786   : > { %12549 = vmatprep.mubr.bf16.mxu0 %v15161_v6  ;;  %v1179_v6 = vld [vmem:[%s22772_s2 + $0x1db0] sm:$0xff] }
 0x787   : > { %v21410_v24 = vpop.f32.mrb[224].mxu1  ;;  %v15192_v22 = vcombine.low %v1179_v6, %v1187_v33 }
 0x788   : > { %23031 = vst [vmem:[#allocation180_spill] sm:$0xff] %v21410_v24  ;;  %v21412_v8 = vpop.f32.mrb[225].mxu1 }
 0x789   : > { %23032 = vst [vmem:[#allocation181_spill] sm:$0xff] %v21412_v8  ;;  %v21414_v23 = vpop.f32.mrb[226].mxu1 }
 0x78a   : > { %23033 = vst [vmem:[#allocation182_spill] sm:$0xff] %v21414_v23  ;;  %v21416_v45 = vpop.f32.mrb[227].mxu1  ;;  %v15193_v23 = vcombine.high %v1179_v6, %v1187_v33 }
 0x78b   : > { %23034 = vst [vmem:[#allocation183_spill] sm:$0xff] %v21416_v45 }
 0x78d   : > { %12550 = vmatmul.mubr.bf16.gmra.mrb[228].mxu0 %v15160_v63  ;;  %v1203_v63 = vld [vmem:[%s22772_s2 + $0x1e70] sm:$0xff] }
 0x78e   : > { %12559 = vmatprep.mubr.bf16.mxu0 %v15177_v61  ;;  %v1195_v61 = vld [vmem:[%s22772_s2 + $0x1e30] sm:$0xff] }
 0x78f   : > { %v21424_v4 = vpop.f32.mrb[228].mxu1  ;;  %v15208_v6 = vcombine.low %v1195_v61, %v1203_v63 }
 0x790   : > { %23035 = vst [vmem:[#allocation184_spill] sm:$0xff] %v21424_v4  ;;  %v21426_v24 = vpop.f32.mrb[229].mxu1 }
 0x791   : > { %23036 = vst [vmem:[#allocation185_spill] sm:$0xff] %v21426_v24  ;;  %v21428_v16 = vpop.f32.mrb[230].mxu1 }
 0x792   : > { %23037 = vst [vmem:[#allocation186_spill] sm:$0xff] %v21428_v16  ;;  %v21430_v8 = vpop.f32.mrb[231].mxu1  ;;  %v15209_v16 = vcombine.high %v1195_v61, %v1203_v63 }
 0x793   : > { %23038 = vst [vmem:[#allocation187_spill] sm:$0xff] %v21430_v8 }
 0x795   : > { %12560 = vmatmul.mubr.bf16.gmra.mrb[232].mxu0 %v15176_v48  ;;  %v1219_v48 = vld [vmem:[%s22772_s2 + $0x1ef0] sm:$0xff] }
 0x796   : > { %12569 = vmatprep.mubr.bf16.mxu0 %v15193_v23  ;;  %v1211_v23 = vld [vmem:[%s22772_s2 + $0x1eb0] sm:$0xff] }
 0x797   : > { %v21438_v45 = vpop.f32.mrb[232].mxu1  ;;  %v15224_v61 = vcombine.low %v1211_v23, %v1219_v48 }
 0x798   : > { %23039 = vst [vmem:[#allocation188_spill] sm:$0xff] %v21438_v45  ;;  %v21440_v4 = vpop.f32.mrb[233].mxu1 }
 0x799   : > { %23040 = vst [vmem:[#allocation189_spill] sm:$0xff] %v21440_v4  ;;  %v21442_v39 = vpop.f32.mrb[234].mxu1 }
 0x79a   : > { %23041 = vst [vmem:[#allocation190_spill] sm:$0xff] %v21442_v39  ;;  %v21444_v24 = vpop.f32.mrb[235].mxu1  ;;  %v15225_v39 = vcombine.high %v1211_v23, %v1219_v48 }
 0x79b   : > { %23042 = vst [vmem:[#allocation191_spill] sm:$0xff] %v21444_v24 }
 0x79d   : > { %12570 = vmatmul.mubr.bf16.gmra.mrb[236].mxu0 %v15192_v22  ;;  %v1235_v22 = vld [vmem:[%s22772_s2 + $0x1f70] sm:$0xff] }
 0x79e   : > { %12579 = vmatprep.mubr.bf16.mxu0 %v15209_v16  ;;  %v1227_v16 = vld [vmem:[%s22772_s2 + $0x1f30] sm:$0xff] }
 0x79f   : > { %v21452_v8 = vpop.f32.mrb[236].mxu1  ;;  %v15240_v23 = vcombine.low %v1227_v16, %v1235_v22 }
 0x7a0   : > { %23043 = vst [vmem:[#allocation192_spill] sm:$0xff] %v21452_v8  ;;  %v21454_v45 = vpop.f32.mrb[237].mxu1 }
 0x7a1   : > { %23044 = vst [vmem:[#allocation193_spill] sm:$0xff] %v21454_v45  ;;  %v21456_v33 = vpop.f32.mrb[238].mxu1 }
 0x7a2   : > { %23045 = vst [vmem:[#allocation194_spill] sm:$0xff] %v21456_v33  ;;  %v21458_v4 = vpop.f32.mrb[239].mxu1  ;;  %v15241_v33 = vcombine.high %v1227_v16, %v1235_v22 }
 0x7a3   : > { %23046 = vst [vmem:[#allocation195_spill] sm:$0xff] %v21458_v4 }
 0x7a5   : > { %12580 = vmatmul.mubr.bf16.gmra.mrb[240].mxu0 %v15208_v6  ;;  %v1251_v6 = vld [vmem:[%s22772_s2 + $0x1ff0] sm:$0xff] }
 0x7a6   : > { %12589 = vmatprep.mubr.bf16.mxu0 %v15225_v39  ;;  %v1243_v39 = vld [vmem:[%s22772_s2 + $0x1fb0] sm:$0xff] }
 0x7a7   : > { %v21466_v24 = vpop.f32.mrb[240].mxu1  ;;  %v15256_v16 = vcombine.low %v1243_v39, %v1251_v6 }
 0x7a8   : > { %23047 = vst [vmem:[#allocation196_spill] sm:$0xff] %v21466_v24  ;;  %v21468_v8 = vpop.f32.mrb[241].mxu1 }
 0x7a9   : > { %23048 = vst [vmem:[#allocation197_spill] sm:$0xff] %v21468_v8  ;;  %v21470_v63 = vpop.f32.mrb[242].mxu1 }
 0x7aa   : > { %23049 = vst [vmem:[#allocation198_spill] sm:$0xff] %v21470_v63  ;;  %v21472_v45 = vpop.f32.mrb[243].mxu1  ;;  %v15257_v63 = vcombine.high %v1243_v39, %v1251_v6 }
 0x7ab   : > { %23050 = vst [vmem:[#allocation199_spill] sm:$0xff] %v21472_v45 }
 0x7ad   : > { %12590 = vmatmul.mubr.bf16.gmra.mrb[244].mxu0 %v15224_v61  ;;  %v244_v61 = vld [vmem:[%s22772_s2 + $0x78] sm:$0xff] }
 0x7ae   : > { %12599 = vmatprep.mubr.bf16.mxu0 %v15241_v33  ;;  %v236_v33 = vld [vmem:[%s22772_s2 + $0x38] sm:$0xff] }
 0x7af   : > { %v21480_v4 = vpop.f32.mrb[244].mxu1  ;;  %v14250_v39 = vcombine.low %v236_v33, %v244_v61 }
 0x7b0   : > { %23051 = vst [vmem:[#allocation200_spill] sm:$0xff] %v21480_v4  ;;  %v21482_v24 = vpop.f32.mrb[245].mxu1 }
 0x7b1   : > { %23052 = vst [vmem:[#allocation201_spill] sm:$0xff] %v21482_v24  ;;  %v21484_v48 = vpop.f32.mrb[246].mxu1 }
 0x7b2   : > { %23053 = vst [vmem:[#allocation202_spill] sm:$0xff] %v21484_v48  ;;  %v21486_v8 = vpop.f32.mrb[247].mxu1  ;;  %v14251_v48 = vcombine.high %v236_v33, %v244_v61  ;;  %v284_v33 = vld [vmem:[%s22772_s2 + $0x1b8] sm:$0xff] }
 0x7b3   : > { %23054 = vst [vmem:[#allocation203_spill] sm:$0xff] %v21486_v8  ;;  %v292_v61 = vld [vmem:[%s22772_s2 + $0x1f8] sm:$0xff] }
 0x7b5   : > { %12600 = vmatmul.mubr.bf16.gmra.mrb[248].mxu0 %v15240_v23  ;;  %v260_v23 = vld [vmem:[%s22772_s2 + $0xf8] sm:$0xff] }
 0x7b6   : > { %12609 = vmatprep.mubr.bf16.mxu0 %v15257_v63  ;;  %v252_v63 = vld [vmem:[%s22772_s2 + $0xb8] sm:$0xff] }
 0x7b7   : > { %v21494_v45 = vpop.f32.mrb[248].mxu1 }
 0x7b8   : > { %23055 = vst [vmem:[#allocation204_spill] sm:$0xff] %v21494_v45  ;;  %v21496_v4 = vpop.f32.mrb[249].mxu1 }
 0x7b9   : > { %23056 = vst [vmem:[#allocation205_spill] sm:$0xff] %v21496_v4  ;;  %v21498_v22 = vpop.f32.mrb[250].mxu1 }
 0x7ba   : > { %23057 = vst [vmem:[#allocation206_spill] sm:$0xff] %v21498_v22  ;;  %v21500_v24 = vpop.f32.mrb[251].mxu1  ;;  %v14267_v22 = vcombine.high %v252_v63, %v260_v23 }
 0x7bb   : > { %23058 = vst [vmem:[#allocation207_spill] sm:$0xff] %v21500_v24  ;;  %v14266_v24 = vcombine.low %v252_v63, %v260_v23  ;;  %v316_v23 = vld [vmem:[%s22772_s2 + $0x2b8] sm:$0xff] }
 0x7bd   : > { %12610 = vmatmul.mubr.bf16.gmra.mrb[252].mxu0 %v15256_v16  ;;  %v276_v16 = vld [vmem:[%s22772_s2 + $0x178] sm:$0xff] }
 0x7be   : > { %12652 = vmatprep.mubr.bf16.mxu0 %v14251_v48  ;;  %v268_v48 = vld [vmem:[%s22772_s2 + $0x138] sm:$0xff] }
 0x7bf   : > { %v21508_v8 = vpop.f32.mrb[252].mxu1 }
 0x7c0   : > { %23059 = vst [vmem:[#allocation208_spill] sm:$0xff] %v21508_v8  ;;  %v21510_v45 = vpop.f32.mrb[253].mxu1  ;;  %v14283_v8 = vcombine.high %v268_v48, %v276_v16 }
 0x7c1   : > { %23060 = vst [vmem:[#allocation209_spill] sm:$0xff] %v21510_v45  ;;  %v21512_v6 = vpop.f32.mrb[254].mxu1 }
 0x7c2   : > { %23061 = vst [vmem:[#allocation210_spill] sm:$0xff] %v21512_v6  ;;  %v21514_v4 = vpop.f32.mrb[255].mxu1 }
 0x7c3   : > { %23062 = vst [vmem:[#allocation211_spill] sm:$0xff] %v21514_v4  ;;  %v300_v4 = vld [vmem:[%s22772_s2 + $0x238] sm:$0xff] }
 0x7c5   : > { %12653 = vmatmul.mubr.bf16.vlgmr.msra.gmra.mrb[0].mxu0 %v14250_v39  ;;  %v14299_v39 = vcombine.high %v284_v33, %v292_v61 }
 0x7c6   : > { %12662 = vmatprep.mubr.bf16.mxu0 %v14267_v22  ;;  %v14282_v22 = vcombine.low %v268_v48, %v276_v16  ;;  %v324_v48 = vld [vmem:[%s22772_s2 + $0x2f8] sm:$0xff] }
 0x7cd   : > { %12663 = vmatmul.mubr.bf16.gmra.mrb[4].mxu0 %v14266_v24  ;;  %v14298_v24 = vcombine.low %v284_v33, %v292_v61  ;;  %v340_v33 = vld [vmem:[%s22772_s2 + $0x378] sm:$0xff]  ;;  %v14330_v61 = vcombine.low %v316_v23, %v324_v48 }
 0x7ce   : > { %12672 = vmatprep.mubr.bf16.mxu0 %v14283_v8  ;;  %v308_v8 = vld [vmem:[%s22772_s2 + $0x278] sm:$0xff] }
 0x7cf   : > { %v14315_v63 = vcombine.high %v300_v4, %v308_v8  ;;  %v14314_v16 = vcombine.low %v300_v4, %v308_v8  ;;  %v356_v4 = vld [vmem:[%s22772_s2 + $0x3f8] sm:$0xff] }
 0x7d5   : > { %12673 = vmatmul.mubr.bf16.gmra.mrb[8].mxu0 %v14282_v22  ;;  %v14331_v22 = vcombine.high %v316_v23, %v324_v48  ;;  %v372_v23 = vld [vmem:[%s22772_s2 + $0x478] sm:$0xff] }
 0x7d6   : > { %12682 = vmatprep.mubr.bf16.mxu0 %v14299_v39  ;;  %v332_v39 = vld [vmem:[%s22772_s2 + $0x338] sm:$0xff] }
 0x7d7   : > { %v14346_v8 = vcombine.low %v332_v39, %v340_v33 }
 0x7dd   : > { %12683 = vmatmul.mubr.bf16.gmra.mrb[12].mxu0 %v14298_v24  ;;  %v14347_v24 = vcombine.high %v332_v39, %v340_v33  ;;  %v388_v39 = vld [vmem:[%s22772_s2 + $0x4f8] sm:$0xff] }
 0x7de   : > { %12692 = vmatprep.mubr.bf16.mxu0 %v14315_v63  ;;  %v348_v63 = vld [vmem:[%s22772_s2 + $0x3b8] sm:$0xff] }
 0x7df   : > { %v14362_v48 = vcombine.low %v348_v63, %v356_v4 }
 0x7e5   : > { %12693 = vmatmul.mubr.bf16.gmra.mrb[16].mxu0 %v14314_v16  ;;  %v14363_v16 = vcombine.high %v348_v63, %v356_v4  ;;  %v404_v63 = vld [vmem:[%s22772_s2 + $0x578] sm:$0xff] }
 0x7e6   : > { %12702 = vmatprep.mubr.bf16.mxu0 %v14331_v22  ;;  %v364_v22 = vld [vmem:[%s22772_s2 + $0x438] sm:$0xff] }
 0x7e7   : > { %v14378_v33 = vcombine.low %v364_v22, %v372_v23 }
 0x7ed   : > { %12703 = vmatmul.mubr.bf16.gmra.mrb[20].mxu0 %v14330_v61  ;;  %v14379_v61 = vcombine.high %v364_v22, %v372_v23  ;;  %v420_v22 = vld [vmem:[%s22772_s2 + $0x5f8] sm:$0xff] }
 0x7ee   : > { %12712 = vmatprep.mubr.bf16.mxu0 %v14347_v24  ;;  %v380_v24 = vld [vmem:[%s22772_s2 + $0x4b8] sm:$0xff] }
 0x7ef   : > { %v14394_v4 = vcombine.low %v380_v24, %v388_v39 }
 0x7f5   : > { %12713 = vmatmul.mubr.bf16.gmra.mrb[24].mxu0 %v14346_v8  ;;  %v14395_v8 = vcombine.high %v380_v24, %v388_v39  ;;  %v436_v24 = vld [vmem:[%s22772_s2 + $0x678] sm:$0xff] }
 0x7f6   : > { %12722 = vmatprep.mubr.bf16.mxu0 %v14363_v16  ;;  %v396_v16 = vld [vmem:[%s22772_s2 + $0x538] sm:$0xff] }
 0x7f7   : > { %v14410_v23 = vcombine.low %v396_v16, %v404_v63 }
 0x7fd   : > { %12723 = vmatmul.mubr.bf16.gmra.mrb[28].mxu0 %v14362_v48  ;;  %v14411_v48 = vcombine.high %v396_v16, %v404_v63  ;;  %v452_v16 = vld [vmem:[%s22772_s2 + $0x6f8] sm:$0xff] }
 0x7fe   : > { %12732 = vmatprep.mubr.bf16.mxu0 %v14379_v61  ;;  %v412_v61 = vld [vmem:[%s22772_s2 + $0x5b8] sm:$0xff] }
 0x7ff   : > { %v14426_v39 = vcombine.low %v412_v61, %v420_v22 }
 0x805   : > { %12733 = vmatmul.mubr.bf16.gmra.mrb[32].mxu0 %v14378_v33  ;;  %v14427_v33 = vcombine.high %v412_v61, %v420_v22  ;;  %v468_v61 = vld [vmem:[%s22772_s2 + $0x778] sm:$0xff] }
 0x806   : > { %12742 = vmatprep.mubr.bf16.mxu0 %v14395_v8  ;;  %v428_v8 = vld [vmem:[%s22772_s2 + $0x638] sm:$0xff] }
 0x807   : > { %v14442_v63 = vcombine.low %v428_v8, %v436_v24 }
 0x80d   : > { %12743 = vmatmul.mubr.bf16.gmra.mrb[36].mxu0 %v14394_v4  ;;  %v14443_v4 = vcombine.high %v428_v8, %v436_v24  ;;  %v484_v8 = vld [vmem:[%s22772_s2 + $0x7f8] sm:$0xff] }
 0x80e   : > { %12752 = vmatprep.mubr.bf16.mxu0 %v14411_v48  ;;  %v444_v48 = vld [vmem:[%s22772_s2 + $0x6b8] sm:$0xff] }
 0x80f   : > { %v14458_v22 = vcombine.low %v444_v48, %v452_v16 }
 0x815   : > { %12753 = vmatmul.mubr.bf16.gmra.mrb[40].mxu0 %v14410_v23  ;;  %v14459_v23 = vcombine.high %v444_v48, %v452_v16  ;;  %v500_v48 = vld [vmem:[%s22772_s2 + $0x878] sm:$0xff] }
 0x816   : > { %12762 = vmatprep.mubr.bf16.mxu0 %v14427_v33  ;;  %v460_v33 = vld [vmem:[%s22772_s2 + $0x738] sm:$0xff] }
 0x817   : > { %v14474_v24 = vcombine.low %v460_v33, %v468_v61 }
 0x81d   : > { %12763 = vmatmul.mubr.bf16.gmra.mrb[44].mxu0 %v14426_v39  ;;  %v14475_v39 = vcombine.high %v460_v33, %v468_v61  ;;  %v516_v33 = vld [vmem:[%s22772_s2 + $0x8f8] sm:$0xff] }
 0x81e   : > { %12772 = vmatprep.mubr.bf16.mxu0 %v14443_v4  ;;  %v476_v4 = vld [vmem:[%s22772_s2 + $0x7b8] sm:$0xff] }
 0x81f   : > { %v14490_v16 = vcombine.low %v476_v4, %v484_v8 }
 0x825   : > { %12773 = vmatmul.mubr.bf16.gmra.mrb[48].mxu0 %v14442_v63  ;;  %v14491_v63 = vcombine.high %v476_v4, %v484_v8  ;;  %v532_v4 = vld [vmem:[%s22772_s2 + $0x978] sm:$0xff] }
 0x826   : > { %12782 = vmatprep.mubr.bf16.mxu0 %v14459_v23  ;;  %v492_v23 = vld [vmem:[%s22772_s2 + $0x838] sm:$0xff] }
 0x827   : > { %v14506_v61 = vcombine.low %v492_v23, %v500_v48 }
 0x82d   : > { %12783 = vmatmul.mubr.bf16.gmra.mrb[52].mxu0 %v14458_v22  ;;  %v14507_v22 = vcombine.high %v492_v23, %v500_v48  ;;  %v548_v23 = vld [vmem:[%s22772_s2 + $0x9f8] sm:$0xff] }
 0x82e   : > { %12792 = vmatprep.mubr.bf16.mxu0 %v14475_v39  ;;  %v508_v39 = vld [vmem:[%s22772_s2 + $0x8b8] sm:$0xff] }
 0x82f   : > { %v14522_v8 = vcombine.low %v508_v39, %v516_v33 }
 0x835   : > { %12793 = vmatmul.mubr.bf16.gmra.mrb[56].mxu0 %v14474_v24  ;;  %v14523_v24 = vcombine.high %v508_v39, %v516_v33  ;;  %v564_v39 = vld [vmem:[%s22772_s2 + $0xa78] sm:$0xff] }
 0x836   : > { %12802 = vmatprep.mubr.bf16.mxu0 %v14491_v63  ;;  %v524_v63 = vld [vmem:[%s22772_s2 + $0x938] sm:$0xff] }
 0x837   : > { %v14538_v48 = vcombine.low %v524_v63, %v532_v4 }
 0x83d   : > { %12803 = vmatmul.mubr.bf16.gmra.mrb[60].mxu0 %v14490_v16  ;;  %v14539_v16 = vcombine.high %v524_v63, %v532_v4  ;;  %v580_v63 = vld [vmem:[%s22772_s2 + $0xaf8] sm:$0xff] }
 0x83e   : > { %12812 = vmatprep.mubr.bf16.mxu0 %v14507_v22  ;;  %v540_v22 = vld [vmem:[%s22772_s2 + $0x9b8] sm:$0xff] }
 0x83f   : > { %v14554_v33 = vcombine.low %v540_v22, %v548_v23 }
 0x845   : > { %12813 = vmatmul.mubr.bf16.gmra.mrb[64].mxu0 %v14506_v61  ;;  %v14555_v61 = vcombine.high %v540_v22, %v548_v23  ;;  %v596_v22 = vld [vmem:[%s22772_s2 + $0xb78] sm:$0xff] }
 0x846   : > { %12822 = vmatprep.mubr.bf16.mxu0 %v14523_v24  ;;  %v556_v24 = vld [vmem:[%s22772_s2 + $0xa38] sm:$0xff] }
 0x847   : > { %v14570_v4 = vcombine.low %v556_v24, %v564_v39 }
 0x84d   : > { %12823 = vmatmul.mubr.bf16.gmra.mrb[68].mxu0 %v14522_v8  ;;  %v14571_v8 = vcombine.high %v556_v24, %v564_v39  ;;  %v612_v24 = vld [vmem:[%s22772_s2 + $0xbf8] sm:$0xff] }
 0x84e   : > { %12832 = vmatprep.mubr.bf16.mxu0 %v14539_v16  ;;  %v572_v16 = vld [vmem:[%s22772_s2 + $0xab8] sm:$0xff] }
 0x84f   : > { %v14586_v23 = vcombine.low %v572_v16, %v580_v63 }
 0x855   : > { %12833 = vmatmul.mubr.bf16.gmra.mrb[72].mxu0 %v14538_v48  ;;  %v14587_v48 = vcombine.high %v572_v16, %v580_v63  ;;  %v628_v16 = vld [vmem:[%s22772_s2 + $0xc78] sm:$0xff] }
 0x856   : > { %12842 = vmatprep.mubr.bf16.mxu0 %v14555_v61  ;;  %v588_v61 = vld [vmem:[%s22772_s2 + $0xb38] sm:$0xff] }
 0x857   : > { %v14602_v39 = vcombine.low %v588_v61, %v596_v22 }
 0x85d   : > { %12843 = vmatmul.mubr.bf16.gmra.mrb[76].mxu0 %v14554_v33  ;;  %v14603_v33 = vcombine.high %v588_v61, %v596_v22  ;;  %v644_v61 = vld [vmem:[%s22772_s2 + $0xcf8] sm:$0xff] }
 0x85e   : > { %12852 = vmatprep.mubr.bf16.mxu0 %v14571_v8  ;;  %v604_v8 = vld [vmem:[%s22772_s2 + $0xbb8] sm:$0xff] }
 0x85f   : > { %v14618_v63 = vcombine.low %v604_v8, %v612_v24 }
 0x865   : > { %12853 = vmatmul.mubr.bf16.gmra.mrb[80].mxu0 %v14570_v4  ;;  %v14619_v4 = vcombine.high %v604_v8, %v612_v24  ;;  %v660_v8 = vld [vmem:[%s22772_s2 + $0xd78] sm:$0xff] }
 0x866   : > { %12862 = vmatprep.mubr.bf16.mxu0 %v14587_v48  ;;  %v620_v48 = vld [vmem:[%s22772_s2 + $0xc38] sm:$0xff] }
 0x867   : > { %v14634_v22 = vcombine.low %v620_v48, %v628_v16 }
 0x86d   : > { %12863 = vmatmul.mubr.bf16.gmra.mrb[84].mxu0 %v14586_v23  ;;  %v14635_v23 = vcombine.high %v620_v48, %v628_v16  ;;  %v676_v48 = vld [vmem:[%s22772_s2 + $0xdf8] sm:$0xff] }
 0x86e   : > { %12872 = vmatprep.mubr.bf16.mxu0 %v14603_v33  ;;  %v636_v33 = vld [vmem:[%s22772_s2 + $0xcb8] sm:$0xff] }
 0x86f   : > { %v14650_v24 = vcombine.low %v636_v33, %v644_v61 }
 0x875   : > { %12873 = vmatmul.mubr.bf16.gmra.mrb[88].mxu0 %v14602_v39  ;;  %v14651_v39 = vcombine.high %v636_v33, %v644_v61  ;;  %v684_v33 = vld [vmem:[%s22772_s2 + $0xe38] sm:$0xff] }
 0x876   : > { %12882 = vmatprep.mubr.bf16.mxu0 %v14619_v4  ;;  %v652_v4 = vld [vmem:[%s22772_s2 + $0xd38] sm:$0xff] }
 0x877   : > { %v14666_v16 = vcombine.low %v652_v4, %v660_v8  ;;  %v692_v61 = vld [vmem:[%s22772_s2 + $0xe78] sm:$0xff] }
 0x87d   : > { %12883 = vmatmul.mubr.bf16.gmra.mrb[92].mxu0 %v14618_v63  ;;  %v14667_v63 = vcombine.high %v652_v4, %v660_v8  ;;  %v14699_v4 = vcombine.high %v684_v33, %v692_v61 }
 0x87e   : > { %12892 = vmatprep.mubr.bf16.mxu0 %v14635_v23  ;;  %v668_v23 = vld [vmem:[%s22772_s2 + $0xdb8] sm:$0xff] }
 0x87f   : > { %v14682_v6 = vcombine.low %v668_v23, %v676_v48 }
 0x885   : > { %12893 = vmatmul.mubr.bf16.gmra.mrb[96].mxu0 %v14634_v22  ;;  %v14683_v22 = vcombine.high %v668_v23, %v676_v48  ;;  %v21691_v23 = vld [vmem:[%s21686_s20] sm:$0xff] }
 0x886   : > { %12902 = vmatprep.mubr.bf16.mxu0 %v14651_v39  ;;  %14098 = vst [vmem:[%s21711_s5] sm:$0xff] %v21691_v23 }
 0x88d   : > { %12903 = vmatmul.mubr.bf16.gmra.mrb[100].mxu0 %v14650_v24 }
 0x88e   : > { %12912 = vmatprep.mubr.bf16.mxu0 %v14667_v63 }
 0x895   : > { %12913 = vmatmul.mubr.bf16.gmra.mrb[104].mxu0 %v14666_v16 }
 0x896   : > { %12922 = vmatprep.mubr.bf16.mxu0 %v14683_v22 }
 0x898   : > { %v12654_v39 = vpop.f32.mrb[0].mxu0 }
 0x899   : > { %v15573_v24 = vadd.f32 %v12654_v39, %v20156_v34  ;;  %v12656_v63 = vpop.f32.mrb[1].mxu0  ;;  %v14698_v39 = vcombine.low %v684_v33, %v692_v61  ;;  %v724_v61 = vld [vmem:[%s22772_s2 + $0xf78] sm:$0xff] }
 0x89a   : > { %v15574_v45 = vadd.f32 %v12656_v63, %v20158_v35  ;;  %v12658_v40 = vpop.f32.mrb[2].mxu0 }
 0x89b   : > { %v15575_v8 = vadd.f32 %v12658_v40, %v20160_v38  ;;  %v12660_v16 = vpop.f32.mrb[3].mxu0  ;;  %v15517_v38 = vcombine.high %v21691_v23, %v21691_v23  ;;  %v708_v40 = vld [vmem:[%s22772_s2 + $0xef8] sm:$0xff] }
 0x89c   : > { %v15576_v22 = vadd.f32 %v12660_v16, %v20162_v41  ;;  %v700_v41 = vld [vmem:[%s22772_s2 + $0xeb8] sm:$0xff] }
 0x89d   : > { %v21688_v34 = vpack.c.bf16 %v15575_v8, %v15573_v24  ;;  %12923 = vmatmul.mubr.bf16.gmra.mrb[108].mxu0 %v14682_v6  ;;  %13741 = vmatprep.mubr.bf16.mxu1 %v15517_v38 }
 0x89e   : > { %v21693_v35 = vpack.c.bf16 %v15576_v22, %v15574_v45  ;;  %12932 = vmatprep.mubr.bf16.mxu0 %v14699_v4  ;;  %v14715_v4 = vcombine.high %v700_v41, %v708_v40 }
 0x8a0   : > { %v12664_v48 = vpop.f32.mrb[4].mxu0  ;;  %13709 = vmatprep.subr.bf16.mxu1 %v21693_v35 }
 0x8a1   : > { %v15577_v6 = vadd.f32 %v12664_v48, %v20176_v46  ;;  %v12666_v45 = vpop.f32.mrb[5].mxu0  ;;  %13710 = vmatpush1.bf16.msra.mxu1 %v21688_v34  ;;  %v14714_v48 = vcombine.low %v700_v41, %v708_v40 }
 0x8a2   : > { %v15578_v24 = vadd.f32 %v12666_v45, %v20178_v47  ;;  %v12668_v63 = vpop.f32.mrb[6].mxu0  ;;  %v716_v47 = vld [vmem:[%s22772_s2 + $0xf38] sm:$0xff] }
 0x8a3   : > { %v15579_v8 = vadd.f32 %v12668_v63, %v20180_v50  ;;  %v12670_v16 = vpop.f32.mrb[7].mxu0  ;;  %v14730_v40 = vcombine.low %v716_v47, %v724_v61 }
 0x8a4   : > { %v15580_v46 = vadd.f32 %v12670_v16, %v20182_v53 }
 0x8a5   : > { %v21717_v22 = vpack.c.bf16 %v15579_v8, %v15577_v6  ;;  %12933 = vmatmul.mubr.bf16.gmra.mrb[112].mxu0 %v14698_v39  ;;  %v14731_v39 = vcombine.high %v716_v47, %v724_v61 }
 0x8a6   : > { %v21719_v33 = vpack.c.bf16 %v15580_v46, %v15578_v24  ;;  %12942 = vmatprep.mubr.bf16.mxu0 %v14715_v4 }
 0x8a8   : > { %v12674_v50 = vpop.f32.mrb[8].mxu0  ;;  %13711 = vmatprep.subr.bf16.mxu1 %v21719_v33 }
 0x8a9   : > { %v15581_v38 = vadd.f32 %v12674_v50, %v20196_v58  ;;  %v12676_v53 = vpop.f32.mrb[9].mxu0  ;;  %13712 = vmatpush1.bf16.msra.mxu1 %v21717_v22  ;;  %v732_v58 = vld [vmem:[%s22772_s2 + $0xfb8] sm:$0xff] }
 0x8aa   : > { %v15582_v6 = vadd.f32 %v12676_v53, %v20198_v59  ;;  %v12678_v45 = vpop.f32.mrb[10].mxu0  ;;  %v740_v59 = vld [vmem:[%s22772_s2 + $0xff8] sm:$0xff] }
 0x8ab   : > { %v15583_v24 = vadd.f32 %v12678_v45, %v20200_v62  ;;  %v12680_v63 = vpop.f32.mrb[11].mxu0  ;;  %v14746_v61 = vcombine.low %v732_v58, %v740_v59 }
 0x8ac   : > { %v15584_v4 = vadd.f32 %v12680_v63, %v20202_v7 }
 0x8ad   : > { %v21733_v8 = vpack.c.bf16 %v15583_v24, %v15581_v38  ;;  %12943 = vmatmul.mubr.bf16.gmra.mrb[116].mxu0 %v14714_v48  ;;  %v14747_v38 = vcombine.high %v732_v58, %v740_v59 }
 0x8ae   : > { %v21735_v16 = vpack.c.bf16 %v15584_v4, %v15582_v6  ;;  %12952 = vmatprep.mubr.bf16.mxu0 %v14731_v39 }
 0x8b0   : > { %v12684_v41 = vpop.f32.mrb[12].mxu0  ;;  %13713 = vmatprep.subr.bf16.mxu1 %v21735_v16 }
 0x8b1   : > { %v15585_v62 = vadd.f32 %v12684_v41, %v20217_v13  ;;  %v12686_v7 = vpop.f32.mrb[13].mxu0  ;;  %13714 = vmatpush1.bf16.msra.mxu1 %v21733_v8  ;;  %v748_v13 = vld [vmem:[%s22772_s2 + $0x1038] sm:$0xff] }
 0x8b2   : > { %v15586_v46 = vadd.f32 %v12686_v7, %v20219_v14  ;;  %v12688_v50 = vpop.f32.mrb[14].mxu0  ;;  %v756_v14 = vld [vmem:[%s22772_s2 + $0x1078] sm:$0xff] }
 0x8b3   : > { %v15587_v53 = vadd.f32 %v12688_v50, %v20221_v17  ;;  %v12690_v48 = vpop.f32.mrb[15].mxu0  ;;  %v14763_v4 = vcombine.high %v748_v13, %v756_v14  ;;  %v14762_v59 = vcombine.low %v748_v13, %v756_v14 }
 0x8b4   : > { %v15588_v6 = vadd.f32 %v12690_v48, %v20223_v20 }
 0x8b5   : > { %v21749_v45 = vpack.c.bf16 %v15587_v53, %v15585_v62  ;;  %12953 = vmatmul.mubr.bf16.gmra.mrb[120].mxu0 %v14730_v40 }
 0x8b6   : > { %v21751_v39 = vpack.c.bf16 %v15588_v6, %v15586_v46  ;;  %12962 = vmatprep.mubr.bf16.mxu0 %v14747_v38 }
 0x8b8   : > { %v12694_v47 = vpop.f32.mrb[16].mxu0  ;;  %13715 = vmatprep.subr.bf16.mxu1 %v21751_v39 }
 0x8b9   : > { %v15589_v17 = vadd.f32 %v12694_v47, %v20237_v0  ;;  %v12696_v20 = vpop.f32.mrb[17].mxu0  ;;  %13716 = vmatpush1.bf16.msra.mxu1 %v21749_v45  ;;  %v764_v0 = vld [vmem:[%s22772_s2 + $0x10b8] sm:$0xff] }
 0x8ba   : > { %v15590_v24 = vadd.f32 %v12696_v20, %v20239_v1  ;;  %v12698_v63 = vpop.f32.mrb[18].mxu0  ;;  %v772_v1 = vld [vmem:[%s22772_s2 + $0x10f8] sm:$0xff] }
 0x8bb   : > { %v15591_v41 = vadd.f32 %v12698_v63, %v20241_v5  ;;  %v12700_v62 = vpop.f32.mrb[19].mxu0  ;;  %v14779_v53 = vcombine.high %v764_v0, %v772_v1  ;;  %v14778_v14 = vcombine.low %v764_v0, %v772_v1 }
 0x8bc   : > { %v15592_v7 = vadd.f32 %v12700_v62, %v20243_v26 }
 0x8bd   : > { %v21765_v40 = vpack.c.bf16 %v15591_v41, %v15589_v17  ;;  %12963 = vmatmul.mubr.bf16.gmra.mrb[124].mxu0 %v14746_v61 }
 0x8be   : > { %v21767_v46 = vpack.c.bf16 %v15592_v7, %v15590_v24  ;;  %12972 = vmatprep.mubr.bf16.mxu0 %v14763_v4 }
 0x8c0   : > { %v12704_v58 = vpop.f32.mrb[20].mxu0  ;;  %13717 = vmatprep.subr.bf16.mxu1 %v21767_v46 }
 0x8c1   : > { %v15593_v5 = vadd.f32 %v12704_v58, %v20257_v31  ;;  %v12706_v26 = vpop.f32.mrb[21].mxu0  ;;  %13718 = vmatpush1.bf16.msra.mxu1 %v21765_v40  ;;  %v780_v31 = vld [vmem:[%s22772_s2 + $0x1138] sm:$0xff] }
 0x8c2   : > { %v15594_v50 = vadd.f32 %v12706_v26, %v20259_v32  ;;  %v12708_v38 = vpop.f32.mrb[22].mxu0  ;;  %v788_v32 = vld [vmem:[%s22772_s2 + $0x1178] sm:$0xff] }
 0x8c3   : > { %v15595_v48 = vadd.f32 %v12708_v38, %v20261_v37  ;;  %v12710_v6 = vpop.f32.mrb[23].mxu0  ;;  %v14795_v63 = vcombine.high %v780_v31, %v788_v32  ;;  %v14794_v1 = vcombine.low %v780_v31, %v788_v32 }
 0x8c4   : > { %v15596_v47 = vadd.f32 %v12710_v6, %v20263_v42 }
 0x8c5   : > { %v21781_v17 = vpack.c.bf16 %v15595_v48, %v15593_v5  ;;  %12973 = vmatmul.mubr.bf16.gmra.mrb[128].mxu0 %v14762_v59 }
 0x8c6   : > { %v21783_v20 = vpack.c.bf16 %v15596_v47, %v15594_v50  ;;  %12982 = vmatprep.mubr.bf16.mxu0 %v14779_v53 }
 0x8c8   : > { %v12714_v13 = vpop.f32.mrb[24].mxu0  ;;  %13719 = vmatprep.subr.bf16.mxu1 %v21783_v20 }
 0x8c9   : > { %v15597_v37 = vadd.f32 %v12714_v13, %v20277_v49  ;;  %v12716_v42 = vpop.f32.mrb[25].mxu0  ;;  %13720 = vmatpush1.bf16.msra.mxu1 %v21781_v17  ;;  %v796_v49 = vld [vmem:[%s22772_s2 + $0x11b8] sm:$0xff] }
 0x8ca   : > { %v15598_v61 = vadd.f32 %v12716_v42, %v20279_v51  ;;  %v12718_v24 = vpop.f32.mrb[26].mxu0  ;;  %v804_v51 = vld [vmem:[%s22772_s2 + $0x11f8] sm:$0xff] }
 0x8cb   : > { %v15599_v4 = vadd.f32 %v12718_v24, %v20281_v55  ;;  %v12720_v41 = vpop.f32.mrb[27].mxu0  ;;  %v14811_v59 = vcombine.high %v796_v49, %v804_v51  ;;  %v14810_v31 = vcombine.low %v796_v49, %v804_v51 }
 0x8cc   : > { %v15600_v62 = vadd.f32 %v12720_v41, %v20283_v60 }
 0x8cd   : > { %v21797_v7 = vpack.c.bf16 %v15599_v4, %v15597_v37  ;;  %12983 = vmatmul.mubr.bf16.gmra.mrb[132].mxu0 %v14778_v14 }
 0x8ce   : > { %v21799_v58 = vpack.c.bf16 %v15600_v62, %v15598_v61  ;;  %12992 = vmatprep.mubr.bf16.mxu0 %v14795_v63 }
 0x8d0   : > { %v12724_v0 = vpop.f32.mrb[28].mxu0  ;;  %13721 = vmatprep.subr.bf16.mxu1 %v21799_v58 }
 0x8d1   : > { %v15601_v55 = vadd.f32 %v12724_v0, %v20297_v9  ;;  %v12726_v60 = vpop.f32.mrb[29].mxu0  ;;  %13722 = vmatpush1.bf16.msra.mxu1 %v21797_v7  ;;  %v812_v9 = vld [vmem:[%s22772_s2 + $0x1238] sm:$0xff] }
 0x8d2   : > { %v15602_v5 = vadd.f32 %v12726_v60, %v20299_v10  ;;  %v12728_v26 = vpop.f32.mrb[30].mxu0  ;;  %v820_v10 = vld [vmem:[%s22772_s2 + $0x1278] sm:$0xff] }
 0x8d3   : > { %v15603_v50 = vadd.f32 %v12728_v26, %v20301_v15  ;;  %v12730_v38 = vpop.f32.mrb[31].mxu0  ;;  %v14827_v37 = vcombine.high %v812_v9, %v820_v10  ;;  %v14826_v41 = vcombine.low %v812_v9, %v820_v10 }
 0x8d4   : > { %v15604_v53 = vadd.f32 %v12730_v38, %v20303_v19 }
 0x8d5   : > { %v21813_v48 = vpack.c.bf16 %v15603_v50, %v15601_v55  ;;  %12993 = vmatmul.mubr.bf16.gmra.mrb[136].mxu0 %v14794_v1 }
 0x8d6   : > { %v21815_v6 = vpack.c.bf16 %v15604_v53, %v15602_v5  ;;  %13002 = vmatprep.mubr.bf16.mxu0 %v14811_v59 }
 0x8d8   : > { %v12734_v47 = vpop.f32.mrb[32].mxu0  ;;  %13723 = vmatprep.subr.bf16.mxu1 %v21815_v6 }
 0x8d9   : > { %v15605_v15 = vadd.f32 %v12734_v47, %v20317_v2  ;;  %v12736_v19 = vpop.f32.mrb[33].mxu0  ;;  %13724 = vmatpush1.bf16.msra.mxu1 %v21813_v48  ;;  %v828_v2 = vld [vmem:[%s22772_s2 + $0x12b8] sm:$0xff]  ;;  %v23063_v47 = vld [vmem:[#allocation6_spill] sm:$0xff] }
 0x8da   : > { %v15606_v32 = vadd.f32 %v12736_v19, %v20319_v3  ;;  %v12738_v13 = vpop.f32.mrb[34].mxu0  ;;  %v836_v3 = vld [vmem:[%s22772_s2 + $0x12f8] sm:$0xff] }
 0x8db   : > { %v15607_v42 = vadd.f32 %v12738_v13, %v20321_v27  ;;  %v12740_v14 = vpop.f32.mrb[35].mxu0  ;;  %v14843_v51 = vcombine.high %v828_v2, %v836_v3  ;;  %v14842_v59 = vcombine.low %v828_v2, %v836_v3 }
 0x8dc   : > { %v15608_v61 = vadd.f32 %v12740_v14, %v20323_v30  ;;  %v23065_v14 = vld [vmem:[#allocation8_spill] sm:$0xff] }
 0x8dd   : > { %v21829_v24 = vpack.c.bf16 %v15607_v42, %v15605_v15  ;;  %13003 = vmatmul.mubr.bf16.gmra.mrb[140].mxu0 %v14810_v31 }
 0x8de   : > { %v21831_v63 = vpack.c.bf16 %v15608_v61, %v15606_v32  ;;  %13012 = vmatprep.mubr.bf16.mxu0 %v14827_v37 }
 0x8e0   : > { %v12744_v4 = vpop.f32.mrb[36].mxu0  ;;  %13725 = vmatprep.subr.bf16.mxu1 %v21831_v63 }
 0x8e1   : > { %v15609_v27 = vadd.f32 %v12744_v4, %v20337_v43  ;;  %v12746_v30 = vpop.f32.mrb[37].mxu0  ;;  %13726 = vmatpush1.bf16.msra.mxu1 %v21829_v24  ;;  %v844_v43 = vld [vmem:[%s22772_s2 + $0x1338] sm:$0xff] }
 0x8e2   : > { %v15610_v62 = vadd.f32 %v12746_v30, %v20339_v44  ;;  %v12748_v49 = vpop.f32.mrb[38].mxu0  ;;  %v852_v44 = vld [vmem:[%s22772_s2 + $0x1378] sm:$0xff] }
 0x8e3   : > { %v15611_v0 = vadd.f32 %v12748_v49, %v20341_v52  ;;  %v12750_v55 = vpop.f32.mrb[39].mxu0  ;;  %v14859_v53 = vcombine.high %v844_v43, %v852_v44  ;;  %v14858_v42 = vcombine.low %v844_v43, %v852_v44  ;;  %v23066_v4 = vld [vmem:[#allocation9_spill] sm:$0xff]  ;;  %v23068_v43 = vld [vmem:[#allocation11_spill] sm:$0xff] }
 0x8e4   : > { %v15612_v60 = vadd.f32 %v12750_v55, %v20343_v57  ;;  %v884_v55 = vld [vmem:[%s22772_s2 + $0x1478] sm:$0xff] }
 0x8e5   : > { %v21845_v1 = vpack.c.bf16 %v15611_v0, %v15609_v27  ;;  %13013 = vmatmul.mubr.bf16.gmra.mrb[144].mxu0 %v14826_v41  ;;  %v23067_v41 = vld [vmem:[#allocation10_spill] sm:$0xff]  ;;  %v876_v0 = vld [vmem:[%s22772_s2 + $0x1438] sm:$0xff] }
 0x8e6   : > { %v21847_v5 = vpack.c.bf16 %v15612_v60, %v15610_v62  ;;  %13022 = vmatprep.mubr.bf16.mxu0 %v14843_v51 }
 0x8e8   : > { %v12754_v26 = vpop.f32.mrb[40].mxu0  ;;  %13727 = vmatprep.subr.bf16.mxu1 %v21847_v5 }
 0x8e9   : > { %v15613_v52 = vadd.f32 %v12754_v26, %v20357_v11  ;;  %v12756_v57 = vpop.f32.mrb[41].mxu0  ;;  %13728 = vmatpush1.bf16.msra.mxu1 %v21845_v1  ;;  %v860_v11 = vld [vmem:[%s22772_s2 + $0x13b8] sm:$0xff] }
 0x8ea   : > { %v15614_v50 = vadd.f32 %v12756_v57, %v20359_v12  ;;  %v12758_v38 = vpop.f32.mrb[42].mxu0  ;;  %v868_v12 = vld [vmem:[%s22772_s2 + $0x13f8] sm:$0xff]  ;;  %v23069_v57 = vld [vmem:[#allocation12_spill] sm:$0xff] }
 0x8eb   : > { %v15615_v9 = vadd.f32 %v12758_v38, %v20361_v21  ;;  %v12760_v10 = vpop.f32.mrb[43].mxu0  ;;  %v23064_v21 = vld [vmem:[#allocation7_spill] sm:$0xff]  ;;  %v14875_v3 = vcombine.high %v860_v11, %v868_v12  ;;  %v14891_v38 = vcombine.high %v876_v0, %v884_v55 }
 0x8ec   : > { %v15616_v15 = vadd.f32 %v12760_v10, %v23063_v47  ;;  %v23071_v47 = vld [vmem:[#allocation14_spill] sm:$0xff] }
 0x8ed   : > { %v21861_v19 = vpack.c.bf16 %v15615_v9, %v15613_v52  ;;  %13023 = vmatmul.mubr.bf16.gmra.mrb[148].mxu0 %v14842_v59  ;;  %v14874_v52 = vcombine.low %v860_v11, %v868_v12  ;;  %v900_v11 = vld [vmem:[%s22772_s2 + $0x14f8] sm:$0xff] }
 0x8ee   : > { %v21863_v31 = vpack.c.bf16 %v15616_v15, %v15614_v50  ;;  %13032 = vmatprep.mubr.bf16.mxu0 %v14859_v53  ;;  %v23070_v53 = vld [vmem:[#allocation13_spill] sm:$0xff] }
 0x8f0   : > { %v12764_v32 = vpop.f32.mrb[44].mxu0  ;;  %13729 = vmatprep.subr.bf16.mxu1 %v21863_v31 }
 0x8f1   : > { %v15617_v13 = vadd.f32 %v12764_v32, %v23064_v21  ;;  %v12766_v37 = vpop.f32.mrb[45].mxu0  ;;  %13730 = vmatpush1.bf16.msra.mxu1 %v21861_v19 }
 0x8f2   : > { %v15618_v61 = vadd.f32 %v12766_v37, %v23065_v14  ;;  %v12768_v2 = vpop.f32.mrb[46].mxu0  ;;  %v23072_v37 = vld [vmem:[#allocation15_spill] sm:$0xff] }
 0x8f3   : > { %v15619_v27 = vadd.f32 %v12768_v2, %v23066_v4  ;;  %v12770_v30 = vpop.f32.mrb[47].mxu0  ;;  %v23073_v2 = vld [vmem:[#allocation16_spill] sm:$0xff] }
 0x8f4   : > { %v15620_v62 = vadd.f32 %v12770_v30, %v23067_v41  ;;  %v23074_v30 = vld [vmem:[#allocation17_spill] sm:$0xff] }
 0x8f5   : > { %v21877_v49 = vpack.c.bf16 %v15619_v27, %v15617_v13  ;;  %13033 = vmatmul.mubr.bf16.gmra.mrb[152].mxu0 %v14858_v42  ;;  %v892_v13 = vld [vmem:[%s22772_s2 + $0x14b8] sm:$0xff] }
 0x8f6   : > { %v21879_v51 = vpack.c.bf16 %v15620_v62, %v15618_v61  ;;  %13042 = vmatprep.mubr.bf16.mxu0 %v14875_v3  ;;  %v14890_v61 = vcombine.low %v876_v0, %v884_v55  ;;  %v14907_v27 = vcombine.high %v892_v13, %v900_v11  ;;  %v916_v0 = vld [vmem:[%s22772_s2 + $0x1578] sm:$0xff] }
 0x8f8   : > { %v12774_v60 = vpop.f32.mrb[48].mxu0  ;;  %13731 = vmatprep.subr.bf16.mxu1 %v21879_v51 }
 0x8f9   : > { %v15621_v44 = vadd.f32 %v12774_v60, %v23068_v43  ;;  %v12776_v26 = vpop.f32.mrb[49].mxu0  ;;  %13732 = vmatpush1.bf16.msra.mxu1 %v21877_v49  ;;  %v23075_v60 = vld [vmem:[#allocation18_spill] sm:$0xff] }
 0x8fa   : > { %v15622_v59 = vadd.f32 %v12776_v26, %v23069_v57  ;;  %v12778_v50 = vpop.f32.mrb[50].mxu0  ;;  %v23076_v57 = vld [vmem:[#allocation19_spill] sm:$0xff] }
 0x8fb   : > { %v15623_v9 = vadd.f32 %v12778_v50, %v23070_v53  ;;  %v12780_v10 = vpop.f32.mrb[51].mxu0  ;;  %v23077_v53 = vld [vmem:[#allocation20_spill] sm:$0xff] }
 0x8fc   : > { %v15624_v15 = vadd.f32 %v12780_v10, %v23071_v47 }
 0x8fd   : > { %v21893_v32 = vpack.c.bf16 %v15623_v9, %v15621_v44  ;;  %13043 = vmatmul.mubr.bf16.gmra.mrb[156].mxu0 %v14874_v52  ;;  %v908_v52 = vld [vmem:[%s22772_s2 + $0x1538] sm:$0xff] }
 0x8fe   : > { %v21895_v21 = vpack.c.bf16 %v15624_v15, %v15622_v59  ;;  %13052 = vmatprep.mubr.bf16.mxu0 %v14891_v38  ;;  %v14906_v38 = vcombine.low %v892_v13, %v900_v11  ;;  %v14923_v47 = vcombine.high %v908_v52, %v916_v0  ;;  %v23078_v15 = vld [vmem:[#allocation21_spill] sm:$0xff] }
 0x8ff   : > { %v932_v13 = vld [vmem:[%s22772_s2 + $0x15f8] sm:$0xff] }
 0x900   : > { %v12784_v12 = vpop.f32.mrb[52].mxu0  ;;  %13733 = vmatprep.subr.bf16.mxu1 %v21895_v21 }
 0x901   : > { %v15625_v42 = vadd.f32 %v12784_v12, %v23072_v37  ;;  %v12786_v14 = vpop.f32.mrb[53].mxu0  ;;  %13734 = vmatpush1.bf16.msra.mxu1 %v21893_v32 }
 0x902   : > { %v15626_v3 = vadd.f32 %v12786_v14, %v23073_v2  ;;  %v12788_v4 = vpop.f32.mrb[54].mxu0 }
 0x903   : > { %v15627_v41 = vadd.f32 %v12788_v4, %v23074_v30  ;;  %v12790_v62 = vpop.f32.mrb[55].mxu0  ;;  %v23080_v4 = vld [vmem:[#allocation23_spill] sm:$0xff] }
 0x904   : > { %v15628_v43 = vadd.f32 %v12790_v62, %v23075_v60  ;;  %v23081_v62 = vld [vmem:[#allocation24_spill] sm:$0xff] }
 0x905   : > { %v21909_v44 = vpack.c.bf16 %v15627_v41, %v15625_v42  ;;  %13053 = vmatmul.mubr.bf16.gmra.mrb[160].mxu0 %v14890_v61  ;;  %v23079_v42 = vld [vmem:[#allocation22_spill] sm:$0xff]  ;;  %v14922_v41 = vcombine.low %v908_v52, %v916_v0  ;;  %v948_v52 = vld [vmem:[%s22772_s2 + $0x1678] sm:$0xff] }
 0x906   : > { %v21911_v26 = vpack.c.bf16 %v15628_v43, %v15626_v3  ;;  %13062 = vmatprep.mubr.bf16.mxu0 %v14907_v27  ;;  %v924_v3 = vld [vmem:[%s22772_s2 + $0x15b8] sm:$0xff] }
 0x908   : > { %v12794_v55 = vpop.f32.mrb[56].mxu0  ;;  %13735 = vmatprep.subr.bf16.mxu1 %v21911_v26 }
 0x909   : > { %v15629_v59 = vadd.f32 %v12794_v55, %v23076_v57  ;;  %v12796_v50 = vpop.f32.mrb[57].mxu0  ;;  %13736 = vmatpush1.bf16.msra.mxu1 %v21909_v44  ;;  %v14939_v55 = vcombine.high %v924_v3, %v932_v13  ;;  %v23082_v57 = vld [vmem:[#allocation25_spill] sm:$0xff] }
 0x90a   : > { %v15630_v9 = vadd.f32 %v12796_v50, %v23077_v53  ;;  %v12798_v10 = vpop.f32.mrb[58].mxu0 }
 0x90b   : > { %v15631_v12 = vadd.f32 %v12798_v10, %v23078_v15  ;;  %v12800_v37 = vpop.f32.mrb[59].mxu0  ;;  %v15516_v15 = vcombine.low %v21691_v23, %v21691_v23  ;;  %v21962_v23 = vld [vmem:[%s21686_s20 + $0x8] sm:$0xff] }
 0x90c   : > { %v15632_v14 = vadd.f32 %v12800_v37, %v23079_v42  ;;  %14099 = vst [vmem:[%s21711_s5 + $0x8] sm:$0xff] %v21962_v23 }
 0x90d   : > { %v21925_v61 = vpack.c.bf16 %v15631_v12, %v15629_v59  ;;  %13063 = vmatmul.mubr.bf16.gmra.mrb[164].mxu0 %v14906_v38  ;;  %v23083_v38 = vld [vmem:[#allocation26_spill] sm:$0xff]  ;;  %v23084_v12 = vld [vmem:[#allocation27_spill] sm:$0xff] }
 0x90e   : > { %v21927_v2 = vpack.c.bf16 %v15632_v14, %v15630_v9  ;;  %13072 = vmatprep.mubr.bf16.mxu0 %v14923_v47  ;;  %v940_v47 = vld [vmem:[%s22772_s2 + $0x1638] sm:$0xff]  ;;  %v14938_v14 = vcombine.low %v924_v3, %v932_v13  ;;  %v15519_v3 = vcombine.high %v21962_v23, %v21962_v23 }
 0x90f   : > { %v956_v13 = vld [vmem:[%s22772_s2 + $0x16b8] sm:$0xff] }
 0x910   : > { %v12804_v11 = vpop.f32.mrb[60].mxu0  ;;  %13737 = vmatprep.subr.bf16.mxu1 %v21927_v2 }
 0x911   : > { %v15633_v27 = vadd.f32 %v12804_v11, %v23080_v4  ;;  %v12806_v30 = vpop.f32.mrb[61].mxu0  ;;  %13738 = vmatpush1.bf16.msra.mxu1 %v21925_v61  ;;  %v23085_v11 = vld [vmem:[#allocation28_spill] sm:$0xff] }
 0x912   : > { %v15634_v60 = vadd.f32 %v12806_v30, %v23081_v62  ;;  %v12808_v43 = vpop.f32.mrb[62].mxu0  ;;  %v14955_v30 = vcombine.high %v940_v47, %v948_v52 }
 0x913   : > { %v15635_v59 = vadd.f32 %v12808_v43, %v23082_v57  ;;  %v12810_v50 = vpop.f32.mrb[63].mxu0  ;;  %v23087_v43 = vld [vmem:[#allocation30_spill] sm:$0xff] }
 0x914   : > { %v15636_v53 = vadd.f32 %v12810_v50, %v23083_v38  ;;  %v964_v50 = vld [vmem:[%s22772_s2 + $0x16f8] sm:$0xff] }
 0x915   : > { %v21941_v9 = vpack.c.bf16 %v15635_v59, %v15633_v27  ;;  %13073 = vmatmul.mubr.bf16.gmra.mrb[168].mxu0 %v14922_v41  ;;  %v23086_v41 = vld [vmem:[#allocation29_spill] sm:$0xff] }
 0x916   : > { %v21943_v10 = vpack.c.bf16 %v15636_v53, %v15634_v60  ;;  %13082 = vmatprep.mubr.bf16.mxu0 %v14939_v55  ;;  %v23088_v53 = vld [vmem:[#allocation31_spill] sm:$0xff] }
 0x918   : > { %v12814_v0 = vpop.f32.mrb[64].mxu0  ;;  %13739 = vmatprep.subr.bf16.mxu1 %v21943_v10 }
 0x919   : > { %v15637_v37 = vadd.f32 %v12814_v0, %v23084_v12  ;;  %v12816_v42 = vpop.f32.mrb[65].mxu0  ;;  %13740 = vmatpush1.bf16.msra.mxu1 %v21941_v9  ;;  %v14954_v12 = vcombine.low %v940_v47, %v948_v52  ;;  %v980_v47 = vld [vmem:[%s22772_s2 + $0x1778] sm:$0xff] }
 0x91a   : > { %v15638_v4 = vadd.f32 %v12816_v42, %v23085_v11  ;;  %v12818_v27 = vpop.f32.mrb[66].mxu0  ;;  %v14971_v11 = vcombine.high %v956_v13, %v964_v50 }
 0x91b   : > { %v15639_v62 = vadd.f32 %v12818_v27, %v23086_v41  ;;  %v12820_v60 = vpop.f32.mrb[67].mxu0  ;;  %v23091_v41 = vld [vmem:[#allocation34_spill] sm:$0xff] }
 0x91c   : > { %v15640_v55 = vadd.f32 %v12820_v60, %v23087_v43  ;;  %13742 = vmatmul.mubr.bf16.vlgmr.msra.gmra.mrb[0].mxu1 %v15516_v15 }
 0x91d   : > { %v21959_v57 = vpack.c.bf16 %v15639_v62, %v15637_v37  ;;  %13083 = vmatmul.mubr.bf16.gmra.mrb[172].mxu0 %v14938_v14  ;;  %13782 = vmatprep.mubr.bf16.mxu1 %v15519_v3  ;;  %v23089_v37 = vld [vmem:[#allocation32_spill] sm:$0xff]  ;;  %v23094_v3 = vld [vmem:[#allocation35_spill] sm:$0xff] }
 0x91e   : > { %v21964_v59 = vpack.c.bf16 %v15640_v55, %v15638_v4  ;;  %13092 = vmatprep.mubr.bf16.mxu0 %v14955_v30  ;;  %v23090_v4 = vld [vmem:[#allocation33_spill] sm:$0xff] }
 0x91f   : > { %v972_v55 = vld [vmem:[%s22772_s2 + $0x1738] sm:$0xff] }
 0x920   : > { %v12824_v38 = vpop.f32.mrb[68].mxu0  ;;  %13750 = vmatprep.subr.bf16.mxu1 %v21964_v59 }
 0x921   : > { %v15641_v0 = vadd.f32 %v12824_v38, %v23088_v53  ;;  %v12826_v15 = vpop.f32.mrb[69].mxu0  ;;  %13751 = vmatpush1.bf16.msra.mxu1 %v21959_v57 }
 0x922   : > { %v15642_v42 = vadd.f32 %v12826_v15, %v23089_v37  ;;  %v12828_v14 = vpop.f32.mrb[70].mxu0  ;;  %v23095_v15 = vld [vmem:[#allocation36_spill] sm:$0xff] }
 0x923   : > { %v15643_v27 = vadd.f32 %v12828_v14, %v23090_v4  ;;  %v12830_v30 = vpop.f32.mrb[71].mxu0  ;;  %v23096_v14 = vld [vmem:[#allocation37_spill] sm:$0xff] }
 0x924   : > { %v15644_v62 = vadd.f32 %v12830_v30, %v23091_v41 }
 0x925   : > { %v21982_v60 = vpack.c.bf16 %v15643_v27, %v15641_v0  ;;  %13093 = vmatmul.mubr.bf16.gmra.mrb[176].mxu0 %v14954_v12  ;;  %v14970_v0 = vcombine.low %v956_v13, %v964_v50  ;;  %v23097_v27 = vld [vmem:[#allocation38_spill] sm:$0xff]  ;;  %v996_v13 = vld [vmem:[%s22772_s2 + $0x17f8] sm:$0xff] }
 0x926   : > { %v21984_v43 = vpack.c.bf16 %v15644_v62, %v15642_v42  ;;  %13102 = vmatprep.mubr.bf16.mxu0 %v14971_v11  ;;  %v14987_v42 = vcombine.high %v972_v55, %v980_v47 }
 0x927   : > { %23092 = vst [vmem:[#allocation6_spill] sm:$0xff] %v21982_v60 }
 0x928   : > { %23093 = vst [vmem:[#allocation7_spill] sm:$0xff] %v21984_v43  ;;  %v12834_v52 = vpop.f32.mrb[72].mxu0  ;;  %13752 = vmatprep.subr.bf16.mxu1 %v21984_v43 }
 0x929   : > { %v15645_v38 = vadd.f32 %v12834_v52, %v23094_v3  ;;  %v12836_v53 = vpop.f32.mrb[73].mxu0  ;;  %13753 = vmatpush1.bf16.msra.mxu1 %v21982_v60  ;;  %v988_v52 = vld [vmem:[%s22772_s2 + $0x17b8] sm:$0xff]  ;;  %v23098_v3 = vld [vmem:[#allocation39_spill] sm:$0xff] }
 0x92a   : > { %v15646_v12 = vadd.f32 %v12836_v53, %v23095_v15  ;;  %v12838_v37 = vpop.f32.mrb[74].mxu0 }
 0x92b   : > { %v15647_v11 = vadd.f32 %v12838_v37, %v23096_v14  ;;  %v12840_v4 = vpop.f32.mrb[75].mxu0  ;;  %v23100_v14 = vld [vmem:[#allocation41_spill] sm:$0xff] }
 0x92c   : > { %v15648_v30 = vadd.f32 %v12840_v4, %v23097_v27  ;;  %v23101_v27 = vld [vmem:[#allocation42_spill] sm:$0xff] }
 0x92d   : > { %v21998_v41 = vpack.c.bf16 %v15647_v11, %v15645_v38  ;;  %13103 = vmatmul.mubr.bf16.gmra.mrb[180].mxu0 %v14970_v0  ;;  %v14986_v38 = vcombine.low %v972_v55, %v980_v47  ;;  %v23099_v0 = vld [vmem:[#allocation40_spill] sm:$0xff]  ;;  %v1012_v55 = vld [vmem:[%s22772_s2 + $0x1878] sm:$0xff] }
 0x92e   : > { %v22000_v62 = vpack.c.bf16 %v15648_v30, %v15646_v12  ;;  %13112 = vmatprep.mubr.bf16.mxu0 %v14987_v42  ;;  %v15003_v42 = vcombine.high %v988_v52, %v996_v13 }
 0x930   : > { %v12844_v50 = vpop.f32.mrb[76].mxu0  ;;  %13754 = vmatprep.subr.bf16.mxu1 %v22000_v62 }
 0x931   : > { %v15649_v53 = vadd.f32 %v12844_v50, %v23098_v3  ;;  %v12846_v15 = vpop.f32.mrb[77].mxu0  ;;  %13755 = vmatpush1.bf16.msra.mxu1 %v21998_v41  ;;  %v1004_v50 = vld [vmem:[%s22772_s2 + $0x1838] sm:$0xff] }
 0x932   : > { %v15650_v12 = vadd.f32 %v12846_v15, %v23099_v0  ;;  %v12848_v37 = vpop.f32.mrb[78].mxu0 }
 0x933   : > { %v15651_v11 = vadd.f32 %v12848_v37, %v23100_v14  ;;  %v12850_v4 = vpop.f32.mrb[79].mxu0  ;;  %v23103_v14 = vld [vmem:[#allocation43_spill] sm:$0xff] }
 0x934   : > { %v15652_v30 = vadd.f32 %v12850_v4, %v23101_v27 }
 0x935   : > { %v22014_v60 = vpack.c.bf16 %v15651_v11, %v15649_v53  ;;  %13113 = vmatmul.mubr.bf16.gmra.mrb[184].mxu0 %v14986_v38  ;;  %v15002_v53 = vcombine.low %v988_v52, %v996_v13 }
 0x936   : > { %v22016_v43 = vpack.c.bf16 %v15652_v30, %v15650_v12  ;;  %13122 = vmatprep.mubr.bf16.mxu0 %v15003_v42  ;;  %v15019_v12 = vcombine.high %v1004_v50, %v1012_v55 }
 0x937   : > { %23102 = vst [vmem:[#allocation8_spill] sm:$0xff] %v22014_v60 }
 0x938   : > { %v12854_v47 = vpop.f32.mrb[80].mxu0  ;;  %13756 = vmatprep.subr.bf16.mxu1 %v22016_v43 }
 0x939   : > { %v15653_v3 = vadd.f32 %v12854_v47, %v20564_v29  ;;  %v12856_v15 = vpop.f32.mrb[81].mxu0  ;;  %13757 = vmatpush1.bf16.msra.mxu1 %v22014_v60  ;;  %v1020_v29 = vld [vmem:[%s22772_s2 + $0x18b8] sm:$0xff]  ;;  %v15018_v47 = vcombine.low %v1004_v50, %v1012_v55 }
 0x93a   : > { %v15654_v38 = vadd.f32 %v12856_v15, %v20567_v18  ;;  %v12858_v0 = vpop.f32.mrb[82].mxu0  ;;  %v1028_v18 = vld [vmem:[%s22772_s2 + $0x18f8] sm:$0xff] }
 0x93b   : > { %v15655_v37 = vadd.f32 %v12858_v0, %v20569_v25  ;;  %v12860_v42 = vpop.f32.mrb[83].mxu0  ;;  %v23106_v25 = vld [vmem:[#allocation44_spill] sm:$0xff]  ;;  %v23108_v0 = vld [vmem:[#allocation46_spill] sm:$0xff]  ;;  %v1044_v50 = vld [vmem:[%s22772_s2 + $0x1978] sm:$0xff] }
 0x93c   : > { %v15656_v11 = vadd.f32 %v12860_v42, %v23103_v14  ;;  %v23109_v42 = vld [vmem:[#allocation47_spill] sm:$0xff] }
 0x93d   : > { %v22030_v4 = vpack.c.bf16 %v15655_v37, %v15653_v3  ;;  %13123 = vmatmul.mubr.bf16.gmra.mrb[188].mxu0 %v15002_v53  ;;  %v23107_v3 = vld [vmem:[#allocation45_spill] sm:$0xff] }
 0x93e   : > { %v22032_v27 = vpack.c.bf16 %v15656_v11, %v15654_v38  ;;  %13132 = vmatprep.mubr.bf16.mxu0 %v15019_v12  ;;  %v15035_v38 = vcombine.high %v1020_v29, %v1028_v18 }
 0x93f   : > { %23104 = vst [vmem:[#allocation9_spill] sm:$0xff] %v22030_v4 }
 0x940   : > { %23105 = vst [vmem:[#allocation10_spill] sm:$0xff] %v22032_v27  ;;  %v12864_v52 = vpop.f32.mrb[84].mxu0  ;;  %13758 = vmatprep.subr.bf16.mxu1 %v22032_v27 }
 0x941   : > { %v15657_v13 = vadd.f32 %v12864_v52, %v23106_v25  ;;  %v12866_v30 = vpop.f32.mrb[85].mxu0  ;;  %13759 = vmatpush1.bf16.msra.mxu1 %v22030_v4  ;;  %v1036_v52 = vld [vmem:[%s22772_s2 + $0x1938] sm:$0xff]  ;;  %v23112_v25 = vld [vmem:[#allocation48_spill] sm:$0xff] }
 0x942   : > { %v15658_v15 = vadd.f32 %v12866_v30, %v23107_v3  ;;  %v12868_v53 = vpop.f32.mrb[86].mxu0 }
 0x943   : > { %v15659_v12 = vadd.f32 %v12868_v53, %v23108_v0  ;;  %v12870_v37 = vpop.f32.mrb[87].mxu0  ;;  %v23114_v0 = vld [vmem:[#allocation50_spill] sm:$0xff] }
 0x944   : > { %v15660_v14 = vadd.f32 %v12870_v37, %v23109_v42  ;;  %v23115_v42 = vld [vmem:[#allocation51_spill] sm:$0xff] }
 0x945   : > { %v22046_v11 = vpack.c.bf16 %v15659_v12, %v15657_v13  ;;  %13133 = vmatmul.mubr.bf16.gmra.mrb[192].mxu0 %v15018_v47  ;;  %v15034_v13 = vcombine.low %v1020_v29, %v1028_v18  ;;  %v23113_v47 = vld [vmem:[#allocation49_spill] sm:$0xff] }
 0x946   : > { %v22048_v60 = vpack.c.bf16 %v15660_v14, %v15658_v15  ;;  %13142 = vmatprep.mubr.bf16.mxu0 %v15035_v38  ;;  %v15051_v38 = vcombine.high %v1036_v52, %v1044_v50  ;;  %v1060_v29 = vld [vmem:[%s22772_s2 + $0x19f8] sm:$0xff] }
 0x947   : > { %23110 = vst [vmem:[#allocation11_spill] sm:$0xff] %v22046_v11 }
 0x948   : > { %23111 = vst [vmem:[#allocation12_spill] sm:$0xff] %v22048_v60  ;;  %v12874_v55 = vpop.f32.mrb[88].mxu0  ;;  %13760 = vmatprep.subr.bf16.mxu1 %v22048_v60 }
 0x949   : > { %v15661_v30 = vadd.f32 %v12874_v55, %v23112_v25  ;;  %v12876_v3 = vpop.f32.mrb[89].mxu0  ;;  %13761 = vmatpush1.bf16.msra.mxu1 %v22046_v11  ;;  %v1052_v55 = vld [vmem:[%s22772_s2 + $0x19b8] sm:$0xff]  ;;  %v23118_v25 = vld [vmem:[#allocation52_spill] sm:$0xff] }
 0x94a   : > { %v15662_v15 = vadd.f32 %v12876_v3, %v23113_v47  ;;  %v12878_v53 = vpop.f32.mrb[90].mxu0 }
 0x94b   : > { %v15663_v12 = vadd.f32 %v12878_v53, %v23114_v0  ;;  %v12880_v37 = vpop.f32.mrb[91].mxu0  ;;  %v23120_v0 = vld [vmem:[#allocation54_spill] sm:$0xff] }
 0x94c   : > { %v15664_v14 = vadd.f32 %v12880_v37, %v23115_v42  ;;  %v23121_v42 = vld [vmem:[#allocation55_spill] sm:$0xff] }
 0x94d   : > { %v22062_v4 = vpack.c.bf16 %v15663_v12, %v15661_v30  ;;  %13143 = vmatmul.mubr.bf16.gmra.mrb[196].mxu0 %v15034_v13  ;;  %v15050_v30 = vcombine.low %v1036_v52, %v1044_v50  ;;  %v23119_v13 = vld [vmem:[#allocation53_spill] sm:$0xff] }
 0x94e   : > { %v22064_v27 = vpack.c.bf16 %v15664_v14, %v15662_v15  ;;  %13152 = vmatprep.mubr.bf16.mxu0 %v15051_v38  ;;  %v15067_v38 = vcombine.high %v1052_v55, %v1060_v29  ;;  %v1076_v52 = vld [vmem:[%s22772_s2 + $0x1a78] sm:$0xff] }
 0x94f   : > { %23116 = vst [vmem:[#allocation13_spill] sm:$0xff] %v22062_v4 }
 0x950   : > { %23117 = vst [vmem:[#allocation14_spill] sm:$0xff] %v22064_v27  ;;  %v12884_v18 = vpop.f32.mrb[92].mxu0  ;;  %13762 = vmatprep.subr.bf16.mxu1 %v22064_v27 }
 0x951   : > { %v15665_v3 = vadd.f32 %v12884_v18, %v23118_v25  ;;  %v12886_v47 = vpop.f32.mrb[93].mxu0  ;;  %13763 = vmatpush1.bf16.msra.mxu1 %v22062_v4  ;;  %v1068_v18 = vld [vmem:[%s22772_s2 + $0x1a38] sm:$0xff]  ;;  %v23124_v25 = vld [vmem:[#allocation56_spill] sm:$0xff] }
 0x952   : > { %v15666_v15 = vadd.f32 %v12886_v47, %v23119_v13  ;;  %v12888_v53 = vpop.f32.mrb[94].mxu0 }
 0x953   : > { %v15667_v12 = vadd.f32 %v12888_v53, %v23120_v0  ;;  %v12890_v37 = vpop.f32.mrb[95].mxu0  ;;  %v23126_v0 = vld [vmem:[#allocation58_spill] sm:$0xff] }
 0x954   : > { %v15668_v14 = vadd.f32 %v12890_v37, %v23121_v42  ;;  %v23127_v42 = vld [vmem:[#allocation59_spill] sm:$0xff] }
 0x955   : > { %v22078_v11 = vpack.c.bf16 %v15667_v12, %v15665_v3  ;;  %13153 = vmatmul.mubr.bf16.gmra.mrb[200].mxu0 %v15050_v30  ;;  %v15066_v3 = vcombine.low %v1052_v55, %v1060_v29  ;;  %v23125_v30 = vld [vmem:[#allocation57_spill] sm:$0xff] }
 0x956   : > { %v22080_v60 = vpack.c.bf16 %v15668_v14, %v15666_v15  ;;  %13162 = vmatprep.mubr.bf16.mxu0 %v15067_v38  ;;  %v15083_v38 = vcombine.high %v1068_v18, %v1076_v52  ;;  %v1092_v55 = vld [vmem:[%s22772_s2 + $0x1af8] sm:$0xff] }
 0x957   : > { %23122 = vst [vmem:[#allocation15_spill] sm:$0xff] %v22078_v11 }
 0x958   : > { %23123 = vst [vmem:[#allocation16_spill] sm:$0xff] %v22080_v60  ;;  %v12894_v50 = vpop.f32.mrb[96].mxu0  ;;  %13764 = vmatprep.subr.bf16.mxu1 %v22080_v60 }
 0x959   : > { %v15669_v47 = vadd.f32 %v12894_v50, %v23124_v25  ;;  %v12896_v13 = vpop.f32.mrb[97].mxu0  ;;  %13765 = vmatpush1.bf16.msra.mxu1 %v22078_v11  ;;  %v1084_v50 = vld [vmem:[%s22772_s2 + $0x1ab8] sm:$0xff]  ;;  %v23130_v25 = vld [vmem:[#allocation60_spill] sm:$0xff] }
 0x95a   : > { %v15670_v15 = vadd.f32 %v12896_v13, %v23125_v30  ;;  %v12898_v53 = vpop.f32.mrb[98].mxu0 }
 0x95b   : > { %v15671_v12 = vadd.f32 %v12898_v53, %v23126_v0  ;;  %v12900_v37 = vpop.f32.mrb[99].mxu0  ;;  %v23132_v0 = vld [vmem:[#allocation62_spill] sm:$0xff] }
 0x95c   : > { %v15672_v14 = vadd.f32 %v12900_v37, %v23127_v42  ;;  %v23133_v42 = vld [vmem:[#allocation63_spill] sm:$0xff] }
 0x95d   : > { %v22094_v4 = vpack.c.bf16 %v15671_v12, %v15669_v47  ;;  %13163 = vmatmul.mubr.bf16.gmra.mrb[204].mxu0 %v15066_v3  ;;  %v15082_v47 = vcombine.low %v1068_v18, %v1076_v52  ;;  %v23131_v3 = vld [vmem:[#allocation61_spill] sm:$0xff] }
 0x95e   : > { %v22096_v27 = vpack.c.bf16 %v15672_v14, %v15670_v15  ;;  %13172 = vmatprep.mubr.bf16.mxu0 %v15083_v38  ;;  %v15099_v38 = vcombine.high %v1084_v50, %v1092_v55  ;;  %v1108_v18 = vld [vmem:[%s22772_s2 + $0x1b78] sm:$0xff] }
 0x95f   : > { %23128 = vst [vmem:[#allocation17_spill] sm:$0xff] %v22094_v4 }
 0x960   : > { %23129 = vst [vmem:[#allocation18_spill] sm:$0xff] %v22096_v27  ;;  %v12904_v29 = vpop.f32.mrb[100].mxu0  ;;  %13766 = vmatprep.subr.bf16.mxu1 %v22096_v27 }
 0x961   : > { %v15673_v13 = vadd.f32 %v12904_v29, %v23130_v25  ;;  %v12906_v30 = vpop.f32.mrb[101].mxu0  ;;  %13767 = vmatpush1.bf16.msra.mxu1 %v22094_v4  ;;  %v1100_v29 = vld [vmem:[%s22772_s2 + $0x1b38] sm:$0xff]  ;;  %v23136_v25 = vld [vmem:[#allocation64_spill] sm:$0xff] }
 0x962   : > { %v15674_v15 = vadd.f32 %v12906_v30, %v23131_v3  ;;  %v12908_v53 = vpop.f32.mrb[102].mxu0 }
 0x963   : > { %v15675_v12 = vadd.f32 %v12908_v53, %v23132_v0  ;;  %v12910_v37 = vpop.f32.mrb[103].mxu0  ;;  %v23138_v0 = vld [vmem:[#allocation66_spill] sm:$0xff] }
 0x964   : > { %v15676_v14 = vadd.f32 %v12910_v37, %v23133_v42  ;;  %v23139_v42 = vld [vmem:[#allocation67_spill] sm:$0xff] }
 0x965   : > { %v22110_v11 = vpack.c.bf16 %v15675_v12, %v15673_v13  ;;  %13173 = vmatmul.mubr.bf16.gmra.mrb[208].mxu0 %v15082_v47  ;;  %v15098_v13 = vcombine.low %v1084_v50, %v1092_v55  ;;  %v23137_v47 = vld [vmem:[#allocation65_spill] sm:$0xff] }
 0x966   : > { %v22112_v60 = vpack.c.bf16 %v15676_v14, %v15674_v15  ;;  %13182 = vmatprep.mubr.bf16.mxu0 %v15099_v38  ;;  %v15115_v38 = vcombine.high %v1100_v29, %v1108_v18  ;;  %v1124_v50 = vld [vmem:[%s22772_s2 + $0x1bf8] sm:$0xff] }
 0x967   : > { %23134 = vst [vmem:[#allocation19_spill] sm:$0xff] %v22110_v11 }
 0x968   : > { %23135 = vst [vmem:[#allocation20_spill] sm:$0xff] %v22112_v60  ;;  %v12914_v52 = vpop.f32.mrb[104].mxu0  ;;  %13768 = vmatprep.subr.bf16.mxu1 %v22112_v60 }
 0x969   : > { %v15677_v30 = vadd.f32 %v12914_v52, %v23136_v25  ;;  %v12916_v3 = vpop.f32.mrb[105].mxu0  ;;  %13769 = vmatpush1.bf16.msra.mxu1 %v22110_v11  ;;  %v1116_v52 = vld [vmem:[%s22772_s2 + $0x1bb8] sm:$0xff]  ;;  %v23142_v25 = vld [vmem:[#allocation68_spill] sm:$0xff] }
 0x96a   : > { %v15678_v15 = vadd.f32 %v12916_v3, %v23137_v47  ;;  %v12918_v53 = vpop.f32.mrb[106].mxu0 }
 0x96b   : > { %v15679_v12 = vadd.f32 %v12918_v53, %v23138_v0  ;;  %v12920_v37 = vpop.f32.mrb[107].mxu0  ;;  %v23144_v0 = vld [vmem:[#allocation70_spill] sm:$0xff] }
 0x96c   : > { %v15680_v14 = vadd.f32 %v12920_v37, %v23139_v42  ;;  %v23145_v42 = vld [vmem:[#allocation71_spill] sm:$0xff] }
 0x96d   : > { %v22126_v4 = vpack.c.bf16 %v15679_v12, %v15677_v30  ;;  %13183 = vmatmul.mubr.bf16.gmra.mrb[212].mxu0 %v15098_v13  ;;  %v15114_v30 = vcombine.low %v1100_v29, %v1108_v18  ;;  %v23143_v13 = vld [vmem:[#allocation69_spill] sm:$0xff] }
 0x96e   : > { %v22128_v27 = vpack.c.bf16 %v15680_v14, %v15678_v15  ;;  %13192 = vmatprep.mubr.bf16.mxu0 %v15115_v38  ;;  %v15131_v38 = vcombine.high %v1116_v52, %v1124_v50  ;;  %v1140_v29 = vld [vmem:[%s22772_s2 + $0x1c78] sm:$0xff] }
 0x96f   : > { %23140 = vst [vmem:[#allocation21_spill] sm:$0xff] %v22126_v4 }
 0x970   : > { %23141 = vst [vmem:[#allocation22_spill] sm:$0xff] %v22128_v27  ;;  %v12924_v55 = vpop.f32.mrb[108].mxu0  ;;  %13770 = vmatprep.subr.bf16.mxu1 %v22128_v27 }
 0x971   : > { %v15681_v3 = vadd.f32 %v12924_v55, %v23142_v25  ;;  %v12926_v47 = vpop.f32.mrb[109].mxu0  ;;  %13771 = vmatpush1.bf16.msra.mxu1 %v22126_v4  ;;  %v1132_v55 = vld [vmem:[%s22772_s2 + $0x1c38] sm:$0xff]  ;;  %v23148_v25 = vld [vmem:[#allocation72_spill] sm:$0xff] }
 0x972   : > { %v15682_v15 = vadd.f32 %v12926_v47, %v23143_v13  ;;  %v12928_v53 = vpop.f32.mrb[110].mxu0 }
 0x973   : > { %v15683_v12 = vadd.f32 %v12928_v53, %v23144_v0  ;;  %v12930_v37 = vpop.f32.mrb[111].mxu0  ;;  %v23150_v0 = vld [vmem:[#allocation74_spill] sm:$0xff] }
 0x974   : > { %v15684_v14 = vadd.f32 %v12930_v37, %v23145_v42  ;;  %v23151_v42 = vld [vmem:[#allocation75_spill] sm:$0xff] }
 0x975   : > { %v22142_v11 = vpack.c.bf16 %v15683_v12, %v15681_v3  ;;  %13193 = vmatmul.mubr.bf16.gmra.mrb[216].mxu0 %v15114_v30  ;;  %v15130_v3 = vcombine.low %v1116_v52, %v1124_v50  ;;  %v23149_v30 = vld [vmem:[#allocation73_spill] sm:$0xff] }
 0x976   : > { %v22144_v60 = vpack.c.bf16 %v15684_v14, %v15682_v15  ;;  %13202 = vmatprep.mubr.bf16.mxu0 %v15131_v38  ;;  %v15147_v38 = vcombine.high %v1132_v55, %v1140_v29  ;;  %v1156_v52 = vld [vmem:[%s22772_s2 + $0x1cf8] sm:$0xff] }
 0x977   : > { %23146 = vst [vmem:[#allocation23_spill] sm:$0xff] %v22142_v11 }
 0x978   : > { %23147 = vst [vmem:[#allocation24_spill] sm:$0xff] %v22144_v60  ;;  %v12934_v18 = vpop.f32.mrb[112].mxu0  ;;  %13772 = vmatprep.subr.bf16.mxu1 %v22144_v60 }
 0x979   : > { %v15685_v47 = vadd.f32 %v12934_v18, %v23148_v25  ;;  %v12936_v13 = vpop.f32.mrb[113].mxu0  ;;  %13773 = vmatpush1.bf16.msra.mxu1 %v22142_v11  ;;  %v1148_v18 = vld [vmem:[%s22772_s2 + $0x1cb8] sm:$0xff]  ;;  %v23154_v25 = vld [vmem:[#allocation76_spill] sm:$0xff] }
 0x97a   : > { %v15686_v15 = vadd.f32 %v12936_v13, %v23149_v30  ;;  %v12938_v53 = vpop.f32.mrb[114].mxu0 }
 0x97b   : > { %v15687_v12 = vadd.f32 %v12938_v53, %v23150_v0  ;;  %v12940_v37 = vpop.f32.mrb[115].mxu0  ;;  %v23156_v0 = vld [vmem:[#allocation78_spill] sm:$0xff] }
 0x97c   : > { %v15688_v14 = vadd.f32 %v12940_v37, %v23151_v42  ;;  %v23157_v42 = vld [vmem:[#allocation79_spill] sm:$0xff] }
 0x97d   : > { %v22158_v4 = vpack.c.bf16 %v15687_v12, %v15685_v47  ;;  %13203 = vmatmul.mubr.bf16.gmra.mrb[220].mxu0 %v15130_v3  ;;  %v15146_v47 = vcombine.low %v1132_v55, %v1140_v29  ;;  %v23155_v3 = vld [vmem:[#allocation77_spill] sm:$0xff] }
 0x97e   : > { %v22160_v27 = vpack.c.bf16 %v15688_v14, %v15686_v15  ;;  %13212 = vmatprep.mubr.bf16.mxu0 %v15147_v38  ;;  %v15163_v38 = vcombine.high %v1148_v18, %v1156_v52  ;;  %v1172_v55 = vld [vmem:[%s22772_s2 + $0x1d78] sm:$0xff] }
 0x97f   : > { %23152 = vst [vmem:[#allocation25_spill] sm:$0xff] %v22158_v4 }
 0x980   : > { %23153 = vst [vmem:[#allocation26_spill] sm:$0xff] %v22160_v27  ;;  %v12944_v50 = vpop.f32.mrb[116].mxu0  ;;  %13774 = vmatprep.subr.bf16.mxu1 %v22160_v27 }
 0x981   : > { %v15689_v13 = vadd.f32 %v12944_v50, %v23154_v25  ;;  %v12946_v30 = vpop.f32.mrb[117].mxu0  ;;  %13775 = vmatpush1.bf16.msra.mxu1 %v22158_v4  ;;  %v1164_v50 = vld [vmem:[%s22772_s2 + $0x1d38] sm:$0xff]  ;;  %v23160_v25 = vld [vmem:[#allocation80_spill] sm:$0xff] }
 0x982   : > { %v15690_v15 = vadd.f32 %v12946_v30, %v23155_v3  ;;  %v12948_v53 = vpop.f32.mrb[118].mxu0 }
 0x983   : > { %v15691_v12 = vadd.f32 %v12948_v53, %v23156_v0  ;;  %v12950_v37 = vpop.f32.mrb[119].mxu0  ;;  %v23162_v0 = vld [vmem:[#allocation82_spill] sm:$0xff] }
 0x984   : > { %v15692_v14 = vadd.f32 %v12950_v37, %v23157_v42  ;;  %v23163_v42 = vld [vmem:[#allocation83_spill] sm:$0xff] }
 0x985   : > { %v22174_v11 = vpack.c.bf16 %v15691_v12, %v15689_v13  ;;  %13213 = vmatmul.mubr.bf16.gmra.mrb[224].mxu0 %v15146_v47  ;;  %v15162_v13 = vcombine.low %v1148_v18, %v1156_v52  ;;  %v23161_v47 = vld [vmem:[#allocation81_spill] sm:$0xff] }
 0x986   : > { %v22176_v60 = vpack.c.bf16 %v15692_v14, %v15690_v15  ;;  %13222 = vmatprep.mubr.bf16.mxu0 %v15163_v38  ;;  %v15179_v38 = vcombine.high %v1164_v50, %v1172_v55  ;;  %v1188_v18 = vld [vmem:[%s22772_s2 + $0x1df8] sm:$0xff] }
 0x987   : > { %23158 = vst [vmem:[#allocation27_spill] sm:$0xff] %v22174_v11 }
 0x988   : > { %23159 = vst [vmem:[#allocation28_spill] sm:$0xff] %v22176_v60  ;;  %v12954_v29 = vpop.f32.mrb[120].mxu0  ;;  %13776 = vmatprep.subr.bf16.mxu1 %v22176_v60 }
 0x989   : > { %v15693_v30 = vadd.f32 %v12954_v29, %v23160_v25  ;;  %v12956_v3 = vpop.f32.mrb[121].mxu0  ;;  %13777 = vmatpush1.bf16.msra.mxu1 %v22174_v11  ;;  %v1180_v29 = vld [vmem:[%s22772_s2 + $0x1db8] sm:$0xff]  ;;  %v23166_v25 = vld [vmem:[#allocation84_spill] sm:$0xff] }
 0x98a   : > { %v15694_v15 = vadd.f32 %v12956_v3, %v23161_v47  ;;  %v12958_v53 = vpop.f32.mrb[122].mxu0 }
 0x98b   : > { %v15695_v12 = vadd.f32 %v12958_v53, %v23162_v0  ;;  %v12960_v37 = vpop.f32.mrb[123].mxu0  ;;  %v23168_v0 = vld [vmem:[#allocation86_spill] sm:$0xff] }
 0x98c   : > { %v15696_v14 = vadd.f32 %v12960_v37, %v23163_v42  ;;  %v23169_v42 = vld [vmem:[#allocation87_spill] sm:$0xff] }
 0x98d   : > { %v22190_v4 = vpack.c.bf16 %v15695_v12, %v15693_v30  ;;  %13223 = vmatmul.mubr.bf16.gmra.mrb[228].mxu0 %v15162_v13  ;;  %v15178_v30 = vcombine.low %v1164_v50, %v1172_v55  ;;  %v23167_v13 = vld [vmem:[#allocation85_spill] sm:$0xff] }
 0x98e   : > { %v22192_v27 = vpack.c.bf16 %v15696_v14, %v15694_v15  ;;  %13232 = vmatprep.mubr.bf16.mxu0 %v15179_v38  ;;  %v15195_v38 = vcombine.high %v1180_v29, %v1188_v18  ;;  %v1204_v50 = vld [vmem:[%s22772_s2 + $0x1e78] sm:$0xff] }
 0x98f   : > { %23164 = vst [vmem:[#allocation29_spill] sm:$0xff] %v22190_v4 }
 0x990   : > { %23165 = vst [vmem:[#allocation30_spill] sm:$0xff] %v22192_v27  ;;  %v12964_v52 = vpop.f32.mrb[124].mxu0  ;;  %13778 = vmatprep.subr.bf16.mxu1 %v22192_v27 }
 0x991   : > { %v15697_v3 = vadd.f32 %v12964_v52, %v23166_v25  ;;  %v12966_v47 = vpop.f32.mrb[125].mxu0  ;;  %13779 = vmatpush1.bf16.msra.mxu1 %v22190_v4  ;;  %v1196_v52 = vld [vmem:[%s22772_s2 + $0x1e38] sm:$0xff]  ;;  %v15518_v25 = vcombine.low %v21962_v23, %v21962_v23  ;;  %v22227_v23 = vld [vmem:[%s21686_s20 + $0x10] sm:$0xff] }
 0x992   : > { %v15698_v15 = vadd.f32 %v12966_v47, %v23167_v13  ;;  %v12968_v53 = vpop.f32.mrb[126].mxu0  ;;  %v15194_v13 = vcombine.low %v1180_v29, %v1188_v18  ;;  %v15521_v29 = vcombine.high %v22227_v23, %v22227_v23  ;;  %14100 = vst [vmem:[%s21711_s5 + $0x10] sm:$0xff] %v22227_v23  ;;  %v1212_v18 = vld [vmem:[%s22772_s2 + $0x1eb8] sm:$0xff] }
 0x993   : > { %v15699_v12 = vadd.f32 %v12968_v53, %v23168_v0  ;;  %v12970_v37 = vpop.f32.mrb[127].mxu0  ;;  %v15211_v0 = vcombine.high %v1196_v52, %v1204_v50 }
 0x994   : > { %v15700_v14 = vadd.f32 %v12970_v37, %v23169_v42 }
 0x995   : > { %v22206_v11 = vpack.c.bf16 %v15699_v12, %v15697_v3  ;;  %13233 = vmatmul.mubr.bf16.gmra.mrb[232].mxu0 %v15178_v30  ;;  %v23172_v3 = vld [vmem:[#allocation88_spill] sm:$0xff]  ;;  %v23174_v12 = vld [vmem:[#allocation90_spill] sm:$0xff] }
 0x996   : > { %v22208_v60 = vpack.c.bf16 %v15700_v14, %v15698_v15  ;;  %13242 = vmatprep.mubr.bf16.mxu0 %v15195_v38  ;;  %v23173_v15 = vld [vmem:[#allocation89_spill] sm:$0xff]  ;;  %v23175_v14 = vld [vmem:[#allocation91_spill] sm:$0xff] }
 0x997   : > { %23170 = vst [vmem:[#allocation31_spill] sm:$0xff] %v22206_v11 }
 0x998   : > { %23171 = vst [vmem:[#allocation32_spill] sm:$0xff] %v22208_v60  ;;  %v12974_v55 = vpop.f32.mrb[128].mxu0  ;;  %13780 = vmatprep.subr.bf16.mxu1 %v22208_v60 }
 0x999   : > { %v15701_v47 = vadd.f32 %v12974_v55, %v23172_v3  ;;  %v12976_v30 = vpop.f32.mrb[129].mxu0  ;;  %13781 = vmatpush1.bf16.msra.mxu1 %v22206_v11 }
 0x99a   : > { %v15702_v53 = vadd.f32 %v12976_v30, %v23173_v15  ;;  %v12978_v38 = vpop.f32.mrb[130].mxu0  ;;  %v23179_v15 = vld [vmem:[#allocation93_spill] sm:$0xff] }
 0x99b   : > { %v15703_v37 = vadd.f32 %v12978_v38, %v23174_v12  ;;  %v12980_v42 = vpop.f32.mrb[131].mxu0  ;;  %v23180_v12 = vld [vmem:[#allocation94_spill] sm:$0xff] }
 0x99c   : > { %v15704_v4 = vadd.f32 %v12980_v42, %v23175_v14  ;;  %13783 = vmatmul.mubr.bf16.vlgmr.msra.gmra.mrb[0].mxu1 %v15518_v25  ;;  %v1220_v25 = vld [vmem:[%s22772_s2 + $0x1ef8] sm:$0xff]  ;;  %v23181_v14 = vld [vmem:[#allocation95_spill] sm:$0xff] }
 0x99d   : > { %v22224_v60 = vpack.c.bf16 %v15703_v37, %v15701_v47  ;;  %13243 = vmatmul.mubr.bf16.gmra.mrb[236].mxu0 %v15194_v13  ;;  %13823 = vmatprep.mubr.bf16.mxu1 %v15521_v29  ;;  %v15210_v13 = vcombine.low %v1196_v52, %v1204_v50  ;;  %v1228_v29 = vld [vmem:[%s22772_s2 + $0x1f38] sm:$0xff] }
 0x99e   : > { %v22229_v55 = vpack.c.bf16 %v15704_v4, %v15702_v53  ;;  %13252 = vmatprep.mubr.bf16.mxu0 %v15211_v0  ;;  %v23178_v4 = vld [vmem:[#allocation92_spill] sm:$0xff]  ;;  %v15227_v0 = vcombine.high %v1212_v18, %v1220_v25  ;;  %v1236_v52 = vld [vmem:[%s22772_s2 + $0x1f78] sm:$0xff] }
 0x99f   : > { %23176 = vst [vmem:[#allocation33_spill] sm:$0xff] %v22224_v60 }
 0x9a0   : > { %23177 = vst [vmem:[#allocation34_spill] sm:$0xff] %v22229_v55  ;;  %v12984_v3 = vpop.f32.mrb[132].mxu0  ;;  %13791 = vmatprep.subr.bf16.mxu1 %v22229_v55 }
 0x9a1   : > { %v15705_v47 = vadd.f32 %v12984_v3, %v23178_v4  ;;  %v12986_v30 = vpop.f32.mrb[133].mxu0  ;;  %13792 = vmatpush1.bf16.msra.mxu1 %v22224_v60  ;;  %v23184_v3 = vld [vmem:[#allocation96_spill] sm:$0xff] }
 0x9a2   : > { %v15706_v53 = vadd.f32 %v12986_v30, %v23179_v15  ;;  %v12988_v38 = vpop.f32.mrb[134].mxu0 }
 0x9a3   : > { %v15707_v37 = vadd.f32 %v12988_v38, %v23180_v12  ;;  %v12990_v42 = vpop.f32.mrb[135].mxu0  ;;  %v23186_v38 = vld [vmem:[#allocation98_spill] sm:$0xff] }
 0x9a4   : > { %v15708_v11 = vadd.f32 %v12990_v42, %v23181_v14 }
 0x9a5   : > { %v22247_v27 = vpack.c.bf16 %v15707_v37, %v15705_v47  ;;  %13253 = vmatmul.mubr.bf16.gmra.mrb[240].mxu0 %v15210_v13  ;;  %v15226_v47 = vcombine.low %v1212_v18, %v1220_v25  ;;  %v23187_v37 = vld [vmem:[#allocation99_spill] sm:$0xff]  ;;  %v1252_v18 = vld [vmem:[%s22772_s2 + $0x1ff8] sm:$0xff] }
 0x9a6   : > { %v22249_v55 = vpack.c.bf16 %v15708_v11, %v15706_v53  ;;  %13262 = vmatprep.mubr.bf16.mxu0 %v15227_v0  ;;  %v23185_v11 = vld [vmem:[#allocation97_spill] sm:$0xff]  ;;  %v15243_v53 = vcombine.high %v1228_v29, %v1236_v52 }
 0x9a7   : > { %23182 = vst [vmem:[#allocation35_spill] sm:$0xff] %v22247_v27 }
 0x9a8   : > { %23183 = vst [vmem:[#allocation36_spill] sm:$0xff] %v22249_v55  ;;  %v12994_v50 = vpop.f32.mrb[136].mxu0  ;;  %13793 = vmatprep.subr.bf16.mxu1 %v22249_v55 }
 0x9a9   : > { %v15709_v4 = vadd.f32 %v12994_v50, %v23184_v3  ;;  %v12996_v30 = vpop.f32.mrb[137].mxu0  ;;  %13794 = vmatpush1.bf16.msra.mxu1 %v22247_v27  ;;  %v1244_v50 = vld [vmem:[%s22772_s2 + $0x1fb8] sm:$0xff]  ;;  %v23189_v3 = vld [vmem:[#allocation100_spill] sm:$0xff] }
 0x9aa   : > { %v15710_v13 = vadd.f32 %v12996_v30, %v23185_v11  ;;  %v12998_v15 = vpop.f32.mrb[138].mxu0 }
 0x9ab   : > { %v15711_v0 = vadd.f32 %v12998_v15, %v23186_v38  ;;  %v13000_v12 = vpop.f32.mrb[139].mxu0  ;;  %v23191_v38 = vld [vmem:[#allocation102_spill] sm:$0xff] }
 0x9ac   : > { %v15712_v42 = vadd.f32 %v13000_v12, %v23187_v37  ;;  %v23192_v37 = vld [vmem:[#allocation103_spill] sm:$0xff] }
 0x9ad   : > { %v22263_v14 = vpack.c.bf16 %v15711_v0, %v15709_v4  ;;  %13263 = vmatmul.mubr.bf16.gmra.mrb[244].mxu0 %v15226_v47  ;;  %v15242_v4 = vcombine.low %v1228_v29, %v1236_v52  ;;  %v23190_v47 = vld [vmem:[#allocation101_spill] sm:$0xff] }
 0x9ae   : > { %v22265_v60 = vpack.c.bf16 %v15712_v42, %v15710_v13  ;;  %13272 = vmatprep.mubr.bf16.mxu0 %v15243_v53  ;;  %v15259_v53 = vcombine.high %v1244_v50, %v1252_v18 }
 0x9af   : > { %23188 = vst [vmem:[#allocation37_spill] sm:$0xff] %v22263_v14 }
 0x9b0   : > { %v13004_v25 = vpop.f32.mrb[140].mxu0  ;;  %13795 = vmatprep.subr.bf16.mxu1 %v22265_v60 }
 0x9b1   : > { %v15713_v30 = vadd.f32 %v13004_v25, %v23189_v3  ;;  %v13006_v11 = vpop.f32.mrb[141].mxu0  ;;  %13796 = vmatpush1.bf16.msra.mxu1 %v22263_v14  ;;  %v23193_v3 = vld [vmem:[#allocation104_spill] sm:$0xff]  ;;  %v23195_v14 = vld [vmem:[#allocation106_spill] sm:$0xff] }
 0x9b2   : > { %v15714_v13 = vadd.f32 %v13006_v11, %v23190_v47  ;;  %v13008_v15 = vpop.f32.mrb[142].mxu0  ;;  %v15258_v11 = vcombine.low %v1244_v50, %v1252_v18  ;;  %v23194_v47 = vld [vmem:[#allocation105_spill] sm:$0xff] }
 0x9b3   : > { %v15715_v0 = vadd.f32 %v13008_v15, %v23191_v38  ;;  %v13010_v12 = vpop.f32.mrb[143].mxu0  ;;  %v23200_v50 = vld [vmem:[#allocation109_spill] sm:$0xff] }
 0x9b4   : > { %v15716_v42 = vadd.f32 %v13010_v12, %v23192_v37 }
 0x9b5   : > { %v22279_v27 = vpack.c.bf16 %v15715_v0, %v15713_v30  ;;  %13273 = vmatmul.mubr.bf16.gmra.mrb[248].mxu0 %v15242_v4  ;;  %v23196_v0 = vld [vmem:[#allocation107_spill] sm:$0xff] }
 0x9b6   : > { %v22281_v55 = vpack.c.bf16 %v15716_v42, %v15714_v13  ;;  %13282 = vmatprep.mubr.bf16.mxu0 %v15259_v53  ;;  %v23199_v42 = vld [vmem:[#allocation108_spill] sm:$0xff] }
 0x9b8   : > { %v13014_v25 = vpop.f32.mrb[144].mxu0  ;;  %13797 = vmatprep.subr.bf16.mxu1 %v22281_v55 }
 0x9b9   : > { %v15717_v29 = vadd.f32 %v13014_v25, %v23193_v3  ;;  %v13016_v52 = vpop.f32.mrb[145].mxu0  ;;  %13798 = vmatpush1.bf16.msra.mxu1 %v22279_v27 }
 0x9ba   : > { %v15718_v15 = vadd.f32 %v13016_v52, %v23194_v47  ;;  %v13018_v38 = vpop.f32.mrb[146].mxu0 }
 0x9bb   : > { %v15719_v12 = vadd.f32 %v13018_v38, %v23195_v14  ;;  %v13020_v30 = vpop.f32.mrb[147].mxu0  ;;  %v23201_v14 = vld [vmem:[#allocation110_spill] sm:$0xff] }
 0x9bc   : > { %v15720_v4 = vadd.f32 %v13020_v30, %v23196_v0  ;;  %v23202_v30 = vld [vmem:[#allocation111_spill] sm:$0xff]  ;;  %v23205_v0 = vld [vmem:[#allocation112_spill] sm:$0xff] }
 0x9bd   : > { %v22289_v13 = vpack.c.bf16 %v15719_v12, %v15717_v29  ;;  %13283 = vmatmul.mubr.bf16.gmra.mrb[252].mxu0 %v15258_v11 }
 0x9be   : > { %v22291_v53 = vpack.c.bf16 %v15720_v4, %v15718_v15 }
 0x9bf   : > { %23197 = vst [vmem:[#allocation38_spill] sm:$0xff] %v22289_v13 }
 0x9c0   : > { %23198 = vst [vmem:[#allocation39_spill] sm:$0xff] %v22291_v53  ;;  %v13024_v37 = vpop.f32.mrb[148].mxu0  ;;  %13799 = vmatprep.subr.bf16.mxu1 %v22291_v53  ;;  %v23208_v53 = vld [vmem:[#allocation115_spill] sm:$0xff] }
 0x9c1   : > { %v15721_v25 = vadd.f32 %v13024_v37, %v23199_v42  ;;  %v13026_v3 = vpop.f32.mrb[149].mxu0  ;;  %13800 = vmatpush1.bf16.msra.mxu1 %v22289_v13  ;;  %v23206_v42 = vld [vmem:[#allocation113_spill] sm:$0xff]  ;;  %v23207_v13 = vld [vmem:[#allocation114_spill] sm:$0xff] }
 0x9c2   : > { %v15722_v18 = vadd.f32 %v13026_v3, %v23200_v50  ;;  %v13028_v52 = vpop.f32.mrb[150].mxu0 }
 0x9c3   : > { %v15723_v47 = vadd.f32 %v13028_v52, %v23201_v14  ;;  %v13030_v38 = vpop.f32.mrb[151].mxu0 }
 0x9c4   : > { %v15724_v29 = vadd.f32 %v13030_v38, %v23202_v30  ;;  %v23211_v30 = vld [vmem:[#allocation116_spill] sm:$0xff] }
 0x9c5   : > { %v22299_v12 = vpack.c.bf16 %v15723_v47, %v15721_v25 }
 0x9c6   : > { %v22301_v11 = vpack.c.bf16 %v15724_v29, %v15722_v18 }
 0x9c7   : > { %23203 = vst [vmem:[#allocation40_spill] sm:$0xff] %v22299_v12 }
 0x9c8   : > { %23204 = vst [vmem:[#allocation41_spill] sm:$0xff] %v22301_v11  ;;  %v13034_v15 = vpop.f32.mrb[152].mxu0  ;;  %13801 = vmatprep.subr.bf16.mxu1 %v22301_v11  ;;  %v23214_v11 = vld [vmem:[#allocation119_spill] sm:$0xff] }
 0x9c9   : > { %v15725_v4 = vadd.f32 %v13034_v15, %v23205_v0  ;;  %v13036_v37 = vpop.f32.mrb[153].mxu0  ;;  %13802 = vmatpush1.bf16.msra.mxu1 %v22299_v12  ;;  %v23212_v0 = vld [vmem:[#allocation117_spill] sm:$0xff]  ;;  %v23213_v12 = vld [vmem:[#allocation118_spill] sm:$0xff] }
 0x9ca   : > { %v15726_v3 = vadd.f32 %v13036_v37, %v23206_v42  ;;  %v13038_v50 = vpop.f32.mrb[154].mxu0 }
 0x9cb   : > { %v15727_v52 = vadd.f32 %v13038_v50, %v23207_v13  ;;  %v13040_v14 = vpop.f32.mrb[155].mxu0 }
 0x9cc   : > { %v15728_v38 = vadd.f32 %v13040_v14, %v23208_v53  ;;  %v23217_v14 = vld [vmem:[#allocation120_spill] sm:$0xff] }
 0x9cd   : > { %v22309_v25 = vpack.c.bf16 %v15727_v52, %v15725_v4 }
 0x9ce   : > { %v22311_v18 = vpack.c.bf16 %v15728_v38, %v15726_v3 }
 0x9cf   : > { %23209 = vst [vmem:[#allocation42_spill] sm:$0xff] %v22309_v25 }
 0x9d0   : > { %23210 = vst [vmem:[#allocation43_spill] sm:$0xff] %v22311_v18  ;;  %v13044_v47 = vpop.f32.mrb[156].mxu0  ;;  %13803 = vmatprep.subr.bf16.mxu1 %v22311_v18  ;;  %v23220_v18 = vld [vmem:[#allocation123_spill] sm:$0xff] }
 0x9d1   : > { %v15729_v29 = vadd.f32 %v13044_v47, %v23211_v30  ;;  %v13046_v15 = vpop.f32.mrb[157].mxu0  ;;  %13804 = vmatpush1.bf16.msra.mxu1 %v22309_v25  ;;  %v23218_v30 = vld [vmem:[#allocation121_spill] sm:$0xff]  ;;  %v23219_v25 = vld [vmem:[#allocation122_spill] sm:$0xff] }
 0x9d2   : > { %v15730_v37 = vadd.f32 %v13046_v15, %v23212_v0  ;;  %v13048_v42 = vpop.f32.mrb[158].mxu0 }
 0x9d3   : > { %v15731_v13 = vadd.f32 %v13048_v42, %v23213_v12  ;;  %v13050_v50 = vpop.f32.mrb[159].mxu0 }
 0x9d4   : > { %v15732_v53 = vadd.f32 %v13050_v50, %v23214_v11  ;;  %v23223_v50 = vld [vmem:[#allocation124_spill] sm:$0xff] }
 0x9d5   : > { %v22319_v4 = vpack.c.bf16 %v15731_v13, %v15729_v29 }
 0x9d6   : > { %v22321_v3 = vpack.c.bf16 %v15732_v53, %v15730_v37 }
 0x9d7   : > { %23215 = vst [vmem:[#allocation44_spill] sm:$0xff] %v22319_v4 }
 0x9d8   : > { %23216 = vst [vmem:[#allocation45_spill] sm:$0xff] %v22321_v3  ;;  %v13054_v52 = vpop.f32.mrb[160].mxu0  ;;  %13805 = vmatprep.subr.bf16.mxu1 %v22321_v3  ;;  %v23226_v3 = vld [vmem:[#allocation127_spill] sm:$0xff] }
 0x9d9   : > { %v15733_v38 = vadd.f32 %v13054_v52, %v23217_v14  ;;  %v13056_v47 = vpop.f32.mrb[161].mxu0  ;;  %13806 = vmatpush1.bf16.msra.mxu1 %v22319_v4  ;;  %v23224_v14 = vld [vmem:[#allocation125_spill] sm:$0xff]  ;;  %v23225_v4 = vld [vmem:[#allocation126_spill] sm:$0xff] }
 0x9da   : > { %v15734_v15 = vadd.f32 %v13056_v47, %v23218_v30  ;;  %v13058_v0 = vpop.f32.mrb[162].mxu0 }
 0x9db   : > { %v15735_v12 = vadd.f32 %v13058_v0, %v23219_v25  ;;  %v13060_v42 = vpop.f32.mrb[163].mxu0 }
 0x9dc   : > { %v15736_v11 = vadd.f32 %v13060_v42, %v23220_v18  ;;  %v23228_v42 = vld [vmem:[#allocation128_spill] sm:$0xff] }
 0x9dd   : > { %v22329_v29 = vpack.c.bf16 %v15735_v12, %v15733_v38 }
 0x9de   : > { %v22331_v37 = vpack.c.bf16 %v15736_v11, %v15734_v15 }
 0x9df   : > { %23221 = vst [vmem:[#allocation46_spill] sm:$0xff] %v22329_v29 }
 0x9e0   : > { %23222 = vst [vmem:[#allocation47_spill] sm:$0xff] %v22331_v37  ;;  %v13064_v13 = vpop.f32.mrb[164].mxu0  ;;  %13807 = vmatprep.subr.bf16.mxu1 %v22331_v37  ;;  %v23231_v37 = vld [vmem:[#allocation131_spill] sm:$0xff] }
 0x9e1   : > { %v15737_v53 = vadd.f32 %v13064_v13, %v23223_v50  ;;  %v13066_v52 = vpop.f32.mrb[165].mxu0  ;;  %13808 = vmatpush1.bf16.msra.mxu1 %v22329_v29  ;;  %v23229_v50 = vld [vmem:[#allocation129_spill] sm:$0xff]  ;;  %v23230_v29 = vld [vmem:[#allocation130_spill] sm:$0xff] }
 0x9e2   : > { %v15738_v47 = vadd.f32 %v13066_v52, %v23224_v14  ;;  %v13068_v30 = vpop.f32.mrb[166].mxu0 }
 0x9e3   : > { %v15739_v25 = vadd.f32 %v13068_v30, %v23225_v4  ;;  %v13070_v0 = vpop.f32.mrb[167].mxu0 }
 0x9e4   : > { %v15740_v18 = vadd.f32 %v13070_v0, %v23226_v3 }
 0x9e5   : > { %v22339_v38 = vpack.c.bf16 %v15739_v25, %v15737_v53 }
 0x9e6   : > { %v22341_v15 = vpack.c.bf16 %v15740_v18, %v15738_v47 }
 0x9e7   : > { %23227 = vst [vmem:[#allocation48_spill] sm:$0xff] %v22339_v38 }
 0x9e8   : > { %v13074_v12 = vpop.f32.mrb[168].mxu0  ;;  %13809 = vmatprep.subr.bf16.mxu1 %v22341_v15 }
 0x9e9   : > { %v15741_v11 = vadd.f32 %v13074_v12, %v23228_v42  ;;  %v13076_v13 = vpop.f32.mrb[169].mxu0  ;;  %13810 = vmatpush1.bf16.msra.mxu1 %v22339_v38  ;;  %v23233_v12 = vld [vmem:[#allocation132_spill] sm:$0xff]  ;;  %v23235_v38 = vld [vmem:[#allocation134_spill] sm:$0xff] }
 0x9ea   : > { %v15742_v52 = vadd.f32 %v13076_v13, %v23229_v50  ;;  %v13078_v14 = vpop.f32.mrb[170].mxu0  ;;  %v23234_v50 = vld [vmem:[#allocation133_spill] sm:$0xff] }
 0x9eb   : > { %v15743_v4 = vadd.f32 %v13078_v14, %v23230_v29  ;;  %v13080_v30 = vpop.f32.mrb[171].mxu0 }
 0x9ec   : > { %v15744_v3 = vadd.f32 %v13080_v30, %v23231_v37 }
 0x9ed   : > { %v22349_v53 = vpack.c.bf16 %v15743_v4, %v15741_v11 }
 0x9ee   : > { %v22351_v47 = vpack.c.bf16 %v15744_v3, %v15742_v52  ;;  %v23236_v3 = vld [vmem:[#allocation135_spill] sm:$0xff] }
 0x9ef   : > { %23232 = vst [vmem:[#allocation49_spill] sm:$0xff] %v22349_v53 }
 0x9f0   : > { %v13084_v25 = vpop.f32.mrb[172].mxu0  ;;  %13811 = vmatprep.subr.bf16.mxu1 %v22351_v47 }
 0x9f1   : > { %v15745_v0 = vadd.f32 %v13084_v25, %v21038_v54  ;;  %v13086_v18 = vpop.f32.mrb[173].mxu0  ;;  %13812 = vmatpush1.bf16.msra.mxu1 %v22349_v53  ;;  %v23238_v53 = vld [vmem:[#allocation137_spill] sm:$0xff] }
 0x9f2   : > { %v15746_v42 = vadd.f32 %v13086_v18, %v23233_v12  ;;  %v13088_v13 = vpop.f32.mrb[174].mxu0  ;;  %v23237_v12 = vld [vmem:[#allocation136_spill] sm:$0xff] }
 0x9f3   : > { %v15747_v29 = vadd.f32 %v13088_v13, %v23234_v50  ;;  %v13090_v14 = vpop.f32.mrb[175].mxu0 }
 0x9f4   : > { %v15748_v37 = vadd.f32 %v13090_v14, %v23235_v38 }
 0x9f5   : > { %v22359_v11 = vpack.c.bf16 %v15747_v29, %v15745_v0 }
 0x9f6   : > { %v22361_v52 = vpack.c.bf16 %v15748_v37, %v15746_v42 }
 0x9f8   : > { %v13094_v4 = vpop.f32.mrb[176].mxu0  ;;  %13813 = vmatprep.subr.bf16.mxu1 %v22361_v52 }
 0x9f9   : > { %v15749_v54 = vadd.f32 %v13094_v4, %v21058_v28  ;;  %v13096_v30 = vpop.f32.mrb[177].mxu0  ;;  %13814 = vmatpush1.bf16.msra.mxu1 %v22359_v11 }
 0x9fa   : > { %v15750_v25 = vadd.f32 %v13096_v30, %v23236_v3  ;;  %v13098_v18 = vpop.f32.mrb[178].mxu0  ;;  %v23241_v30 = vld [vmem:[#allocation138_spill] sm:$0xff] }
 0x9fb   : > { %v15751_v13 = vadd.f32 %v13098_v18, %v23237_v12  ;;  %v13100_v50 = vpop.f32.mrb[179].mxu0  ;;  %v23242_v12 = vld [vmem:[#allocation139_spill] sm:$0xff] }
 0x9fc   : > { %v15752_v38 = vadd.f32 %v13100_v50, %v23238_v53  ;;  %v23245_v50 = vld [vmem:[#allocation140_spill] sm:$0xff] }
 0x9fd   : > { %v22369_v0 = vpack.c.bf16 %v15751_v13, %v15749_v54 }
 0x9fe   : > { %v22371_v42 = vpack.c.bf16 %v15752_v38, %v15750_v25 }
 0x9ff   : > { %23239 = vst [vmem:[#allocation50_spill] sm:$0xff] %v22369_v0 }
 0xa00   : > { %23240 = vst [vmem:[#allocation51_spill] sm:$0xff] %v22371_v42  ;;  %v13104_v29 = vpop.f32.mrb[180].mxu0  ;;  %13815 = vmatprep.subr.bf16.mxu1 %v22371_v42  ;;  %v23248_v42 = vld [vmem:[#allocation143_spill] sm:$0xff] }
 0xa01   : > { %v15753_v28 = vadd.f32 %v13104_v29, %v21256_v56  ;;  %v13106_v14 = vpop.f32.mrb[181].mxu0  ;;  %13816 = vmatpush1.bf16.msra.mxu1 %v22369_v0  ;;  %v23246_v29 = vld [vmem:[#allocation141_spill] sm:$0xff]  ;;  %v23247_v0 = vld [vmem:[#allocation142_spill] sm:$0xff] }
 0xa02   : > { %v15754_v37 = vadd.f32 %v13106_v14, %v21258_v36  ;;  %v13108_v4 = vpop.f32.mrb[182].mxu0 }
 0xa03   : > { %v15755_v3 = vadd.f32 %v13108_v4, %v23241_v30  ;;  %v13110_v18 = vpop.f32.mrb[183].mxu0 }
 0xa04   : > { %v15756_v53 = vadd.f32 %v13110_v18, %v23242_v12  ;;  %v23251_v12 = vld [vmem:[#allocation144_spill] sm:$0xff] }
 0xa05   : > { %v22379_v54 = vpack.c.bf16 %v15755_v3, %v15753_v28 }
 0xa06   : > { %v22381_v25 = vpack.c.bf16 %v15756_v53, %v15754_v37 }
 0xa07   : > { %23243 = vst [vmem:[#allocation52_spill] sm:$0xff] %v22379_v54 }
 0xa08   : > { %23244 = vst [vmem:[#allocation53_spill] sm:$0xff] %v22381_v25  ;;  %v13114_v13 = vpop.f32.mrb[184].mxu0  ;;  %13817 = vmatprep.subr.bf16.mxu1 %v22381_v25 }
 0xa09   : > { %v15757_v56 = vadd.f32 %v13114_v13, %v23245_v50  ;;  %v13116_v38 = vpop.f32.mrb[185].mxu0  ;;  %13818 = vmatpush1.bf16.msra.mxu1 %v22379_v54  ;;  %v23252_v50 = vld [vmem:[#allocation145_spill] sm:$0xff] }
 0xa0a   : > { %v15758_v36 = vadd.f32 %v13116_v38, %v23246_v29  ;;  %v13118_v14 = vpop.f32.mrb[186].mxu0  ;;  %v23253_v29 = vld [vmem:[#allocation146_spill] sm:$0xff] }
 0xa0b   : > { %v15759_v4 = vadd.f32 %v13118_v14, %v23247_v0  ;;  %v13120_v30 = vpop.f32.mrb[187].mxu0 }
 0xa0c   : > { %v15760_v18 = vadd.f32 %v13120_v30, %v23248_v42 }
 0xa0d   : > { %v22389_v28 = vpack.c.bf16 %v15759_v4, %v15757_v56  ;;  %v23254_v56 = vld [vmem:[#allocation147_spill] sm:$0xff] }
 0xa0e   : > { %v22391_v37 = vpack.c.bf16 %v15760_v18, %v15758_v36 }
 0xa0f   : > { %23249 = vst [vmem:[#allocation54_spill] sm:$0xff] %v22389_v28 }
 0xa10   : > { %23250 = vst [vmem:[#allocation55_spill] sm:$0xff] %v22391_v37  ;;  %v13124_v3 = vpop.f32.mrb[188].mxu0  ;;  %13819 = vmatprep.subr.bf16.mxu1 %v22391_v37 }
 0xa11   : > { %v15761_v53 = vadd.f32 %v13124_v3, %v23251_v12  ;;  %v13126_v13 = vpop.f32.mrb[189].mxu0  ;;  %13820 = vmatpush1.bf16.msra.mxu1 %v22389_v28  ;;  %v15520_v3 = vcombine.low %v22227_v23, %v22227_v23  ;;  %v22407_v12 = vld [vmem:[%s21686_s20 + $0x18] sm:$0xff]  ;;  %v23257_v28 = vld [vmem:[#allocation148_spill] sm:$0xff]  ;;  %s204_s20 = sand.u32 1, %s17900_s16  }
 0xa12   : > { %v15762_v38 = vadd.f32 %v13126_v13, %v23252_v50  ;;  %v13128_v0 = vpop.f32.mrb[190].mxu0  ;;  %14101 = vst [vmem:[%s21711_s5 + $0x18] sm:$0xff] %v22407_v12  ;;  %s14229_s6 = sshll.u32 %s204_s20, 4  ;;  %s14107_s22 = scalar_lea.sflag [#allocation4], %s204_s20 }
 0xa13   : > { %v15763_v14 = vadd.f32 %v13128_v0, %v23253_v29  ;;  %v13130_v42 = vpop.f32.mrb[191].mxu0  ;;  %v15523_v0 = vcombine.high %v22407_v12, %v22407_v12  ;;  %s22616_s7 = scalar_lea.vmem [#allocation3], %s14229_s6 }
 0xa14   : > { %v15764_v4 = vadd.f32 %v13130_v42, %v23254_v56  ;;  %s14126_s10 = sshll.u32 %s22616_s7, 4  ;;  %s14127_s10 = int_to_ptr.vmem [resolvable:$true] %s14126_s10 }
 0xa15   : > { %v22399_v36 = vpack.c.bf16 %v15763_v14, %v15761_v53  ;;  %v23258_v53 = vld [vmem:[#allocation149_spill] sm:$0xff]  ;;  %v23259_v14 = vld [vmem:[#allocation150_spill] sm:$0xff]  ;;  %s17846_s23 = scalar_lea.vmem %s14127_s10, 256  ;;  %p17853_p0 = scmp.lt.s32.totalorder %s14127_s10, %s17851_s28 }
 0xa16   : > { %v22401_v30 = vpack.c.bf16 %v15764_v4, %v15762_v38  ;;  %v23260_v4 = vld [vmem:[#allocation151_spill] sm:$0xff]  ;;  %p17847_p11 = scmp.ne.s32.totalorder %s14127_s10, %s17846_s23  ;;  %p17854_p1 = scmp.lt.s32.totalorder %s17852_s19, %s17846_s23 }
 0xa17   : > { %23255 = vst [vmem:[#allocation56_spill] sm:$0xff] %v22399_v36 }
 0xa18   : > { %23256 = vst [vmem:[#allocation57_spill] sm:$0xff] %v22401_v30  ;;  %v13134_v18 = vpop.f32.mrb[192].mxu0  ;;  %13821 = vmatprep.subr.bf16.mxu1 %v22401_v30  ;;  %p17848_p12 = pnand %p17847_p11, %p17974_p5  ;;  %p17855_p2 = por %p17854_p1, %p17853_p0 }
 0xa19   : > { %v15765_v13 = vadd.f32 %v13134_v18, %v23257_v28  ;;  %v13136_v50 = vpop.f32.mrb[193].mxu0  ;;  %13822 = vmatpush1.bf16.msra.mxu1 %v22399_v36  ;;  %v23263_v36 = vld [vmem:[#allocation152_spill] sm:$0xff] }
 0xa1a   : > { %v15766_v38 = vadd.f32 %v13136_v50, %v23258_v53  ;;  %v13138_v29 = vpop.f32.mrb[194].mxu0  ;;  %v23264_v50 = vld [vmem:[#allocation153_spill] sm:$0xff]  ;;  %p17849_p13 = pneg %p17848_p12 }
 0xa1b   : > { %v15767_v42 = vadd.f32 %v13138_v29, %v23259_v14  ;;  %v13140_v56 = vpop.f32.mrb[195].mxu0  ;;  %v23265_v14 = vld [vmem:[#allocation154_spill] sm:$0xff] }
 0xa1c   : > { %v15768_v23 = vadd.f32 %v13140_v56, %v23260_v4  ;;  %13824 = vmatmul.mubr.bf16.vlgmr.msra.gmra.mrb[0].mxu1 %v15520_v3  ;;  %v23266_v3 = vld [vmem:[#allocation155_spill] sm:$0xff]  ;;  %v23269_v4 = vld [vmem:[#allocation156_spill] sm:$0xff]  ;;  %p17856_p3 = pnand %p17855_p2, %p17849_p13 }
 0xa1d   : > { %v22418_v30 = vpack.c.bf16 %v15767_v42, %v15765_v13  ;;  %13864 = vmatprep.mubr.bf16.mxu1 %v15523_v0 }
 0xa1e   : > { %v22420_v28 = vpack.c.bf16 %v15768_v23, %v15766_v38 }
 0xa1f   : > { %23261 = vst [vmem:[#allocation58_spill] sm:$0xff] %v22418_v30 }
 0xa20   : > { %23262 = vst [vmem:[#allocation59_spill] sm:$0xff] %v22420_v28  ;;  %v13144_v18 = vpop.f32.mrb[196].mxu0  ;;  %13832 = vmatprep.subr.bf16.mxu1 %v22420_v28  ;;  %v23272_v28 = vld [vmem:[#allocation159_spill] sm:$0xff] }
 0xa21   : > { %v15769_v37 = vadd.f32 %v13144_v18, %v23263_v36  ;;  %v13146_v54 = vpop.f32.mrb[197].mxu0  ;;  %13833 = vmatpush1.bf16.msra.mxu1 %v22418_v30  ;;  %v23270_v18 = vld [vmem:[#allocation157_spill] sm:$0xff]  ;;  %v23271_v30 = vld [vmem:[#allocation158_spill] sm:$0xff] }
 0xa22   : > { %v15770_v53 = vadd.f32 %v13146_v54, %v23264_v50  ;;  %v13148_v29 = vpop.f32.mrb[198].mxu0 }
 0xa23   : > { %v15771_v25 = vadd.f32 %v13148_v29, %v23265_v14  ;;  %v13150_v56 = vpop.f32.mrb[199].mxu0 }
 0xa24   : > { %v15772_v13 = vadd.f32 %v13150_v56, %v23266_v3  ;;  %v23275_v3 = vld [vmem:[#allocation160_spill] sm:$0xff] }
 0xa25   : > { %v22428_v42 = vpack.c.bf16 %v15771_v25, %v15769_v37 }
 0xa26   : > { %v22430_v0 = vpack.c.bf16 %v15772_v13, %v15770_v53 }
 0xa27   : > { %23267 = vst [vmem:[#allocation60_spill] sm:$0xff] %v22428_v42 }
 0xa28   : > { %23268 = vst [vmem:[#allocation61_spill] sm:$0xff] %v22430_v0  ;;  %v13154_v38 = vpop.f32.mrb[200].mxu0  ;;  %13834 = vmatprep.subr.bf16.mxu1 %v22430_v0  ;;  %v23278_v0 = vld [vmem:[#allocation163_spill] sm:$0xff] }
 0xa29   : > { %v15773_v36 = vadd.f32 %v13154_v38, %v23269_v4  ;;  %v13156_v23 = vpop.f32.mrb[201].mxu0  ;;  %13835 = vmatpush1.bf16.msra.mxu1 %v22428_v42  ;;  %v23276_v4 = vld [vmem:[#allocation161_spill] sm:$0xff]  ;;  %v23277_v42 = vld [vmem:[#allocation162_spill] sm:$0xff] }
 0xa2a   : > { %v15774_v54 = vadd.f32 %v13156_v23, %v23270_v18  ;;  %v13158_v50 = vpop.f32.mrb[202].mxu0 }
 0xa2b   : > { %v15775_v29 = vadd.f32 %v13158_v50, %v23271_v30  ;;  %v13160_v14 = vpop.f32.mrb[203].mxu0 }
 0xa2c   : > { %v15776_v56 = vadd.f32 %v13160_v14, %v23272_v28  ;;  %v23281_v14 = vld [vmem:[#allocation164_spill] sm:$0xff] }
 0xa2d   : > { %v22438_v25 = vpack.c.bf16 %v15775_v29, %v15773_v36 }
 0xa2e   : > { %v22440_v37 = vpack.c.bf16 %v15776_v56, %v15774_v54 }
 0xa2f   : > { %23273 = vst [vmem:[#allocation62_spill] sm:$0xff] %v22438_v25 }
 0xa30   : > { %23274 = vst [vmem:[#allocation63_spill] sm:$0xff] %v22440_v37  ;;  %v13164_v53 = vpop.f32.mrb[204].mxu0  ;;  %13836 = vmatprep.subr.bf16.mxu1 %v22440_v37  ;;  %v23284_v37 = vld [vmem:[#allocation167_spill] sm:$0xff] }
 0xa31   : > { %v15777_v13 = vadd.f32 %v13164_v53, %v23275_v3  ;;  %v13166_v38 = vpop.f32.mrb[205].mxu0  ;;  %13837 = vmatpush1.bf16.msra.mxu1 %v22438_v25  ;;  %v23282_v3 = vld [vmem:[#allocation165_spill] sm:$0xff]  ;;  %v23283_v25 = vld [vmem:[#allocation166_spill] sm:$0xff] }
 0xa32   : > { %v15778_v23 = vadd.f32 %v13166_v38, %v23276_v4  ;;  %v13168_v18 = vpop.f32.mrb[206].mxu0 }
 0xa33   : > { %v15779_v30 = vadd.f32 %v13168_v18, %v23277_v42  ;;  %v13170_v50 = vpop.f32.mrb[207].mxu0 }
 0xa34   : > { %v15780_v28 = vadd.f32 %v13170_v50, %v23278_v0  ;;  %v23287_v50 = vld [vmem:[#allocation168_spill] sm:$0xff] }
 0xa35   : > { %v22448_v36 = vpack.c.bf16 %v15779_v30, %v15777_v13 }
 0xa36   : > { %v22450_v54 = vpack.c.bf16 %v15780_v28, %v15778_v23 }
 0xa37   : > { %23279 = vst [vmem:[#allocation64_spill] sm:$0xff] %v22448_v36 }
 0xa38   : > { %23280 = vst [vmem:[#allocation65_spill] sm:$0xff] %v22450_v54  ;;  %v13174_v29 = vpop.f32.mrb[208].mxu0  ;;  %13838 = vmatprep.subr.bf16.mxu1 %v22450_v54  ;;  %v23290_v54 = vld [vmem:[#allocation171_spill] sm:$0xff] }
 0xa39   : > { %v15781_v56 = vadd.f32 %v13174_v29, %v23281_v14  ;;  %v13176_v53 = vpop.f32.mrb[209].mxu0  ;;  %13839 = vmatpush1.bf16.msra.mxu1 %v22448_v36  ;;  %v23288_v14 = vld [vmem:[#allocation169_spill] sm:$0xff]  ;;  %v23289_v36 = vld [vmem:[#allocation170_spill] sm:$0xff] }
 0xa3a   : > { %v15782_v38 = vadd.f32 %v13176_v53, %v23282_v3  ;;  %v13178_v4 = vpop.f32.mrb[210].mxu0 }
 0xa3b   : > { %v15783_v42 = vadd.f32 %v13178_v4, %v23283_v25  ;;  %v13180_v18 = vpop.f32.mrb[211].mxu0 }
 0xa3c   : > { %v15784_v0 = vadd.f32 %v13180_v18, %v23284_v37  ;;  %v23293_v18 = vld [vmem:[#allocation172_spill] sm:$0xff] }
 0xa3d   : > { %v22458_v13 = vpack.c.bf16 %v15783_v42, %v15781_v56 }
 0xa3e   : > { %v22460_v23 = vpack.c.bf16 %v15784_v0, %v15782_v38 }
 0xa3f   : > { %23285 = vst [vmem:[#allocation66_spill] sm:$0xff] %v22458_v13 }
 0xa40   : > { %23286 = vst [vmem:[#allocation67_spill] sm:$0xff] %v22460_v23  ;;  %v13184_v30 = vpop.f32.mrb[212].mxu0  ;;  %13840 = vmatprep.subr.bf16.mxu1 %v22460_v23  ;;  %v23296_v23 = vld [vmem:[#allocation175_spill] sm:$0xff] }
 0xa41   : > { %v15785_v28 = vadd.f32 %v13184_v30, %v23287_v50  ;;  %v13186_v29 = vpop.f32.mrb[213].mxu0  ;;  %13841 = vmatpush1.bf16.msra.mxu1 %v22458_v13  ;;  %v23294_v50 = vld [vmem:[#allocation173_spill] sm:$0xff]  ;;  %v23295_v13 = vld [vmem:[#allocation174_spill] sm:$0xff] }
 0xa42   : > { %v15786_v53 = vadd.f32 %v13186_v29, %v23288_v14  ;;  %v13188_v3 = vpop.f32.mrb[214].mxu0 }
 0xa43   : > { %v15787_v25 = vadd.f32 %v13188_v3, %v23289_v36  ;;  %v13190_v4 = vpop.f32.mrb[215].mxu0 }
 0xa44   : > { %v15788_v37 = vadd.f32 %v13190_v4, %v23290_v54  ;;  %v23299_v4 = vld [vmem:[#allocation176_spill] sm:$0xff] }
 0xa45   : > { %v22468_v56 = vpack.c.bf16 %v15787_v25, %v15785_v28 }
 0xa46   : > { %v22470_v38 = vpack.c.bf16 %v15788_v37, %v15786_v53 }
 0xa47   : > { %23291 = vst [vmem:[#allocation68_spill] sm:$0xff] %v22468_v56 }
 0xa48   : > { %23292 = vst [vmem:[#allocation69_spill] sm:$0xff] %v22470_v38  ;;  %v13194_v42 = vpop.f32.mrb[216].mxu0  ;;  %13842 = vmatprep.subr.bf16.mxu1 %v22470_v38  ;;  %v23302_v38 = vld [vmem:[#allocation179_spill] sm:$0xff] }
 0xa49   : > { %v15789_v0 = vadd.f32 %v13194_v42, %v23293_v18  ;;  %v13196_v30 = vpop.f32.mrb[217].mxu0  ;;  %13843 = vmatpush1.bf16.msra.mxu1 %v22468_v56  ;;  %v23300_v18 = vld [vmem:[#allocation177_spill] sm:$0xff]  ;;  %v23301_v56 = vld [vmem:[#allocation178_spill] sm:$0xff] }
 0xa4a   : > { %v15790_v29 = vadd.f32 %v13196_v30, %v23294_v50  ;;  %v13198_v14 = vpop.f32.mrb[218].mxu0 }
 0xa4b   : > { %v15791_v36 = vadd.f32 %v13198_v14, %v23295_v13  ;;  %v13200_v3 = vpop.f32.mrb[219].mxu0 }
 0xa4c   : > { %v15792_v54 = vadd.f32 %v13200_v3, %v23296_v23  ;;  %v23305_v3 = vld [vmem:[#allocation180_spill] sm:$0xff] }
 0xa4d   : > { %v22478_v28 = vpack.c.bf16 %v15791_v36, %v15789_v0 }
 0xa4e   : > { %v22480_v53 = vpack.c.bf16 %v15792_v54, %v15790_v29 }
 0xa4f   : > { %23297 = vst [vmem:[#allocation70_spill] sm:$0xff] %v22478_v28 }
 0xa50   : > { %23298 = vst [vmem:[#allocation71_spill] sm:$0xff] %v22480_v53  ;;  %v13204_v25 = vpop.f32.mrb[220].mxu0  ;;  %13844 = vmatprep.subr.bf16.mxu1 %v22480_v53  ;;  %v23308_v53 = vld [vmem:[#allocation183_spill] sm:$0xff] }
 0xa51   : > { %v15793_v37 = vadd.f32 %v13204_v25, %v23299_v4  ;;  %v13206_v42 = vpop.f32.mrb[221].mxu0  ;;  %13845 = vmatpush1.bf16.msra.mxu1 %v22478_v28  ;;  %v23306_v4 = vld [vmem:[#allocation181_spill] sm:$0xff]  ;;  %v23307_v28 = vld [vmem:[#allocation182_spill] sm:$0xff] }
 0xa52   : > { %v15794_v30 = vadd.f32 %v13206_v42, %v23300_v18  ;;  %v13208_v50 = vpop.f32.mrb[222].mxu0 }
 0xa53   : > { %v15795_v13 = vadd.f32 %v13208_v50, %v23301_v56  ;;  %v13210_v14 = vpop.f32.mrb[223].mxu0 }
 0xa54   : > { %v15796_v23 = vadd.f32 %v13210_v14, %v23302_v38  ;;  %v23311_v14 = vld [vmem:[#allocation184_spill] sm:$0xff] }
 0xa55   : > { %v22488_v0 = vpack.c.bf16 %v15795_v13, %v15793_v37 }
 0xa56   : > { %v22490_v29 = vpack.c.bf16 %v15796_v23, %v15794_v30 }
 0xa57   : > { %23303 = vst [vmem:[#allocation72_spill] sm:$0xff] %v22488_v0 }
 0xa58   : > { %23304 = vst [vmem:[#allocation73_spill] sm:$0xff] %v22490_v29  ;;  %v13214_v36 = vpop.f32.mrb[224].mxu0  ;;  %13846 = vmatprep.subr.bf16.mxu1 %v22490_v29  ;;  %v23314_v29 = vld [vmem:[#allocation187_spill] sm:$0xff] }
 0xa59   : > { %v15797_v54 = vadd.f32 %v13214_v36, %v23305_v3  ;;  %v13216_v25 = vpop.f32.mrb[225].mxu0  ;;  %13847 = vmatpush1.bf16.msra.mxu1 %v22488_v0  ;;  %v23312_v3 = vld [vmem:[#allocation185_spill] sm:$0xff]  ;;  %v23313_v0 = vld [vmem:[#allocation186_spill] sm:$0xff] }
 0xa5a   : > { %v15798_v42 = vadd.f32 %v13216_v25, %v23306_v4  ;;  %v13218_v18 = vpop.f32.mrb[226].mxu0 }
 0xa5b   : > { %v15799_v56 = vadd.f32 %v13218_v18, %v23307_v28  ;;  %v13220_v50 = vpop.f32.mrb[227].mxu0 }
 0xa5c   : > { %v15800_v38 = vadd.f32 %v13220_v50, %v23308_v53  ;;  %v23317_v50 = vld [vmem:[#allocation188_spill] sm:$0xff] }
 0xa5d   : > { %v22498_v37 = vpack.c.bf16 %v15799_v56, %v15797_v54 }
 0xa5e   : > { %v22500_v30 = vpack.c.bf16 %v15800_v38, %v15798_v42 }
 0xa5f   : > { %23309 = vst [vmem:[#allocation74_spill] sm:$0xff] %v22498_v37 }
 0xa60   : > { %23310 = vst [vmem:[#allocation75_spill] sm:$0xff] %v22500_v30  ;;  %v13224_v13 = vpop.f32.mrb[228].mxu0  ;;  %13848 = vmatprep.subr.bf16.mxu1 %v22500_v30  ;;  %v23320_v30 = vld [vmem:[#allocation191_spill] sm:$0xff] }
 0xa61   : > { %v15801_v23 = vadd.f32 %v13224_v13, %v23311_v14  ;;  %v13226_v36 = vpop.f32.mrb[229].mxu0  ;;  %13849 = vmatpush1.bf16.msra.mxu1 %v22498_v37  ;;  %v23318_v14 = vld [vmem:[#allocation189_spill] sm:$0xff]  ;;  %v23319_v37 = vld [vmem:[#allocation190_spill] sm:$0xff] }
 0xa62   : > { %v15802_v25 = vadd.f32 %v13226_v36, %v23312_v3  ;;  %v13228_v4 = vpop.f32.mrb[230].mxu0 }
 0xa63   : > { %v15803_v28 = vadd.f32 %v13228_v4, %v23313_v0  ;;  %v13230_v18 = vpop.f32.mrb[231].mxu0 }
 0xa64   : > { %v15804_v53 = vadd.f32 %v13230_v18, %v23314_v29  ;;  %v23323_v18 = vld [vmem:[#allocation192_spill] sm:$0xff] }
 0xa65   : > { %v22508_v54 = vpack.c.bf16 %v15803_v28, %v15801_v23 }
 0xa66   : > { %v22510_v42 = vpack.c.bf16 %v15804_v53, %v15802_v25 }
 0xa67   : > { %23315 = vst [vmem:[#allocation76_spill] sm:$0xff] %v22508_v54 }
 0xa68   : > { %23316 = vst [vmem:[#allocation77_spill] sm:$0xff] %v22510_v42  ;;  %v13234_v56 = vpop.f32.mrb[232].mxu0  ;;  %13850 = vmatprep.subr.bf16.mxu1 %v22510_v42  ;;  %v23326_v42 = vld [vmem:[#allocation195_spill] sm:$0xff] }
 0xa69   : > { %v15805_v38 = vadd.f32 %v13234_v56, %v23317_v50  ;;  %v13236_v13 = vpop.f32.mrb[233].mxu0  ;;  %13851 = vmatpush1.bf16.msra.mxu1 %v22508_v54  ;;  %v23324_v50 = vld [vmem:[#allocation193_spill] sm:$0xff]  ;;  %v23325_v54 = vld [vmem:[#allocation194_spill] sm:$0xff] }
 0xa6a   : > { %v15806_v36 = vadd.f32 %v13236_v13, %v23318_v14  ;;  %v13238_v3 = vpop.f32.mrb[234].mxu0 }
 0xa6b   : > { %v15807_v0 = vadd.f32 %v13238_v3, %v23319_v37  ;;  %v13240_v4 = vpop.f32.mrb[235].mxu0 }
 0xa6c   : > { %v15808_v29 = vadd.f32 %v13240_v4, %v23320_v30  ;;  %v23329_v4 = vld [vmem:[#allocation196_spill] sm:$0xff] }
 0xa6d   : > { %v22518_v23 = vpack.c.bf16 %v15807_v0, %v15805_v38 }
 0xa6e   : > { %v22520_v25 = vpack.c.bf16 %v15808_v29, %v15806_v36 }
 0xa6f   : > { %23321 = vst [vmem:[#allocation78_spill] sm:$0xff] %v22518_v23 }
 0xa70   : > { %23322 = vst [vmem:[#allocation79_spill] sm:$0xff] %v22520_v25  ;;  %v13244_v28 = vpop.f32.mrb[236].mxu0  ;;  %13852 = vmatprep.subr.bf16.mxu1 %v22520_v25  ;;  %v23332_v25 = vld [vmem:[#allocation199_spill] sm:$0xff] }
 0xa71   : > { %v15809_v53 = vadd.f32 %v13244_v28, %v23323_v18  ;;  %v13246_v56 = vpop.f32.mrb[237].mxu0  ;;  %13853 = vmatpush1.bf16.msra.mxu1 %v22518_v23  ;;  %v23330_v18 = vld [vmem:[#allocation197_spill] sm:$0xff]  ;;  %v23331_v23 = vld [vmem:[#allocation198_spill] sm:$0xff] }
 0xa72   : > { %v15810_v13 = vadd.f32 %v13246_v56, %v23324_v50  ;;  %v13248_v14 = vpop.f32.mrb[238].mxu0 }
 0xa73   : > { %v15811_v37 = vadd.f32 %v13248_v14, %v23325_v54  ;;  %v13250_v3 = vpop.f32.mrb[239].mxu0 }
 0xa74   : > { %v15812_v30 = vadd.f32 %v13250_v3, %v23326_v42  ;;  %v23335_v3 = vld [vmem:[#allocation200_spill] sm:$0xff] }
 0xa75   : > { %v22528_v38 = vpack.c.bf16 %v15811_v37, %v15809_v53 }
 0xa76   : > { %v22530_v36 = vpack.c.bf16 %v15812_v30, %v15810_v13 }
 0xa77   : > { %23327 = vst [vmem:[#allocation80_spill] sm:$0xff] %v22528_v38 }
 0xa78   : > { %23328 = vst [vmem:[#allocation81_spill] sm:$0xff] %v22530_v36  ;;  %v13254_v0 = vpop.f32.mrb[240].mxu0  ;;  %13854 = vmatprep.subr.bf16.mxu1 %v22530_v36  ;;  %v23338_v36 = vld [vmem:[#allocation203_spill] sm:$0xff] }
 0xa79   : > { %v15813_v29 = vadd.f32 %v13254_v0, %v23329_v4  ;;  %v13256_v28 = vpop.f32.mrb[241].mxu0  ;;  %13855 = vmatpush1.bf16.msra.mxu1 %v22528_v38  ;;  %v23336_v4 = vld [vmem:[#allocation201_spill] sm:$0xff]  ;;  %v23337_v38 = vld [vmem:[#allocation202_spill] sm:$0xff] }
 0xa7a   : > { %v15814_v56 = vadd.f32 %v13256_v28, %v23330_v18  ;;  %v13258_v50 = vpop.f32.mrb[242].mxu0 }
 0xa7b   : > { %v15815_v54 = vadd.f32 %v13258_v50, %v23331_v23  ;;  %v13260_v14 = vpop.f32.mrb[243].mxu0 }
 0xa7c   : > { %v15816_v42 = vadd.f32 %v13260_v14, %v23332_v25  ;;  %v23341_v14 = vld [vmem:[#allocation204_spill] sm:$0xff] }
 0xa7d   : > { %v22538_v53 = vpack.c.bf16 %v15815_v54, %v15813_v29 }
 0xa7e   : > { %v22540_v13 = vpack.c.bf16 %v15816_v42, %v15814_v56 }
 0xa7f   : > { %23333 = vst [vmem:[#allocation82_spill] sm:$0xff] %v22538_v53 }
 0xa80   : > { %23334 = vst [vmem:[#allocation83_spill] sm:$0xff] %v22540_v13  ;;  %v13264_v37 = vpop.f32.mrb[244].mxu0  ;;  %13856 = vmatprep.subr.bf16.mxu1 %v22540_v13  ;;  %v23344_v13 = vld [vmem:[#allocation207_spill] sm:$0xff] }
 0xa81   : > { %v15817_v30 = vadd.f32 %v13264_v37, %v23335_v3  ;;  %v13266_v0 = vpop.f32.mrb[245].mxu0  ;;  %13857 = vmatpush1.bf16.msra.mxu1 %v22538_v53  ;;  %v23342_v3 = vld [vmem:[#allocation205_spill] sm:$0xff]  ;;  %v23343_v53 = vld [vmem:[#allocation206_spill] sm:$0xff] }
 0xa82   : > { %v15818_v28 = vadd.f32 %v13266_v0, %v23336_v4  ;;  %v13268_v18 = vpop.f32.mrb[246].mxu0 }
 0xa83   : > { %v15819_v23 = vadd.f32 %v13268_v18, %v23337_v38  ;;  %v13270_v50 = vpop.f32.mrb[247].mxu0 }
 0xa84   : > { %v15820_v25 = vadd.f32 %v13270_v50, %v23338_v36  ;;  %v23345_v50 = vld [vmem:[#allocation208_spill] sm:$0xff] }
 0xa85   : > { %v22548_v29 = vpack.c.bf16 %v15819_v23, %v15817_v30 }
 0xa86   : > { %v22550_v56 = vpack.c.bf16 %v15820_v25, %v15818_v28 }
 0xa87   : > { %23339 = vst [vmem:[#allocation84_spill] sm:$0xff] %v22548_v29 }
 0xa88   : > { %23340 = vst [vmem:[#allocation85_spill] sm:$0xff] %v22550_v56  ;;  %v13274_v54 = vpop.f32.mrb[248].mxu0  ;;  %13858 = vmatprep.subr.bf16.mxu1 %v22550_v56  ;;  %v23348_v56 = vld [vmem:[#allocation211_spill] sm:$0xff] }
 0xa89   : > { %v15821_v42 = vadd.f32 %v13274_v54, %v23341_v14  ;;  %v13276_v37 = vpop.f32.mrb[249].mxu0  ;;  %13859 = vmatpush1.bf16.msra.mxu1 %v22548_v29  ;;  %v23346_v14 = vld [vmem:[#allocation209_spill] sm:$0xff]  ;;  %v23347_v29 = vld [vmem:[#allocation210_spill] sm:$0xff] }
 0xa8a   : > { %v15822_v0 = vadd.f32 %v13276_v37, %v23342_v3  ;;  %v13278_v4 = vpop.f32.mrb[250].mxu0 }
 0xa8b   : > { %v15823_v38 = vadd.f32 %v13278_v4, %v23343_v53  ;;  %v13280_v18 = vpop.f32.mrb[251].mxu0 }
 0xa8c   : > { %v15824_v36 = vadd.f32 %v13280_v18, %v23344_v13  ;;  %v23368_v18 = vld [vmem:[#allocation26_spill] sm:$0xff] }
 0xa8d   : > { %v22558_v30 = vpack.c.bf16 %v15823_v38, %v15821_v42  ;;  %v15522_v38 = vcombine.low %v22407_v12, %v22407_v12  ;;  %v23365_v12 = vld [vmem:[#allocation21_spill] sm:$0xff] }
 0xa8e   : > { %v22560_v28 = vpack.c.bf16 %v15824_v36, %v15822_v0  ;;  %v23369_v36 = vld [vmem:[#allocation25_spill] sm:$0xff] }
 0xa90   : > { %v13284_v23 = vpop.f32.mrb[252].mxu0  ;;  %13860 = vmatprep.subr.bf16.mxu1 %v22560_v28 }
 0xa91   : > { %v15825_v25 = vadd.f32 %v13284_v23, %v23345_v50  ;;  %v13286_v54 = vpop.f32.mrb[253].mxu0  ;;  %13861 = vmatpush1.bf16.msra.mxu1 %v22558_v30  ;;  %v23370_v23 = vld [vmem:[#allocation28_spill] sm:$0xff]  ;;  %v23371_v50 = vld [vmem:[#allocation27_spill] sm:$0xff] }
 0xa92   : > { %v15826_v37 = vadd.f32 %v13286_v54, %v23346_v14  ;;  %v13288_v3 = vpop.f32.mrb[254].mxu0  ;;  %v23373_v54 = vld [vmem:[#allocation29_spill] sm:$0xff]  ;;  %v23374_v14 = vld [vmem:[#allocation32_spill] sm:$0xff] }
 0xa93   : > { %v15827_v53 = vadd.f32 %v13288_v3, %v23347_v29  ;;  %v13290_v4 = vpop.f32.mrb[255].mxu0  ;;  %v23366_v29 = vld [vmem:[#allocation24_spill] sm:$0xff]  ;;  %v23376_v3 = vld [vmem:[#allocation34_spill] sm:$0xff] }
 0xa94   : > { %v15828_v13 = vadd.f32 %v13290_v4, %v23348_v56  ;;  %v23367_v56 = vld [vmem:[#allocation23_spill] sm:$0xff]  ;;  %v23378_v4 = vld [vmem:[#allocation36_spill] sm:$0xff] }
 0xa95   : > { %v22568_v42 = vpack.c.bf16 %v15827_v53, %v15825_v25  ;;  %v23372_v25 = vld [vmem:[#allocation30_spill] sm:$0xff]  ;;  %v23377_v53 = vld [vmem:[#allocation33_spill] sm:$0xff] }
 0xa96   : > { %v22570_v0 = vpack.c.bf16 %v15828_v13, %v15826_v37  ;;  %v23375_v37 = vld [vmem:[#allocation31_spill] sm:$0xff] }
 0xa97   : > { %v23379_v13 = vld [vmem:[#allocation35_spill] sm:$0xff] }
 0xa98   : > { %13862 = vmatprep.subr.bf16.mxu1 %v22570_v0 }
 0xa99   : > { %13863 = vmatpush1.bf16.msra.mxu1 %v22568_v42 }
 0xa9a   : > { %13894 = vmatprep.subr.bf16.mxu1 %v21693_v35 }
 0xa9c   : > { %13865 = vmatmul.mubr.bf16.vlgmr.msra.gmra.mrb[0].mxu1 %v15522_v38  ;;  %v23380_v38 = vld [vmem:[#allocation37_spill] sm:$0xff] }
 0xaa2   : > { %13895 = vmatpush1.bf16.xpose.msra.mxu1 %v21688_v34 }
 0xaa3   : > { %13896 = vmatprep.subr.bf16.mxu1 %v21719_v33 }
 0xaaa   : > { %13897 = vmatpush1.bf16.xpose.msra.mxu1 %v21717_v22 }
 0xaab   : > { %13898 = vmatprep.subr.bf16.mxu1 %v21735_v16 }
 0xab2   : > { %13899 = vmatpush1.bf16.xpose.msra.mxu1 %v21733_v8 }
 0xab3   : > { %13900 = vmatprep.subr.bf16.mxu1 %v21751_v39 }
 0xaba   : > { %13901 = vmatpush1.bf16.xpose.msra.mxu1 %v21749_v45 }
 0xabb   : > { %13902 = vmatprep.subr.bf16.mxu1 %v21767_v46 }
 0xac2   : > { %13903 = vmatpush1.bf16.xpose.msra.mxu1 %v21765_v40 }
 0xac3   : > { %13904 = vmatprep.subr.bf16.mxu1 %v21783_v20 }
 0xaca   : > { %13905 = vmatpush1.bf16.xpose.msra.mxu1 %v21781_v17 }
 0xacb   : > { %13906 = vmatprep.subr.bf16.mxu1 %v21799_v58 }
 0xad2   : > { %13907 = vmatpush1.bf16.xpose.msra.mxu1 %v21797_v7 }
 0xad3   : > { %13908 = vmatprep.subr.bf16.mxu1 %v21815_v6 }
 0xada   : > { %13909 = vmatpush1.bf16.xpose.msra.mxu1 %v21813_v48 }
 0xadb   : > { %13910 = vmatprep.subr.bf16.mxu1 %v21831_v63 }
 0xae2   : > { %13911 = vmatpush1.bf16.xpose.msra.mxu1 %v21829_v24 }
 0xae3   : > { %13912 = vmatprep.subr.bf16.mxu1 %v21847_v5 }
 0xaea   : > { %13913 = vmatpush1.bf16.xpose.msra.mxu1 %v21845_v1 }
 0xaeb   : > { %13914 = vmatprep.subr.bf16.mxu1 %v21863_v31  ;;  %v23349_v31 = vld [vmem:[#allocation7_spill] sm:$0xff] }
 0xaf2   : > { %13915 = vmatpush1.bf16.xpose.msra.mxu1 %v21861_v19 }
 0xaf3   : > { %13916 = vmatprep.subr.bf16.mxu1 %v21879_v51  ;;  %v23351_v51 = vld [vmem:[#allocation8_spill] sm:$0xff] }
 0xafa   : > { %13917 = vmatpush1.bf16.xpose.msra.mxu1 %v21877_v49  ;;  %v23350_v49 = vld [vmem:[#allocation6_spill] sm:$0xff] }
 0xafb   : > { %13918 = vmatprep.subr.bf16.mxu1 %v21895_v21  ;;  %v23353_v21 = vld [vmem:[#allocation9_spill] sm:$0xff] }
 0xb02   : > { %13919 = vmatpush1.bf16.xpose.msra.mxu1 %v21893_v32  ;;  %v23352_v32 = vld [vmem:[#allocation10_spill] sm:$0xff] }
 0xb03   : > { %13920 = vmatprep.subr.bf16.mxu1 %v21911_v26  ;;  %v23355_v26 = vld [vmem:[#allocation11_spill] sm:$0xff] }
 0xb0a   : > { %13921 = vmatpush1.bf16.xpose.msra.mxu1 %v21909_v44  ;;  %v23354_v44 = vld [vmem:[#allocation12_spill] sm:$0xff] }
 0xb0b   : > { %13922 = vmatprep.subr.bf16.mxu1 %v21927_v2  ;;  %v23357_v2 = vld [vmem:[#allocation13_spill] sm:$0xff] }
 0xb12   : > { %13923 = vmatpush1.bf16.xpose.msra.mxu1 %v21925_v61  ;;  %v23356_v61 = vld [vmem:[#allocation14_spill] sm:$0xff] }
 0xb13   : > { %13924 = vmatprep.subr.bf16.mxu1 %v21943_v10  ;;  %v23359_v10 = vld [vmem:[#allocation15_spill] sm:$0xff] }
 0xb1a   : > { %13925 = vmatpush1.bf16.xpose.msra.mxu1 %v21941_v9  ;;  %v23358_v9 = vld [vmem:[#allocation16_spill] sm:$0xff] }
 0xb1b   : > { %13935 = vmatprep.subr.bf16.mxu1 %v21964_v59  ;;  %v23361_v59 = vld [vmem:[#allocation17_spill] sm:$0xff] }
 0xb6f   : > { %v13866_v34 = vpop.f32.mrb[0].mxu1 }
 0xb70   : > { %v13873_v35 = vmul.f32 0.25, %v13866_v34  ;;  %v13868_v22 = vpop.f32.mrb[1].mxu1  ;;  %v23381_v34 = vld [vmem:[#allocation39_spill] sm:$0xff] }
 0xb71   : > { %v13874_v33 = vmul.f32 0.25, %v13868_v22  ;;  %v13870_v8 = vpop.f32.mrb[2].mxu1  ;;  %v23383_v22 = vld [vmem:[#allocation41_spill] sm:$0xff] }
 0xb72   : > { %v13871_v16 = vpop.f32.mrb[3].mxu1  ;;  %v23385_v8 = vld [vmem:[#allocation43_spill] sm:$0xff] }
 0xb73   : > { %v13875_v45 = vmax.f32 %v13873_v35, %v13874_v33  ;;  %v23386_v16 = vld [vmem:[#allocation42_spill] sm:$0xff] }
 0xb75   : > { %13876 = vmax.xlane.f32.xlu0 %v13875_v45  ;;  %v23388_v45 = vld [vmem:[#allocation44_spill] sm:$0xff] }
 0xc02   : > { %v13877_v39 = vpop.xlane.xlu0 %13876 }
 0xc03   : > { %v13878_v40 = vsub.f32 %v13873_v35, %v13877_v39  ;;  %v13879_v46 = vsub.f32 %v13874_v33, %v13877_v39  ;;  %v23382_v35 = vld [vmem:[#allocation38_spill] sm:$0xff]  ;;  %v23384_v33 = vld [vmem:[#allocation40_spill] sm:$0xff] }
 0xc04   : > { %v23391_v39 = vld [vmem:[#allocation48_spill] sm:$0xff] }
 0xc05   : > { %v13880_v17 = vmul.f32 1.442695, %v13878_v40  ;;  %v13882_v20 = vmul.f32 1.442695, %v13879_v46  ;;  %v23392_v40 = vld [vmem:[#allocation49_spill] sm:$0xff] }
 0xc07   : > { %17808 = vpow2.f32 %v13880_v17 }
 0xc08   : > { %17810 = vpow2.f32 %v13882_v20 }
 0xc11   : > { %v17809_v7 = vpop.eup %17808 }
 0xc12   : > { %v17811_v58 = vpop.eup %17810 }
 0xc13   : > { %v13884_v48 = vadd.f32 %v17811_v58, %v17809_v7 }
 0xc15   : > { %13885 = vadd.xlane.f32.xlu0 %v13884_v48  ;;  %v23393_v48 = vld [vmem:[#allocation51_spill] sm:$0xff] }
 0xca2   : > { %v13886_v6 = vpop.xlane.xlu0 %13885 }
 0xca3   : > { %17812 = vrcp.f32 %v13886_v6  ;;  %v23394_v6 = vld [vmem:[#allocation50_spill] sm:$0xff] }
 0xcad   : > { %v17813_v24 = vpop.eup %17812 }
 0xcae   : > { %v13888_v63 = vmul.f32 %v17813_v24, %v17809_v7  ;;  %v13889_v1 = vmul.f32 %v17813_v24, %v17811_v58  ;;  %v23396_v24 = vld [vmem:[#allocation52_spill] sm:$0xff] }
 0xcb0   : > { %v22612_v5 = vpack.c.bf16 %v13888_v63, %v13888_v63  ;;  %v22614_v19 = vpack.c.bf16 %v13889_v1, %v13889_v1  ;;  %13890 = vst [vmem:[%s22616_s7] sm:$0xff] %v13888_v63  ;;  %13891 = vst [vmem:[%s22616_s7 + $0x8] sm:$0xff] %v13889_v1  ;;  %v23398_v63 = vld [vmem:[#allocation54_spill] sm:$0xff]  ;;  %v23400_v1 = vld [vmem:[#allocation56_spill] sm:$0xff] }
 0xcb2   : > { %13926 = vmatprep.mubr.bf16.mxu1 %v22614_v19 }
 0xcb3   : > { %13927 = vmatmul.mubr.bf16.vlgmr.msra.gmra.mrb[4].mxu1 %v22612_v5 }
 0xcb4   : > { %13936 = vmatpush1.bf16.xpose.msra.mxu1 %v21959_v57  ;;  %13967 = vmatprep.mubr.bf16.mxu1 %v22614_v19  ;;  %v23360_v57 = vld [vmem:[#allocation18_spill] sm:$0xff] }
 0xcb5   : > { %13937 = vmatprep.subr.bf16.mxu1 %v23349_v31  ;;  %v23401_v31 = vld [vmem:[#allocation59_spill] sm:$0xff] }
 0xcbc   : > { %13938 = vmatpush1.bf16.xpose.msra.mxu1 %v23350_v49  ;;  %v23403_v49 = vld [vmem:[#allocation61_spill] sm:$0xff] }
 0xcbd   : > { %13939 = vmatprep.subr.bf16.mxu1 %v22000_v62  ;;  %v23364_v62 = vld [vmem:[#allocation22_spill] sm:$0xff] }
 0xcc4   : > { %13940 = vmatpush1.bf16.xpose.msra.mxu1 %v21998_v41  ;;  %v23363_v41 = vld [vmem:[#allocation19_spill] sm:$0xff] }
 0xcc5   : > { %13941 = vmatprep.subr.bf16.mxu1 %v22016_v43  ;;  %v23362_v43 = vld [vmem:[#allocation20_spill] sm:$0xff] }
 0xccc   : > { %13942 = vmatpush1.bf16.xpose.msra.mxu1 %v23351_v51  ;;  %v23404_v51 = vld [vmem:[#allocation60_spill] sm:$0xff] }
 0xccd   : > { %13943 = vmatprep.subr.bf16.mxu1 %v23352_v32  ;;  %v23405_v32 = vld [vmem:[#allocation63_spill] sm:$0xff] }
 0xcd4   : > { %13944 = vmatpush1.bf16.xpose.msra.mxu1 %v23353_v21  ;;  %v23406_v21 = vld [vmem:[#allocation62_spill] sm:$0xff] }
 0xcd5   : > { %13945 = vmatprep.subr.bf16.mxu1 %v23354_v44  ;;  %v23407_v44 = vld [vmem:[#allocation65_spill] sm:$0xff] }
 0xcdc   : > { %13946 = vmatpush1.bf16.xpose.msra.mxu1 %v23355_v26  ;;  %v23408_v26 = vld [vmem:[#allocation64_spill] sm:$0xff] }
 0xcdd   : > { %13947 = vmatprep.subr.bf16.mxu1 %v23356_v61  ;;  %v23409_v61 = vld [vmem:[#allocation67_spill] sm:$0xff] }
 0xce4   : > { %13948 = vmatpush1.bf16.xpose.msra.mxu1 %v23357_v2  ;;  %v23410_v2 = vld [vmem:[#allocation66_spill] sm:$0xff] }
 0xce5   : > { %13949 = vmatprep.subr.bf16.mxu1 %v23358_v9  ;;  %v23411_v9 = vld [vmem:[#allocation69_spill] sm:$0xff] }
 0xcec   : > { %13950 = vmatpush1.bf16.xpose.msra.mxu1 %v23359_v10  ;;  %v23412_v10 = vld [vmem:[#allocation68_spill] sm:$0xff] }
 0xced   : > { %13951 = vmatprep.subr.bf16.mxu1 %v23360_v57  ;;  %v23414_v57 = vld [vmem:[#allocation70_spill] sm:$0xff] }
 0xcf4   : > { %13952 = vmatpush1.bf16.xpose.msra.mxu1 %v23361_v59  ;;  %v23415_v59 = vld [vmem:[#allocation73_spill] sm:$0xff] }
 0xcf5   : > { %13953 = vmatprep.subr.bf16.mxu1 %v23362_v43  ;;  %v23416_v43 = vld [vmem:[#allocation72_spill] sm:$0xff] }
 0xcfc   : > { %13954 = vmatpush1.bf16.xpose.msra.mxu1 %v23363_v41  ;;  %v23417_v41 = vld [vmem:[#allocation75_spill] sm:$0xff] }
 0xcfd   : > { %13955 = vmatprep.subr.bf16.mxu1 %v23364_v62  ;;  %v23418_v62 = vld [vmem:[#allocation74_spill] sm:$0xff] }
 0xd04   : > { %13956 = vmatpush1.bf16.xpose.msra.mxu1 %v23365_v12  ;;  %v23419_v12 = vld [vmem:[#allocation77_spill] sm:$0xff] }
 0xd05   : > { %13957 = vmatprep.subr.bf16.mxu1 %v23366_v29  ;;  %v23420_v29 = vld [vmem:[#allocation76_spill] sm:$0xff] }
 0xd0c   : > { %13958 = vmatpush1.bf16.xpose.msra.mxu1 %v23367_v56  ;;  %v23421_v56 = vld [vmem:[#allocation79_spill] sm:$0xff] }
 0xd0d   : > { %13959 = vmatprep.subr.bf16.mxu1 %v23368_v18  ;;  %v23422_v18 = vld [vmem:[#allocation78_spill] sm:$0xff] }
 0xd14   : > { %13960 = vmatpush1.bf16.xpose.msra.mxu1 %v23369_v36  ;;  %v23423_v36 = vld [vmem:[#allocation81_spill] sm:$0xff] }
 0xd15   : > { %13961 = vmatprep.subr.bf16.mxu1 %v23370_v23 }
 0xd1c   : > { %13962 = vmatpush1.bf16.xpose.msra.mxu1 %v23371_v50 }
 0xd1d   : > { %13963 = vmatprep.subr.bf16.mxu1 %v23372_v25 }
 0xd24   : > { %13964 = vmatpush1.bf16.xpose.msra.mxu1 %v23373_v54 }
 0xd25   : > { %13965 = vmatprep.subr.bf16.mxu1 %v23374_v14 }
 0xd2c   : > { %13966 = vmatpush1.bf16.xpose.msra.mxu1 %v23375_v37  ;;  %v23424_v37 = vld [vmem:[#allocation80_spill] sm:$0xff] }
 0xd2d   : > { %13976 = vmatprep.subr.bf16.mxu1 %v23376_v3  ;;  %v23425_v3 = vld [vmem:[#allocation83_spill] sm:$0xff] }
 0xd33   : > { %13968 = vmatmul.mubr.bf16.vlgmr.msra.gmra.mrb[8].mxu1 %v22612_v5 }
 0xd34   : > { %13977 = vmatpush1.bf16.xpose.msra.mxu1 %v23377_v53  ;;  %14008 = vmatprep.mubr.bf16.mxu1 %v22614_v19  ;;  %v23426_v53 = vld [vmem:[#allocation82_spill] sm:$0xff] }
 0xd35   : > { %13978 = vmatprep.subr.bf16.mxu1 %v23378_v4  ;;  %v23427_v4 = vld [vmem:[#allocation85_spill] sm:$0xff] }
 0xd3c   : > { %13979 = vmatpush1.bf16.xpose.msra.mxu1 %v23379_v13  ;;  %v23428_v13 = vld [vmem:[#allocation84_spill] sm:$0xff] }
 0xd3d   : > { %13980 = vmatprep.subr.bf16.mxu1 %v22265_v60  ;;  %v23387_v60 = vld [vmem:[#allocation45_spill] sm:$0xff] }
 0xd44   : > { %13981 = vmatpush1.bf16.xpose.msra.mxu1 %v23380_v38 }
 0xd45   : > { %13982 = vmatprep.subr.bf16.mxu1 %v22281_v55  ;;  %v23389_v55 = vld [vmem:[#allocation47_spill] sm:$0xff] }
 0xd4c   : > { %13983 = vmatpush1.bf16.xpose.msra.mxu1 %v22279_v27  ;;  %v23390_v27 = vld [vmem:[#allocation46_spill] sm:$0xff] }
 0xd4d   : > { %13984 = vmatprep.subr.bf16.mxu1 %v23381_v34 }
 0xd54   : > { %13985 = vmatpush1.bf16.xpose.msra.mxu1 %v23382_v35 }
 0xd55   : > { %13986 = vmatprep.subr.bf16.mxu1 %v23383_v22 }
 0xd5c   : > { %13987 = vmatpush1.bf16.xpose.msra.mxu1 %v23384_v33 }
 0xd5d   : > { %13988 = vmatprep.subr.bf16.mxu1 %v23385_v8 }
 0xd64   : > { %13989 = vmatpush1.bf16.xpose.msra.mxu1 %v23386_v16 }
 0xd65   : > { %13990 = vmatprep.subr.bf16.mxu1 %v23387_v60 }
 0xd6c   : > { %13991 = vmatpush1.bf16.xpose.msra.mxu1 %v23388_v45 }
 0xd6d   : > { %13992 = vmatprep.subr.bf16.mxu1 %v23389_v55 }
 0xd74   : > { %13993 = vmatpush1.bf16.xpose.msra.mxu1 %v23390_v27 }
 0xd75   : > { %13994 = vmatprep.subr.bf16.mxu1 %v22341_v15  ;;  %v23395_v15 = vld [vmem:[#allocation53_spill] sm:$0xff] }
 0xd7c   : > { %13995 = vmatpush1.bf16.xpose.msra.mxu1 %v23391_v39 }
 0xd7d   : > { %13996 = vmatprep.subr.bf16.mxu1 %v22351_v47  ;;  %v23397_v47 = vld [vmem:[#allocation55_spill] sm:$0xff] }
 0xd84   : > { %13997 = vmatpush1.bf16.xpose.msra.mxu1 %v23392_v40 }
 0xd85   : > { %13998 = vmatprep.subr.bf16.mxu1 %v22361_v52  ;;  %v23399_v52 = vld [vmem:[#allocation57_spill] sm:$0xff] }
 0xd86   : > { %v13928_v46 = vpop.f32.mrb[4].mxu1 }
 0xd87   : > { %v13930_v17 = vpop.f32.mrb[5].mxu1 }
 0xd88   : > { %v15536_v20 = vpack.c.bf16 %v13930_v17, %v13928_v46  ;;  %v13932_v7 = vpop.f32.mrb[6].mxu1 }
 0xd89   : > { %v13933_v58 = vpop.f32.mrb[7].mxu1 }
 0xd8a   : > { %14102 = vst [vmem:[%s21711_s5 + $0x20] sm:$0xff] %v15536_v20 }
 0xd8c   : > { %13999 = vmatpush1.bf16.xpose.msra.mxu1 %v22359_v11  ;;  %v23402_v11 = vld [vmem:[#allocation58_spill] sm:$0xff] }
 0xd8d   : > { %14000 = vmatprep.subr.bf16.mxu1 %v23393_v48 }
 0xd94   : > { %14001 = vmatpush1.bf16.xpose.msra.mxu1 %v23394_v6 }
 0xd95   : > { %14002 = vmatprep.subr.bf16.mxu1 %v23395_v15 }
 0xd9c   : > { %14003 = vmatpush1.bf16.xpose.msra.mxu1 %v23396_v24 }
 0xd9d   : > { %14004 = vmatprep.subr.bf16.mxu1 %v23397_v47 }
 0xda4   : > { %14005 = vmatpush1.bf16.xpose.msra.mxu1 %v23398_v63 }
 0xda5   : > { %14006 = vmatprep.subr.bf16.mxu1 %v23399_v52 }
 0xdac   : > { %14007 = vmatpush1.bf16.xpose.msra.mxu1 %v23400_v1 }
 0xdad   : > { %14017 = vmatprep.subr.bf16.mxu1 %v23401_v31 }
 0xdb3   : > { %14009 = vmatmul.mubr.bf16.vlgmr.msra.gmra.mrb[12].mxu1 %v22612_v5 }
 0xdb4   : > { %14018 = vmatpush1.bf16.xpose.msra.mxu1 %v23402_v11  ;;  %14049 = vmatprep.mubr.bf16.mxu1 %v22614_v19  ;;  %v23413_v19 = vld [vmem:[#allocation71_spill] sm:$0xff] }
 0xdb5   : > { %14019 = vmatprep.subr.bf16.mxu1 %v23403_v49 }
 0xdbc   : > { %14020 = vmatpush1.bf16.xpose.msra.mxu1 %v23404_v51 }
 0xdbd   : > { %14021 = vmatprep.subr.bf16.mxu1 %v23405_v32 }
 0xdc4   : > { %14022 = vmatpush1.bf16.xpose.msra.mxu1 %v23406_v21 }
 0xdc5   : > { %14023 = vmatprep.subr.bf16.mxu1 %v23407_v44 }
 0xdcc   : > { %14024 = vmatpush1.bf16.xpose.msra.mxu1 %v23408_v26 }
 0xdcd   : > { %14025 = vmatprep.subr.bf16.mxu1 %v23409_v61 }
 0xdd4   : > { %14026 = vmatpush1.bf16.xpose.msra.mxu1 %v23410_v2 }
 0xdd5   : > { %14027 = vmatprep.subr.bf16.mxu1 %v23411_v9 }
 0xddc   : > { %14028 = vmatpush1.bf16.xpose.msra.mxu1 %v23412_v10 }
 0xddd   : > { %14029 = vmatprep.subr.bf16.mxu1 %v23413_v19 }
 0xde4   : > { %14030 = vmatpush1.bf16.xpose.msra.mxu1 %v23414_v57 }
 0xde5   : > { %14031 = vmatprep.subr.bf16.mxu1 %v23415_v59 }
 0xdec   : > { %14032 = vmatpush1.bf16.xpose.msra.mxu1 %v23416_v43 }
 0xded   : > { %14033 = vmatprep.subr.bf16.mxu1 %v23417_v41 }
 0xdf4   : > { %14034 = vmatpush1.bf16.xpose.msra.mxu1 %v23418_v62 }
 0xdf5   : > { %14035 = vmatprep.subr.bf16.mxu1 %v23419_v12 }
 0xdfc   : > { %14036 = vmatpush1.bf16.xpose.msra.mxu1 %v23420_v29 }
 0xdfd   : > { %14037 = vmatprep.subr.bf16.mxu1 %v23421_v56 }
 0xe04   : > { %14038 = vmatpush1.bf16.xpose.msra.mxu1 %v23422_v18 }
 0xe05   : > { %14039 = vmatprep.subr.bf16.mxu1 %v23423_v36 }
 0xe06   : > { %v13969_v23 = vpop.f32.mrb[8].mxu1 }
 0xe07   : > { %v13971_v50 = vpop.f32.mrb[9].mxu1 }
 0xe08   : > { %v15537_v25 = vpack.c.bf16 %v13971_v50, %v13969_v23  ;;  %v13973_v54 = vpop.f32.mrb[10].mxu1 }
 0xe09   : > { %v13974_v14 = vpop.f32.mrb[11].mxu1 }
 0xe0a   : > { %14103 = vst [vmem:[%s21711_s5 + $0x28] sm:$0xff] %v15537_v25 }
 0xe0c   : > { %14040 = vmatpush1.bf16.xpose.msra.mxu1 %v23424_v37 }
 0xe0d   : > { %14041 = vmatprep.subr.bf16.mxu1 %v23425_v3 }
 0xe14   : > { %14042 = vmatpush1.bf16.xpose.msra.mxu1 %v23426_v53 }
 0xe15   : > { %14043 = vmatprep.subr.bf16.mxu1 %v23427_v4 }
 0xe1c   : > { %14044 = vmatpush1.bf16.xpose.msra.mxu1 %v23428_v13 }
 0xe1d   : > { %14045 = vmatprep.subr.bf16.mxu1 %v22560_v28 }
 0xe24   : > { %14046 = vmatpush1.bf16.xpose.msra.mxu1 %v22558_v30 }
 0xe25   : > { %14047 = vmatprep.subr.bf16.mxu1 %v22570_v0 }
 0xe2c   : > { %14048 = vmatpush1.bf16.xpose.msra.mxu1 %v22568_v42 }
 0xe33   : > { %14050 = vmatmul.mubr.bf16.vlgmr.msra.gmra.mrb[16].mxu1 %v22612_v5 }
 0xe86   : > { %v14010_v38 = vpop.f32.mrb[12].mxu1 }
 0xe87   : > { %v14012_v34 = vpop.f32.mrb[13].mxu1 }
 0xe88   : > { %v15538_v35 = vpack.c.bf16 %v14012_v34, %v14010_v38  ;;  %v14014_v22 = vpop.f32.mrb[14].mxu1 }
 0xe89   : > { %v14015_v33 = vpop.f32.mrb[15].mxu1 }
 0xe8a   : > { %14104 = vst [vmem:[%s21711_s5 + $0x30] sm:$0xff] %v15538_v35 }
 0xe8b   : > { %17859 = shalt.err (!%p17856_p3)
}
 0xe8c   : > { %s17860_s29 = scalar_lea.hbm %s22730_s14, 256  ;;  %s17864_s9 = scalar_lea.hbm %s22773_s3, 512 }
 0xe8d   : > { %p17861_p4 = scmp.ne.s32.totalorder %s22730_s14, %s17860_s29  ;;  %p17865_p9 = scmp.lt.u32.totalorder %s22730_s14, %s22773_s3 }
 0xe8e   : > { %p17866_p10 = scmp.lt.u32.totalorder %s17864_s9, %s17860_s29  ;;  %p17868_p12 = scmp.lt.u32.totalorder %s17860_s29, %s22730_s14 }
 0xe8f   : > { %p17862_p7 = pnand %p17861_p4, %p17974_p5 }
 0xe90   : > { %p17867_p11 = por %p17866_p10, %p17865_p9 }
 0xe91   : > { %p17863_p8 = pneg %p17862_p7 }
 0xe92   : > { %p17869_p13 = por %p17868_p12, %p17867_p11 }
 0xe94   : > { %p17870_p0 = pnand %p17869_p13, %p17863_p8 }
 0xe96   : > { %17873 = shalt.err (!%p17870_p0)
}
 0xe97   : > { %17377 = dma.vmem_to_hbm [thread:$0]  (%p17974_p5), %s14127_s10, 256, %s22730_s14, %s14107_s22  }
 0xf06   : > { %v14051_v30 = vpop.f32.mrb[16].mxu1 }
 0xf07   : > { %v14053_v28 = vpop.f32.mrb[17].mxu1 }
 0xf08   : > { %v15539_v42 = vpack.c.bf16 %v14053_v28, %v14051_v30  ;;  %v14055_v0 = vpop.f32.mrb[18].mxu1 }
 0xf09   : > { %v14056_v5 = vpop.f32.mrb[19].mxu1 }
 0xf0a   : > { %14105 = vst [vmem:[%s21711_s5 + $0x38] sm:$0xff] %v15539_v42 }
 0xf0b PF: > { %p17383_p1 = scmp.ge.s32.totalorder %s17908_s18, 2  ;;  %s14141_s7 = sand.u32 1, %s17896_s15  }
 0xf0c   : > { %s14142_s8 = scalar_lea.sflag [#allocation4], %s14141_s7 }
 0xf0d   : > { %p17380_p2 = pnand %p17383_p1, %p17978_p6 }
 0xf0f   : > { %17891 = dma.done.wait (!%p17380_p2), %s14142_s8, 256  }
 0xf10   : > { %17893 = vsyncadd (!%p17380_p2), %s14142_s8, 4294967040  ;;  %p15_p5 = scmp.ge.s32.totalorder %s17961_s21, 4   ;;  %s23429_s15 = smov %s17900_s16 }
 0xf11   : > { %s23430_s16 = smov %s17904_s17  ;;  %s23431_s17 = smov %s17972_s24 }
 0xf12   : > { %s23432_s18 = smov %s17961_s21  ;;  %17 = sbr.rel (!%p15_p5) target bundleno = 3 (0x3), region = 82 }
 0xf19   :  { %14155 = vsyncpa [#allocation4], 1 }
 0xf1a   :  { %14157 = vsyncpa [#allocation4 + $0x1], 1 }

</bundles_post_ra>
